<compile_context>
chip_gen: v7x
topology: tpu7x:2x2x1
jax: 0.10.0
libtpu: 0.0.40
codegen_flags: <defaults>
</compile_context>

<pallas_src>
import math
from functools import partial

import jax
import jax.numpy as jnp
from jax.experimental import pallas as pl
from jax.experimental.pallas import tpu as pltpu

EPS = 1e-5

# ------------------------- VMEM budget (v5e/v6e/v7x safe) -------------------------

def _default_vmem_limit():
    # v5e/v6e have 128 MiB of VMEM, v7x only 64 MiB.  Stay well under the smallest
    # physical size and leave headroom for Mosaic scratch / double buffering.
    try:
        cap = pltpu.get_tpu_info().vmem_capacity_bytes
    except Exception:
        cap = 64 * 1024 * 1024
    return min(cap // 2, 48 * 1024 * 1024)


_VMEM_LIMIT = _default_vmem_limit()
_VMEM_FULL = pl.BlockSpec(memory_space=pltpu.MemorySpace.VMEM)


def _cparams(*dim_sem):
    return pltpu.CompilerParams(
        dimension_semantics=dim_sem if dim_sem else None,
        vmem_limit_bytes=_VMEM_LIMIT,
    )


# ------------------------------- tiling helpers -----------------------------------

_TM_MAX = 256                       # row tile (8-aligned)
_TN_MAX = 256                       # lane-dense output tile (multiple of 128)
_TK_MAX = 512                       # K tile when K must be split
_SINGLE_K_BUDGET = 12 * 1024 * 1024  # bf16, double-buffered x+w tiles


def _round_up(x, m):
    return (x + m - 1) // m * m


def _choose_tile(padded, max_tile, quantum):
    """Largest multiple of `quantum` <= max_tile that divides `padded`."""
    if padded <= max_tile:
        return padded
    t = (max_tile // quantum) * quantum
    while padded % t:
        t -= quantum
    return t


# ----------------------------- Pallas matmul kernels ------------------------------

def _mm_kernel(x_ref, w_ref, b_ref, o_ref, acc_ref, *, relu):
    """acc += x @ w (bf16 in, f32 acc); epilogue: + bias [+ReLU]."""
    k = pl.program_id(2)

    @pl.when(k == 0)
    def _():
        acc_ref[...] = jnp.zeros_like(acc_ref)

    acc_ref[...] += jnp.dot(x_ref[...], w_ref[...], preferred_element_type=jnp.float32)

    @pl.when(k == pl.num_programs(2) - 1)
    def _():
        y = acc_ref[...] + b_ref[...]
        if relu:
            y = jnp.maximum(y, 0.0)
        o_ref[...] = y


def _mm_res_kernel(x_ref, w_ref, b_ref, r_ref, o_ref, acc_ref):
    """conv2 + bn2 + precomputed residual + ReLU of a BasicBlock, fused."""
    k = pl.program_id(2)

    @pl.when(k == 0)
    def _():
        acc_ref[...] = jnp.zeros_like(acc_ref)

    acc_ref[...] += jnp.dot(x_ref[...], w_ref[...], preferred_element_type=jnp.float32)

    @pl.when(k == pl.num_programs(2) - 1)
    def _():
        o_ref[...] = jnp.maximum(acc_ref[...] + b_ref[...] + r_ref[...], 0.0)


def _mm_down_kernel(x_ref, w_ref, b_ref, xd_ref, wd_ref, bd_ref, o_ref, acc_ref):
    """conv2 + bn2 + in-kernel 1x1 downsample (conv+bn) + add + ReLU, fully fused."""
    k = pl.program_id(2)

    @pl.when(k == 0)
    def _():
        acc_ref[...] = jnp.zeros_like(acc_ref)

    acc_ref[...] += jnp.dot(x_ref[...], w_ref[...], preferred_element_type=jnp.float32)

    @pl.when(k == pl.num_programs(2) - 1)
    def _():
        ident = jnp.dot(xd_ref[...], wd_ref[...],
                        preferred_element_type=jnp.float32) + bd_ref[...]
        o_ref[...] = jnp.maximum(acc_ref[...] + b_ref[...] + ident, 0.0)


def _conv_matmul(x2dp, w2dp, biasp, *, relu, res2dp=None, down=None):
    """(Mp,Kp)@(Kp,Np) + bias [+ residual | + fused downsample] [+ ReLU].

    Operands are pre-padded: Mp % 8 == 0, Np % 128 == 0, Kp % 128 == 0.
    Activations/weights are bf16, bias/residual f32; output f32.
    """
    Mp, Kp = x2dp.shape
    Np = w2dp.shape[1]
    tm = _choose_tile(Mp, _TM_MAX, 8)
    tn = _choose_tile(Np, _TN_MAX, 128)
    # Single K tile whenever the double-buffered bf16 x/w tiles fit comfortably
    # (saves per-grid-step overhead at this net's small spatial sizes); otherwise
    # split K for pipelining.
    if 4 * Kp * (tm + tn) <= _SINGLE_K_BUDGET:
        tk = Kp
    else:
        tk = _choose_tile(Kp, _TK_MAX, 128)
    grid = (Mp // tm, Np // tn, Kp // tk)

    in_specs = [
        pl.BlockSpec((tm, tk), lambda i, j, k: (i, k)),   # activations (bf16)
        pl.BlockSpec((tk, tn), lambda i, j, k: (k, j)),   # weights, BN scale folded
        pl.BlockSpec((1, tn), lambda i, j, k: (0, j)),    # bias = BN shift (f32)
    ]
    operands = [x2dp, w2dp, biasp]

    if down is not None:
        xd2dp, wd2dp, bdp = down
        kd = xd2dp.shape[1]
        kernel = _mm_down_kernel
        in_specs += [
            pl.BlockSpec((tm, kd), lambda i, j, k: (i, 0)),
            pl.BlockSpec((kd, tn), lambda i, j, k: (0, j)),
            pl.BlockSpec((1, tn), lambda i, j, k: (0, j)),
        ]
        operands += [xd2dp, wd2dp, bdp]
    elif res2dp is not None:
        kernel = _mm_res_kernel
        in_specs.append(pl.BlockSpec((tm, tn), lambda i, j, k: (i, j)))
        operands.append(res2dp)
    else:
        kernel = partial(_mm_kernel, relu=relu)

    return pl.pallas_call(
        kernel,
        out_shape=jax.ShapeDtypeStruct((Mp, Np), jnp.float32),
        grid_spec=pltpu.PrefetchScalarGridSpec(
            num_scalar_prefetch=0,
            grid=grid,
            in_specs=in_specs,
            out_specs=pl.BlockSpec((tm, tn), lambda i, j, k: (i, j)),
            scratch_shapes=[pltpu.VMEM((tm, tn), jnp.float32)],
        ),
        compiler_params=_cparams("parallel", "parallel", "arbitrary"),
    )(*operands)


# ------------------------------- pooling kernels -----------------------------------

def _maxpool_kernel(ee_ref, eo_ref, oe_ref, oo_ref, o_ref):
    # Even/odd phase planes of the (-inf)-padded input; 3x3/stride-2 max becomes a
    # 9-tap max over unit-shifted views of the phases (no strided access needed).
    ee = ee_ref[...]
    eo = eo_ref[...]
    oe = oe_ref[...]
    oo = oo_ref[...]
    m = ee[:, :-1, :-1, :]
    m = jnp.maximum(m, ee[:, :-1, 1:, :])
    m = jnp.maximum(m, ee[:, 1:, :-1, :])
    m = jnp.maximum(m, ee[:, 1:, 1:, :])
    m = jnp.maximum(m, eo[:, :-1, :-1, :])
    m = jnp.maximum(m, eo[:, 1:, :-1, :])
    m = jnp.maximum(m, oe[:, :-1, :-1, :])
    m = jnp.maximum(m, oe[:, :-1, 1:, :])
    m = jnp.maximum(m, oo[:, :-1, :-1, :])
    o_ref[...] = m


def maxpool_3x3_s2_p1(x):
    """MaxPool2d(kernel=3, stride=2, padding=1) on NHWC in a single Pallas kernel."""
    B, H, W, C = x.shape
    Ho = (H + 2 - 3) // 2 + 1
    Wo = (W + 2 - 3) // 2 + 1
    neg = float(jnp.finfo(jnp.float32).min)
    hp = 2 * (Ho + 1)
    wp = 2 * (Wo + 1)
    xp = jnp.pad(x, ((0, 0), (1, hp - 1 - H), (1, wp - 1 - W), (0, 0)),
                 constant_values=neg)
    # Phase split is ~1x the input bytes of layout plumbing (no 9x duplication).
    ee = xp[:, 0::2, 0::2, :]
    eo = xp[:, 0::2, 1::2, :]
    oe = xp[:, 1::2, 0::2, :]
    oo = xp[:, 1::2, 1::2, :]
    return pl.pallas_call(
        _maxpool_kernel,
        out_shape=jax.ShapeDtypeStruct((B, Ho, Wo, C), jnp.float32),
        in_specs=[_VMEM_FULL] * 4,
        out_specs=_VMEM_FULL,
        compiler_params=_cparams(),
    )(ee, eo, oe, oo)


def _avgpool_kernel(x_ref, o_ref):
    o_ref[...] = jnp.mean(x_ref[...], axis=1)


def global_avgpool(x):
    """AdaptiveAvgPool2d((1,1)) + squeeze -> (B, C)."""
    B, H, W, C = x.shape
    return pl.pallas_call(
        _avgpool_kernel,
        out_shape=jax.ShapeDtypeStruct((B, C), jnp.float32),
        in_specs=[_VMEM_FULL],
        out_specs=_VMEM_FULL,
        compiler_params=_cparams(),
    )(x.reshape(B, H * W, C))


# ------------------------------ parameters / prep ----------------------------------

def _kaiming_conv(key, kh, kw, cin, cout):
    # kaiming_normal_(mode='fan_out', nonlinearity='relu'): std = sqrt(2/(kh*kw*cout))
    std = math.sqrt(2.0 / (kh * kw * cout))
    return jax.random.normal(key, (kh, kw, cin, cout), jnp.float32) * std


def _bn_affine(c):
    # eval-mode BN with gamma=1, beta=0, running_mean=0, running_var=1
    gamma = jnp.ones((c,), jnp.float32)
    beta = jnp.zeros((c,), jnp.float32)
    mean = jnp.zeros((c,), jnp.float32)
    var = jnp.ones((c,), jnp.float32)
    scale = gamma / jnp.sqrt(var + EPS)
    shift = beta - mean * scale
    return scale, shift


def _prep_conv(key, kh, kw, cin, cout, stride, pad):
    """Conv2d(bias=False)+BN(eval) folded into a padded bf16 weight and f32 bias."""
    w = _kaiming_conv(key, kh, kw, cin, cout)
    scale, shift = _bn_affine(cout)
    w = w * scale                                  # fold BN scale into the weight
    K = kh * kw * cin
    Kp = _round_up(K, 128)                         # lane-aligned contraction dim
    Np = _round_up(cout, 128)                      # lane-dense output (64 -> 128)
    w2d = jnp.zeros((Kp, Np), jnp.float32).at[:K, :cout].set(w.reshape(K, cout))
    bias = jnp.zeros((1, Np), jnp.float32).at[0, :cout].set(shift)
    return {
        "w": w2d.astype(jnp.bfloat16),
        "b": bias,
        "kh": kh, "kw": kw, "cin": cin, "cout": cout,
        "K": K, "Kp": Kp, "Np": Np,
        "stride": stride, "pad": pad,
    }


def init_backbone_params(key, layers=(1, 1, 1, 1)):
    keys = iter(jax.random.split(key, 64))
    params = {"conv1": _prep_conv(next(keys), 7, 7, 1, 64, stride=2, pad=3)}
    inplanes = 64
    stages = []
    for planes, nblocks, stage_stride in zip((64, 128, 256, 512), layers, (1, 2, 2, 2)):
        blocks = []
        for bi in range(nblocks):
            s = stage_stride if bi == 0 else 1
            blk = {
                "conv1": _prep_conv(next(keys), 3, 3, inplanes, planes, stride=s, pad=1),
                "conv2": _prep_conv(next(keys), 3, 3, planes, planes, stride=1, pad=1),
            }
            if s != 1 or inplanes != planes:       # BasicBlock expansion == 1
                blk["down"] = _prep_conv(next(keys), 1, 1, inplanes, planes,
                                         stride=s, pad=0)
            blocks.append(blk)
            inplanes = planes
        stages.append(blocks)
    params["stages"] = stages
    return params


# ------------------------------------ glue -----------------------------------------

def _im2col(x, kh, kw, stride, pad):
    """x: (B,H,W,C) -> (B,Ho,Wo,kh*kw*C) patches, (kh,kw,C) row-major order."""
    B, H, W, C = x.shape
    Ho = (H + 2 * pad - kh) // stride + 1
    Wo = (W + 2 * pad - kw) // stride + 1
    xp = jnp.pad(x, ((0, 0), (pad, pad), (pad, pad), (0, 0)))
    cols = []
    for i in range(kh):
        for j in range(kw):
            cols.append(xp[:, i:i + stride * Ho:stride, j:j + stride * Wo:stride, :])
    return jnp.concatenate(cols, axis=-1), Ho, Wo


def _pad2d(a, rows, cols):
    r, c = a.shape
    if r == rows and c == cols:
        return a
    return jnp.pad(a, ((0, rows - r), (0, cols - c)))


def _apply_conv(x, cv, *, relu=True, residual=None, down=None):
    """Conv + folded BN [+ residual | + fused 1x1 downsample residual] [+ ReLU].

    x: (B,H,W,Cin) f32.  residual: (B,Ho,Wo,cout) f32.  down: (block_input, down_cv).
    """
    B = x.shape[0]
    cols, Ho, Wo = _im2col(x.astype(jnp.bfloat16),
                           cv["kh"], cv["kw"], cv["stride"], cv["pad"])
    M = B * Ho * Wo
    Mp = _round_up(M, 8) if M <= _TM_MAX else _round_up(M, _TM_MAX)
    x2dp = _pad2d(cols.reshape(M, cv["K"]), Mp, cv["Kp"])

    res2dp = None
    down_ops = None
    if down is not None:
        x_in, dcv = down
        s = dcv["stride"]
        xd = x_in[:, ::s, ::s, :].astype(jnp.bfloat16).reshape(M, dcv["K"])
        down_ops = (_pad2d(xd, Mp, dcv["Kp"]), dcv["w"], dcv["b"])
    elif residual is not None:
        res2dp = _pad2d(residual.reshape(M, cv["cout"]), Mp, cv["Np"])

    out = _conv_matmul(x2dp, cv["w"], cv["b"], relu=relu,
                       res2dp=res2dp, down=down_ops)
    return out[:M, :cv["cout"]].reshape(B, Ho, Wo, cv["cout"])


def basic_block(x, blk):
    out = _apply_conv(x, blk["conv1"], relu=True)
    if "down" in blk:
        if blk["down"]["Kp"] <= 2048:
            # conv2 + bn2 + 1x1-downsample + add + ReLU in a single kernel.
            return _apply_conv(out, blk["conv2"], down=(x, blk["down"]))
        identity = _apply_conv(x, blk["down"], relu=False)
        return _apply_conv(out, blk["conv2"], residual=identity)
    return _apply_conv(out, blk["conv2"], residual=x)


def audio_backbone_forward(a_nchw, params):
    """a_nchw: (B, 1, 13, T) float32 (PyTorch NCHW).  Returns (B, 512)."""
    x = jnp.transpose(a_nchw, (0, 2, 3, 1))            # NCHW -> NHWC
    x = _apply_conv(x, params["conv1"], relu=True)      # conv1 + bn1 + relu
    x = maxpool_3x3_s2_p1(x)                            # maxpool
    for blocks in params["stages"]:                     # layer1..layer4
        for blk in blocks:
            x = basic_block(x, blk)
    return global_avgpool(x)                            # avgpool + squeeze


# ------------------------------------- main -----------------------------------------

if __name__ == "__main__":
    key = jax.random.PRNGKey(0)
    pkey, xkey = jax.random.split(key)
    params = init_backbone_params(pkey, layers=(1, 1, 1, 1))

    B, C, H, T = 2, 1, 13, 16                      # forward expects (B, 1, 13, T)
    a = jax.random.normal(xkey, (B, C, H, T), jnp.float32)

    # jit the whole forward (params captured as constants; conv metadata stays static)
    fwd = jax.jit(lambda inp: audio_backbone_forward(inp, params))
    out = jax.block_until_ready(fwd(a))

    assert out.shape == (B, 512), out.shape
    assert bool(jnp.all(jnp.isfinite(out)))
    print("KERNEL_OK")
</pallas_src>

<mosaic_0001>
module attributes {stable_mosaic.version = 11 : i64} {
  func.func @_mm_kernel(%arg0: i32, %arg1: i32, %arg2: i32, %arg3: memref<112x128xbf16, #tpu.memory_space<vmem>>, %arg4: memref<128x128xbf16, #tpu.memory_space<vmem>>, %arg5: memref<1x128xf32, #tpu.memory_space<vmem>>, %arg6: memref<112x128xf32, #tpu.memory_space<vmem>>, %arg7: memref<112x128xf32, #tpu.memory_space<vmem>>) attributes {dimension_semantics = [#tpu.dimension_semantics<parallel>, #tpu.dimension_semantics<parallel>, #tpu.dimension_semantics<arbitrary>], iteration_bounds = array<i64: 1, 1, 1>, scalar_prefetch = 0 : i64, scratch_operands = 1 : i64, tpu.core_type = #tpu.core_type<tc>, window_params = [{transform_indices = @transform_0, window_bounds = array<i64: 112, 128>}, {transform_indices = @transform_1, window_bounds = array<i64: 128, 128>}, {transform_indices = @transform_2, window_bounds = array<i64: 1, 128>}, {transform_indices = @transform_3, window_bounds = array<i64: 112, 128>}]} {
    %c0_i32 = arith.constant 0 : i32
    %0 = arith.cmpi eq, %arg2, %c0_i32 : i32
    %1 = arith.extui %0 : i1 to i32
    %c0_i32_0 = arith.constant 0 : i32
    %2 = arith.cmpi ne, %1, %c0_i32_0 : i32
    scf.if %2 {
      %cst_10 = arith.constant 0.000000e+00 : f32
      %12 = vector.broadcast %cst_10 : f32 to vector<112x128xf32>
      %c0_11 = arith.constant 0 : index
      %c0_12 = arith.constant 0 : index
      %13 = vector.load %arg7[%c0_11, %c0_12] : memref<112x128xf32, #tpu.memory_space<vmem>>, vector<112x128xf32>
      tpu.vector_store %arg7[%c0_11, %c0_12], %12 {strides = array<i32>} : memref<112x128xf32, #tpu.memory_space<vmem>>, vector<112x128xf32>,
    } else {
    }
    %c0 = arith.constant 0 : index
    %c0_1 = arith.constant 0 : index
    %3 = vector.load %arg7[%c0, %c0_1] : memref<112x128xf32, #tpu.memory_space<vmem>>, vector<112x128xf32>
    %c0_2 = arith.constant 0 : index
    %c0_3 = arith.constant 0 : index
    %4 = vector.load %arg3[%c0_2, %c0_3] : memref<112x128xbf16, #tpu.memory_space<vmem>>, vector<112x128xbf16>
    %c0_4 = arith.constant 0 : index
    %c0_5 = arith.constant 0 : index
    %5 = vector.load %arg4[%c0_4, %c0_5] : memref<128x128xbf16, #tpu.memory_space<vmem>>, vector<128x128xbf16>
    %cst = arith.constant dense<0.000000e+00> : vector<112x128xf32>
    %6 = tpu.matmul %4, %5, %cst {dimension_numbers = #tpu.dot_dimension_numbers<[1], [0], [0], [1], [0, 0, 1, 1], [], []>} : vector<112x128xbf16>, vector<128x128xbf16>, vector<112x128xf32> -> vector<112x128xf32>
    %7 = arith.addf %3, %6 : vector<112x128xf32>
    %c0_6 = arith.constant 0 : index
    %c0_7 = arith.constant 0 : index
    %8 = vector.load %arg7[%c0_6, %c0_7] : memref<112x128xf32, #tpu.memory_space<vmem>>, vector<112x128xf32>
    tpu.vector_store %arg7[%c0_6, %c0_7], %7 {strides = array<i32>} : memref<112x128xf32, #tpu.memory_space<vmem>>, vector<112x128xf32>,
    %c0_i32_8 = arith.constant 0 : i32
    %9 = arith.cmpi eq, %arg2, %c0_i32_8 : i32
    %10 = arith.extui %9 : i1 to i32
    %c0_i32_9 = arith.constant 0 : i32
    %11 = arith.cmpi ne, %10, %c0_i32_9 : i32
    scf.if %11 {
      %c0_10 = arith.constant 0 : index
      %c0_11 = arith.constant 0 : index
      %12 = vector.load %arg7[%c0_10, %c0_11] : memref<112x128xf32, #tpu.memory_space<vmem>>, vector<112x128xf32>
      %c0_12 = arith.constant 0 : index
      %c0_13 = arith.constant 0 : index
      %13 = vector.load %arg5[%c0_12, %c0_13] : memref<1x128xf32, #tpu.memory_space<vmem>>, vector<1x128xf32>
      %14 = vector.broadcast %13 : vector<1x128xf32> to vector<112x128xf32>
      %15 = arith.addf %12, %14 : vector<112x128xf32>
      %cst_14 = arith.constant 0.000000e+00 : f32
      %16 = vector.broadcast %cst_14 : f32 to vector<112x128xf32>
      %17 = arith.maximumf %15, %16 : vector<112x128xf32>
      %c0_15 = arith.constant 0 : index
      %c0_16 = arith.constant 0 : index
      %18 = vector.load %arg6[%c0_15, %c0_16] : memref<112x128xf32, #tpu.memory_space<vmem>>, vector<112x128xf32>
      tpu.vector_store %arg6[%c0_15, %c0_16], %17 {strides = array<i32>} : memref<112x128xf32, #tpu.memory_space<vmem>>, vector<112x128xf32>,
    } else {
    }
    return
  }
  func.func @transform_0(%arg0: i32, %arg1: i32, %arg2: i32) -> (i32, i32) {
    %c0_i32 = arith.constant 0 : i32
    return %arg0, %arg2 : i32, i32
  }
  func.func @transform_1(%arg0: i32, %arg1: i32, %arg2: i32) -> (i32, i32) {
    %c0_i32 = arith.constant 0 : i32
    return %arg2, %arg1 : i32, i32
  }
  func.func @transform_2(%arg0: i32, %arg1: i32, %arg2: i32) -> (i32, i32) {
    %c0_i32 = arith.constant 0 : i32
    %c0_i32_0 = arith.constant 0 : i32
    return %c0_i32, %arg1 : i32, i32
  }
  func.func @transform_3(%arg0: i32, %arg1: i32, %arg2: i32) -> (i32, i32) {
    %c0_i32 = arith.constant 0 : i32
    return %arg0, %arg1 : i32, i32
  }
}

module attributes {stable_mosaic.version = 11 : i64} {
  func.func @_maxpool_kernel(%arg0: memref<2x5x5x64xf32, #tpu.memory_space<vmem>>, %arg1: memref<2x5x5x64xf32, #tpu.memory_space<vmem>>, %arg2: memref<2x5x5x64xf32, #tpu.memory_space<vmem>>, %arg3: memref<2x5x5x64xf32, #tpu.memory_space<vmem>>, %arg4: memref<2x4x4x64xf32, #tpu.memory_space<vmem>>) attributes {dimension_semantics = [], scalar_prefetch = 0 : i64, scratch_operands = 0 : i64, tpu.core_type = #tpu.core_type<tc>} {
    %c0 = arith.constant 0 : index
    %c0_0 = arith.constant 0 : index
    %c0_1 = arith.constant 0 : index
    %c0_2 = arith.constant 0 : index
    %0 = vector.load %arg0[%c0, %c0_0, %c0_1, %c0_2] : memref<2x5x5x64xf32, #tpu.memory_space<vmem>>, vector<2x5x5x64xf32>
    %c0_3 = arith.constant 0 : index
    %c0_4 = arith.constant 0 : index
    %c0_5 = arith.constant 0 : index
    %c0_6 = arith.constant 0 : index
    %1 = vector.load %arg1[%c0_3, %c0_4, %c0_5, %c0_6] : memref<2x5x5x64xf32, #tpu.memory_space<vmem>>, vector<2x5x5x64xf32>
    %c0_7 = arith.constant 0 : index
    %c0_8 = arith.constant 0 : index
    %c0_9 = arith.constant 0 : index
    %c0_10 = arith.constant 0 : index
    %2 = vector.load %arg2[%c0_7, %c0_8, %c0_9, %c0_10] : memref<2x5x5x64xf32, #tpu.memory_space<vmem>>, vector<2x5x5x64xf32>
    %c0_11 = arith.constant 0 : index
    %c0_12 = arith.constant 0 : index
    %c0_13 = arith.constant 0 : index
    %c0_14 = arith.constant 0 : index
    %3 = vector.load %arg3[%c0_11, %c0_12, %c0_13, %c0_14] : memref<2x5x5x64xf32, #tpu.memory_space<vmem>>, vector<2x5x5x64xf32>
    %4 = vector.extract_strided_slice %0 {offsets = [0, 0, 0, 0], sizes = [2, 4, 4, 64], strides = [1, 1, 1, 1]} : vector<2x5x5x64xf32> to vector<2x4x4x64xf32>
    %5 = vector.extract_strided_slice %0 {offsets = [0, 0, 1, 0], sizes = [2, 4, 4, 64], strides = [1, 1, 1, 1]} : vector<2x5x5x64xf32> to vector<2x4x4x64xf32>
    %6 = arith.maximumf %4, %5 : vector<2x4x4x64xf32>
    %7 = vector.extract_strided_slice %0 {offsets = [0, 1, 0, 0], sizes = [2, 4, 4, 64], strides = [1, 1, 1, 1]} : vector<2x5x5x64xf32> to vector<2x4x4x64xf32>
    %8 = arith.maximumf %6, %7 : vector<2x4x4x64xf32>
    %9 = vector.extract_strided_slice %0 {offsets = [0, 1, 1, 0], sizes = [2, 4, 4, 64], strides = [1, 1, 1, 1]} : vector<2x5x5x64xf32> to vector<2x4x4x64xf32>
    %10 = arith.maximumf %8, %9 : vector<2x4x4x64xf32>
    %11 = vector.extract_strided_slice %1 {offsets = [0, 0, 0, 0], sizes = [2, 4, 4, 64], strides = [1, 1, 1, 1]} : vector<2x5x5x64xf32> to vector<2x4x4x64xf32>
    %12 = arith.maximumf %10, %11 : vector<2x4x4x64xf32>
    %13 = vector.extract_strided_slice %1 {offsets = [0, 1, 0, 0], sizes = [2, 4, 4, 64], strides = [1, 1, 1, 1]} : vector<2x5x5x64xf32> to vector<2x4x4x64xf32>
    %14 = arith.maximumf %12, %13 : vector<2x4x4x64xf32>
    %15 = vector.extract_strided_slice %2 {offsets = [0, 0, 0, 0], sizes = [2, 4, 4, 64], strides = [1, 1, 1, 1]} : vector<2x5x5x64xf32> to vector<2x4x4x64xf32>
    %16 = arith.maximumf %14, %15 : vector<2x4x4x64xf32>
    %17 = vector.extract_strided_slice %2 {offsets = [0, 0, 1, 0], sizes = [2, 4, 4, 64], strides = [1, 1, 1, 1]} : vector<2x5x5x64xf32> to vector<2x4x4x64xf32>
    %18 = arith.maximumf %16, %17 : vector<2x4x4x64xf32>
    %19 = vector.extract_strided_slice %3 {offsets = [0, 0, 0, 0], sizes = [2, 4, 4, 64], strides = [1, 1, 1, 1]} : vector<2x5x5x64xf32> to vector<2x4x4x64xf32>
    %20 = arith.maximumf %18, %19 : vector<2x4x4x64xf32>
    %c0_15 = arith.constant 0 : index
    %c0_16 = arith.constant 0 : index
    %c0_17 = arith.constant 0 : index
    %c0_18 = arith.constant 0 : index
    %21 = vector.load %arg4[%c0_15, %c0_16, %c0_17, %c0_18] : memref<2x4x4x64xf32, #tpu.memory_space<vmem>>, vector<2x4x4x64xf32>
    tpu.vector_store %arg4[%c0_15, %c0_16, %c0_17, %c0_18], %20 {strides = array<i32>} : memref<2x4x4x64xf32, #tpu.memory_space<vmem>>, vector<2x4x4x64xf32>,
    return
  }
}

module attributes {stable_mosaic.version = 11 : i64} {
  func.func @_mm_kernel(%arg0: i32, %arg1: i32, %arg2: i32, %arg3: memref<32x640xbf16, #tpu.memory_space<vmem>>, %arg4: memref<640x128xbf16, #tpu.memory_space<vmem>>, %arg5: memref<1x128xf32, #tpu.memory_space<vmem>>, %arg6: memref<32x128xf32, #tpu.memory_space<vmem>>, %arg7: memref<32x128xf32, #tpu.memory_space<vmem>>) attributes {dimension_semantics = [#tpu.dimension_semantics<parallel>, #tpu.dimension_semantics<parallel>, #tpu.dimension_semantics<arbitrary>], iteration_bounds = array<i64: 1, 1, 1>, scalar_prefetch = 0 : i64, scratch_operands = 1 : i64, tpu.core_type = #tpu.core_type<tc>, window_params = [{transform_indices = @transform_0, window_bounds = array<i64: 32, 640>}, {transform_indices = @transform_1, window_bounds = array<i64: 640, 128>}, {transform_indices = @transform_2, window_bounds = array<i64: 1, 128>}, {transform_indices = @transform_3, window_bounds = array<i64: 32, 128>}]} {
    %c0_i32 = arith.constant 0 : i32
    %0 = arith.cmpi eq, %arg2, %c0_i32 : i32
    %1 = arith.extui %0 : i1 to i32
    %c0_i32_0 = arith.constant 0 : i32
    %2 = arith.cmpi ne, %1, %c0_i32_0 : i32
    scf.if %2 {
      %cst_10 = arith.constant 0.000000e+00 : f32
      %12 = vector.broadcast %cst_10 : f32 to vector<32x128xf32>
      %c0_11 = arith.constant 0 : index
      %c0_12 = arith.constant 0 : index
      %13 = vector.load %arg7[%c0_11, %c0_12] : memref<32x128xf32, #tpu.memory_space<vmem>>, vector<32x128xf32>
      tpu.vector_store %arg7[%c0_11, %c0_12], %12 {strides = array<i32>} : memref<32x128xf32, #tpu.memory_space<vmem>>, vector<32x128xf32>,
    } else {
    }
    %c0 = arith.constant 0 : index
    %c0_1 = arith.constant 0 : index
    %3 = vector.load %arg7[%c0, %c0_1] : memref<32x128xf32, #tpu.memory_space<vmem>>, vector<32x128xf32>
    %c0_2 = arith.constant 0 : index
    %c0_3 = arith.constant 0 : index
    %4 = vector.load %arg3[%c0_2, %c0_3] : memref<32x640xbf16, #tpu.memory_space<vmem>>, vector<32x640xbf16>
    %c0_4 = arith.constant 0 : index
    %c0_5 = arith.constant 0 : index
    %5 = vector.load %arg4[%c0_4, %c0_5] : memref<640x128xbf16, #tpu.memory_space<vmem>>, vector<640x128xbf16>
    %cst = arith.constant dense<0.000000e+00> : vector<32x128xf32>
    %6 = tpu.matmul %4, %5, %cst {dimension_numbers = #tpu.dot_dimension_numbers<[1], [0], [0], [1], [0, 0, 1, 1], [], []>} : vector<32x640xbf16>, vector<640x128xbf16>, vector<32x128xf32> -> vector<32x128xf32>
    %7 = arith.addf %3, %6 : vector<32x128xf32>
    %c0_6 = arith.constant 0 : index
    %c0_7 = arith.constant 0 : index
    %8 = vector.load %arg7[%c0_6, %c0_7] : memref<32x128xf32, #tpu.memory_space<vmem>>, vector<32x128xf32>
    tpu.vector_store %arg7[%c0_6, %c0_7], %7 {strides = array<i32>} : memref<32x128xf32, #tpu.memory_space<vmem>>, vector<32x128xf32>,
    %c0_i32_8 = arith.constant 0 : i32
    %9 = arith.cmpi eq, %arg2, %c0_i32_8 : i32
    %10 = arith.extui %9 : i1 to i32
    %c0_i32_9 = arith.constant 0 : i32
    %11 = arith.cmpi ne, %10, %c0_i32_9 : i32
    scf.if %11 {
      %c0_10 = arith.constant 0 : index
      %c0_11 = arith.constant 0 : index
      %12 = vector.load %arg7[%c0_10, %c0_11] : memref<32x128xf32, #tpu.memory_space<vmem>>, vector<32x128xf32>
      %c0_12 = arith.constant 0 : index
      %c0_13 = arith.constant 0 : index
      %13 = vector.load %arg5[%c0_12, %c0_13] : memref<1x128xf32, #tpu.memory_space<vmem>>, vector<1x128xf32>
      %14 = vector.broadcast %13 : vector<1x128xf32> to vector<32x128xf32>
      %15 = arith.addf %12, %14 : vector<32x128xf32>
      %cst_14 = arith.constant 0.000000e+00 : f32
      %16 = vector.broadcast %cst_14 : f32 to vector<32x128xf32>
      %17 = arith.maximumf %15, %16 : vector<32x128xf32>
      %c0_15 = arith.constant 0 : index
      %c0_16 = arith.constant 0 : index
      %18 = vector.load %arg6[%c0_15, %c0_16] : memref<32x128xf32, #tpu.memory_space<vmem>>, vector<32x128xf32>
      tpu.vector_store %arg6[%c0_15, %c0_16], %17 {strides = array<i32>} : memref<32x128xf32, #tpu.memory_space<vmem>>, vector<32x128xf32>,
    } else {
    }
    return
  }
  func.func @transform_0(%arg0: i32, %arg1: i32, %arg2: i32) -> (i32, i32) {
    %c0_i32 = arith.constant 0 : i32
    return %arg0, %arg2 : i32, i32
  }
  func.func @transform_1(%arg0: i32, %arg1: i32, %arg2: i32) -> (i32, i32) {
    %c0_i32 = arith.constant 0 : i32
    return %arg2, %arg1 : i32, i32
  }
  func.func @transform_2(%arg0: i32, %arg1: i32, %arg2: i32) -> (i32, i32) {
    %c0_i32 = arith.constant 0 : i32
    %c0_i32_0 = arith.constant 0 : i32
    return %c0_i32, %arg1 : i32, i32
  }
  func.func @transform_3(%arg0: i32, %arg1: i32, %arg2: i32) -> (i32, i32) {
    %c0_i32 = arith.constant 0 : i32
    return %arg0, %arg1 : i32, i32
  }
}

module attributes {stable_mosaic.version = 11 : i64} {
  func.func @_mm_res_kernel(%arg0: i32, %arg1: i32, %arg2: i32, %arg3: memref<32x640xbf16, #tpu.memory_space<vmem>>, %arg4: memref<640x128xbf16, #tpu.memory_space<vmem>>, %arg5: memref<1x128xf32, #tpu.memory_space<vmem>>, %arg6: memref<32x128xf32, #tpu.memory_space<vmem>>, %arg7: memref<32x128xf32, #tpu.memory_space<vmem>>, %arg8: memref<32x128xf32, #tpu.memory_space<vmem>>) attributes {dimension_semantics = [#tpu.dimension_semantics<parallel>, #tpu.dimension_semantics<parallel>, #tpu.dimension_semantics<arbitrary>], iteration_bounds = array<i64: 1, 1, 1>, scalar_prefetch = 0 : i64, scratch_operands = 1 : i64, tpu.core_type = #tpu.core_type<tc>, window_params = [{transform_indices = @transform_0, window_bounds = array<i64: 32, 640>}, {transform_indices = @transform_1, window_bounds = array<i64: 640, 128>}, {transform_indices = @transform_2, window_bounds = array<i64: 1, 128>}, {transform_indices = @transform_3, window_bounds = array<i64: 32, 128>}, {transform_indices = @transform_4, window_bounds = array<i64: 32, 128>}]} {
    %c0_i32 = arith.constant 0 : i32
    %0 = arith.cmpi eq, %arg2, %c0_i32 : i32
    %1 = arith.extui %0 : i1 to i32
    %c0_i32_0 = arith.constant 0 : i32
    %2 = arith.cmpi ne, %1, %c0_i32_0 : i32
    scf.if %2 {
      %cst_10 = arith.constant 0.000000e+00 : f32
      %12 = vector.broadcast %cst_10 : f32 to vector<32x128xf32>
      %c0_11 = arith.constant 0 : index
      %c0_12 = arith.constant 0 : index
      %13 = vector.load %arg8[%c0_11, %c0_12] : memref<32x128xf32, #tpu.memory_space<vmem>>, vector<32x128xf32>
      tpu.vector_store %arg8[%c0_11, %c0_12], %12 {strides = array<i32>} : memref<32x128xf32, #tpu.memory_space<vmem>>, vector<32x128xf32>,
    } else {
    }
    %c0 = arith.constant 0 : index
    %c0_1 = arith.constant 0 : index
    %3 = vector.load %arg8[%c0, %c0_1] : memref<32x128xf32, #tpu.memory_space<vmem>>, vector<32x128xf32>
    %c0_2 = arith.constant 0 : index
    %c0_3 = arith.constant 0 : index
    %4 = vector.load %arg3[%c0_2, %c0_3] : memref<32x640xbf16, #tpu.memory_space<vmem>>, vector<32x640xbf16>
    %c0_4 = arith.constant 0 : index
    %c0_5 = arith.constant 0 : index
    %5 = vector.load %arg4[%c0_4, %c0_5] : memref<640x128xbf16, #tpu.memory_space<vmem>>, vector<640x128xbf16>
    %cst = arith.constant dense<0.000000e+00> : vector<32x128xf32>
    %6 = tpu.matmul %4, %5, %cst {dimension_numbers = #tpu.dot_dimension_numbers<[1], [0], [0], [1], [0, 0, 1, 1], [], []>} : vector<32x640xbf16>, vector<640x128xbf16>, vector<32x128xf32> -> vector<32x128xf32>
    %7 = arith.addf %3, %6 : vector<32x128xf32>
    %c0_6 = arith.constant 0 : index
    %c0_7 = arith.constant 0 : index
    %8 = vector.load %arg8[%c0_6, %c0_7] : memref<32x128xf32, #tpu.memory_space<vmem>>, vector<32x128xf32>
    tpu.vector_store %arg8[%c0_6, %c0_7], %7 {strides = array<i32>} : memref<32x128xf32, #tpu.memory_space<vmem>>, vector<32x128xf32>,
    %c0_i32_8 = arith.constant 0 : i32
    %9 = arith.cmpi eq, %arg2, %c0_i32_8 : i32
    %10 = arith.extui %9 : i1 to i32
    %c0_i32_9 = arith.constant 0 : i32
    %11 = arith.cmpi ne, %10, %c0_i32_9 : i32
    scf.if %11 {
      %c0_10 = arith.constant 0 : index
      %c0_11 = arith.constant 0 : index
      %12 = vector.load %arg8[%c0_10, %c0_11] : memref<32x128xf32, #tpu.memory_space<vmem>>, vector<32x128xf32>
      %c0_12 = arith.constant 0 : index
      %c0_13 = arith.constant 0 : index
      %13 = vector.load %arg5[%c0_12, %c0_13] : memref<1x128xf32, #tpu.memory_space<vmem>>, vector<1x128xf32>
      %14 = vector.broadcast %13 : vector<1x128xf32> to vector<32x128xf32>
      %15 = arith.addf %12, %14 : vector<32x128xf32>
      %c0_14 = arith.constant 0 : index
      %c0_15 = arith.constant 0 : index
      %16 = vector.load %arg6[%c0_14, %c0_15] : memref<32x128xf32, #tpu.memory_space<vmem>>, vector<32x128xf32>
      %17 = arith.addf %15, %16 : vector<32x128xf32>
      %cst_16 = arith.constant 0.000000e+00 : f32
      %18 = vector.broadcast %cst_16 : f32 to vector<32x128xf32>
      %19 = arith.maximumf %17, %18 : vector<32x128xf32>
      %c0_17 = arith.constant 0 : index
      %c0_18 = arith.constant 0 : index
      %20 = vector.load %arg7[%c0_17, %c0_18] : memref<32x128xf32, #tpu.memory_space<vmem>>, vector<32x128xf32>
      tpu.vector_store %arg7[%c0_17, %c0_18], %19 {strides = array<i32>} : memref<32x128xf32, #tpu.memory_space<vmem>>, vector<32x128xf32>,
    } else {
    }
    return
  }
  func.func @transform_0(%arg0: i32, %arg1: i32, %arg2: i32) -> (i32, i32) {
    %c0_i32 = arith.constant 0 : i32
    return %arg0, %arg2 : i32, i32
  }
  func.func @transform_1(%arg0: i32, %arg1: i32, %arg2: i32) -> (i32, i32) {
    %c0_i32 = arith.constant 0 : i32
    return %arg2, %arg1 : i32, i32
  }
  func.func @transform_2(%arg0: i32, %arg1: i32, %arg2: i32) -> (i32, i32) {
    %c0_i32 = arith.constant 0 : i32
    %c0_i32_0 = arith.constant 0 : i32
    return %c0_i32, %arg1 : i32, i32
  }
  func.func @transform_3(%arg0: i32, %arg1: i32, %arg2: i32) -> (i32, i32) {
    %c0_i32 = arith.constant 0 : i32
    return %arg0, %arg1 : i32, i32
  }
  func.func @transform_4(%arg0: i32, %arg1: i32, %arg2: i32) -> (i32, i32) {
    %c0_i32 = arith.constant 0 : i32
    return %arg0, %arg1 : i32, i32
  }
}

module attributes {stable_mosaic.version = 11 : i64} {
  func.func @_mm_kernel(%arg0: i32, %arg1: i32, %arg2: i32, %arg3: memref<8x640xbf16, #tpu.memory_space<vmem>>, %arg4: memref<640x128xbf16, #tpu.memory_space<vmem>>, %arg5: memref<1x128xf32, #tpu.memory_space<vmem>>, %arg6: memref<8x128xf32, #tpu.memory_space<vmem>>, %arg7: memref<8x128xf32, #tpu.memory_space<vmem>>) attributes {dimension_semantics = [#tpu.dimension_semantics<parallel>, #tpu.dimension_semantics<parallel>, #tpu.dimension_semantics<arbitrary>], iteration_bounds = array<i64: 1, 1, 1>, scalar_prefetch = 0 : i64, scratch_operands = 1 : i64, tpu.core_type = #tpu.core_type<tc>, window_params = [{transform_indices = @transform_0, window_bounds = array<i64: 8, 640>}, {transform_indices = @transform_1, window_bounds = array<i64: 640, 128>}, {transform_indices = @transform_2, window_bounds = array<i64: 1, 128>}, {transform_indices = @transform_3, window_bounds = array<i64: 8, 128>}]} {
    %c0_i32 = arith.constant 0 : i32
    %0 = arith.cmpi eq, %arg2, %c0_i32 : i32
    %1 = arith.extui %0 : i1 to i32
    %c0_i32_0 = arith.constant 0 : i32
    %2 = arith.cmpi ne, %1, %c0_i32_0 : i32
    scf.if %2 {
      %cst_10 = arith.constant 0.000000e+00 : f32
      %12 = vector.broadcast %cst_10 : f32 to vector<8x128xf32>
      %c0_11 = arith.constant 0 : index
      %c0_12 = arith.constant 0 : index
      %13 = vector.load %arg7[%c0_11, %c0_12] : memref<8x128xf32, #tpu.memory_space<vmem>>, vector<8x128xf32>
      tpu.vector_store %arg7[%c0_11, %c0_12], %12 {strides = array<i32>} : memref<8x128xf32, #tpu.memory_space<vmem>>, vector<8x128xf32>,
    } else {
    }
    %c0 = arith.constant 0 : index
    %c0_1 = arith.constant 0 : index
    %3 = vector.load %arg7[%c0, %c0_1] : memref<8x128xf32, #tpu.memory_space<vmem>>, vector<8x128xf32>
    %c0_2 = arith.constant 0 : index
    %c0_3 = arith.constant 0 : index
    %4 = vector.load %arg3[%c0_2, %c0_3] : memref<8x640xbf16, #tpu.memory_space<vmem>>, vector<8x640xbf16>
    %c0_4 = arith.constant 0 : index
    %c0_5 = arith.constant 0 : index
    %5 = vector.load %arg4[%c0_4, %c0_5] : memref<640x128xbf16, #tpu.memory_space<vmem>>, vector<640x128xbf16>
    %cst = arith.constant dense<0.000000e+00> : vector<8x128xf32>
    %6 = tpu.matmul %4, %5, %cst {dimension_numbers = #tpu.dot_dimension_numbers<[1], [0], [0], [1], [0, 0, 1, 1], [], []>} : vector<8x640xbf16>, vector<640x128xbf16>, vector<8x128xf32> -> vector<8x128xf32>
    %7 = arith.addf %3, %6 : vector<8x128xf32>
    %c0_6 = arith.constant 0 : index
    %c0_7 = arith.constant 0 : index
    %8 = vector.load %arg7[%c0_6, %c0_7] : memref<8x128xf32, #tpu.memory_space<vmem>>, vector<8x128xf32>
    tpu.vector_store %arg7[%c0_6, %c0_7], %7 {strides = array<i32>} : memref<8x128xf32, #tpu.memory_space<vmem>>, vector<8x128xf32>,
    %c0_i32_8 = arith.constant 0 : i32
    %9 = arith.cmpi eq, %arg2, %c0_i32_8 : i32
    %10 = arith.extui %9 : i1 to i32
    %c0_i32_9 = arith.constant 0 : i32
    %11 = arith.cmpi ne, %10, %c0_i32_9 : i32
    scf.if %11 {
      %c0_10 = arith.constant 0 : index
      %c0_11 = arith.constant 0 : index
      %12 = vector.load %arg7[%c0_10, %c0_11] : memref<8x128xf32, #tpu.memory_space<vmem>>, vector<8x128xf32>
      %c0_12 = arith.constant 0 : index
      %c0_13 = arith.constant 0 : index
      %13 = vector.load %arg5[%c0_12, %c0_13] : memref<1x128xf32, #tpu.memory_space<vmem>>, vector<1x128xf32>
      %14 = vector.broadcast %13 : vector<1x128xf32> to vector<8x128xf32>
      %15 = arith.addf %12, %14 : vector<8x128xf32>
      %cst_14 = arith.constant 0.000000e+00 : f32
      %16 = vector.broadcast %cst_14 : f32 to vector<8x128xf32>
      %17 = arith.maximumf %15, %16 : vector<8x128xf32>
      %c0_15 = arith.constant 0 : index
      %c0_16 = arith.constant 0 : index
      %18 = vector.load %arg6[%c0_15, %c0_16] : memref<8x128xf32, #tpu.memory_space<vmem>>, vector<8x128xf32>
      tpu.vector_store %arg6[%c0_15, %c0_16], %17 {strides = array<i32>} : memref<8x128xf32, #tpu.memory_space<vmem>>, vector<8x128xf32>,
    } else {
    }
    return
  }
  func.func @transform_0(%arg0: i32, %arg1: i32, %arg2: i32) -> (i32, i32) {
    %c0_i32 = arith.constant 0 : i32
    return %arg0, %arg2 : i32, i32
  }
  func.func @transform_1(%arg0: i32, %arg1: i32, %arg2: i32) -> (i32, i32) {
    %c0_i32 = arith.constant 0 : i32
    return %arg2, %arg1 : i32, i32
  }
  func.func @transform_2(%arg0: i32, %arg1: i32, %arg2: i32) -> (i32, i32) {
    %c0_i32 = arith.constant 0 : i32
    %c0_i32_0 = arith.constant 0 : i32
    return %c0_i32, %arg1 : i32, i32
  }
  func.func @transform_3(%arg0: i32, %arg1: i32, %arg2: i32) -> (i32, i32) {
    %c0_i32 = arith.constant 0 : i32
    return %arg0, %arg1 : i32, i32
  }
}

module attributes {stable_mosaic.version = 11 : i64} {
  func.func @_mm_down_kernel(%arg0: i32, %arg1: i32, %arg2: i32, %arg3: memref<8x1152xbf16, #tpu.memory_space<vmem>>, %arg4: memref<1152x128xbf16, #tpu.memory_space<vmem>>, %arg5: memref<1x128xf32, #tpu.memory_space<vmem>>, %arg6: memref<8x128xbf16, #tpu.memory_space<vmem>>, %arg7: memref<128x128xbf16, #tpu.memory_space<vmem>>, %arg8: memref<1x128xf32, #tpu.memory_space<vmem>>, %arg9: memref<8x128xf32, #tpu.memory_space<vmem>>, %arg10: memref<8x128xf32, #tpu.memory_space<vmem>>) attributes {dimension_semantics = [#tpu.dimension_semantics<parallel>, #tpu.dimension_semantics<parallel>, #tpu.dimension_semantics<arbitrary>], iteration_bounds = array<i64: 1, 1, 1>, scalar_prefetch = 0 : i64, scratch_operands = 1 : i64, tpu.core_type = #tpu.core_type<tc>, window_params = [{transform_indices = @transform_0, window_bounds = array<i64: 8, 1152>}, {transform_indices = @transform_1, window_bounds = array<i64: 1152, 128>}, {transform_indices = @transform_2, window_bounds = array<i64: 1, 128>}, {transform_indices = @transform_3, window_bounds = array<i64: 8, 128>}, {transform_indices = @transform_4, window_bounds = array<i64: 128, 128>}, {transform_indices = @transform_5, window_bounds = array<i64: 1, 128>}, {transform_indices = @transform_6, window_bounds = array<i64: 8, 128>}]} {
    %c0_i32 = arith.constant 0 : i32
    %0 = arith.cmpi eq, %arg2, %c0_i32 : i32
    %1 = arith.extui %0 : i1 to i32
    %c0_i32_0 = arith.constant 0 : i32
    %2 = arith.cmpi ne, %1, %c0_i32_0 : i32
    scf.if %2 {
      %cst_10 = arith.constant 0.000000e+00 : f32
      %12 = vector.broadcast %cst_10 : f32 to vector<8x128xf32>
      %c0_11 = arith.constant 0 : index
      %c0_12 = arith.constant 0 : index
      %13 = vector.load %arg10[%c0_11, %c0_12] : memref<8x128xf32, #tpu.memory_space<vmem>>, vector<8x128xf32>
      tpu.vector_store %arg10[%c0_11, %c0_12], %12 {strides = array<i32>} : memref<8x128xf32, #tpu.memory_space<vmem>>, vector<8x128xf32>,
    } else {
    }
    %c0 = arith.constant 0 : index
    %c0_1 = arith.constant 0 : index
    %3 = vector.load %arg10[%c0, %c0_1] : memref<8x128xf32, #tpu.memory_space<vmem>>, vector<8x128xf32>
    %c0_2 = arith.constant 0 : index
    %c0_3 = arith.constant 0 : index
    %4 = vector.load %arg3[%c0_2, %c0_3] : memref<8x1152xbf16, #tpu.memory_space<vmem>>, vector<8x1152xbf16>
    %c0_4 = arith.constant 0 : index
    %c0_5 = arith.constant 0 : index
    %5 = vector.load %arg4[%c0_4, %c0_5] : memref<1152x128xbf16, #tpu.memory_space<vmem>>, vector<1152x128xbf16>
    %cst = arith.constant dense<0.000000e+00> : vector<8x128xf32>
    %6 = tpu.matmul %4, %5, %cst {dimension_numbers = #tpu.dot_dimension_numbers<[1], [0], [0], [1], [0, 0, 1, 1], [], []>} : vector<8x1152xbf16>, vector<1152x128xbf16>, vector<8x128xf32> -> vector<8x128xf32>
    %7 = arith.addf %3, %6 : vector<8x128xf32>
    %c0_6 = arith.constant 0 : index
    %c0_7 = arith.constant 0 : index
    %8 = vector.load %arg10[%c0_6, %c0_7] : memref<8x128xf32, #tpu.memory_space<vmem>>, vector<8x128xf32>
    tpu.vector_store %arg10[%c0_6, %c0_7], %7 {strides = array<i32>} : memref<8x128xf32, #tpu.memory_space<vmem>>, vector<8x128xf32>,
    %c0_i32_8 = arith.constant 0 : i32
    %9 = arith.cmpi eq, %arg2, %c0_i32_8 : i32
    %10 = arith.extui %9 : i1 to i32
    %c0_i32_9 = arith.constant 0 : i32
    %11 = arith.cmpi ne, %10, %c0_i32_9 : i32
    scf.if %11 {
      %c0_10 = arith.constant 0 : index
      %c0_11 = arith.constant 0 : index
      %12 = vector.load %arg6[%c0_10, %c0_11] : memref<8x128xbf16, #tpu.memory_space<vmem>>, vector<8x128xbf16>
      %c0_12 = arith.constant 0 : index
      %c0_13 = arith.constant 0 : index
      %13 = vector.load %arg7[%c0_12, %c0_13] : memref<128x128xbf16, #tpu.memory_space<vmem>>, vector<128x128xbf16>
      %cst_14 = arith.constant dense<0.000000e+00> : vector<8x128xf32>
      %14 = tpu.matmul %12, %13, %cst_14 {dimension_numbers = #tpu.dot_dimension_numbers<[1], [0], [0], [1], [0, 0, 1, 1], [], []>} : vector<8x128xbf16>, vector<128x128xbf16>, vector<8x128xf32> -> vector<8x128xf32>
      %c0_15 = arith.constant 0 : index
      %c0_16 = arith.constant 0 : index
      %15 = vector.load %arg8[%c0_15, %c0_16] : memref<1x128xf32, #tpu.memory_space<vmem>>, vector<1x128xf32>
      %16 = vector.broadcast %15 : vector<1x128xf32> to vector<8x128xf32>
      %17 = arith.addf %14, %16 : vector<8x128xf32>
      %c0_17 = arith.constant 0 : index
      %c0_18 = arith.constant 0 : index
      %18 = vector.load %arg10[%c0_17, %c0_18] : memref<8x128xf32, #tpu.memory_space<vmem>>, vector<8x128xf32>
      %c0_19 = arith.constant 0 : index
      %c0_20 = arith.constant 0 : index
      %19 = vector.load %arg5[%c0_19, %c0_20] : memref<1x128xf32, #tpu.memory_space<vmem>>, vector<1x128xf32>
      %20 = vector.broadcast %19 : vector<1x128xf32> to vector<8x128xf32>
      %21 = arith.addf %18, %20 : vector<8x128xf32>
      %22 = arith.addf %21, %17 : vector<8x128xf32>
      %cst_21 = arith.constant 0.000000e+00 : f32
      %23 = vector.broadcast %cst_21 : f32 to vector<8x128xf32>
      %24 = arith.maximumf %22, %23 : vector<8x128xf32>
      %c0_22 = arith.constant 0 : index
      %c0_23 = arith.constant 0 : index
      %25 = vector.load %arg9[%c0_22, %c0_23] : memref<8x128xf32, #tpu.memory_space<vmem>>, vector<8x128xf32>
      tpu.vector_store %arg9[%c0_22, %c0_23], %24 {strides = array<i32>} : memref<8x128xf32, #tpu.memory_space<vmem>>, vector<8x128xf32>,
    } else {
    }
    return
  }
  func.func @transform_0(%arg0: i32, %arg1: i32, %arg2: i32) -> (i32, i32) {
    %c0_i32 = arith.constant 0 : i32
    return %arg0, %arg2 : i32, i32
  }
  func.func @transform_1(%arg0: i32, %arg1: i32, %arg2: i32) -> (i32, i32) {
    %c0_i32 = arith.constant 0 : i32
    return %arg2, %arg1 : i32, i32
  }
  func.func @transform_2(%arg0: i32, %arg1: i32, %arg2: i32) -> (i32, i32) {
    %c0_i32 = arith.constant 0 : i32
    %c0_i32_0 = arith.constant 0 : i32
    return %c0_i32, %arg1 : i32, i32
  }
  func.func @transform_3(%arg0: i32, %arg1: i32, %arg2: i32) -> (i32, i32) {
    %c0_i32 = arith.constant 0 : i32
    %c0_i32_0 = arith.constant 0 : i32
    return %arg0, %c0_i32 : i32, i32
  }
  func.func @transform_4(%arg0: i32, %arg1: i32, %arg2: i32) -> (i32, i32) {
    %c0_i32 = arith.constant 0 : i32
    %c0_i32_0 = arith.constant 0 : i32
    return %c0_i32, %arg1 : i32, i32
  }
  func.func @transform_5(%arg0: i32, %arg1: i32, %arg2: i32) -> (i32, i32) {
    %c0_i32 = arith.constant 0 : i32
    %c0_i32_0 = arith.constant 0 : i32
    return %c0_i32, %arg1 : i32, i32
  }
  func.func @transform_6(%arg0: i32, %arg1: i32, %arg2: i32) -> (i32, i32) {
    %c0_i32 = arith.constant 0 : i32
    return %arg0, %arg1 : i32, i32
  }
}

module attributes {stable_mosaic.version = 11 : i64} {
  func.func @_mm_kernel(%arg0: i32, %arg1: i32, %arg2: i32, %arg3: memref<8x1152xbf16, #tpu.memory_space<vmem>>, %arg4: memref<1152x256xbf16, #tpu.memory_space<vmem>>, %arg5: memref<1x256xf32, #tpu.memory_space<vmem>>, %arg6: memref<8x256xf32, #tpu.memory_space<vmem>>, %arg7: memref<8x256xf32, #tpu.memory_space<vmem>>) attributes {dimension_semantics = [#tpu.dimension_semantics<parallel>, #tpu.dimension_semantics<parallel>, #tpu.dimension_semantics<arbitrary>], iteration_bounds = array<i64: 1, 1, 1>, scalar_prefetch = 0 : i64, scratch_operands = 1 : i64, tpu.core_type = #tpu.core_type<tc>, window_params = [{transform_indices = @transform_0, window_bounds = array<i64: 8, 1152>}, {transform_indices = @transform_1, window_bounds = array<i64: 1152, 256>}, {transform_indices = @transform_2, window_bounds = array<i64: 1, 256>}, {transform_indices = @transform_3, window_bounds = array<i64: 8, 256>}]} {
    %c0_i32 = arith.constant 0 : i32
    %0 = arith.cmpi eq, %arg2, %c0_i32 : i32
    %1 = arith.extui %0 : i1 to i32
    %c0_i32_0 = arith.constant 0 : i32
    %2 = arith.cmpi ne, %1, %c0_i32_0 : i32
    scf.if %2 {
      %cst_10 = arith.constant 0.000000e+00 : f32
      %12 = vector.broadcast %cst_10 : f32 to vector<8x256xf32>
      %c0_11 = arith.constant 0 : index
      %c0_12 = arith.constant 0 : index
      %13 = vector.load %arg7[%c0_11, %c0_12] : memref<8x256xf32, #tpu.memory_space<vmem>>, vector<8x256xf32>
      tpu.vector_store %arg7[%c0_11, %c0_12], %12 {strides = array<i32>} : memref<8x256xf32, #tpu.memory_space<vmem>>, vector<8x256xf32>,
    } else {
    }
    %c0 = arith.constant 0 : index
    %c0_1 = arith.constant 0 : index
    %3 = vector.load %arg7[%c0, %c0_1] : memref<8x256xf32, #tpu.memory_space<vmem>>, vector<8x256xf32>
    %c0_2 = arith.constant 0 : index
    %c0_3 = arith.constant 0 : index
    %4 = vector.load %arg3[%c0_2, %c0_3] : memref<8x1152xbf16, #tpu.memory_space<vmem>>, vector<8x1152xbf16>
    %c0_4 = arith.constant 0 : index
    %c0_5 = arith.constant 0 : index
    %5 = vector.load %arg4[%c0_4, %c0_5] : memref<1152x256xbf16, #tpu.memory_space<vmem>>, vector<1152x256xbf16>
    %cst = arith.constant dense<0.000000e+00> : vector<8x256xf32>
    %6 = tpu.matmul %4, %5, %cst {dimension_numbers = #tpu.dot_dimension_numbers<[1], [0], [0], [1], [0, 0, 1, 1], [], []>} : vector<8x1152xbf16>, vector<1152x256xbf16>, vector<8x256xf32> -> vector<8x256xf32>
    %7 = arith.addf %3, %6 : vector<8x256xf32>
    %c0_6 = arith.constant 0 : index
    %c0_7 = arith.constant 0 : index
    %8 = vector.load %arg7[%c0_6, %c0_7] : memref<8x256xf32, #tpu.memory_space<vmem>>, vector<8x256xf32>
    tpu.vector_store %arg7[%c0_6, %c0_7], %7 {strides = array<i32>} : memref<8x256xf32, #tpu.memory_space<vmem>>, vector<8x256xf32>,
    %c0_i32_8 = arith.constant 0 : i32
    %9 = arith.cmpi eq, %arg2, %c0_i32_8 : i32
    %10 = arith.extui %9 : i1 to i32
    %c0_i32_9 = arith.constant 0 : i32
    %11 = arith.cmpi ne, %10, %c0_i32_9 : i32
    scf.if %11 {
      %c0_10 = arith.constant 0 : index
      %c0_11 = arith.constant 0 : index
      %12 = vector.load %arg7[%c0_10, %c0_11] : memref<8x256xf32, #tpu.memory_space<vmem>>, vector<8x256xf32>
      %c0_12 = arith.constant 0 : index
      %c0_13 = arith.constant 0 : index
      %13 = vector.load %arg5[%c0_12, %c0_13] : memref<1x256xf32, #tpu.memory_space<vmem>>, vector<1x256xf32>
      %14 = vector.broadcast %13 : vector<1x256xf32> to vector<8x256xf32>
      %15 = arith.addf %12, %14 : vector<8x256xf32>
      %cst_14 = arith.constant 0.000000e+00 : f32
      %16 = vector.broadcast %cst_14 : f32 to vector<8x256xf32>
      %17 = arith.maximumf %15, %16 : vector<8x256xf32>
      %c0_15 = arith.constant 0 : index
      %c0_16 = arith.constant 0 : index
      %18 = vector.load %arg6[%c0_15, %c0_16] : memref<8x256xf32, #tpu.memory_space<vmem>>, vector<8x256xf32>
      tpu.vector_store %arg6[%c0_15, %c0_16], %17 {strides = array<i32>} : memref<8x256xf32, #tpu.memory_space<vmem>>, vector<8x256xf32>,
    } else {
    }
    return
  }
  func.func @transform_0(%arg0: i32, %arg1: i32, %arg2: i32) -> (i32, i32) {
    %c0_i32 = arith.constant 0 : i32
    return %arg0, %arg2 : i32, i32
  }
  func.func @transform_1(%arg0: i32, %arg1: i32, %arg2: i32) -> (i32, i32) {
    %c0_i32 = arith.constant 0 : i32
    return %arg2, %arg1 : i32, i32
  }
  func.func @transform_2(%arg0: i32, %arg1: i32, %arg2: i32) -> (i32, i32) {
    %c0_i32 = arith.constant 0 : i32
    %c0_i32_0 = arith.constant 0 : i32
    return %c0_i32, %arg1 : i32, i32
  }
  func.func @transform_3(%arg0: i32, %arg1: i32, %arg2: i32) -> (i32, i32) {
    %c0_i32 = arith.constant 0 : i32
    return %arg0, %arg1 : i32, i32
  }
}

module attributes {stable_mosaic.version = 11 : i64} {
  func.func @_mm_down_kernel(%arg0: i32, %arg1: i32, %arg2: i32, %arg3: memref<8x2304xbf16, #tpu.memory_space<vmem>>, %arg4: memref<2304x256xbf16, #tpu.memory_space<vmem>>, %arg5: memref<1x256xf32, #tpu.memory_space<vmem>>, %arg6: memref<8x128xbf16, #tpu.memory_space<vmem>>, %arg7: memref<128x256xbf16, #tpu.memory_space<vmem>>, %arg8: memref<1x256xf32, #tpu.memory_space<vmem>>, %arg9: memref<8x256xf32, #tpu.memory_space<vmem>>, %arg10: memref<8x256xf32, #tpu.memory_space<vmem>>) attributes {dimension_semantics = [#tpu.dimension_semantics<parallel>, #tpu.dimension_semantics<parallel>, #tpu.dimension_semantics<arbitrary>], iteration_bounds = array<i64: 1, 1, 1>, scalar_prefetch = 0 : i64, scratch_operands = 1 : i64, tpu.core_type = #tpu.core_type<tc>, window_params = [{transform_indices = @transform_0, window_bounds = array<i64: 8, 2304>}, {transform_indices = @transform_1, window_bounds = array<i64: 2304, 256>}, {transform_indices = @transform_2, window_bounds = array<i64: 1, 256>}, {transform_indices = @transform_3, window_bounds = array<i64: 8, 128>}, {transform_indices = @transform_4, window_bounds = array<i64: 128, 256>}, {transform_indices = @transform_5, window_bounds = array<i64: 1, 256>}, {transform_indices = @transform_6, window_bounds = array<i64: 8, 256>}]} {
    %c0_i32 = arith.constant 0 : i32
    %0 = arith.cmpi eq, %arg2, %c0_i32 : i32
    %1 = arith.extui %0 : i1 to i32
    %c0_i32_0 = arith.constant 0 : i32
    %2 = arith.cmpi ne, %1, %c0_i32_0 : i32
    scf.if %2 {
      %cst_10 = arith.constant 0.000000e+00 : f32
      %12 = vector.broadcast %cst_10 : f32 to vector<8x256xf32>
      %c0_11 = arith.constant 0 : index
      %c0_12 = arith.constant 0 : index
      %13 = vector.load %arg10[%c0_11, %c0_12] : memref<8x256xf32, #tpu.memory_space<vmem>>, vector<8x256xf32>
      tpu.vector_store %arg10[%c0_11, %c0_12], %12 {strides = array<i32>} : memref<8x256xf32, #tpu.memory_space<vmem>>, vector<8x256xf32>,
    } else {
    }
    %c0 = arith.constant 0 : index
    %c0_1 = arith.constant 0 : index
    %3 = vector.load %arg10[%c0, %c0_1] : memref<8x256xf32, #tpu.memory_space<vmem>>, vector<8x256xf32>
    %c0_2 = arith.constant 0 : index
    %c0_3 = arith.constant 0 : index
    %4 = vector.load %arg3[%c0_2, %c0_3] : memref<8x2304xbf16, #tpu.memory_space<vmem>>, vector<8x2304xbf16>
    %c0_4 = arith.constant 0 : index
    %c0_5 = arith.constant 0 : index
    %5 = vector.load %arg4[%c0_4, %c0_5] : memref<2304x256xbf16, #tpu.memory_space<vmem>>, vector<2304x256xbf16>
    %cst = arith.constant dense<0.000000e+00> : vector<8x256xf32>
    %6 = tpu.matmul %4, %5, %cst {dimension_numbers = #tpu.dot_dimension_numbers<[1], [0], [0], [1], [0, 0, 1, 1], [], []>} : vector<8x2304xbf16>, vector<2304x256xbf16>, vector<8x256xf32> -> vector<8x256xf32>
    %7 = arith.addf %3, %6 : vector<8x256xf32>
    %c0_6 = arith.constant 0 : index
    %c0_7 = arith.constant 0 : index
    %8 = vector.load %arg10[%c0_6, %c0_7] : memref<8x256xf32, #tpu.memory_space<vmem>>, vector<8x256xf32>
    tpu.vector_store %arg10[%c0_6, %c0_7], %7 {strides = array<i32>} : memref<8x256xf32, #tpu.memory_space<vmem>>, vector<8x256xf32>,
    %c0_i32_8 = arith.constant 0 : i32
    %9 = arith.cmpi eq, %arg2, %c0_i32_8 : i32
    %10 = arith.extui %9 : i1 to i32
    %c0_i32_9 = arith.constant 0 : i32
    %11 = arith.cmpi ne, %10, %c0_i32_9 : i32
    scf.if %11 {
      %c0_10 = arith.constant 0 : index
      %c0_11 = arith.constant 0 : index
      %12 = vector.load %arg6[%c0_10, %c0_11] : memref<8x128xbf16, #tpu.memory_space<vmem>>, vector<8x128xbf16>
      %c0_12 = arith.constant 0 : index
      %c0_13 = arith.constant 0 : index
      %13 = vector.load %arg7[%c0_12, %c0_13] : memref<128x256xbf16, #tpu.memory_space<vmem>>, vector<128x256xbf16>
      %cst_14 = arith.constant dense<0.000000e+00> : vector<8x256xf32>
      %14 = tpu.matmul %12, %13, %cst_14 {dimension_numbers = #tpu.dot_dimension_numbers<[1], [0], [0], [1], [0, 0, 1, 1], [], []>} : vector<8x128xbf16>, vector<128x256xbf16>, vector<8x256xf32> -> vector<8x256xf32>
      %c0_15 = arith.constant 0 : index
      %c0_16 = arith.constant 0 : index
      %15 = vector.load %arg8[%c0_15, %c0_16] : memref<1x256xf32, #tpu.memory_space<vmem>>, vector<1x256xf32>
      %16 = vector.broadcast %15 : vector<1x256xf32> to vector<8x256xf32>
      %17 = arith.addf %14, %16 : vector<8x256xf32>
      %c0_17 = arith.constant 0 : index
      %c0_18 = arith.constant 0 : index
      %18 = vector.load %arg10[%c0_17, %c0_18] : memref<8x256xf32, #tpu.memory_space<vmem>>, vector<8x256xf32>
      %c0_19 = arith.constant 0 : index
      %c0_20 = arith.constant 0 : index
      %19 = vector.load %arg5[%c0_19, %c0_20] : memref<1x256xf32, #tpu.memory_space<vmem>>, vector<1x256xf32>
      %20 = vector.broadcast %19 : vector<1x256xf32> to vector<8x256xf32>
      %21 = arith.addf %18, %20 : vector<8x256xf32>
      %22 = arith.addf %21, %17 : vector<8x256xf32>
      %cst_21 = arith.constant 0.000000e+00 : f32
      %23 = vector.broadcast %cst_21 : f32 to vector<8x256xf32>
      %24 = arith.maximumf %22, %23 : vector<8x256xf32>
      %c0_22 = arith.constant 0 : index
      %c0_23 = arith.constant 0 : index
      %25 = vector.load %arg9[%c0_22, %c0_23] : memref<8x256xf32, #tpu.memory_space<vmem>>, vector<8x256xf32>
      tpu.vector_store %arg9[%c0_22, %c0_23], %24 {strides = array<i32>} : memref<8x256xf32, #tpu.memory_space<vmem>>, vector<8x256xf32>,
    } else {
    }
    return
  }
  func.func @transform_0(%arg0: i32, %arg1: i32, %arg2: i32) -> (i32, i32) {
    %c0_i32 = arith.constant 0 : i32
    return %arg0, %arg2 : i32, i32
  }
  func.func @transform_1(%arg0: i32, %arg1: i32, %arg2: i32) -> (i32, i32) {
    %c0_i32 = arith.constant 0 : i32
    return %arg2, %arg1 : i32, i32
  }
  func.func @transform_2(%arg0: i32, %arg1: i32, %arg2: i32) -> (i32, i32) {
    %c0_i32 = arith.constant 0 : i32
    %c0_i32_0 = arith.constant 0 : i32
    return %c0_i32, %arg1 : i32, i32
  }
  func.func @transform_3(%arg0: i32, %arg1: i32, %arg2: i32) -> (i32, i32) {
    %c0_i32 = arith.constant 0 : i32
    %c0_i32_0 = arith.constant 0 : i32
    return %arg0, %c0_i32 : i32, i32
  }
  func.func @transform_4(%arg0: i32, %arg1: i32, %arg2: i32) -> (i32, i32) {
    %c0_i32 = arith.constant 0 : i32
    %c0_i32_0 = arith.constant 0 : i32
    return %c0_i32, %arg1 : i32, i32
  }
  func.func @transform_5(%arg0: i32, %arg1: i32, %arg2: i32) -> (i32, i32) {
    %c0_i32 = arith.constant 0 : i32
    %c0_i32_0 = arith.constant 0 : i32
    return %c0_i32, %arg1 : i32, i32
  }
  func.func @transform_6(%arg0: i32, %arg1: i32, %arg2: i32) -> (i32, i32) {
    %c0_i32 = arith.constant 0 : i32
    return %arg0, %arg1 : i32, i32
  }
}

module attributes {stable_mosaic.version = 11 : i64} {
  func.func @_mm_kernel(%arg0: i32, %arg1: i32, %arg2: i32, %arg3: memref<8x2304xbf16, #tpu.memory_space<vmem>>, %arg4: memref<2304x256xbf16, #tpu.memory_space<vmem>>, %arg5: memref<1x256xf32, #tpu.memory_space<vmem>>, %arg6: memref<8x256xf32, #tpu.memory_space<vmem>>, %arg7: memref<8x256xf32, #tpu.memory_space<vmem>>) attributes {dimension_semantics = [#tpu.dimension_semantics<parallel>, #tpu.dimension_semantics<parallel>, #tpu.dimension_semantics<arbitrary>], iteration_bounds = array<i64: 1, 2, 1>, scalar_prefetch = 0 : i64, scratch_operands = 1 : i64, tpu.core_type = #tpu.core_type<tc>, window_params = [{transform_indices = @transform_0, window_bounds = array<i64: 8, 2304>}, {transform_indices = @transform_1, window_bounds = array<i64: 2304, 256>}, {transform_indices = @transform_2, window_bounds = array<i64: 1, 256>}, {transform_indices = @transform_3, window_bounds = array<i64: 8, 256>}]} {
    %c0_i32 = arith.constant 0 : i32
    %0 = arith.cmpi eq, %arg2, %c0_i32 : i32
    %1 = arith.extui %0 : i1 to i32
    %c0_i32_0 = arith.constant 0 : i32
    %2 = arith.cmpi ne, %1, %c0_i32_0 : i32
    scf.if %2 {
      %cst_10 = arith.constant 0.000000e+00 : f32
      %12 = vector.broadcast %cst_10 : f32 to vector<8x256xf32>
      %c0_11 = arith.constant 0 : index
      %c0_12 = arith.constant 0 : index
      %13 = vector.load %arg7[%c0_11, %c0_12] : memref<8x256xf32, #tpu.memory_space<vmem>>, vector<8x256xf32>
      tpu.vector_store %arg7[%c0_11, %c0_12], %12 {strides = array<i32>} : memref<8x256xf32, #tpu.memory_space<vmem>>, vector<8x256xf32>,
    } else {
    }
    %c0 = arith.constant 0 : index
    %c0_1 = arith.constant 0 : index
    %3 = vector.load %arg7[%c0, %c0_1] : memref<8x256xf32, #tpu.memory_space<vmem>>, vector<8x256xf32>
    %c0_2 = arith.constant 0 : index
    %c0_3 = arith.constant 0 : index
    %4 = vector.load %arg3[%c0_2, %c0_3] : memref<8x2304xbf16, #tpu.memory_space<vmem>>, vector<8x2304xbf16>
    %c0_4 = arith.constant 0 : index
    %c0_5 = arith.constant 0 : index
    %5 = vector.load %arg4[%c0_4, %c0_5] : memref<2304x256xbf16, #tpu.memory_space<vmem>>, vector<2304x256xbf16>
    %cst = arith.constant dense<0.000000e+00> : vector<8x256xf32>
    %6 = tpu.matmul %4, %5, %cst {dimension_numbers = #tpu.dot_dimension_numbers<[1], [0], [0], [1], [0, 0, 1, 1], [], []>} : vector<8x2304xbf16>, vector<2304x256xbf16>, vector<8x256xf32> -> vector<8x256xf32>
    %7 = arith.addf %3, %6 : vector<8x256xf32>
    %c0_6 = arith.constant 0 : index
    %c0_7 = arith.constant 0 : index
    %8 = vector.load %arg7[%c0_6, %c0_7] : memref<8x256xf32, #tpu.memory_space<vmem>>, vector<8x256xf32>
    tpu.vector_store %arg7[%c0_6, %c0_7], %7 {strides = array<i32>} : memref<8x256xf32, #tpu.memory_space<vmem>>, vector<8x256xf32>,
    %c0_i32_8 = arith.constant 0 : i32
    %9 = arith.cmpi eq, %arg2, %c0_i32_8 : i32
    %10 = arith.extui %9 : i1 to i32
    %c0_i32_9 = arith.constant 0 : i32
    %11 = arith.cmpi ne, %10, %c0_i32_9 : i32
    scf.if %11 {
      %c0_10 = arith.constant 0 : index
      %c0_11 = arith.constant 0 : index
      %12 = vector.load %arg7[%c0_10, %c0_11] : memref<8x256xf32, #tpu.memory_space<vmem>>, vector<8x256xf32>
      %c0_12 = arith.constant 0 : index
      %c0_13 = arith.constant 0 : index
      %13 = vector.load %arg5[%c0_12, %c0_13] : memref<1x256xf32, #tpu.memory_space<vmem>>, vector<1x256xf32>
      %14 = vector.broadcast %13 : vector<1x256xf32> to vector<8x256xf32>
      %15 = arith.addf %12, %14 : vector<8x256xf32>
      %cst_14 = arith.constant 0.000000e+00 : f32
      %16 = vector.broadcast %cst_14 : f32 to vector<8x256xf32>
      %17 = arith.maximumf %15, %16 : vector<8x256xf32>
      %c0_15 = arith.constant 0 : index
      %c0_16 = arith.constant 0 : index
      %18 = vector.load %arg6[%c0_15, %c0_16] : memref<8x256xf32, #tpu.memory_space<vmem>>, vector<8x256xf32>
      tpu.vector_store %arg6[%c0_15, %c0_16], %17 {strides = array<i32>} : memref<8x256xf32, #tpu.memory_space<vmem>>, vector<8x256xf32>,
    } else {
    }
    return
  }
  func.func @transform_0(%arg0: i32, %arg1: i32, %arg2: i32) -> (i32, i32) {
    %c0_i32 = arith.constant 0 : i32
    return %arg0, %arg2 : i32, i32
  }
  func.func @transform_1(%arg0: i32, %arg1: i32, %arg2: i32) -> (i32, i32) {
    %c0_i32 = arith.constant 0 : i32
    return %arg2, %arg1 : i32, i32
  }
  func.func @transform_2(%arg0: i32, %arg1: i32, %arg2: i32) -> (i32, i32) {
    %c0_i32 = arith.constant 0 : i32
    %c0_i32_0 = arith.constant 0 : i32
    return %c0_i32, %arg1 : i32, i32
  }
  func.func @transform_3(%arg0: i32, %arg1: i32, %arg2: i32) -> (i32, i32) {
    %c0_i32 = arith.constant 0 : i32
    return %arg0, %arg1 : i32, i32
  }
}

module attributes {stable_mosaic.version = 11 : i64} {
  func.func @_mm_down_kernel(%arg0: i32, %arg1: i32, %arg2: i32, %arg3: memref<8x4608xbf16, #tpu.memory_space<vmem>>, %arg4: memref<4608x256xbf16, #tpu.memory_space<vmem>>, %arg5: memref<1x256xf32, #tpu.memory_space<vmem>>, %arg6: memref<8x256xbf16, #tpu.memory_space<vmem>>, %arg7: memref<256x256xbf16, #tpu.memory_space<vmem>>, %arg8: memref<1x256xf32, #tpu.memory_space<vmem>>, %arg9: memref<8x256xf32, #tpu.memory_space<vmem>>, %arg10: memref<8x256xf32, #tpu.memory_space<vmem>>) attributes {dimension_semantics = [#tpu.dimension_semantics<parallel>, #tpu.dimension_semantics<parallel>, #tpu.dimension_semantics<arbitrary>], iteration_bounds = array<i64: 1, 2, 1>, scalar_prefetch = 0 : i64, scratch_operands = 1 : i64, tpu.core_type = #tpu.core_type<tc>, window_params = [{transform_indices = @transform_0, window_bounds = array<i64: 8, 4608>}, {transform_indices = @transform_1, window_bounds = array<i64: 4608, 256>}, {transform_indices = @transform_2, window_bounds = array<i64: 1, 256>}, {transform_indices = @transform_3, window_bounds = array<i64: 8, 256>}, {transform_indices = @transform_4, window_bounds = array<i64: 256, 256>}, {transform_indices = @transform_5, window_bounds = array<i64: 1, 256>}, {transform_indices = @transform_6, window_bounds = array<i64: 8, 256>}]} {
    %c0_i32 = arith.constant 0 : i32
    %0 = arith.cmpi eq, %arg2, %c0_i32 : i32
    %1 = arith.extui %0 : i1 to i32
    %c0_i32_0 = arith.constant 0 : i32
    %2 = arith.cmpi ne, %1, %c0_i32_0 : i32
    scf.if %2 {
      %cst_10 = arith.constant 0.000000e+00 : f32
      %12 = vector.broadcast %cst_10 : f32 to vector<8x256xf32>
      %c0_11 = arith.constant 0 : index
      %c0_12 = arith.constant 0 : index
      %13 = vector.load %arg10[%c0_11, %c0_12] : memref<8x256xf32, #tpu.memory_space<vmem>>, vector<8x256xf32>
      tpu.vector_store %arg10[%c0_11, %c0_12], %12 {strides = array<i32>} : memref<8x256xf32, #tpu.memory_space<vmem>>, vector<8x256xf32>,
    } else {
    }
    %c0 = arith.constant 0 : index
    %c0_1 = arith.constant 0 : index
    %3 = vector.load %arg10[%c0, %c0_1] : memref<8x256xf32, #tpu.memory_space<vmem>>, vector<8x256xf32>
    %c0_2 = arith.constant 0 : index
    %c0_3 = arith.constant 0 : index
    %4 = vector.load %arg3[%c0_2, %c0_3] : memref<8x4608xbf16, #tpu.memory_space<vmem>>, vector<8x4608xbf16>
    %c0_4 = arith.constant 0 : index
    %c0_5 = arith.constant 0 : index
    %5 = vector.load %arg4[%c0_4, %c0_5] : memref<4608x256xbf16, #tpu.memory_space<vmem>>, vector<4608x256xbf16>
    %cst = arith.constant dense<0.000000e+00> : vector<8x256xf32>
    %6 = tpu.matmul %4, %5, %cst {dimension_numbers = #tpu.dot_dimension_numbers<[1], [0], [0], [1], [0, 0, 1, 1], [], []>} : vector<8x4608xbf16>, vector<4608x256xbf16>, vector<8x256xf32> -> vector<8x256xf32>
    %7 = arith.addf %3, %6 : vector<8x256xf32>
    %c0_6 = arith.constant 0 : index
    %c0_7 = arith.constant 0 : index
    %8 = vector.load %arg10[%c0_6, %c0_7] : memref<8x256xf32, #tpu.memory_space<vmem>>, vector<8x256xf32>
    tpu.vector_store %arg10[%c0_6, %c0_7], %7 {strides = array<i32>} : memref<8x256xf32, #tpu.memory_space<vmem>>, vector<8x256xf32>,
    %c0_i32_8 = arith.constant 0 : i32
    %9 = arith.cmpi eq, %arg2, %c0_i32_8 : i32
    %10 = arith.extui %9 : i1 to i32
    %c0_i32_9 = arith.constant 0 : i32
    %11 = arith.cmpi ne, %10, %c0_i32_9 : i32
    scf.if %11 {
      %c0_10 = arith.constant 0 : index
      %c0_11 = arith.constant 0 : index
      %12 = vector.load %arg6[%c0_10, %c0_11] : memref<8x256xbf16, #tpu.memory_space<vmem>>, vector<8x256xbf16>
      %c0_12 = arith.constant 0 : index
      %c0_13 = arith.constant 0 : index
      %13 = vector.load %arg7[%c0_12, %c0_13] : memref<256x256xbf16, #tpu.memory_space<vmem>>, vector<256x256xbf16>
      %cst_14 = arith.constant dense<0.000000e+00> : vector<8x256xf32>
      %14 = tpu.matmul %12, %13, %cst_14 {dimension_numbers = #tpu.dot_dimension_numbers<[1], [0], [0], [1], [0, 0, 1, 1], [], []>} : vector<8x256xbf16>, vector<256x256xbf16>, vector<8x256xf32> -> vector<8x256xf32>
      %c0_15 = arith.constant 0 : index
      %c0_16 = arith.constant 0 : index
      %15 = vector.load %arg8[%c0_15, %c0_16] : memref<1x256xf32, #tpu.memory_space<vmem>>, vector<1x256xf32>
      %16 = vector.broadcast %15 : vector<1x256xf32> to vector<8x256xf32>
      %17 = arith.addf %14, %16 : vector<8x256xf32>
      %c0_17 = arith.constant 0 : index
      %c0_18 = arith.constant 0 : index
      %18 = vector.load %arg10[%c0_17, %c0_18] : memref<8x256xf32, #tpu.memory_space<vmem>>, vector<8x256xf32>
      %c0_19 = arith.constant 0 : index
      %c0_20 = arith.constant 0 : index
      %19 = vector.load %arg5[%c0_19, %c0_20] : memref<1x256xf32, #tpu.memory_space<vmem>>, vector<1x256xf32>
      %20 = vector.broadcast %19 : vector<1x256xf32> to vector<8x256xf32>
      %21 = arith.addf %18, %20 : vector<8x256xf32>
      %22 = arith.addf %21, %17 : vector<8x256xf32>
      %cst_21 = arith.constant 0.000000e+00 : f32
      %23 = vector.broadcast %cst_21 : f32 to vector<8x256xf32>
      %24 = arith.maximumf %22, %23 : vector<8x256xf32>
      %c0_22 = arith.constant 0 : index
      %c0_23 = arith.constant 0 : index
      %25 = vector.load %arg9[%c0_22, %c0_23] : memref<8x256xf32, #tpu.memory_space<vmem>>, vector<8x256xf32>
      tpu.vector_store %arg9[%c0_22, %c0_23], %24 {strides = array<i32>} : memref<8x256xf32, #tpu.memory_space<vmem>>, vector<8x256xf32>,
    } else {
    }
    return
  }
  func.func @transform_0(%arg0: i32, %arg1: i32, %arg2: i32) -> (i32, i32) {
    %c0_i32 = arith.constant 0 : i32
    return %arg0, %arg2 : i32, i32
  }
  func.func @transform_1(%arg0: i32, %arg1: i32, %arg2: i32) -> (i32, i32) {
    %c0_i32 = arith.constant 0 : i32
    return %arg2, %arg1 : i32, i32
  }
  func.func @transform_2(%arg0: i32, %arg1: i32, %arg2: i32) -> (i32, i32) {
    %c0_i32 = arith.constant 0 : i32
    %c0_i32_0 = arith.constant 0 : i32
    return %c0_i32, %arg1 : i32, i32
  }
  func.func @transform_3(%arg0: i32, %arg1: i32, %arg2: i32) -> (i32, i32) {
    %c0_i32 = arith.constant 0 : i32
    %c0_i32_0 = arith.constant 0 : i32
    return %arg0, %c0_i32 : i32, i32
  }
  func.func @transform_4(%arg0: i32, %arg1: i32, %arg2: i32) -> (i32, i32) {
    %c0_i32 = arith.constant 0 : i32
    %c0_i32_0 = arith.constant 0 : i32
    return %c0_i32, %arg1 : i32, i32
  }
  func.func @transform_5(%arg0: i32, %arg1: i32, %arg2: i32) -> (i32, i32) {
    %c0_i32 = arith.constant 0 : i32
    %c0_i32_0 = arith.constant 0 : i32
    return %c0_i32, %arg1 : i32, i32
  }
  func.func @transform_6(%arg0: i32, %arg1: i32, %arg2: i32) -> (i32, i32) {
    %c0_i32 = arith.constant 0 : i32
    return %arg0, %arg1 : i32, i32
  }
}

module attributes {stable_mosaic.version = 11 : i64} {
  func.func @_avgpool_kernel(%arg0: memref<2x1x512xf32, #tpu.memory_space<vmem>>, %arg1: memref<2x512xf32, #tpu.memory_space<vmem>>) attributes {dimension_semantics = [], scalar_prefetch = 0 : i64, scratch_operands = 0 : i64, tpu.core_type = #tpu.core_type<tc>} {
    %c0 = arith.constant 0 : index
    %c0_0 = arith.constant 0 : index
    %c0_1 = arith.constant 0 : index
    %0 = vector.load %arg0[%c0, %c0_0, %c0_1] : memref<2x1x512xf32, #tpu.memory_space<vmem>>, vector<2x1x512xf32>
    %cst = arith.constant dense<0.000000e+00> : vector<2x512xf32>
    %1 = vector.multi_reduction <add>, %0, %cst [1] : vector<2x1x512xf32> to vector<2x512xf32>
    %cst_2 = arith.constant 1.000000e+00 : f32
    %2 = vector.broadcast %cst_2 : f32 to vector<2x512xf32>
    %3 = arith.divf %1, %2 : vector<2x512xf32>
    %c0_3 = arith.constant 0 : index
    %c0_4 = arith.constant 0 : index
    %4 = vector.load %arg1[%c0_3, %c0_4] : memref<2x512xf32, #tpu.memory_space<vmem>>, vector<2x512xf32>
    tpu.vector_store %arg1[%c0_3, %c0_4], %3 {strides = array<i32>} : memref<2x512xf32, #tpu.memory_space<vmem>>, vector<2x512xf32>,
    return
  }
}

</mosaic_0001>

<bundles_post_ra>
// kernel: _lambda_.12
= control target key start
LH: loop header
LB: loop body
LE: loop exit
PB: predicated region body
PF: predicated region fallthrough
CT: control target
= control target key end

     0   :  { %vm171_vm0 = vcmask 519168   ;;  %s349_s0 = inlined_call_operand.vmem [shape: f32[2,5,5,64], index: 0, kind: input, shape index: {}]   ;;  %s350_s1 = inlined_call_operand.vmem [shape: f32[2,5,5,64], index: 1, kind: input, shape index: {}]   ;;  %s351_s2 = inlined_call_operand.vmem [shape: f32[2,5,5,64], index: 2, kind: input, shape index: {}]   ;;  %s352_s3 = inlined_call_operand.vmem [shape: f32[2,5,5,64], index: 3, kind: input, shape index: {}]   ;;  %s353_s4 = inlined_call_operand.vmem [shape: f32[2,4,4,64], index: 4, kind: output, shape index: {}]  }
   0x1   :  { %v17_v0 = vld [vmem:[%s349_s0] sm:$0x1f]  ;;  %v18_v1 = vld [vmem:[%s349_s0 + $0x8] sm:$0x1f]  ;;  %v19_v4 = vld [vmem:[%s349_s0 + $0x10] sm:$0x1f] }
   0x2   :  { %v61_v2 = vrot.slane %v17_v0, 1  ;;  %v62_v3 = vrot.slane %v18_v1, 1  ;;  %v63_v6 = vrot.slane %v19_v4, 1  ;;  %v20_v8 = vld [vmem:[%s349_s0 + $0x18] sm:$0x1f] }
   0x3   :  { %v64_v9 = vrot.slane %v20_v8, 1  ;;  %v27_v10 = vld [vmem:[%s350_s1] sm:$0x1f]  ;;  %v28_v16 = vld [vmem:[%s350_s1 + $0x8] sm:$0x1f] }
   0x4   :  { %v77_v5 = vmax.f32 %v17_v0, %v61_v2  ;;  %v78_v7 = vmax.f32 %v18_v1, %v62_v3  ;;  %v37_v11 = vld [vmem:[%s351_s2] sm:$0x1f]  ;;  %v79_v14 = vmax.f32 %v19_v4, %v63_v6  ;;  %v38_v17 = vld [vmem:[%s351_s2 + $0x8] sm:$0x1f]  ;;  %v39_v22 = vld [vmem:[%s351_s2 + $0x10] sm:$0x1f] }
   0x5   :  { %v21_v15 = vld [vmem:[%s349_s0 + $0x20] sm:$0x1f]  ;;  %v80_v18 = vmax.f32 %v20_v8, %v64_v9  ;;  %v22_v24 = vld [vmem:[%s349_s0 + $0x28] sm:$0x1f]  ;;  %v23_v25 = vld [vmem:[%s349_s0 + $0x30] sm:$0x1f] }
   0x6   :  { %v85_v12 = vmax.f32 %v77_v5, %v18_v1  ;;  %v86_v13 = vmax.f32 %v78_v7, %v19_v4  ;;  %v95_v19 = vrot.slane %v21_v15, 1  ;;  %v87_v23 = vmax.f32 %v79_v14, %v20_v8  ;;  %v29_v27 = vld [vmem:[%s350_s1 + $0x10] sm:$0x1f]  ;;  %v30_v28 = vld [vmem:[%s350_s1 + $0x18] sm:$0x1f] }
   0x7   :  { %v139_v26 = vrot.slane %v37_v11, 1  ;;  %v88_v29 = vmax.f32 %v80_v18, %v21_v15  ;;  %v40_v33 = vld [vmem:[%s351_s2 + $0x18] sm:$0x1f]  ;;  %v65_v34 = vrot.slane %v22_v24, 1  ;;  %v140_v36 = vrot.slane %v38_v17, 1 }
   0x8   :  { %v99_v20 = vmax.f32 %v85_v12, %v62_v3  ;;  %v100_v21 = vmax.f32 %v86_v13, %v63_v6  ;;  %v101_v32 = vmax.f32 %v87_v23, %v64_v9  ;;  %v24_v35 = vld [vmem:[%s349_s0 + $0x38] sm:$0x1f]  ;;  %v141_v37 = vrot.slane %v39_v22, 1  ;;  %v31_v43 = vld [vmem:[%s350_s1 + $0x20] sm:$0x1f] }
   0x9   :  { %v102_v38 = vmax.f32 %v88_v29, %v95_v19  ;;  %v66_v39 = vrot.slane %v23_v25, 1  ;;  %v81_v44 = vmax.f32 %v22_v24, %v65_v34  ;;  %v25_v45 = vld [vmem:[%s349_s0 + $0x40] sm:$0x1f]  ;;  %v142_v47 = vrot.slane %v40_v33, 1  ;;  %v41_v54 = vld [vmem:[%s351_s2 + $0x28] sm:$0x1f] }
   0xa   :  { %v107_v30 = vmax.f32 %v99_v20, %v27_v10  ;;  %v108_v31 = vmax.f32 %v100_v21, %v28_v16  ;;  %v109_v42 = vmax.f32 %v101_v32, %v29_v27  ;;  %v67_v48 = vrot.slane %v24_v35, 1  ;;  %v45_v50 = vld [vmem:[%s352_s3] sm:$0x1f]  ;;  %v46_v56 = vld [vmem:[%s352_s3 + $0x8] sm:$0x1f] }
   0xb   :  { %v110_v46 = vmax.f32 %v102_v38, %v30_v28  ;;  %v82_v49 = vmax.f32 %v23_v25, %v66_v39  ;;  %v89_v55 = vmax.f32 %v81_v44, %v23_v25  ;;  %v32_v58 = vld [vmem:[%s350_s1 + $0x28] sm:$0x1f]  ;;  %v68_v60 = vrot.slane %v25_v45, 1  ;;  %v47_v0 = vld [vmem:[%s352_s3 + $0x10] sm:$0x1f] }
   0xc   :  { %v115_v40 = vmax.f32 %v107_v30, %v28_v16  ;;  %v116_v41 = vmax.f32 %v108_v31, %v29_v27  ;;  %v117_v53 = vmax.f32 %v109_v42, %v30_v28  ;;  %v83_v61 = vmax.f32 %v24_v35, %v67_v48  ;;  %v33_v2 = vld [vmem:[%s350_s1 + $0x30] sm:$0x1f]  ;;  %v26_v9 = vld [vmem:[%s349_s0 + $0x48] sm:$0x1f]  ;;  %v48_v13 = vld [vmem:[%s352_s3 + $0x18] sm:$0x1f] }
   0xd   :  { %v118_v57 = vmax.f32 %v110_v46, %v31_v43  ;;  %v90_v59 = vmax.f32 %v82_v49, %v24_v35  ;;  %v103_v3 = vmax.f32 %v89_v55, %v66_v39  ;;  %v143_v5 = vrot.slane %v41_v54, 1  ;;  %v42_v6 = vld [vmem:[%s351_s2 + $0x30] sm:$0x1f]  ;;  %v34_v15 = vld [vmem:[%s350_s1 + $0x38] sm:$0x1f] }
   0xe   :  { %v123_v51 = vmax.f32 %v115_v40, %v37_v11  ;;  %v124_v52 = vmax.f32 %v116_v41, %v38_v17  ;;  %v125_v1 = vmax.f32 %v117_v53, %v39_v22  ;;  %v91_v8 = vmax.f32 %v83_v61, %v25_v45  ;;  %v43_v23 = vld [vmem:[%s351_s2 + $0x38] sm:$0x1f]  ;;  %v35_v30 = vld [vmem:[%s350_s1 + $0x40] sm:$0x1f]  ;;  %v49_v31 = vld [vmem:[%s352_s3 + $0x28] sm:$0x1f] }
   0xf   :  { %v126_v4 = vmax.f32 %v118_v57, %v40_v33  ;;  %v104_v7 = vmax.f32 %v90_v59, %v67_v48  ;;  %v111_v14 = vmax.f32 %v103_v3, %v32_v58  ;;  %v84_v19 = vmax.f32 %v25_v45, %v68_v60  ;;  %v36_v38 = vld [vmem:[%s350_s1 + $0x48] sm:$0x1f]  ;;  %v44_v39 = vld [vmem:[%s351_s2 + $0x40] sm:$0x1f]  ;;  %v51_v44 = vld [vmem:[%s352_s3 + $0x38] sm:$0x1f] }
  0x10   :  { %v155_v62 = vmax.f32 %v123_v51, %v139_v26  ;;  %v156_v63 = vmax.f32 %v124_v52, %v140_v36  ;;  %v157_v12 = vmax.f32 %v125_v1, %v141_v37  ;;  %v105_v18 = vmax.f32 %v91_v8, %v68_v60  ;;  %v50_v37 = vld [vmem:[%s352_s3 + $0x30] sm:$0x1f]  ;;  %v52_v51 = vld [vmem:[%s352_s3 + $0x40] sm:$0x1f] }
  0x11   :  { %v158_v16 = vmax.f32 %v126_v4, %v142_v47  ;;  %v112_v17 = vmax.f32 %v104_v7, %v33_v2  ;;  %v119_v21 = vmax.f32 %v111_v14, %v33_v2  ;;  %v144_v22 = vrot.slane %v42_v6, 1 }
  0x12   :  { %v163_v10 = vmax.f32 %v155_v62, %v45_v50  ;;  %v164_v11 = vmax.f32 %v156_v63, %v46_v56  ;;  %v165_v20 = vmax.f32 %v157_v12, %v47_v0  ;;  %v96_v24 = vrot.slane %v26_v9, 1 }
  0x13   :  { %v166_v25 = vmax.f32 %v158_v16, %v48_v13  ;;  %v120_v26 = vmax.f32 %v112_v17, %v34_v15  ;;  %v113_v27 = vmax.f32 %v105_v18, %v34_v15  ;;  %v92_v28 = vmax.f32 %v84_v19, %v26_v9 }
  0x14   :  { %172 = vst.msk [vmem:[%s353_s4] sm:$0xf] %vm171_vm0, %v163_v10  ;;  %173 = vst.msk [vmem:[%s353_s4 + $0x4] sm:$0xf] %vm171_vm0, %v164_v11  ;;  %v127_v29 = vmax.f32 %v119_v21, %v41_v54  ;;  %v145_v34 = vrot.slane %v43_v23, 1  ;;  %v146_v48 = vrot.slane %v44_v39, 1 }
  0x15   :  { %174 = vst.msk [vmem:[%s353_s4 + $0x8] sm:$0xf] %vm171_vm0, %v165_v20  ;;  %175 = vst.msk [vmem:[%s353_s4 + $0xc] sm:$0xf] %vm171_vm0, %v166_v25  ;;  %v128_v32 = vmax.f32 %v120_v26, %v42_v6  ;;  %v121_v33 = vmax.f32 %v113_v27, %v35_v30  ;;  %v106_v35 = vmax.f32 %v92_v28, %v96_v24 }
  0x16   :  { %v159_v36 = vmax.f32 %v127_v29, %v143_v5 }
  0x17   :  { %v160_v40 = vmax.f32 %v128_v32, %v144_v22  ;;  %v129_v41 = vmax.f32 %v121_v33, %v43_v23  ;;  %v114_v42 = vmax.f32 %v106_v35, %v35_v30 }
  0x18   :  { %v167_v43 = vmax.f32 %v159_v36, %v49_v31 }
  0x19   :  { %v168_v45 = vmax.f32 %v160_v40, %v50_v37  ;;  %v161_v46 = vmax.f32 %v129_v41, %v145_v34  ;;  %v122_v47 = vmax.f32 %v114_v42, %v36_v38 }
  0x1a   :  { %176 = vst.msk [vmem:[%s353_s4 + $0x10] sm:$0xf] %vm171_vm0, %v167_v43 }
  0x1b   :  { %177 = vst.msk [vmem:[%s353_s4 + $0x14] sm:$0xf] %vm171_vm0, %v168_v45  ;;  %v169_v49 = vmax.f32 %v161_v46, %v51_v44  ;;  %v130_v50 = vmax.f32 %v122_v47, %v44_v39 }
  0x1d   :  { %178 = vst.msk [vmem:[%s353_s4 + $0x18] sm:$0xf] %vm171_vm0, %v169_v49  ;;  %v162_v52 = vmax.f32 %v130_v50, %v146_v48 }
  0x1f   :  { %v170_v53 = vmax.f32 %v162_v52, %v52_v51 }
  0x21   :  { %179 = vst.msk [vmem:[%s353_s4 + $0x1c] sm:$0xf] %vm171_vm0, %v170_v53 }

// kernel: _lambda_.11
= control target key start
LH: loop header
LB: loop body
LE: loop exit
PB: predicated region body
PF: predicated region fallthrough
CT: control target
= control target key end

     0   :  { %v462_v0 = vmov 0.0   ;;  %vm463_vm0 = vmmov 0   ;;  %s597_s1 = inlined_call_operand.vmem [shape: bf16[128,128], index: 1, kind: input, shape index: {}]   ;;  %s598_s0 = inlined_call_operand.vmem [shape: bf16[112,128], index: 0, kind: input, shape index: {}]   ;;  %s599_s2 = inlined_call_operand.vmem [shape: f32[1,128], index: 2, kind: input, shape index: {}]   ;;  %s600_s3 = inlined_call_operand.vmem [shape: f32[112,128], index: 3, kind: output, shape index: {}]  }
   0x1   :  { %385 = vmatprep.subr.bf16.mxu0 %v462_v0  ;;  %v447_v1 = vld [vmem:[%s597_s1] sm:$0xff]   ;;  %429 = vmatprep.subr.bf16.mxu1 %v462_v0  ;;  %v448_v2 = vld [vmem:[%s597_s1 + $0x8] sm:$0xff]   ;;  %v449_v3 = vld [vmem:[%s597_s1 + $0x10] sm:$0xff]  }
   0x2   :  { %401 = vmatprep.mubr.msk.bf16.mxu0 %vm463_vm0, %v462_v0  ;;  %417 = vmatprep.mubr.msk.bf16.mxu1 %vm463_vm0, %v462_v0  ;;  %v450_v4 = vld [vmem:[%s597_s1 + $0x18] sm:$0xff]   ;;  %v451_v5 = vld [vmem:[%s597_s1 + $0x20] sm:$0xff]   ;;  %v452_v6 = vld [vmem:[%s597_s1 + $0x28] sm:$0xff]  }
   0x3   :  { %386 = vmatpush3.bf16.msra.mxu0 %v447_v1  ;;  %437 = vmatpush3.bf16.msra.mxu1 %v447_v1  ;;  %v453_v7 = vld [vmem:[%s597_s1 + $0x30] sm:$0xff]   ;;  %v454_v8 = vld [vmem:[%s597_s1 + $0x38] sm:$0xff]   ;;  %v455_v9 = vld [vmem:[%s598_s0] sm:$0xff]  }
   0x4   :  { %387 = vmatprep.subr.bf16.mxu0 %v462_v0  ;;  %430 = vmatprep.subr.bf16.mxu1 %v462_v0  ;;  %v456_v10 = vld [vmem:[%s598_s0 + $0x20] sm:$0xff]   ;;  %v457_v11 = vld [vmem:[%s598_s0 + $0x8] sm:$0xff]   ;;  %v459_v13 = vld [vmem:[%s598_s0 + $0x10] sm:$0xff]  }
   0x5   :  { %v458_v12 = vld [vmem:[%s598_s0 + $0x28] sm:$0xff]   ;;  %v460_v14 = vld [vmem:[%s598_s0 + $0x30] sm:$0xff]   ;;  %v461_v15 = vld [vmem:[%s598_s0 + $0x18] sm:$0xff]  }
   0x6   :  { %v539_v16 = vld [vmem:[%s599_s2] ss:$0 sm:$0xff] }
   0x7   :  { %388 = vmatpush3.bf16.msra.mxu0 %v448_v2  ;;  %438 = vmatpush3.bf16.msra.mxu1 %v448_v2 }
   0x8   :  { %389 = vmatprep.subr.bf16.mxu0 %v462_v0  ;;  %431 = vmatprep.subr.bf16.mxu1 %v462_v0 }
   0xb   :  { %390 = vmatpush3.bf16.msra.mxu0 %v449_v3  ;;  %439 = vmatpush3.bf16.msra.mxu1 %v449_v3 }
   0xc   :  { %391 = vmatprep.subr.bf16.mxu0 %v462_v0  ;;  %432 = vmatprep.subr.bf16.mxu1 %v462_v0 }
   0xf   :  { %392 = vmatpush3.bf16.msra.mxu0 %v450_v4  ;;  %440 = vmatpush3.bf16.msra.mxu1 %v450_v4 }
  0x10   :  { %393 = vmatprep.subr.bf16.mxu0 %v462_v0  ;;  %433 = vmatprep.subr.bf16.mxu1 %v462_v0 }
  0x13   :  { %394 = vmatpush3.bf16.msra.mxu0 %v451_v5  ;;  %441 = vmatpush3.bf16.msra.mxu1 %v451_v5 }
  0x14   :  { %395 = vmatprep.subr.bf16.mxu0 %v462_v0  ;;  %434 = vmatprep.subr.bf16.mxu1 %v462_v0 }
  0x17   :  { %396 = vmatpush3.bf16.msra.mxu0 %v452_v6  ;;  %442 = vmatpush3.bf16.msra.mxu1 %v452_v6 }
  0x18   :  { %397 = vmatprep.subr.bf16.mxu0 %v462_v0  ;;  %435 = vmatprep.subr.bf16.mxu1 %v462_v0 }
  0x1b   :  { %398 = vmatpush3.bf16.msra.mxu0 %v453_v7  ;;  %443 = vmatpush3.bf16.msra.mxu1 %v453_v7 }
  0x1c   :  { %399 = vmatprep.subr.bf16.mxu0 %v462_v0  ;;  %436 = vmatprep.subr.bf16.mxu1 %v462_v0 }
  0x1f   :  { %400 = vmatpush3.bf16.msra.mxu0 %v454_v8  ;;  %444 = vmatpush3.bf16.msra.mxu1 %v454_v8 }
  0x22   :  { %402 = vmatmul.mubr.bf16.vlgmr.msra.gmra.mrb[0].mxu0 %v455_v9  ;;  %418 = vmatmul.mubr.bf16.vlgmr.msra.gmra.mrb[0].mxu1 %v456_v10 }
  0x23   :  { %405 = vmatprep.mubr.msk.bf16.mxu0 %vm463_vm0, %v462_v0  ;;  %421 = vmatprep.mubr.msk.bf16.mxu1 %vm463_vm0, %v462_v0 }
  0x2a   :  { %406 = vmatmul.mubr.bf16.gmra.mrb[4].mxu0 %v457_v11  ;;  %422 = vmatmul.mubr.bf16.gmra.mrb[4].mxu1 %v458_v12 }
  0x2b   :  { %409 = vmatprep.mubr.msk.bf16.mxu0 %vm463_vm0, %v462_v0  ;;  %425 = vmatprep.mubr.msk.bf16.mxu1 %vm463_vm0, %v462_v0 }
  0x32   :  { %410 = vmatmul.mubr.bf16.gmra.mrb[8].mxu0 %v459_v13  ;;  %426 = vmatmul.mubr.bf16.gmra.mrb[8].mxu1 %v460_v14 }
  0x33   :  { %413 = vmatprep.mubr.msk.bf16.mxu0 %vm463_vm0, %v462_v0 }
  0x3a   :  { %414 = vmatmul.mubr.bf16.gmra.mrb[12].mxu0 %v461_v15 }
  0xf5   :  { %v201_v17 = vpop.f32.mrb[0].mxu0  ;;  %v233_v18 = vpop.f32.mrb[0].mxu1 }
  0xf6   :  { %v308_v19 = vadd.f32 %v539_v16, %v201_v17  ;;  %v403_v20 = vpop.f32.mrb[1].mxu0  ;;  %v316_v21 = vadd.f32 %v539_v16, %v233_v18  ;;  %v419_v22 = vpop.f32.mrb[1].mxu1 }
  0xf7   :  { %v204_v23 = vpop.f32.mrb[2].mxu0  ;;  %v236_v24 = vpop.f32.mrb[2].mxu1 }
  0xf8   :  { %v322_v25 = vmax.f32 %v308_v19, 0.0  ;;  %v309_v26 = vadd.f32 %v539_v16, %v204_v23  ;;  %v404_v27 = vpop.f32.mrb[3].mxu0  ;;  %v330_v28 = vmax.f32 %v316_v21, 0.0  ;;  %v317_v29 = vadd.f32 %v539_v16, %v236_v24  ;;  %v420_v30 = vpop.f32.mrb[3].mxu1 }
  0xfa   :  { %336 = vst [vmem:[%s600_s3] sm:$0xff] %v322_v25  ;;  %v323_v31 = vmax.f32 %v309_v26, 0.0  ;;  %344 = vst [vmem:[%s600_s3 + $0x40] sm:$0xff] %v330_v28  ;;  %v331_v32 = vmax.f32 %v317_v29, 0.0 }
  0xfc   :  { %337 = vst [vmem:[%s600_s3 + $0x8] sm:$0xff] %v323_v31  ;;  %345 = vst [vmem:[%s600_s3 + $0x48] sm:$0xff] %v331_v32 }
  0xfd   :  { %v209_v33 = vpop.f32.mrb[4].mxu0  ;;  %v241_v34 = vpop.f32.mrb[4].mxu1 }
  0xfe   :  { %v310_v35 = vadd.f32 %v539_v16, %v209_v33  ;;  %v407_v36 = vpop.f32.mrb[5].mxu0  ;;  %v318_v37 = vadd.f32 %v539_v16, %v241_v34  ;;  %v423_v38 = vpop.f32.mrb[5].mxu1 }
  0xff   :  { %v212_v39 = vpop.f32.mrb[6].mxu0  ;;  %v244_v40 = vpop.f32.mrb[6].mxu1 }
 0x100   :  { %v324_v41 = vmax.f32 %v310_v35, 0.0  ;;  %v311_v42 = vadd.f32 %v539_v16, %v212_v39  ;;  %v408_v43 = vpop.f32.mrb[7].mxu0  ;;  %v332_v44 = vmax.f32 %v318_v37, 0.0  ;;  %v319_v45 = vadd.f32 %v539_v16, %v244_v40  ;;  %v424_v46 = vpop.f32.mrb[7].mxu1 }
 0x102   :  { %338 = vst [vmem:[%s600_s3 + $0x10] sm:$0xff] %v324_v41  ;;  %v325_v47 = vmax.f32 %v311_v42, 0.0  ;;  %346 = vst [vmem:[%s600_s3 + $0x50] sm:$0xff] %v332_v44  ;;  %v333_v48 = vmax.f32 %v319_v45, 0.0 }
 0x104   :  { %339 = vst [vmem:[%s600_s3 + $0x18] sm:$0xff] %v325_v47  ;;  %347 = vst [vmem:[%s600_s3 + $0x58] sm:$0xff] %v333_v48 }
 0x105   :  { %v217_v49 = vpop.f32.mrb[8].mxu0  ;;  %v249_v50 = vpop.f32.mrb[8].mxu1 }
 0x106   :  { %v312_v51 = vadd.f32 %v539_v16, %v217_v49  ;;  %v411_v52 = vpop.f32.mrb[9].mxu0  ;;  %v320_v53 = vadd.f32 %v539_v16, %v249_v50  ;;  %v427_v54 = vpop.f32.mrb[9].mxu1 }
 0x107   :  { %v220_v55 = vpop.f32.mrb[10].mxu0  ;;  %v252_v56 = vpop.f32.mrb[10].mxu1 }
 0x108   :  { %v326_v57 = vmax.f32 %v312_v51, 0.0  ;;  %v313_v58 = vadd.f32 %v539_v16, %v220_v55  ;;  %v412_v59 = vpop.f32.mrb[11].mxu0  ;;  %v334_v60 = vmax.f32 %v320_v53, 0.0  ;;  %v321_v61 = vadd.f32 %v539_v16, %v252_v56  ;;  %v428_v62 = vpop.f32.mrb[11].mxu1 }
 0x10a   :  { %340 = vst [vmem:[%s600_s3 + $0x20] sm:$0xff] %v326_v57  ;;  %v327_v63 = vmax.f32 %v313_v58, 0.0  ;;  %348 = vst [vmem:[%s600_s3 + $0x60] sm:$0xff] %v334_v60  ;;  %v335_v0 = vmax.f32 %v321_v61, 0.0 }
 0x10c   :  { %341 = vst [vmem:[%s600_s3 + $0x28] sm:$0xff] %v327_v63  ;;  %349 = vst [vmem:[%s600_s3 + $0x68] sm:$0xff] %v335_v0 }
 0x10d   :  { %v225_v1 = vpop.f32.mrb[12].mxu0 }
 0x10e   :  { %v314_v2 = vadd.f32 %v539_v16, %v225_v1  ;;  %v415_v3 = vpop.f32.mrb[13].mxu0 }
 0x10f   :  { %v228_v4 = vpop.f32.mrb[14].mxu0 }
 0x110   :  { %v328_v5 = vmax.f32 %v314_v2, 0.0  ;;  %v315_v6 = vadd.f32 %v539_v16, %v228_v4  ;;  %v416_v7 = vpop.f32.mrb[15].mxu0 }
 0x112   :  { %342 = vst [vmem:[%s600_s3 + $0x30] sm:$0xff] %v328_v5  ;;  %v329_v8 = vmax.f32 %v315_v6, 0.0 }
 0x114   :  { %343 = vst [vmem:[%s600_s3 + $0x38] sm:$0xff] %v329_v8 }

// kernel: _lambda_.13
= control target key start
LH: loop header
LB: loop body
LE: loop exit
PB: predicated region body
PF: predicated region fallthrough
CT: control target
= control target key end

     0   :  { %s972_s1 = inlined_call_operand.vmem [shape: bf16[640,128], index: 1, kind: input, shape index: {}]   ;;  %s973_s0 = inlined_call_operand.vmem [shape: bf16[32,640], index: 0, kind: input, shape index: {}]   ;;  %s974_s2 = inlined_call_operand.vmem [shape: f32[1,128], index: 2, kind: input, shape index: {}]   ;;  %s975_s3 = inlined_call_operand.vmem [shape: f32[32,128], index: 3, kind: output, shape index: {}]  }
   0x1   :  { %v733_v0 = vld [vmem:[%s972_s1 + $0x40] sm:$0xff]   ;;  %v737_v4 = vld [vmem:[%s972_s1 + $0x48] sm:$0xff]   ;;  %v741_v8 = vld [vmem:[%s972_s1 + $0x50] sm:$0xff]  }
   0x2   :  { %v734_v1 = vld [vmem:[%s972_s1 + $0xc0] sm:$0xff]   ;;  %647 = vmatprep.subr.bf16.mxu0 %v733_v0  ;;  %v738_v5 = vld [vmem:[%s972_s1 + $0xc8] sm:$0xff]   ;;  %v742_v9 = vld [vmem:[%s972_s1 + $0xd0] sm:$0xff]  }
   0x3   :  { %v735_v2 = vld [vmem:[%s972_s1] sm:$0xff]   ;;  %675 = vmatprep.subr.bf16.mxu1 %v734_v1  ;;  %v739_v6 = vld [vmem:[%s972_s1 + $0x8] sm:$0xff]   ;;  %v743_v10 = vld [vmem:[%s972_s1 + $0x10] sm:$0xff]  }
   0x4   :  { %v736_v3 = vld [vmem:[%s972_s1 + $0x80] sm:$0xff]   ;;  %648 = vmatpush3.bf16.msra.mxu0 %v735_v2  ;;  %v740_v7 = vld [vmem:[%s972_s1 + $0x88] sm:$0xff]   ;;  %v744_v11 = vld [vmem:[%s972_s1 + $0x90] sm:$0xff]  }
   0x5   :  { %676 = vmatpush3.bf16.msra.mxu1 %v736_v3  ;;  %649 = vmatprep.subr.bf16.mxu0 %v737_v4  ;;  %v745_v12 = vld [vmem:[%s972_s1 + $0x58] sm:$0xff]   ;;  %v749_v16 = vld [vmem:[%s972_s1 + $0x60] sm:$0xff]   ;;  %v753_v20 = vld [vmem:[%s972_s1 + $0x68] sm:$0xff]  }
   0x6   :  { %677 = vmatprep.subr.bf16.mxu1 %v738_v5  ;;  %v746_v13 = vld [vmem:[%s972_s1 + $0xd8] sm:$0xff]   ;;  %v750_v17 = vld [vmem:[%s972_s1 + $0xe0] sm:$0xff]   ;;  %v754_v21 = vld [vmem:[%s972_s1 + $0xe8] sm:$0xff]  }
   0x7   :  { %v747_v14 = vld [vmem:[%s972_s1 + $0x18] sm:$0xff]   ;;  %v751_v18 = vld [vmem:[%s972_s1 + $0x20] sm:$0xff]   ;;  %v755_v22 = vld [vmem:[%s972_s1 + $0x28] sm:$0xff]  }
   0x8   :  { %650 = vmatpush3.bf16.msra.mxu0 %v739_v6  ;;  %v748_v15 = vld [vmem:[%s972_s1 + $0x98] sm:$0xff]   ;;  %v752_v19 = vld [vmem:[%s972_s1 + $0xa0] sm:$0xff]   ;;  %v756_v23 = vld [vmem:[%s972_s1 + $0xa8] sm:$0xff]  }
   0x9   :  { %678 = vmatpush3.bf16.msra.mxu1 %v740_v7  ;;  %651 = vmatprep.subr.bf16.mxu0 %v741_v8  ;;  %v757_v24 = vld [vmem:[%s972_s1 + $0x70] sm:$0xff]   ;;  %v761_v28 = vld [vmem:[%s972_s1 + $0x78] sm:$0xff]   ;;  %v770_v35 = vld [vmem:[%s973_s0 + $0xc] ss:$20 sps:$4 sm:$0xff]  }
   0xa   :  { %679 = vmatprep.subr.bf16.mxu1 %v742_v9  ;;  %v758_v25 = vld [vmem:[%s972_s1 + $0xf0] sm:$0xff]   ;;  %v762_v29 = vld [vmem:[%s972_s1 + $0xf8] sm:$0xff]   ;;  %v771_v36 = vld [vmem:[%s972_s1 + $0x100] sm:$0xff]   ;;  %492 = vmatprep.mubr.bf16.mxu1 %v770_v35 }
   0xb   :  { %v759_v26 = vld [vmem:[%s972_s1 + $0x30] sm:$0xff]   ;;  %v763_v30 = vld [vmem:[%s972_s1 + $0x38] sm:$0xff]   ;;  %v772_v37 = vld [vmem:[%s972_s1 + $0x108] sm:$0xff]  }
   0xc   :  { %652 = vmatpush3.bf16.msra.mxu0 %v743_v10  ;;  %v760_v27 = vld [vmem:[%s972_s1 + $0xb0] sm:$0xff]   ;;  %v764_v31 = vld [vmem:[%s972_s1 + $0xb8] sm:$0xff]   ;;  %v776_v39 = vld [vmem:[%s973_s0 + $0x2c] ss:$20 sps:$4 sm:$0xff]  }
   0xd   :  { %680 = vmatpush3.bf16.msra.mxu1 %v744_v11  ;;  %653 = vmatprep.subr.bf16.mxu0 %v745_v12  ;;  %v765_v32 = vld [vmem:[%s973_s0] ss:$20 sps:$4 sm:$0xff]   ;;  %v767_v33 = vld [vmem:[%s973_s0 + $0x4] ss:$20 sps:$4 sm:$0xff]   ;;  %v768_v34 = vld [vmem:[%s973_s0 + $0x8] ss:$20 sps:$4 sm:$0xff]  }
   0xe   :  { %681 = vmatprep.subr.bf16.mxu1 %v746_v13  ;;  %443 = vmatprep.mubr.bf16.mxu0 %v767_v33  ;;  %v773_v38 = vld [vmem:[%s972_s1 + $0x110] sm:$0xff]   ;;  %v774_v41 = vld [vmem:[%s972_s1 + $0x118] sm:$0xff]   ;;  %v775_v45 = vld [vmem:[%s972_s1 + $0x120] sm:$0xff]  }
   0xf   :  { %v778_v40 = vld [vmem:[%s973_s0 + $0x34] ss:$20 sps:$4 sm:$0xff]   ;;  %v782_v43 = vld [vmem:[%s973_s0 + $0x30] ss:$20 sps:$4 sm:$0xff]   ;;  %v784_v48 = vld [vmem:[%s972_s1 + $0x138] sm:$0xff]  }
  0x10   :  { %654 = vmatpush3.bf16.msra.mxu0 %v747_v14  ;;  %v781_v42 = vld [vmem:[%s973_s0 + $0x28] ss:$20 sps:$4 sm:$0xff]   ;;  %v785_v44 = vld [vmem:[%s973_s0 + $0x10] ss:$20 sps:$4 sm:$0xff]   ;;  %v786_v49 = vld [vmem:[%s973_s0 + $0x38] ss:$20 sps:$4 sm:$0xff]  }
  0x11   :  { %682 = vmatpush3.bf16.msra.mxu1 %v748_v15  ;;  %655 = vmatprep.subr.bf16.mxu0 %v749_v16  ;;  %v780_v46 = vld [vmem:[%s972_s1 + $0x128] sm:$0xff]   ;;  %v783_v47 = vld [vmem:[%s972_s1 + $0x130] sm:$0xff]   ;;  %v646_v15 = vld [vmem:[%s974_s2] ss:$0 sm:$0xff] }
  0x12   :  { %683 = vmatprep.subr.bf16.mxu1 %v750_v17 }
  0x14   :  { %656 = vmatpush3.bf16.msra.mxu0 %v751_v18 }
  0x15   :  { %684 = vmatpush3.bf16.msra.mxu1 %v752_v19  ;;  %657 = vmatprep.subr.bf16.mxu0 %v753_v20 }
  0x16   :  { %685 = vmatprep.subr.bf16.mxu1 %v754_v21 }
  0x18   :  { %658 = vmatpush3.bf16.msra.mxu0 %v755_v22 }
  0x19   :  { %686 = vmatpush3.bf16.msra.mxu1 %v756_v23  ;;  %659 = vmatprep.subr.bf16.mxu0 %v757_v24 }
  0x1a   :  { %687 = vmatprep.subr.bf16.mxu1 %v758_v25 }
  0x1c   :  { %660 = vmatpush3.bf16.msra.mxu0 %v759_v26 }
  0x1d   :  { %688 = vmatpush3.bf16.msra.mxu1 %v760_v27  ;;  %661 = vmatprep.subr.bf16.mxu0 %v761_v28 }
  0x1e   :  { %689 = vmatprep.subr.bf16.mxu1 %v762_v29 }
  0x20   :  { %662 = vmatpush3.bf16.msra.mxu0 %v763_v30 }
  0x21   :  { %690 = vmatpush3.bf16.msra.mxu1 %v764_v31  ;;  %713 = vmatprep.subr.bf16.mxu0 %v771_v36 }
  0x23   :  { %444 = vmatmul.mubr.bf16.vlgmr.msra.gmra.mrb[0].mxu0 %v765_v32 }
  0x24   :  { %493 = vmatmul.mubr.bf16.vlgmr.msra.gmra.mrb[0].mxu1 %v768_v34  ;;  %714 = vmatpush3.bf16.msra.mxu0 %v771_v36 }
  0x25   :  { %715 = vmatprep.subr.bf16.mxu0 %v772_v37  ;;  %451 = vmatprep.mubr.bf16.mxu0 %v776_v39 }
  0x26   :  { %500 = vmatprep.mubr.bf16.mxu1 %v778_v40 }
  0x28   :  { %716 = vmatpush3.bf16.msra.mxu0 %v772_v37 }
  0x29   :  { %717 = vmatprep.subr.bf16.mxu0 %v773_v38 }
  0x2b   :  { %452 = vmatmul.mubr.bf16.gmra.mrb[4].mxu0 %v781_v42 }
  0x2c   :  { %501 = vmatmul.mubr.bf16.gmra.mrb[4].mxu1 %v782_v43  ;;  %718 = vmatpush3.bf16.msra.mxu0 %v773_v38 }
  0x2d   :  { %719 = vmatprep.subr.bf16.mxu0 %v774_v41  ;;  %729 = vmatprep.mubr.bf16.mxu0 %v785_v44 }
  0x30   :  { %720 = vmatpush3.bf16.msra.mxu0 %v774_v41 }
  0x31   :  { %721 = vmatprep.subr.bf16.mxu0 %v775_v45 }
  0x34   :  { %722 = vmatpush3.bf16.msra.mxu0 %v775_v45 }
  0x35   :  { %723 = vmatprep.subr.bf16.mxu0 %v780_v46 }
  0x38   :  { %724 = vmatpush3.bf16.msra.mxu0 %v780_v46 }
  0x39   :  { %725 = vmatprep.subr.bf16.mxu0 %v783_v47 }
  0x3c   :  { %726 = vmatpush3.bf16.msra.mxu0 %v783_v47 }
  0x3d   :  { %727 = vmatprep.subr.bf16.mxu0 %v784_v48 }
  0x40   :  { %728 = vmatpush3.bf16.msra.mxu0 %v784_v48 }
  0x43   :  { %730 = vmatmul.mubr.bf16.vlgmr.msra.gmra.mrb[8].mxu0 %v786_v49 }
  0xf6   :  { %v663_v50 = vpop.f32.mrb[0].mxu0 }
  0xf7   :  { %v691_v51 = vpop.f32.mrb[0].mxu1  ;;  %v664_v52 = vpop.f32.mrb[1].mxu0 }
  0xf8   :  { %v665_v53 = vadd.f32 %v664_v52, %v663_v50  ;;  %v692_v54 = vpop.f32.mrb[1].mxu1  ;;  %v666_v55 = vpop.f32.mrb[2].mxu0 }
  0xf9   :  { %v693_v56 = vadd.f32 %v692_v54, %v691_v51  ;;  %v694_v57 = vpop.f32.mrb[2].mxu1  ;;  %v667_v58 = vpop.f32.mrb[3].mxu0 }
  0xfa   :  { %v668_v59 = vadd.f32 %v667_v58, %v666_v55  ;;  %v695_v60 = vpop.f32.mrb[3].mxu1 }
  0xfb   :  { %v696_v61 = vadd.f32 %v695_v60, %v694_v57  ;;  %v495_v62 = vadd.f32 %v693_v56, %v665_v53 }
  0xfd   :  { %v498_v63 = vadd.f32 %v696_v61, %v668_v59 }
  0xfe   :  { %v669_v0 = vpop.f32.mrb[4].mxu0 }
  0xff   :  { %v697_v1 = vpop.f32.mrb[4].mxu1  ;;  %v670_v2 = vpop.f32.mrb[5].mxu0 }
 0x100   :  { %v671_v3 = vadd.f32 %v670_v2, %v669_v0  ;;  %v698_v4 = vpop.f32.mrb[5].mxu1  ;;  %v672_v5 = vpop.f32.mrb[6].mxu0 }
 0x101   :  { %v699_v6 = vadd.f32 %v698_v4, %v697_v1  ;;  %v700_v7 = vpop.f32.mrb[6].mxu1  ;;  %v673_v8 = vpop.f32.mrb[7].mxu0 }
 0x102   :  { %v674_v9 = vadd.f32 %v673_v8, %v672_v5  ;;  %v701_v10 = vpop.f32.mrb[7].mxu1 }
 0x103   :  { %v702_v11 = vadd.f32 %v701_v10, %v700_v7  ;;  %v503_v12 = vadd.f32 %v699_v6, %v671_v3 }
 0x105   :  { %v506_v13 = vadd.f32 %v702_v11, %v674_v9 }
 0x116   :  { %v731_v14 = vpop.f32.mrb[8].mxu0 }
 0x117   :  { %v552_v16 = vadd.f32 %v731_v14, %v503_v12  ;;  %v543_v17 = vpop.f32.mrb[9].mxu0 }
 0x118   :  { %v544_v18 = vadd.f32 %v543_v17, %v495_v62  ;;  %v732_v19 = vpop.f32.mrb[10].mxu0 }
 0x119   :  { %v582_v20 = vadd.f32 %v646_v15, %v552_v16  ;;  %v555_v21 = vadd.f32 %v732_v19, %v506_v13  ;;  %v546_v22 = vpop.f32.mrb[11].mxu0 }
 0x11a   :  { %v580_v23 = vadd.f32 %v646_v15, %v544_v18  ;;  %v547_v24 = vadd.f32 %v546_v22, %v498_v63 }
 0x11b   :  { %v586_v25 = vmax.f32 %v582_v20, 0.0  ;;  %v583_v26 = vadd.f32 %v646_v15, %v555_v21 }
 0x11c   :  { %v584_v27 = vmax.f32 %v580_v23, 0.0  ;;  %v581_v28 = vadd.f32 %v646_v15, %v547_v24 }
 0x11d   :  { %590 = vst [vmem:[%s975_s3 + $0x10] sm:$0xff] %v586_v25  ;;  %v587_v29 = vmax.f32 %v583_v26, 0.0 }
 0x11e   :  { %588 = vst [vmem:[%s975_s3] sm:$0xff] %v584_v27  ;;  %v585_v30 = vmax.f32 %v581_v28, 0.0 }
 0x11f   :  { %591 = vst [vmem:[%s975_s3 + $0x18] sm:$0xff] %v587_v29 }
 0x120   :  { %589 = vst [vmem:[%s975_s3 + $0x8] sm:$0xff] %v585_v30 }

// kernel: _lambda_.14
= control target key start
LH: loop header
LB: loop body
LE: loop exit
PB: predicated region body
PF: predicated region fallthrough
CT: control target
= control target key end

     0   :  { %s1000_s1 = inlined_call_operand.vmem [shape: bf16[640,128], index: 1, kind: input, shape index: {}]   ;;  %s1001_s0 = inlined_call_operand.vmem [shape: bf16[32,640], index: 0, kind: input, shape index: {}]   ;;  %s1002_s2 = inlined_call_operand.vmem [shape: f32[1,128], index: 2, kind: input, shape index: {}]   ;;  %s1003_s3 = inlined_call_operand.vmem [shape: f32[32,128], index: 3, kind: input, shape index: {}]   ;;  %s1004_s4 = inlined_call_operand.vmem [shape: f32[32,128], index: 4, kind: output, shape index: {}]  }
   0x1   :  { %v744_v0 = vld [vmem:[%s1000_s1 + $0x40] sm:$0xff]   ;;  %v748_v4 = vld [vmem:[%s1000_s1 + $0x48] sm:$0xff]   ;;  %v752_v8 = vld [vmem:[%s1000_s1 + $0x50] sm:$0xff]  }
   0x2   :  { %v745_v1 = vld [vmem:[%s1000_s1 + $0xc0] sm:$0xff]   ;;  %658 = vmatprep.subr.bf16.mxu0 %v744_v0  ;;  %v749_v5 = vld [vmem:[%s1000_s1 + $0xc8] sm:$0xff]   ;;  %v753_v9 = vld [vmem:[%s1000_s1 + $0xd0] sm:$0xff]  }
   0x3   :  { %v746_v2 = vld [vmem:[%s1000_s1] sm:$0xff]   ;;  %686 = vmatprep.subr.bf16.mxu1 %v745_v1  ;;  %v750_v6 = vld [vmem:[%s1000_s1 + $0x8] sm:$0xff]   ;;  %v754_v10 = vld [vmem:[%s1000_s1 + $0x10] sm:$0xff]  }
   0x4   :  { %v747_v3 = vld [vmem:[%s1000_s1 + $0x80] sm:$0xff]   ;;  %659 = vmatpush3.bf16.msra.mxu0 %v746_v2  ;;  %v751_v7 = vld [vmem:[%s1000_s1 + $0x88] sm:$0xff]   ;;  %v755_v11 = vld [vmem:[%s1000_s1 + $0x90] sm:$0xff]  }
   0x5   :  { %687 = vmatpush3.bf16.msra.mxu1 %v747_v3  ;;  %660 = vmatprep.subr.bf16.mxu0 %v748_v4  ;;  %v756_v12 = vld [vmem:[%s1000_s1 + $0x58] sm:$0xff]   ;;  %v760_v16 = vld [vmem:[%s1000_s1 + $0x60] sm:$0xff]   ;;  %v764_v20 = vld [vmem:[%s1000_s1 + $0x68] sm:$0xff]  }
   0x6   :  { %688 = vmatprep.subr.bf16.mxu1 %v749_v5  ;;  %v757_v13 = vld [vmem:[%s1000_s1 + $0xd8] sm:$0xff]   ;;  %v761_v17 = vld [vmem:[%s1000_s1 + $0xe0] sm:$0xff]   ;;  %v765_v21 = vld [vmem:[%s1000_s1 + $0xe8] sm:$0xff]  }
   0x7   :  { %v758_v14 = vld [vmem:[%s1000_s1 + $0x18] sm:$0xff]   ;;  %v762_v18 = vld [vmem:[%s1000_s1 + $0x20] sm:$0xff]   ;;  %v766_v22 = vld [vmem:[%s1000_s1 + $0x28] sm:$0xff]  }
   0x8   :  { %661 = vmatpush3.bf16.msra.mxu0 %v750_v6  ;;  %v759_v15 = vld [vmem:[%s1000_s1 + $0x98] sm:$0xff]   ;;  %v763_v19 = vld [vmem:[%s1000_s1 + $0xa0] sm:$0xff]   ;;  %v767_v23 = vld [vmem:[%s1000_s1 + $0xa8] sm:$0xff]  }
   0x9   :  { %689 = vmatpush3.bf16.msra.mxu1 %v751_v7  ;;  %662 = vmatprep.subr.bf16.mxu0 %v752_v8  ;;  %v768_v24 = vld [vmem:[%s1000_s1 + $0x70] sm:$0xff]   ;;  %v772_v28 = vld [vmem:[%s1000_s1 + $0x78] sm:$0xff]   ;;  %v781_v35 = vld [vmem:[%s1001_s0 + $0xc] ss:$20 sps:$4 sm:$0xff]  }
   0xa   :  { %690 = vmatprep.subr.bf16.mxu1 %v753_v9  ;;  %v769_v25 = vld [vmem:[%s1000_s1 + $0xf0] sm:$0xff]   ;;  %v773_v29 = vld [vmem:[%s1000_s1 + $0xf8] sm:$0xff]   ;;  %v782_v36 = vld [vmem:[%s1000_s1 + $0x100] sm:$0xff]   ;;  %495 = vmatprep.mubr.bf16.mxu1 %v781_v35 }
   0xb   :  { %v770_v26 = vld [vmem:[%s1000_s1 + $0x30] sm:$0xff]   ;;  %v774_v30 = vld [vmem:[%s1000_s1 + $0x38] sm:$0xff]   ;;  %v783_v37 = vld [vmem:[%s1000_s1 + $0x108] sm:$0xff]  }
   0xc   :  { %663 = vmatpush3.bf16.msra.mxu0 %v754_v10  ;;  %v771_v27 = vld [vmem:[%s1000_s1 + $0xb0] sm:$0xff]   ;;  %v775_v31 = vld [vmem:[%s1000_s1 + $0xb8] sm:$0xff]   ;;  %v787_v39 = vld [vmem:[%s1001_s0 + $0x2c] ss:$20 sps:$4 sm:$0xff]  }
   0xd   :  { %691 = vmatpush3.bf16.msra.mxu1 %v755_v11  ;;  %664 = vmatprep.subr.bf16.mxu0 %v756_v12  ;;  %v776_v32 = vld [vmem:[%s1001_s0] ss:$20 sps:$4 sm:$0xff]   ;;  %v778_v33 = vld [vmem:[%s1001_s0 + $0x4] ss:$20 sps:$4 sm:$0xff]   ;;  %v779_v34 = vld [vmem:[%s1001_s0 + $0x8] ss:$20 sps:$4 sm:$0xff]  }
   0xe   :  { %692 = vmatprep.subr.bf16.mxu1 %v757_v13  ;;  %446 = vmatprep.mubr.bf16.mxu0 %v778_v33  ;;  %v784_v38 = vld [vmem:[%s1000_s1 + $0x110] sm:$0xff]   ;;  %v785_v41 = vld [vmem:[%s1000_s1 + $0x118] sm:$0xff]   ;;  %v786_v45 = vld [vmem:[%s1000_s1 + $0x120] sm:$0xff]  }
   0xf   :  { %v789_v40 = vld [vmem:[%s1001_s0 + $0x34] ss:$20 sps:$4 sm:$0xff]   ;;  %v793_v43 = vld [vmem:[%s1001_s0 + $0x30] ss:$20 sps:$4 sm:$0xff]   ;;  %v795_v48 = vld [vmem:[%s1000_s1 + $0x138] sm:$0xff]  }
  0x10   :  { %665 = vmatpush3.bf16.msra.mxu0 %v758_v14  ;;  %v792_v42 = vld [vmem:[%s1001_s0 + $0x28] ss:$20 sps:$4 sm:$0xff]   ;;  %v796_v44 = vld [vmem:[%s1001_s0 + $0x10] ss:$20 sps:$4 sm:$0xff]   ;;  %v797_v49 = vld [vmem:[%s1001_s0 + $0x38] ss:$20 sps:$4 sm:$0xff]  }
  0x11   :  { %693 = vmatpush3.bf16.msra.mxu1 %v759_v15  ;;  %666 = vmatprep.subr.bf16.mxu0 %v760_v16  ;;  %v791_v46 = vld [vmem:[%s1000_s1 + $0x128] sm:$0xff]   ;;  %v794_v47 = vld [vmem:[%s1000_s1 + $0x130] sm:$0xff]   ;;  %v657_v15 = vld [vmem:[%s1002_s2] ss:$0 sm:$0xff] }
  0x12   :  { %694 = vmatprep.subr.bf16.mxu1 %v761_v17 }
  0x14   :  { %667 = vmatpush3.bf16.msra.mxu0 %v762_v18  ;;  %v589_v18 = vld [vmem:[%s1003_s3 + $0x10] sm:$0xff] }
  0x15   :  { %695 = vmatpush3.bf16.msra.mxu1 %v763_v19  ;;  %668 = vmatprep.subr.bf16.mxu0 %v764_v20 }
  0x16   :  { %696 = vmatprep.subr.bf16.mxu1 %v765_v21 }
  0x18   :  { %669 = vmatpush3.bf16.msra.mxu0 %v766_v22  ;;  %v587_v22 = vld [vmem:[%s1003_s3] sm:$0xff] }
  0x19   :  { %697 = vmatpush3.bf16.msra.mxu1 %v767_v23  ;;  %670 = vmatprep.subr.bf16.mxu0 %v768_v24 }
  0x1a   :  { %698 = vmatprep.subr.bf16.mxu1 %v769_v25 }
  0x1c   :  { %671 = vmatpush3.bf16.msra.mxu0 %v770_v26  ;;  %v590_v26 = vld [vmem:[%s1003_s3 + $0x18] sm:$0xff] }
  0x1d   :  { %699 = vmatpush3.bf16.msra.mxu1 %v771_v27  ;;  %672 = vmatprep.subr.bf16.mxu0 %v772_v28 }
  0x1e   :  { %700 = vmatprep.subr.bf16.mxu1 %v773_v29 }
  0x20   :  { %673 = vmatpush3.bf16.msra.mxu0 %v774_v30  ;;  %v588_v30 = vld [vmem:[%s1003_s3 + $0x8] sm:$0xff] }
  0x21   :  { %701 = vmatpush3.bf16.msra.mxu1 %v775_v31  ;;  %724 = vmatprep.subr.bf16.mxu0 %v782_v36 }
  0x23   :  { %447 = vmatmul.mubr.bf16.vlgmr.msra.gmra.mrb[0].mxu0 %v776_v32 }
  0x24   :  { %496 = vmatmul.mubr.bf16.vlgmr.msra.gmra.mrb[0].mxu1 %v779_v34  ;;  %725 = vmatpush3.bf16.msra.mxu0 %v782_v36 }
  0x25   :  { %726 = vmatprep.subr.bf16.mxu0 %v783_v37  ;;  %454 = vmatprep.mubr.bf16.mxu0 %v787_v39 }
  0x26   :  { %503 = vmatprep.mubr.bf16.mxu1 %v789_v40 }
  0x28   :  { %727 = vmatpush3.bf16.msra.mxu0 %v783_v37 }
  0x29   :  { %728 = vmatprep.subr.bf16.mxu0 %v784_v38 }
  0x2b   :  { %455 = vmatmul.mubr.bf16.gmra.mrb[4].mxu0 %v792_v42 }
  0x2c   :  { %504 = vmatmul.mubr.bf16.gmra.mrb[4].mxu1 %v793_v43  ;;  %729 = vmatpush3.bf16.msra.mxu0 %v784_v38 }
  0x2d   :  { %730 = vmatprep.subr.bf16.mxu0 %v785_v41  ;;  %740 = vmatprep.mubr.bf16.mxu0 %v796_v44 }
  0x30   :  { %731 = vmatpush3.bf16.msra.mxu0 %v785_v41 }
  0x31   :  { %732 = vmatprep.subr.bf16.mxu0 %v786_v45 }
  0x34   :  { %733 = vmatpush3.bf16.msra.mxu0 %v786_v45 }
  0x35   :  { %734 = vmatprep.subr.bf16.mxu0 %v791_v46 }
  0x38   :  { %735 = vmatpush3.bf16.msra.mxu0 %v791_v46 }
  0x39   :  { %736 = vmatprep.subr.bf16.mxu0 %v794_v47 }
  0x3c   :  { %737 = vmatpush3.bf16.msra.mxu0 %v794_v47 }
  0x3d   :  { %738 = vmatprep.subr.bf16.mxu0 %v795_v48 }
  0x40   :  { %739 = vmatpush3.bf16.msra.mxu0 %v795_v48 }
  0x43   :  { %741 = vmatmul.mubr.bf16.vlgmr.msra.gmra.mrb[8].mxu0 %v797_v49 }
  0xf6   :  { %v674_v50 = vpop.f32.mrb[0].mxu0 }
  0xf7   :  { %v702_v51 = vpop.f32.mrb[0].mxu1  ;;  %v675_v52 = vpop.f32.mrb[1].mxu0 }
  0xf8   :  { %v676_v53 = vadd.f32 %v675_v52, %v674_v50  ;;  %v703_v54 = vpop.f32.mrb[1].mxu1  ;;  %v677_v55 = vpop.f32.mrb[2].mxu0 }
  0xf9   :  { %v704_v56 = vadd.f32 %v703_v54, %v702_v51  ;;  %v705_v57 = vpop.f32.mrb[2].mxu1  ;;  %v678_v58 = vpop.f32.mrb[3].mxu0 }
  0xfa   :  { %v679_v59 = vadd.f32 %v678_v58, %v677_v55  ;;  %v706_v60 = vpop.f32.mrb[3].mxu1 }
  0xfb   :  { %v707_v61 = vadd.f32 %v706_v60, %v705_v57  ;;  %v498_v62 = vadd.f32 %v704_v56, %v676_v53 }
  0xfd   :  { %v501_v63 = vadd.f32 %v707_v61, %v679_v59 }
  0xfe   :  { %v680_v0 = vpop.f32.mrb[4].mxu0 }
  0xff   :  { %v708_v1 = vpop.f32.mrb[4].mxu1  ;;  %v681_v2 = vpop.f32.mrb[5].mxu0 }
 0x100   :  { %v682_v3 = vadd.f32 %v681_v2, %v680_v0  ;;  %v709_v4 = vpop.f32.mrb[5].mxu1  ;;  %v683_v5 = vpop.f32.mrb[6].mxu0 }
 0x101   :  { %v710_v6 = vadd.f32 %v709_v4, %v708_v1  ;;  %v711_v7 = vpop.f32.mrb[6].mxu1  ;;  %v684_v8 = vpop.f32.mrb[7].mxu0 }
 0x102   :  { %v685_v9 = vadd.f32 %v684_v8, %v683_v5  ;;  %v712_v10 = vpop.f32.mrb[7].mxu1 }
 0x103   :  { %v713_v11 = vadd.f32 %v712_v10, %v711_v7  ;;  %v506_v12 = vadd.f32 %v710_v6, %v682_v3 }
 0x105   :  { %v509_v13 = vadd.f32 %v713_v11, %v685_v9 }
 0x116   :  { %v742_v14 = vpop.f32.mrb[8].mxu0 }
 0x117   :  { %v555_v16 = vadd.f32 %v742_v14, %v506_v12  ;;  %v546_v17 = vpop.f32.mrb[9].mxu0 }
 0x118   :  { %v547_v19 = vadd.f32 %v546_v17, %v498_v62  ;;  %v743_v20 = vpop.f32.mrb[10].mxu0 }
 0x119   :  { %v585_v21 = vadd.f32 %v657_v15, %v555_v16  ;;  %v558_v23 = vadd.f32 %v743_v20, %v509_v13  ;;  %v549_v24 = vpop.f32.mrb[11].mxu0 }
 0x11a   :  { %v583_v25 = vadd.f32 %v657_v15, %v547_v19  ;;  %v550_v27 = vadd.f32 %v549_v24, %v501_v63 }
 0x11b   :  { %v593_v28 = vadd.f32 %v589_v18, %v585_v21  ;;  %v586_v29 = vadd.f32 %v657_v15, %v558_v23 }
 0x11c   :  { %v591_v31 = vadd.f32 %v587_v22, %v583_v25  ;;  %v584_v32 = vadd.f32 %v657_v15, %v550_v27 }
 0x11d   :  { %v597_v33 = vmax.f32 %v593_v28, 0.0  ;;  %v594_v34 = vadd.f32 %v590_v26, %v586_v29 }
 0x11e   :  { %v595_v35 = vmax.f32 %v591_v31, 0.0  ;;  %v592_v36 = vadd.f32 %v588_v30, %v584_v32 }
 0x11f   :  { %601 = vst [vmem:[%s1004_s4 + $0x10] sm:$0xff] %v597_v33  ;;  %v598_v37 = vmax.f32 %v594_v34, 0.0 }
 0x120   :  { %599 = vst [vmem:[%s1004_s4] sm:$0xff] %v595_v35  ;;  %v596_v38 = vmax.f32 %v592_v36, 0.0 }
 0x121   :  { %602 = vst [vmem:[%s1004_s4 + $0x18] sm:$0xff] %v598_v37 }
 0x122   :  { %600 = vst [vmem:[%s1004_s4 + $0x8] sm:$0xff] %v596_v38 }

// kernel: _lambda_.15
= control target key start
LH: loop header
LB: loop body
LE: loop exit
PB: predicated region body
PF: predicated region fallthrough
CT: control target
= control target key end

     0   :  { %v668_v36 = vmov 0.0   ;;  %vm669_vm0 = vmmov 0   ;;  %s825_s1 = inlined_call_operand.vmem [shape: bf16[640,128], index: 1, kind: input, shape index: {}]   ;;  %s826_s0 = inlined_call_operand.vmem [shape: bf16[8,640], index: 0, kind: input, shape index: {}]   ;;  %s827_s2 = inlined_call_operand.vmem [shape: f32[1,128], index: 2, kind: input, shape index: {}]   ;;  %s828_s3 = inlined_call_operand.vmem [shape: f32[8,128], index: 3, kind: output, shape index: {}]  }
   0x1   :  { %v623_v0 = vld [vmem:[%s825_s1 + $0x40] sm:$0xff]   ;;  %v627_v4 = vld [vmem:[%s825_s1 + $0x48] sm:$0xff]   ;;  %v631_v8 = vld [vmem:[%s825_s1 + $0x50] sm:$0xff]  }
   0x2   :  { %v624_v1 = vld [vmem:[%s825_s1 + $0xc0] sm:$0xff]   ;;  %548 = vmatprep.subr.bf16.mxu0 %v623_v0  ;;  %v628_v5 = vld [vmem:[%s825_s1 + $0xc8] sm:$0xff]   ;;  %v632_v9 = vld [vmem:[%s825_s1 + $0xd0] sm:$0xff]  }
   0x3   :  { %v625_v2 = vld [vmem:[%s825_s1] sm:$0xff]   ;;  %570 = vmatprep.subr.bf16.mxu1 %v624_v1  ;;  %v629_v6 = vld [vmem:[%s825_s1 + $0x8] sm:$0xff]   ;;  %v633_v10 = vld [vmem:[%s825_s1 + $0x10] sm:$0xff]  }
   0x4   :  { %v626_v3 = vld [vmem:[%s825_s1 + $0x80] sm:$0xff]   ;;  %549 = vmatpush3.bf16.msra.mxu0 %v625_v2  ;;  %v630_v7 = vld [vmem:[%s825_s1 + $0x88] sm:$0xff]   ;;  %v634_v11 = vld [vmem:[%s825_s1 + $0x90] sm:$0xff]  }
   0x5   :  { %571 = vmatpush3.bf16.msra.mxu1 %v626_v3  ;;  %550 = vmatprep.subr.bf16.mxu0 %v627_v4  ;;  %v635_v12 = vld [vmem:[%s825_s1 + $0x58] sm:$0xff]   ;;  %v639_v16 = vld [vmem:[%s825_s1 + $0x60] sm:$0xff]   ;;  %v643_v20 = vld [vmem:[%s825_s1 + $0x68] sm:$0xff]  }
   0x6   :  { %572 = vmatprep.subr.bf16.mxu1 %v628_v5  ;;  %v636_v13 = vld [vmem:[%s825_s1 + $0xd8] sm:$0xff]   ;;  %v640_v17 = vld [vmem:[%s825_s1 + $0xe0] sm:$0xff]   ;;  %v644_v21 = vld [vmem:[%s825_s1 + $0xe8] sm:$0xff]  }
   0x7   :  { %v637_v14 = vld [vmem:[%s825_s1 + $0x18] sm:$0xff]   ;;  %v641_v18 = vld [vmem:[%s825_s1 + $0x20] sm:$0xff]   ;;  %v645_v22 = vld [vmem:[%s825_s1 + $0x28] sm:$0xff]  }
   0x8   :  { %551 = vmatpush3.bf16.msra.mxu0 %v629_v6  ;;  %v638_v15 = vld [vmem:[%s825_s1 + $0x98] sm:$0xff]   ;;  %v642_v19 = vld [vmem:[%s825_s1 + $0xa0] sm:$0xff]   ;;  %v646_v23 = vld [vmem:[%s825_s1 + $0xa8] sm:$0xff]  }
   0x9   :  { %573 = vmatpush3.bf16.msra.mxu1 %v630_v7  ;;  %552 = vmatprep.subr.bf16.mxu0 %v631_v8  ;;  %v647_v24 = vld [vmem:[%s825_s1 + $0x70] sm:$0xff]   ;;  %v651_v28 = vld [vmem:[%s825_s1 + $0x78] sm:$0xff]   ;;  %v21_v32 = vld [vmem:[%s826_s0] sm:$0xff] }
   0xa   :  { %574 = vmatprep.subr.bf16.mxu1 %v632_v9  ;;  %v648_v25 = vld [vmem:[%s825_s1 + $0xf0] sm:$0xff]   ;;  %v652_v29 = vld [vmem:[%s825_s1 + $0xf8] sm:$0xff]   ;;  %v502_v33 = vcombine.low %v21_v32, %v21_v32  ;;  %v503_v34 = vcombine.high %v21_v32, %v21_v32  ;;  %v22_v35 = vld [vmem:[%s826_s0 + $0x8] sm:$0xff] }
   0xb   :  { %v649_v26 = vld [vmem:[%s825_s1 + $0x30] sm:$0xff]   ;;  %v653_v30 = vld [vmem:[%s825_s1 + $0x38] sm:$0xff]   ;;  %v504_v37 = vcombine.low %v22_v35, %v22_v35  ;;  %v505_v38 = vcombine.high %v22_v35, %v22_v35  ;;  %v660_v39 = vld [vmem:[%s825_s1 + $0x100] sm:$0xff]  }
   0xc   :  { %553 = vmatpush3.bf16.msra.mxu0 %v633_v10  ;;  %v650_v27 = vld [vmem:[%s825_s1 + $0xb0] sm:$0xff]   ;;  %v654_v31 = vld [vmem:[%s825_s1 + $0xb8] sm:$0xff]   ;;  %394 = vmatprep.mubr.bf16.mxu0 %v503_v34  ;;  %v661_v40 = vld [vmem:[%s825_s1 + $0x108] sm:$0xff]  }
   0xd   :  { %575 = vmatpush3.bf16.msra.mxu1 %v634_v11  ;;  %554 = vmatprep.subr.bf16.mxu0 %v635_v12  ;;  %v662_v41 = vld [vmem:[%s825_s1 + $0x110] sm:$0xff]   ;;  %v663_v42 = vld [vmem:[%s825_s1 + $0x118] sm:$0xff]   ;;  %v664_v43 = vld [vmem:[%s825_s1 + $0x120] sm:$0xff]  }
   0xe   :  { %576 = vmatprep.subr.bf16.mxu1 %v636_v13  ;;  %434 = vmatprep.mubr.bf16.mxu1 %v505_v38  ;;  %v665_v44 = vld [vmem:[%s825_s1 + $0x128] sm:$0xff]   ;;  %v666_v45 = vld [vmem:[%s825_s1 + $0x130] sm:$0xff]   ;;  %v667_v46 = vld [vmem:[%s825_s1 + $0x138] sm:$0xff]  }
   0xf   :  { %v657_v47 = vld [vmem:[%s826_s0 + $0x10] ss:$0 sps:$4 sm:$0xff]   ;;  %v547_v60 = vld [vmem:[%s827_s2] ss:$0 sm:$0xff] }
  0x10   :  { %555 = vmatpush3.bf16.msra.mxu0 %v637_v14 }
  0x11   :  { %577 = vmatpush3.bf16.msra.mxu1 %v638_v15  ;;  %556 = vmatprep.subr.bf16.mxu0 %v639_v16 }
  0x12   :  { %578 = vmatprep.subr.bf16.mxu1 %v640_v17 }
  0x14   :  { %557 = vmatpush3.bf16.msra.mxu0 %v641_v18 }
  0x15   :  { %579 = vmatpush3.bf16.msra.mxu1 %v642_v19  ;;  %558 = vmatprep.subr.bf16.mxu0 %v643_v20 }
  0x16   :  { %580 = vmatprep.subr.bf16.mxu1 %v644_v21 }
  0x18   :  { %559 = vmatpush3.bf16.msra.mxu0 %v645_v22 }
  0x19   :  { %581 = vmatpush3.bf16.msra.mxu1 %v646_v23  ;;  %560 = vmatprep.subr.bf16.mxu0 %v647_v24 }
  0x1a   :  { %582 = vmatprep.subr.bf16.mxu1 %v648_v25 }
  0x1c   :  { %561 = vmatpush3.bf16.msra.mxu0 %v649_v26 }
  0x1d   :  { %583 = vmatpush3.bf16.msra.mxu1 %v650_v27  ;;  %562 = vmatprep.subr.bf16.mxu0 %v651_v28 }
  0x1e   :  { %584 = vmatprep.subr.bf16.mxu1 %v652_v29 }
  0x20   :  { %563 = vmatpush3.bf16.msra.mxu0 %v653_v30 }
  0x21   :  { %585 = vmatpush3.bf16.msra.mxu1 %v654_v31  ;;  %601 = vmatprep.subr.bf16.mxu0 %v668_v36 }
  0x23   :  { %395 = vmatmul.mubr.bf16.vlgmr.msra.gmra.mrb[0].mxu0 %v502_v33 }
  0x24   :  { %435 = vmatmul.mubr.bf16.vlgmr.msra.gmra.mrb[0].mxu1 %v504_v37  ;;  %602 = vmatpush3.bf16.msra.mxu0 %v660_v39 }
  0x25   :  { %603 = vmatprep.subr.bf16.mxu0 %v668_v36  ;;  %617 = vmatprep.mubr.msk.bf16.mxu0 %vm669_vm0, %v668_v36 }
  0x28   :  { %604 = vmatpush3.bf16.msra.mxu0 %v661_v40 }
  0x29   :  { %605 = vmatprep.subr.bf16.mxu0 %v668_v36 }
  0x2c   :  { %606 = vmatpush3.bf16.msra.mxu0 %v662_v41 }
  0x2d   :  { %607 = vmatprep.subr.bf16.mxu0 %v668_v36 }
  0x30   :  { %608 = vmatpush3.bf16.msra.mxu0 %v663_v42 }
  0x31   :  { %609 = vmatprep.subr.bf16.mxu0 %v668_v36 }
  0x34   :  { %610 = vmatpush3.bf16.msra.mxu0 %v664_v43 }
  0x35   :  { %611 = vmatprep.subr.bf16.mxu0 %v668_v36 }
  0x38   :  { %612 = vmatpush3.bf16.msra.mxu0 %v665_v44 }
  0x39   :  { %613 = vmatprep.subr.bf16.mxu0 %v668_v36 }
  0x3c   :  { %614 = vmatpush3.bf16.msra.mxu0 %v666_v45 }
  0x3d   :  { %615 = vmatprep.subr.bf16.mxu0 %v668_v36 }
  0x40   :  { %616 = vmatpush3.bf16.msra.mxu0 %v667_v46 }
  0x43   :  { %618 = vmatmul.mubr.bf16.vlgmr.msra.gmra.mrb[4].mxu0 %v657_v47 }
  0xf6   :  { %v564_v48 = vpop.f32.mrb[0].mxu0 }
  0xf7   :  { %v586_v49 = vpop.f32.mrb[0].mxu1  ;;  %v565_v50 = vpop.f32.mrb[1].mxu0 }
  0xf8   :  { %v566_v51 = vadd.f32 %v565_v50, %v564_v48  ;;  %v587_v52 = vpop.f32.mrb[1].mxu1  ;;  %v567_v53 = vpop.f32.mrb[2].mxu0 }
  0xf9   :  { %v588_v54 = vadd.f32 %v587_v52, %v586_v49  ;;  %v568_v55 = vpop.f32.mrb[3].mxu0  ;;  %v589_v56 = vpop.f32.mrb[2].mxu1 }
  0xfa   :  { %v590_v57 = vpop.f32.mrb[3].mxu1 }
  0xfb   :  { %v437_v58 = vadd.f32 %v588_v54, %v566_v51 }
 0x116   :  { %v476_v59 = vpop.f32.mrb[4].mxu0 }
 0x117   :  { %v477_v61 = vadd.f32 %v476_v59, %v437_v58  ;;  %v619_v62 = vpop.f32.mrb[5].mxu0 }
 0x118   :  { %v479_v63 = vpop.f32.mrb[6].mxu0 }
 0x119   :  { %v495_v0 = vadd.f32 %v547_v60, %v477_v61  ;;  %v620_v1 = vpop.f32.mrb[7].mxu0 }
 0x11b   :  { %v496_v2 = vmax.f32 %v495_v0, 0.0 }
 0x11d   :  { %497 = vst [vmem:[%s828_s3] sm:$0xff] %v496_v2 }

// kernel: _lambda_.16
= control target key start
LH: loop header
LB: loop body
LE: loop exit
PB: predicated region body
PF: predicated region fallthrough
CT: control target
= control target key end

     0   :  { %v1311_v39 = vmov 0.0   ;;  %vm1312_vm0 = vmmov 0   ;;  %s1635_s1 = inlined_call_operand.vmem [shape: bf16[1152,128], index: 1, kind: input, shape index: {}]   ;;  %s1636_s0 = inlined_call_operand.vmem [shape: bf16[8,1152], index: 0, kind: input, shape index: {}]   ;;  %s1637_s4 = inlined_call_operand.vmem [shape: bf16[128,128], index: 4, kind: input, shape index: {}]   ;;  %s1638_s3 = inlined_call_operand.vmem [shape: bf16[8,128], index: 3, kind: input, shape index: {}]   ;;  %s1639_s5 = inlined_call_operand.vmem [shape: f32[1,128], index: 5, kind: input, shape index: {}, may-alias: {2,5}]   ;;  %s1640_s2 = inlined_call_operand.vmem [shape: f32[1,128], index: 2, kind: input, shape index: {}, may-alias: {2,5}]   ;;  %s1641_s6 = inlined_call_operand.vmem [shape: f32[8,128], index: 6, kind: output, shape index: {}]  }
   0x1   :  { %v1222_v0 = vld [vmem:[%s1635_s1 + $0x40] sm:$0xff]   ;;  %v1226_v4 = vld [vmem:[%s1635_s1 + $0x48] sm:$0xff]   ;;  %v1230_v8 = vld [vmem:[%s1635_s1 + $0x50] sm:$0xff]  }
   0x2   :  { %v1223_v1 = vld [vmem:[%s1635_s1 + $0x140] sm:$0xff]   ;;  %1067 = vmatprep.subr.bf16.mxu1 %v1222_v0  ;;  %v1227_v5 = vld [vmem:[%s1635_s1 + $0x148] sm:$0xff]   ;;  %v1231_v9 = vld [vmem:[%s1635_s1 + $0x150] sm:$0xff]  }
   0x3   :  { %v1224_v2 = vld [vmem:[%s1635_s1] sm:$0xff]   ;;  %1111 = vmatprep.subr.bf16.mxu0 %v1223_v1  ;;  %v1228_v6 = vld [vmem:[%s1635_s1 + $0x8] sm:$0xff]   ;;  %v1232_v10 = vld [vmem:[%s1635_s1 + $0x10] sm:$0xff]  }
   0x4   :  { %v1225_v3 = vld [vmem:[%s1635_s1 + $0x100] sm:$0xff]   ;;  %1068 = vmatpush3.bf16.msra.mxu1 %v1224_v2  ;;  %v1229_v7 = vld [vmem:[%s1635_s1 + $0x108] sm:$0xff]   ;;  %v1233_v11 = vld [vmem:[%s1635_s1 + $0x110] sm:$0xff]  }
   0x5   :  { %1112 = vmatpush3.bf16.msra.mxu0 %v1225_v3  ;;  %1069 = vmatprep.subr.bf16.mxu1 %v1226_v4  ;;  %v1234_v12 = vld [vmem:[%s1635_s1 + $0x58] sm:$0xff]   ;;  %v1238_v16 = vld [vmem:[%s1635_s1 + $0x60] sm:$0xff]   ;;  %v1242_v20 = vld [vmem:[%s1635_s1 + $0x68] sm:$0xff]  }
   0x6   :  { %1113 = vmatprep.subr.bf16.mxu0 %v1227_v5  ;;  %v1235_v13 = vld [vmem:[%s1635_s1 + $0x158] sm:$0xff]   ;;  %v1239_v17 = vld [vmem:[%s1635_s1 + $0x160] sm:$0xff]   ;;  %v1243_v21 = vld [vmem:[%s1635_s1 + $0x168] sm:$0xff]  }
   0x7   :  { %v1236_v14 = vld [vmem:[%s1635_s1 + $0x18] sm:$0xff]   ;;  %v1240_v18 = vld [vmem:[%s1635_s1 + $0x20] sm:$0xff]   ;;  %v1244_v22 = vld [vmem:[%s1635_s1 + $0x28] sm:$0xff]  }
   0x8   :  { %1070 = vmatpush3.bf16.msra.mxu1 %v1228_v6  ;;  %v1237_v15 = vld [vmem:[%s1635_s1 + $0x118] sm:$0xff]   ;;  %v1241_v19 = vld [vmem:[%s1635_s1 + $0x120] sm:$0xff]   ;;  %v1245_v23 = vld [vmem:[%s1635_s1 + $0x128] sm:$0xff]  }
   0x9   :  { %1114 = vmatpush3.bf16.msra.mxu0 %v1229_v7  ;;  %1071 = vmatprep.subr.bf16.mxu1 %v1230_v8  ;;  %v1246_v24 = vld [vmem:[%s1635_s1 + $0x70] sm:$0xff]   ;;  %v1250_v28 = vld [vmem:[%s1635_s1 + $0x78] sm:$0xff]   ;;  %v30_v32 = vld [vmem:[%s1636_s0] sm:$0xff] }
   0xa   :  { %1115 = vmatprep.subr.bf16.mxu0 %v1231_v9  ;;  %v1247_v25 = vld [vmem:[%s1635_s1 + $0x170] sm:$0xff]   ;;  %v1251_v29 = vld [vmem:[%s1635_s1 + $0x178] sm:$0xff]   ;;  %v976_v33 = vcombine.low %v30_v32, %v30_v32  ;;  %v977_v34 = vcombine.high %v30_v32, %v30_v32  ;;  %v1256_v35 = vld [vmem:[%s1635_s1 + $0xc0] sm:$0xff]  }
   0xb   :  { %v1248_v26 = vld [vmem:[%s1635_s1 + $0x30] sm:$0xff]   ;;  %v1252_v30 = vld [vmem:[%s1635_s1 + $0x38] sm:$0xff]   ;;  %v1259_v40 = vld [vmem:[%s1635_s1 + $0x80] sm:$0xff]  }
   0xc   :  { %1072 = vmatpush3.bf16.msra.mxu1 %v1232_v10  ;;  %v1249_v27 = vld [vmem:[%s1635_s1 + $0x130] sm:$0xff]   ;;  %v1253_v31 = vld [vmem:[%s1635_s1 + $0x138] sm:$0xff]   ;;  %675 = vmatprep.mubr.bf16.mxu1 %v977_v34  ;;  %v1260_v41 = vld [vmem:[%s1635_s1 + $0x200] sm:$0xff]  }
   0xd   :  { %1116 = vmatpush3.bf16.msra.mxu0 %v1233_v11  ;;  %1073 = vmatprep.subr.bf16.mxu1 %v1234_v12  ;;  %v32_v36 = vld [vmem:[%s1636_s0 + $0x10] sm:$0xff]  ;;  %v1261_v42 = vld [vmem:[%s1635_s1 + $0xc8] sm:$0xff]   ;;  %v1267_v48 = vld [vmem:[%s1635_s1 + $0xd8] sm:$0xff]  }
   0xe   :  { %1117 = vmatprep.subr.bf16.mxu0 %v1235_v13  ;;  %v980_v37 = vcombine.low %v32_v36, %v32_v36  ;;  %v981_v38 = vcombine.high %v32_v36, %v32_v36  ;;  %v1262_v43 = vld [vmem:[%s1635_s1 + $0x88] sm:$0xff]   ;;  %v1264_v45 = vld [vmem:[%s1635_s1 + $0xd0] sm:$0xff]   ;;  %v1268_v49 = vld [vmem:[%s1635_s1 + $0x98] sm:$0xff]  }
   0xf   :  { %v1263_v44 = vld [vmem:[%s1635_s1 + $0x208] sm:$0xff]   ;;  %v1265_v46 = vld [vmem:[%s1635_s1 + $0x90] sm:$0xff]   ;;  %v1269_v50 = vld [vmem:[%s1635_s1 + $0x218] sm:$0xff]  }
  0x10   :  { %1074 = vmatpush3.bf16.msra.mxu1 %v1236_v14  ;;  %755 = vmatprep.mubr.bf16.mxu0 %v981_v38  ;;  %v1266_v47 = vld [vmem:[%s1635_s1 + $0x210] sm:$0xff]   ;;  %v1270_v51 = vld [vmem:[%s1635_s1 + $0xe0] sm:$0xff]   ;;  %v1273_v54 = vld [vmem:[%s1635_s1 + $0xe8] sm:$0xff]  }
  0x11   :  { %1118 = vmatpush3.bf16.msra.mxu0 %v1237_v15  ;;  %1075 = vmatprep.subr.bf16.mxu1 %v1238_v16  ;;  %v1271_v52 = vld [vmem:[%s1635_s1 + $0xa0] sm:$0xff]   ;;  %v1274_v55 = vld [vmem:[%s1635_s1 + $0xa8] sm:$0xff]   ;;  %v1276_v57 = vld [vmem:[%s1635_s1 + $0xf0] sm:$0xff]  }
  0x12   :  { %1119 = vmatprep.subr.bf16.mxu0 %v1239_v17  ;;  %v1272_v53 = vld [vmem:[%s1635_s1 + $0x220] sm:$0xff]   ;;  %v1275_v56 = vld [vmem:[%s1635_s1 + $0x228] sm:$0xff]   ;;  %v1277_v58 = vld [vmem:[%s1635_s1 + $0xb0] sm:$0xff]  }
  0x13   :  { %v31_v59 = vld [vmem:[%s1636_s0 + $0x8] sm:$0xff]  ;;  %v1278_v60 = vld [vmem:[%s1635_s1 + $0x230] sm:$0xff]   ;;  %v1279_v62 = vld [vmem:[%s1635_s1 + $0xf8] sm:$0xff]  }
  0x14   :  { %1076 = vmatpush3.bf16.msra.mxu1 %v1240_v18  ;;  %v979_v61 = vcombine.high %v31_v59, %v31_v59  ;;  %v1280_v63 = vld [vmem:[%s1635_s1 + $0xb8] sm:$0xff]   ;;  %v1284_v1 = vld [vmem:[%s1635_s1 + $0x1c0] sm:$0xff]   ;;  %v978_v3 = vcombine.low %v31_v59, %v31_v59  ;;  %v1288_v6 = vld [vmem:[%s1635_s1 + $0x1c8] sm:$0xff]  }
  0x15   :  { %1120 = vmatpush3.bf16.msra.mxu0 %v1241_v19  ;;  %1077 = vmatprep.subr.bf16.mxu1 %v1242_v20  ;;  %v1281_v0 = vld [vmem:[%s1635_s1 + $0x238] sm:$0xff]   ;;  %v1285_v2 = vld [vmem:[%s1635_s1 + $0x180] sm:$0xff]   ;;  %v1289_v7 = vld [vmem:[%s1635_s1 + $0x188] sm:$0xff]  }
  0x16   :  { %1121 = vmatprep.subr.bf16.mxu0 %v1243_v21  ;;  %v1286_v4 = vld [vmem:[%s1636_s0 + $0x20] ss:$0 sps:$4 sm:$0xff]   ;;  %v1290_v8 = vld [vmem:[%s1637_s4 + $0x8] sm:$0xff]   ;;  %v1291_v9 = vld [vmem:[%s1635_s1 + $0x1d0] sm:$0xff]  }
  0x17   :  { %v1287_v5 = vld [vmem:[%s1637_s4] sm:$0xff]   ;;  %v1292_v10 = vld [vmem:[%s1635_s1 + $0x190] sm:$0xff]   ;;  %v1294_v12 = vld [vmem:[%s1635_s1 + $0x1d8] sm:$0xff]  }
  0x18   :  { %1078 = vmatpush3.bf16.msra.mxu1 %v1244_v22  ;;  %v1293_v11 = vld [vmem:[%s1637_s4 + $0x10] sm:$0xff]   ;;  %v1295_v13 = vld [vmem:[%s1635_s1 + $0x198] sm:$0xff]   ;;  %v1297_v15 = vld [vmem:[%s1635_s1 + $0x1e0] sm:$0xff]  }
  0x19   :  { %1122 = vmatpush3.bf16.msra.mxu0 %v1245_v23  ;;  %1079 = vmatprep.subr.bf16.mxu1 %v1246_v24  ;;  %v1296_v14 = vld [vmem:[%s1637_s4 + $0x18] sm:$0xff]   ;;  %v1298_v16 = vld [vmem:[%s1635_s1 + $0x1a0] sm:$0xff]   ;;  %v1300_v19 = vld [vmem:[%s1635_s1 + $0x1e8] sm:$0xff]  }
  0x1a   :  { %1123 = vmatprep.subr.bf16.mxu0 %v1247_v25  ;;  %v33_v17 = vld [vmem:[%s1636_s0 + $0x18] sm:$0xff]  ;;  %v1299_v18 = vld [vmem:[%s1637_s4 + $0x20] sm:$0xff]   ;;  %v1301_v21 = vld [vmem:[%s1635_s1 + $0x1a8] sm:$0xff]  }
  0x1b   :  { %v983_v20 = vcombine.high %v33_v17, %v33_v17  ;;  %v1302_v22 = vld [vmem:[%s1637_s4 + $0x28] sm:$0xff]   ;;  %v1303_v23 = vld [vmem:[%s1635_s1 + $0x1f0] sm:$0xff]  }
  0x1c   :  { %1080 = vmatpush3.bf16.msra.mxu1 %v1248_v26  ;;  %v1304_v24 = vld [vmem:[%s1635_s1 + $0x1b0] sm:$0xff]   ;;  %v1306_v26 = vld [vmem:[%s1635_s1 + $0x1f8] sm:$0xff]  }
  0x1d   :  { %1124 = vmatpush3.bf16.msra.mxu0 %v1249_v27  ;;  %1081 = vmatprep.subr.bf16.mxu1 %v1250_v28  ;;  %v1305_v25 = vld [vmem:[%s1637_s4 + $0x30] sm:$0xff]   ;;  %v1307_v27 = vld [vmem:[%s1635_s1 + $0x1b8] sm:$0xff]  }
  0x1e   :  { %1125 = vmatprep.subr.bf16.mxu0 %v1251_v29  ;;  %v1308_v28 = vld [vmem:[%s1637_s4 + $0x38] sm:$0xff]   ;;  %v982_v29 = vcombine.low %v33_v17, %v33_v17 }
  0x20   :  { %1082 = vmatpush3.bf16.msra.mxu1 %v1252_v30  ;;  %v848_v30 = vld [vmem:[%s1638_s3] sm:$0xf] }
  0x21   :  { %1126 = vmatpush3.bf16.msra.mxu0 %v1253_v31  ;;  %1089 = vmatprep.subr.bf16.mxu1 %v1256_v35 }
  0x22   :  { %1173 = vmatprep.subr.bf16.mxu0 %v1311_v39 }
  0x23   :  { %676 = vmatmul.mubr.bf16.vlgmr.msra.gmra.mrb[0].mxu1 %v976_v33 }
  0x24   :  { %1090 = vmatpush3.bf16.msra.mxu1 %v1259_v40  ;;  %756 = vmatmul.mubr.bf16.vlgmr.msra.gmra.mrb[0].mxu0 %v980_v37 }
  0x25   :  { %1174 = vmatpush3.bf16.msra.mxu0 %v1260_v41  ;;  %1091 = vmatprep.subr.bf16.mxu1 %v1261_v42 }
  0x26   :  { %1175 = vmatprep.subr.bf16.mxu0 %v1311_v39  ;;  %1189 = vmatprep.mubr.msk.bf16.mxu0 %vm1312_vm0, %v1311_v39 }
  0x27   :  { %715 = vmatprep.mubr.bf16.mxu1 %v979_v61 }
  0x28   :  { %1092 = vmatpush3.bf16.msra.mxu1 %v1262_v43 }
  0x29   :  { %1176 = vmatpush3.bf16.msra.mxu0 %v1263_v44  ;;  %1093 = vmatprep.subr.bf16.mxu1 %v1264_v45 }
  0x2a   :  { %1177 = vmatprep.subr.bf16.mxu0 %v1311_v39 }
  0x2c   :  { %1094 = vmatpush3.bf16.msra.mxu1 %v1265_v46 }
  0x2d   :  { %1178 = vmatpush3.bf16.msra.mxu0 %v1266_v47  ;;  %1095 = vmatprep.subr.bf16.mxu1 %v1267_v48 }
  0x2e   :  { %1179 = vmatprep.subr.bf16.mxu0 %v1311_v39 }
  0x30   :  { %1096 = vmatpush3.bf16.msra.mxu1 %v1268_v49 }
  0x31   :  { %1180 = vmatpush3.bf16.msra.mxu0 %v1269_v50  ;;  %1097 = vmatprep.subr.bf16.mxu1 %v1270_v51 }
  0x32   :  { %1181 = vmatprep.subr.bf16.mxu0 %v1311_v39 }
  0x34   :  { %1098 = vmatpush3.bf16.msra.mxu1 %v1271_v52 }
  0x35   :  { %1182 = vmatpush3.bf16.msra.mxu0 %v1272_v53  ;;  %1099 = vmatprep.subr.bf16.mxu1 %v1273_v54  ;;  %v1057_v54 = vld [vmem:[%s1639_s5] ss:$0 sm:$0xff] }
  0x36   :  { %1183 = vmatprep.subr.bf16.mxu0 %v1311_v39 }
  0x38   :  { %1100 = vmatpush3.bf16.msra.mxu1 %v1274_v55 }
  0x39   :  { %1184 = vmatpush3.bf16.msra.mxu0 %v1275_v56  ;;  %1101 = vmatprep.subr.bf16.mxu1 %v1276_v57 }
  0x3a   :  { %1185 = vmatprep.subr.bf16.mxu0 %v1311_v39 }
  0x3c   :  { %1102 = vmatpush3.bf16.msra.mxu1 %v1277_v58 }
  0x3d   :  { %1186 = vmatpush3.bf16.msra.mxu0 %v1278_v60  ;;  %1103 = vmatprep.subr.bf16.mxu1 %v1279_v62  ;;  %v1066_v60 = vld [vmem:[%s1640_s2] ss:$0 sm:$0xff] }
  0x3e   :  { %1187 = vmatprep.subr.bf16.mxu0 %v1311_v39 }
  0x40   :  { %1104 = vmatpush3.bf16.msra.mxu1 %v1280_v63 }
  0x41   :  { %1188 = vmatpush3.bf16.msra.mxu0 %v1281_v0  ;;  %1133 = vmatprep.subr.bf16.mxu1 %v1284_v1 }
  0x42   :  { %1193 = vmatprep.subr.bf16.mxu0 %v1311_v39 }
  0x43   :  { %716 = vmatmul.mubr.bf16.vlgmr.msra.gmra.mrb[4].mxu1 %v978_v3 }
  0x44   :  { %1134 = vmatpush3.bf16.msra.mxu1 %v1285_v2  ;;  %1190 = vmatmul.mubr.bf16.vlgmr.msra.gmra.mrb[4].mxu0 %v1286_v4 }
  0x45   :  { %1194 = vmatpush3.bf16.msra.mxu0 %v1287_v5  ;;  %1135 = vmatprep.subr.bf16.mxu1 %v1288_v6 }
  0x46   :  { %1195 = vmatprep.subr.bf16.mxu0 %v1311_v39  ;;  %1209 = vmatprep.mubr.msk.bf16.mxu0 %vm1312_vm0, %v1311_v39 }
  0x47   :  { %795 = vmatprep.mubr.bf16.mxu1 %v983_v20 }
  0x48   :  { %1136 = vmatpush3.bf16.msra.mxu1 %v1289_v7 }
  0x49   :  { %1196 = vmatpush3.bf16.msra.mxu0 %v1290_v8  ;;  %1137 = vmatprep.subr.bf16.mxu1 %v1291_v9 }
  0x4a   :  { %1197 = vmatprep.subr.bf16.mxu0 %v1311_v39 }
  0x4c   :  { %1138 = vmatpush3.bf16.msra.mxu1 %v1292_v10 }
  0x4d   :  { %1198 = vmatpush3.bf16.msra.mxu0 %v1293_v11  ;;  %1139 = vmatprep.subr.bf16.mxu1 %v1294_v12 }
  0x4e   :  { %1199 = vmatprep.subr.bf16.mxu0 %v1311_v39 }
  0x50   :  { %1140 = vmatpush3.bf16.msra.mxu1 %v1295_v13 }
  0x51   :  { %1200 = vmatpush3.bf16.msra.mxu0 %v1296_v14  ;;  %1141 = vmatprep.subr.bf16.mxu1 %v1297_v15 }
  0x52   :  { %1201 = vmatprep.subr.bf16.mxu0 %v1311_v39 }
  0x54   :  { %1142 = vmatpush3.bf16.msra.mxu1 %v1298_v16 }
  0x55   :  { %1202 = vmatpush3.bf16.msra.mxu0 %v1299_v18  ;;  %1143 = vmatprep.subr.bf16.mxu1 %v1300_v19 }
  0x56   :  { %1203 = vmatprep.subr.bf16.mxu0 %v1311_v39 }
  0x58   :  { %1144 = vmatpush3.bf16.msra.mxu1 %v1301_v21 }
  0x59   :  { %1204 = vmatpush3.bf16.msra.mxu0 %v1302_v22  ;;  %1145 = vmatprep.subr.bf16.mxu1 %v1303_v23 }
  0x5a   :  { %1205 = vmatprep.subr.bf16.mxu0 %v1311_v39 }
  0x5c   :  { %1146 = vmatpush3.bf16.msra.mxu1 %v1304_v24 }
  0x5d   :  { %1206 = vmatpush3.bf16.msra.mxu0 %v1305_v25  ;;  %1147 = vmatprep.subr.bf16.mxu1 %v1306_v26 }
  0x5e   :  { %1207 = vmatprep.subr.bf16.mxu0 %v1311_v39 }
  0x60   :  { %1148 = vmatpush3.bf16.msra.mxu1 %v1307_v27 }
  0x61   :  { %1208 = vmatpush3.bf16.msra.mxu0 %v1308_v28 }
  0x63   :  { %796 = vmatmul.mubr.bf16.vlgmr.msra.gmra.mrb[8].mxu1 %v982_v29 }
  0x64   :  { %1210 = vmatmul.mubr.bf16.vlgmr.msra.gmra.mrb[4].mxu0 %v848_v30 }
  0xf6   :  { %v1083_v31 = vpop.f32.mrb[0].mxu1 }
  0xf7   :  { %v1084_v32 = vpop.f32.mrb[1].mxu1  ;;  %v1127_v33 = vpop.f32.mrb[0].mxu0 }
  0xf8   :  { %v1085_v34 = vadd.f32 %v1084_v32, %v1083_v31  ;;  %v1086_v35 = vpop.f32.mrb[2].mxu1  ;;  %v1128_v36 = vpop.f32.mrb[1].mxu0 }
  0xf9   :  { %v1087_v37 = vpop.f32.mrb[3].mxu1  ;;  %v1129_v38 = vadd.f32 %v1128_v36, %v1127_v33  ;;  %v1130_v40 = vpop.f32.mrb[2].mxu0 }
  0xfa   :  { %v1131_v41 = vpop.f32.mrb[3].mxu0 }
 0x116   :  { %v1105_v39 = vpop.f32.mrb[4].mxu1 }
 0x117   :  { %v1106_v42 = vpop.f32.mrb[5].mxu1 }
 0x118   :  { %v1107_v43 = vadd.f32 %v1106_v42, %v1105_v39  ;;  %v1108_v44 = vpop.f32.mrb[6].mxu1 }
 0x119   :  { %v1109_v45 = vpop.f32.mrb[7].mxu1 }
 0x11a   :  { %v718_v46 = vadd.f32 %v1107_v43, %v1085_v34 }
 0x11c   :  { %v758_v47 = vadd.f32 %v1129_v38, %v718_v46 }
 0x136   :  { %v1149_v48 = vpop.f32.mrb[8].mxu1 }
 0x137   :  { %v954_v49 = vpop.f32.mrb[4].mxu0  ;;  %v1150_v50 = vpop.f32.mrb[9].mxu1 }
 0x138   :  { %v1151_v51 = vadd.f32 %v1150_v50, %v1149_v48  ;;  %v1211_v52 = vpop.f32.mrb[5].mxu0  ;;  %v1152_v53 = vpop.f32.mrb[10].mxu1 }
 0x139   :  { %v957_v55 = vpop.f32.mrb[6].mxu0  ;;  %v1153_v56 = vpop.f32.mrb[11].mxu1 }
 0x13a   :  { %v798_v57 = vadd.f32 %v1151_v51, %v758_v47  ;;  %v1212_v58 = vpop.f32.mrb[7].mxu0 }
 0x13c   :  { %v1213_v59 = vadd.f32 %v1057_v54, %v798_v57 }
 0x13e   :  { %v1214_v61 = vadd.f32 %v1213_v59, %v954_v49 }
 0x140   :  { %v1215_v62 = vadd.f32 %v1214_v61, %v1066_v60 }
 0x142   :  { %v970_v63 = vmax.f32 %v1215_v62, 0.0 }
 0x144   :  { %971 = vst [vmem:[%s1641_s6] sm:$0xff] %v970_v63 }

// kernel: _lambda_.17
= control target key start
LH: loop header
LB: loop body
LE: loop exit
PB: predicated region body
PF: predicated region fallthrough
CT: control target
= control target key end

     0   :  { %s2028_s1 = inlined_call_operand.vmem [shape: bf16[1152,256], index: 1, kind: input, shape index: {}]   ;;  %s2029_s0 = inlined_call_operand.vmem [shape: bf16[8,1152], index: 0, kind: input, shape index: {}]   ;;  %s2030_s2 = inlined_call_operand.vmem [shape: f32[1,256], index: 2, kind: input, shape index: {}]   ;;  %s2031_s3 = inlined_call_operand.vmem [shape: f32[8,256], index: 3, kind: output, shape index: {}]  }
   0x1   :  { %v1314_v0 = vld [vmem:[%s2028_s1 + $0x4] ss:$8 sps:$4 sm:$0xff]   ;;  %v1318_v2 = vld [vmem:[%s2028_s1] ss:$8 sps:$4 sm:$0xff]   ;;  %v1320_v4 = vld [vmem:[%s2028_s1 + $0x14] ss:$8 sps:$4 sm:$0xff]  }
   0x2   :  { %v1316_v1 = vld [vmem:[%s2028_s1 + $0x104] ss:$8 sps:$4 sm:$0xff]   ;;  %924 = vmatprep.subr.bf16.mxu0 %v1314_v0  ;;  %v1319_v3 = vld [vmem:[%s2028_s1 + $0x100] ss:$8 sps:$4 sm:$0xff]   ;;  %v1322_v5 = vld [vmem:[%s2028_s1 + $0x114] ss:$8 sps:$4 sm:$0xff]  }
   0x3   :  { %965 = vmatprep.subr.bf16.mxu1 %v1316_v1  ;;  %925 = vmatpush1.bf16.msra.mxu0 %v1318_v2  ;;  %v1324_v6 = vld [vmem:[%s2028_s1 + $0x10] ss:$8 sps:$4 sm:$0xff]   ;;  %v1326_v8 = vld [vmem:[%s2028_s1 + $0x24] ss:$8 sps:$4 sm:$0xff]   ;;  %v1330_v10 = vld [vmem:[%s2028_s1 + $0x20] ss:$8 sps:$4 sm:$0xff]  }
   0x4   :  { %966 = vmatpush1.bf16.msra.mxu1 %v1319_v3  ;;  %926 = vmatprep.subr.bf16.mxu0 %v1320_v4  ;;  %v1325_v7 = vld [vmem:[%s2028_s1 + $0x110] ss:$8 sps:$4 sm:$0xff]   ;;  %v1328_v9 = vld [vmem:[%s2028_s1 + $0x124] ss:$8 sps:$4 sm:$0xff]   ;;  %v1331_v11 = vld [vmem:[%s2028_s1 + $0x120] ss:$8 sps:$4 sm:$0xff]  }
   0x5   :  { %967 = vmatprep.subr.bf16.mxu1 %v1322_v5  ;;  %v1332_v12 = vld [vmem:[%s2028_s1 + $0x34] ss:$8 sps:$4 sm:$0xff]   ;;  %v1336_v14 = vld [vmem:[%s2028_s1 + $0x30] ss:$8 sps:$4 sm:$0xff]   ;;  %v1338_v16 = vld [vmem:[%s2028_s1 + $0x44] ss:$8 sps:$4 sm:$0xff]  }
   0x6   :  { %v1334_v13 = vld [vmem:[%s2028_s1 + $0x134] ss:$8 sps:$4 sm:$0xff]   ;;  %v1337_v15 = vld [vmem:[%s2028_s1 + $0x130] ss:$8 sps:$4 sm:$0xff]   ;;  %v1340_v17 = vld [vmem:[%s2028_s1 + $0x144] ss:$8 sps:$4 sm:$0xff]  }
   0x7   :  { %927 = vmatpush1.bf16.msra.mxu0 %v1324_v6  ;;  %v1342_v18 = vld [vmem:[%s2028_s1 + $0x40] ss:$8 sps:$4 sm:$0xff]   ;;  %v1344_v20 = vld [vmem:[%s2028_s1 + $0x54] ss:$8 sps:$4 sm:$0xff]   ;;  %v1348_v22 = vld [vmem:[%s2028_s1 + $0x50] ss:$8 sps:$4 sm:$0xff]  }
   0x8   :  { %968 = vmatpush1.bf16.msra.mxu1 %v1325_v7  ;;  %928 = vmatprep.subr.bf16.mxu0 %v1326_v8  ;;  %v1343_v19 = vld [vmem:[%s2028_s1 + $0x140] ss:$8 sps:$4 sm:$0xff]   ;;  %v1346_v21 = vld [vmem:[%s2028_s1 + $0x154] ss:$8 sps:$4 sm:$0xff]   ;;  %v1349_v23 = vld [vmem:[%s2028_s1 + $0x150] ss:$8 sps:$4 sm:$0xff]  }
   0x9   :  { %969 = vmatprep.subr.bf16.mxu1 %v1328_v9  ;;  %v1350_v24 = vld [vmem:[%s2028_s1 + $0x64] ss:$8 sps:$4 sm:$0xff]   ;;  %v1354_v26 = vld [vmem:[%s2028_s1 + $0x60] ss:$8 sps:$4 sm:$0xff]   ;;  %v1356_v28 = vld [vmem:[%s2028_s1 + $0x74] ss:$8 sps:$4 sm:$0xff]  }
   0xa   :  { %v1352_v25 = vld [vmem:[%s2028_s1 + $0x164] ss:$8 sps:$4 sm:$0xff]   ;;  %v1355_v27 = vld [vmem:[%s2028_s1 + $0x160] ss:$8 sps:$4 sm:$0xff]   ;;  %v1358_v29 = vld [vmem:[%s2028_s1 + $0x174] ss:$8 sps:$4 sm:$0xff]  }
   0xb   :  { %929 = vmatpush1.bf16.msra.mxu0 %v1330_v10  ;;  %v1360_v30 = vld [vmem:[%s2028_s1 + $0x70] ss:$8 sps:$4 sm:$0xff]   ;;  %v1362_v32 = vld [vmem:[%s2028_s1 + $0x84] ss:$8 sps:$4 sm:$0xff]   ;;  %v1366_v34 = vld [vmem:[%s2028_s1 + $0x80] ss:$8 sps:$4 sm:$0xff]  }
   0xc   :  { %970 = vmatpush1.bf16.msra.mxu1 %v1331_v11  ;;  %930 = vmatprep.subr.bf16.mxu0 %v1332_v12  ;;  %v1361_v31 = vld [vmem:[%s2028_s1 + $0x170] ss:$8 sps:$4 sm:$0xff]   ;;  %v1364_v33 = vld [vmem:[%s2028_s1 + $0x184] ss:$8 sps:$4 sm:$0xff]   ;;  %v1367_v35 = vld [vmem:[%s2028_s1 + $0x180] ss:$8 sps:$4 sm:$0xff]  }
   0xd   :  { %971 = vmatprep.subr.bf16.mxu1 %v1334_v13  ;;  %v1368_v36 = vld [vmem:[%s2028_s1 + $0x94] ss:$8 sps:$4 sm:$0xff]   ;;  %v1372_v38 = vld [vmem:[%s2028_s1 + $0x90] ss:$8 sps:$4 sm:$0xff]   ;;  %v1374_v40 = vld [vmem:[%s2028_s1 + $0xa4] ss:$8 sps:$4 sm:$0xff]  }
   0xe   :  { %v1370_v37 = vld [vmem:[%s2028_s1 + $0x194] ss:$8 sps:$4 sm:$0xff]   ;;  %v1373_v39 = vld [vmem:[%s2028_s1 + $0x190] ss:$8 sps:$4 sm:$0xff]   ;;  %v1376_v41 = vld [vmem:[%s2028_s1 + $0x1a4] ss:$8 sps:$4 sm:$0xff]  }
   0xf   :  { %931 = vmatpush1.bf16.msra.mxu0 %v1336_v14  ;;  %v1378_v42 = vld [vmem:[%s2028_s1 + $0xa0] ss:$8 sps:$4 sm:$0xff]   ;;  %v1380_v44 = vld [vmem:[%s2028_s1 + $0xb4] ss:$8 sps:$4 sm:$0xff]   ;;  %v1384_v49 = vld [vmem:[%s2028_s1 + $0xb0] ss:$8 sps:$4 sm:$0xff]  }
  0x10   :  { %972 = vmatpush1.bf16.msra.mxu1 %v1337_v15  ;;  %932 = vmatprep.subr.bf16.mxu0 %v1338_v16  ;;  %v1379_v43 = vld [vmem:[%s2028_s1 + $0x1a0] ss:$8 sps:$4 sm:$0xff]   ;;  %v1382_v45 = vld [vmem:[%s2028_s1 + $0x1b4] ss:$8 sps:$4 sm:$0xff]   ;;  %v1385_v50 = vld [vmem:[%s2028_s1 + $0x1b0] ss:$8 sps:$4 sm:$0xff]  }
  0x11   :  { %973 = vmatprep.subr.bf16.mxu1 %v1340_v17  ;;  %v23_v46 = vld [vmem:[%s2029_s0] sm:$0xff]  ;;  %v24_v48 = vld [vmem:[%s2029_s0 + $0x8] sm:$0xff]  ;;  %v1392_v56 = vld [vmem:[%s2028_s1 + $0xd4] ss:$8 sps:$4 sm:$0xff]  }
  0x12   :  { %v1161_v47 = vcombine.high %v23_v46, %v23_v46  ;;  %v1163_v51 = vcombine.high %v24_v48, %v24_v48  ;;  %v1386_v52 = vld [vmem:[%s2028_s1 + $0xc4] ss:$8 sps:$4 sm:$0xff]   ;;  %v1390_v54 = vld [vmem:[%s2028_s1 + $0xc0] ss:$8 sps:$4 sm:$0xff]   ;;  %v1394_v57 = vld [vmem:[%s2028_s1 + $0x1d4] ss:$8 sps:$4 sm:$0xff]   ;;  %v1160_v6 = vcombine.low %v23_v46, %v23_v46  ;;  %v1162_v7 = vcombine.low %v24_v48, %v24_v48 }
  0x13   :  { %933 = vmatpush1.bf16.msra.mxu0 %v1342_v18  ;;  %v1388_v53 = vld [vmem:[%s2028_s1 + $0x1c4] ss:$8 sps:$4 sm:$0xff]   ;;  %v1391_v55 = vld [vmem:[%s2028_s1 + $0x1c0] ss:$8 sps:$4 sm:$0xff]   ;;  %v1396_v58 = vld [vmem:[%s2028_s1 + $0xd0] ss:$8 sps:$4 sm:$0xff]  }
  0x14   :  { %974 = vmatpush1.bf16.msra.mxu1 %v1343_v19  ;;  %934 = vmatprep.subr.bf16.mxu0 %v1344_v20  ;;  %v1397_v59 = vld [vmem:[%s2028_s1 + $0x1d0] ss:$8 sps:$4 sm:$0xff]   ;;  %v1398_v60 = vld [vmem:[%s2028_s1 + $0xe4] ss:$8 sps:$4 sm:$0xff]   ;;  %v1402_v62 = vld [vmem:[%s2028_s1 + $0xe0] ss:$8 sps:$4 sm:$0xff]  }
  0x15   :  { %975 = vmatprep.subr.bf16.mxu1 %v1346_v21  ;;  %956 = vmatprep.mubr.bf16.mxu0 %v1161_v47  ;;  %v1400_v61 = vld [vmem:[%s2028_s1 + $0x1e4] ss:$8 sps:$4 sm:$0xff]   ;;  %v1403_v63 = vld [vmem:[%s2028_s1 + $0x1e0] ss:$8 sps:$4 sm:$0xff]   ;;  %v1404_v0 = vld [vmem:[%s2028_s1 + $0xf4] ss:$8 sps:$4 sm:$0xff]  }
  0x16   :  { %997 = vmatprep.mubr.bf16.mxu1 %v1163_v51  ;;  %v1406_v1 = vld [vmem:[%s2028_s1 + $0x1f4] ss:$8 sps:$4 sm:$0xff]   ;;  %v1408_v2 = vld [vmem:[%s2028_s1 + $0xf0] ss:$8 sps:$4 sm:$0xff]   ;;  %v1416_v4 = vld [vmem:[%s2028_s1 + $0x204] ss:$8 sps:$4 sm:$0xff]  }
  0x17   :  { %935 = vmatpush1.bf16.msra.mxu0 %v1348_v22  ;;  %v1409_v3 = vld [vmem:[%s2028_s1 + $0x1f0] ss:$8 sps:$4 sm:$0xff]   ;;  %v1419_v5 = vld [vmem:[%s2028_s1 + $0x304] ss:$8 sps:$4 sm:$0xff]   ;;  %v1414_v8 = vld [vmem:[%s2028_s1 + $0x200] ss:$8 sps:$4 sm:$0xff]  }
  0x18   :  { %976 = vmatpush1.bf16.msra.mxu1 %v1349_v23  ;;  %936 = vmatprep.subr.bf16.mxu0 %v1350_v24  ;;  %v1417_v9 = vld [vmem:[%s2028_s1 + $0x300] ss:$8 sps:$4 sm:$0xff]   ;;  %v1422_v10 = vld [vmem:[%s2028_s1 + $0x214] ss:$8 sps:$4 sm:$0xff]   ;;  %v1420_v12 = vld [vmem:[%s2028_s1 + $0x210] ss:$8 sps:$4 sm:$0xff]  }
  0x19   :  { %977 = vmatprep.subr.bf16.mxu1 %v1352_v25  ;;  %v1425_v11 = vld [vmem:[%s2028_s1 + $0x314] ss:$8 sps:$4 sm:$0xff]   ;;  %v1423_v13 = vld [vmem:[%s2028_s1 + $0x310] ss:$8 sps:$4 sm:$0xff]   ;;  %v1428_v14 = vld [vmem:[%s2028_s1 + $0x224] ss:$8 sps:$4 sm:$0xff]  }
  0x1a   :  { %v1431_v15 = vld [vmem:[%s2028_s1 + $0x324] ss:$8 sps:$4 sm:$0xff]   ;;  %v1426_v16 = vld [vmem:[%s2028_s1 + $0x220] ss:$8 sps:$4 sm:$0xff]   ;;  %v1434_v18 = vld [vmem:[%s2028_s1 + $0x234] ss:$8 sps:$4 sm:$0xff]  }
  0x1b   :  { %937 = vmatpush1.bf16.msra.mxu0 %v1354_v26  ;;  %v1429_v17 = vld [vmem:[%s2028_s1 + $0x320] ss:$8 sps:$4 sm:$0xff]   ;;  %v1437_v19 = vld [vmem:[%s2028_s1 + $0x334] ss:$8 sps:$4 sm:$0xff]   ;;  %v1432_v20 = vld [vmem:[%s2028_s1 + $0x230] ss:$8 sps:$4 sm:$0xff]  }
  0x1c   :  { %978 = vmatpush1.bf16.msra.mxu1 %v1355_v27  ;;  %938 = vmatprep.subr.bf16.mxu0 %v1356_v28  ;;  %v1435_v21 = vld [vmem:[%s2028_s1 + $0x330] ss:$8 sps:$4 sm:$0xff]   ;;  %v1440_v22 = vld [vmem:[%s2028_s1 + $0x244] ss:$8 sps:$4 sm:$0xff]   ;;  %v1438_v24 = vld [vmem:[%s2028_s1 + $0x240] ss:$8 sps:$4 sm:$0xff]  }
  0x1d   :  { %979 = vmatprep.subr.bf16.mxu1 %v1358_v29  ;;  %v1443_v23 = vld [vmem:[%s2028_s1 + $0x344] ss:$8 sps:$4 sm:$0xff]   ;;  %v1441_v25 = vld [vmem:[%s2028_s1 + $0x340] ss:$8 sps:$4 sm:$0xff]   ;;  %v1446_v26 = vld [vmem:[%s2028_s1 + $0x254] ss:$8 sps:$4 sm:$0xff]  }
  0x1e   :  { %v1449_v27 = vld [vmem:[%s2028_s1 + $0x354] ss:$8 sps:$4 sm:$0xff]   ;;  %v1444_v28 = vld [vmem:[%s2028_s1 + $0x250] ss:$8 sps:$4 sm:$0xff]   ;;  %v1479_v51 = vld [vmem:[%s2028_s1 + $0x3a4] ss:$8 sps:$4 sm:$0xff]  }
  0x1f   :  { %939 = vmatpush1.bf16.msra.mxu0 %v1360_v30  ;;  %v1447_v29 = vld [vmem:[%s2028_s1 + $0x350] ss:$8 sps:$4 sm:$0xff]   ;;  %v1452_v30 = vld [vmem:[%s2028_s1 + $0x264] ss:$8 sps:$4 sm:$0xff]   ;;  %v1470_v46 = vld [vmem:[%s2028_s1 + $0x294] ss:$8 sps:$4 sm:$0xff]  }
  0x20   :  { %980 = vmatpush1.bf16.msra.mxu1 %v1361_v31  ;;  %940 = vmatprep.subr.bf16.mxu0 %v1362_v32  ;;  %v1455_v31 = vld [vmem:[%s2028_s1 + $0x364] ss:$8 sps:$4 sm:$0xff]   ;;  %v1839_v32 = vld [vmem:[%s2029_s0 + $0x10] sm:$0xff] }
  0x21   :  { %981 = vmatprep.subr.bf16.mxu1 %v1364_v33  ;;  %v1450_v33 = vld [vmem:[%s2028_s1 + $0x260] ss:$8 sps:$4 sm:$0xff]   ;;  %v1473_v47 = vld [vmem:[%s2028_s1 + $0x394] ss:$8 sps:$4 sm:$0xff]   ;;  %v1468_v48 = vld [vmem:[%s2028_s1 + $0x290] ss:$8 sps:$4 sm:$0xff]  }
  0x23   :  { %941 = vmatpush1.bf16.msra.mxu0 %v1366_v34  ;;  %v1453_v34 = vld [vmem:[%s2028_s1 + $0x360] ss:$8 sps:$4 sm:$0xff]  }
  0x24   :  { %982 = vmatpush1.bf16.msra.mxu1 %v1367_v35  ;;  %942 = vmatprep.subr.bf16.mxu0 %v1368_v36  ;;  %v1165_v35 = vcombine.high %v1839_v32, %v1839_v32  ;;  %v1852_v36 = vld [vmem:[%s2029_s0 + $0x18] sm:$0xff] }
  0x25   :  { %983 = vmatprep.subr.bf16.mxu1 %v1370_v37  ;;  %v1458_v37 = vld [vmem:[%s2028_s1 + $0x274] ss:$8 sps:$4 sm:$0xff]  }
  0x27   :  { %943 = vmatpush1.bf16.msra.mxu0 %v1372_v38  ;;  %v1167_v38 = vcombine.high %v1852_v36, %v1852_v36 }
  0x28   :  { %984 = vmatpush1.bf16.msra.mxu1 %v1373_v39  ;;  %944 = vmatprep.subr.bf16.mxu0 %v1374_v40  ;;  %v1461_v39 = vld [vmem:[%s2028_s1 + $0x374] ss:$8 sps:$4 sm:$0xff]   ;;  %v1456_v40 = vld [vmem:[%s2028_s1 + $0x270] ss:$8 sps:$4 sm:$0xff]  }
  0x29   :  { %985 = vmatprep.subr.bf16.mxu1 %v1376_v41  ;;  %v1459_v41 = vld [vmem:[%s2028_s1 + $0x370] ss:$8 sps:$4 sm:$0xff]  }
  0x2b   :  { %945 = vmatpush1.bf16.msra.mxu0 %v1378_v42  ;;  %v1464_v42 = vld [vmem:[%s2028_s1 + $0x284] ss:$8 sps:$4 sm:$0xff]  }
  0x2c   :  { %986 = vmatpush1.bf16.msra.mxu1 %v1379_v43  ;;  %946 = vmatprep.subr.bf16.mxu0 %v1380_v44  ;;  %v1467_v43 = vld [vmem:[%s2028_s1 + $0x384] ss:$8 sps:$4 sm:$0xff]   ;;  %v1462_v44 = vld [vmem:[%s2028_s1 + $0x280] ss:$8 sps:$4 sm:$0xff]  }
  0x2d   :  { %987 = vmatprep.subr.bf16.mxu1 %v1382_v45  ;;  %v1465_v45 = vld [vmem:[%s2028_s1 + $0x380] ss:$8 sps:$4 sm:$0xff]  }
  0x2f   :  { %947 = vmatpush1.bf16.msra.mxu0 %v1384_v49  ;;  %v1471_v49 = vld [vmem:[%s2028_s1 + $0x390] ss:$8 sps:$4 sm:$0xff]  }
  0x30   :  { %988 = vmatpush1.bf16.msra.mxu1 %v1385_v50  ;;  %948 = vmatprep.subr.bf16.mxu0 %v1386_v52  ;;  %v1476_v50 = vld [vmem:[%s2028_s1 + $0x2a4] ss:$8 sps:$4 sm:$0xff]   ;;  %v1474_v52 = vld [vmem:[%s2028_s1 + $0x2a0] ss:$8 sps:$4 sm:$0xff]  }
  0x31   :  { %989 = vmatprep.subr.bf16.mxu1 %v1388_v53  ;;  %v1477_v53 = vld [vmem:[%s2028_s1 + $0x3a0] ss:$8 sps:$4 sm:$0xff]  }
  0x33   :  { %949 = vmatpush1.bf16.msra.mxu0 %v1390_v54  ;;  %v1482_v54 = vld [vmem:[%s2028_s1 + $0x2b4] ss:$8 sps:$4 sm:$0xff]  }
  0x34   :  { %990 = vmatpush1.bf16.msra.mxu1 %v1391_v55  ;;  %950 = vmatprep.subr.bf16.mxu0 %v1392_v56  ;;  %v1485_v55 = vld [vmem:[%s2028_s1 + $0x3b4] ss:$8 sps:$4 sm:$0xff]   ;;  %v1480_v56 = vld [vmem:[%s2028_s1 + $0x2b0] ss:$8 sps:$4 sm:$0xff]  }
  0x35   :  { %991 = vmatprep.subr.bf16.mxu1 %v1394_v57  ;;  %v1483_v57 = vld [vmem:[%s2028_s1 + $0x3b0] ss:$8 sps:$4 sm:$0xff]  }
  0x37   :  { %951 = vmatpush1.bf16.msra.mxu0 %v1396_v58  ;;  %v1488_v58 = vld [vmem:[%s2028_s1 + $0x2c4] ss:$8 sps:$4 sm:$0xff]  }
  0x38   :  { %992 = vmatpush1.bf16.msra.mxu1 %v1397_v59  ;;  %952 = vmatprep.subr.bf16.mxu0 %v1398_v60  ;;  %v1491_v59 = vld [vmem:[%s2028_s1 + $0x3c4] ss:$8 sps:$4 sm:$0xff]   ;;  %v1486_v60 = vld [vmem:[%s2028_s1 + $0x2c0] ss:$8 sps:$4 sm:$0xff]  }
  0x39   :  { %993 = vmatprep.subr.bf16.mxu1 %v1400_v61  ;;  %v1489_v61 = vld [vmem:[%s2028_s1 + $0x3c0] ss:$8 sps:$4 sm:$0xff]  }
  0x3b   :  { %953 = vmatpush1.bf16.msra.mxu0 %v1402_v62  ;;  %v1494_v62 = vld [vmem:[%s2028_s1 + $0x2d4] ss:$8 sps:$4 sm:$0xff]  }
  0x3c   :  { %994 = vmatpush1.bf16.msra.mxu1 %v1403_v63  ;;  %954 = vmatprep.subr.bf16.mxu0 %v1404_v0  ;;  %v1497_v63 = vld [vmem:[%s2028_s1 + $0x3d4] ss:$8 sps:$4 sm:$0xff]   ;;  %v1492_v0 = vld [vmem:[%s2028_s1 + $0x2d0] ss:$8 sps:$4 sm:$0xff]  }
  0x3d   :  { %995 = vmatprep.subr.bf16.mxu1 %v1406_v1  ;;  %v1495_v1 = vld [vmem:[%s2028_s1 + $0x3d0] ss:$8 sps:$4 sm:$0xff]  }
  0x3f   :  { %955 = vmatpush1.bf16.msra.mxu0 %v1408_v2  ;;  %v1500_v2 = vld [vmem:[%s2028_s1 + $0x2e4] ss:$8 sps:$4 sm:$0xff]  }
  0x40   :  { %996 = vmatpush1.bf16.msra.mxu1 %v1409_v3  ;;  %1006 = vmatprep.subr.bf16.mxu0 %v1416_v4  ;;  %v1503_v3 = vld [vmem:[%s2028_s1 + $0x3e4] ss:$8 sps:$4 sm:$0xff]   ;;  %v1498_v4 = vld [vmem:[%s2028_s1 + $0x2e0] ss:$8 sps:$4 sm:$0xff]  }
  0x41   :  { %1047 = vmatprep.subr.bf16.mxu1 %v1419_v5  ;;  %v1501_v5 = vld [vmem:[%s2028_s1 + $0x3e0] ss:$8 sps:$4 sm:$0xff]  }
  0x42   :  { %957 = vmatmul.mubr.bf16.vlgmr.msra.gmra.mrb[0].mxu0 %v1160_v6  ;;  %v1506_v6 = vld [vmem:[%s2028_s1 + $0x2f4] ss:$8 sps:$4 sm:$0xff]  }
  0x43   :  { %998 = vmatmul.mubr.bf16.vlgmr.msra.gmra.mrb[0].mxu1 %v1162_v7  ;;  %1007 = vmatpush1.bf16.msra.mxu0 %v1414_v8  ;;  %v1509_v7 = vld [vmem:[%s2028_s1 + $0x3f4] ss:$8 sps:$4 sm:$0xff]   ;;  %v1504_v8 = vld [vmem:[%s2028_s1 + $0x2f0] ss:$8 sps:$4 sm:$0xff]  }
  0x44   :  { %1048 = vmatpush1.bf16.msra.mxu1 %v1417_v9  ;;  %1008 = vmatprep.subr.bf16.mxu0 %v1422_v10  ;;  %v1507_v9 = vld [vmem:[%s2028_s1 + $0x3f0] ss:$8 sps:$4 sm:$0xff]   ;;  %v1514_v10 = vld [vmem:[%s2028_s1 + $0x404] ss:$8 sps:$4 sm:$0xff]  }
  0x45   :  { %1049 = vmatprep.subr.bf16.mxu1 %v1425_v11  ;;  %1038 = vmatprep.mubr.bf16.mxu0 %v1165_v35  ;;  %v1164_v11 = vcombine.low %v1839_v32, %v1839_v32 }
  0x46   :  { %1079 = vmatprep.mubr.bf16.mxu1 %v1167_v38 }
  0x47   :  { %1009 = vmatpush1.bf16.msra.mxu0 %v1420_v12  ;;  %v1166_v12 = vcombine.low %v1852_v36, %v1852_v36 }
  0x48   :  { %1050 = vmatpush1.bf16.msra.mxu1 %v1423_v13  ;;  %1010 = vmatprep.subr.bf16.mxu0 %v1428_v14  ;;  %v1512_v13 = vld [vmem:[%s2028_s1 + $0x400] ss:$8 sps:$4 sm:$0xff]   ;;  %v1519_v14 = vld [vmem:[%s2028_s1 + $0x414] ss:$8 sps:$4 sm:$0xff]  }
  0x49   :  { %1051 = vmatprep.subr.bf16.mxu1 %v1431_v15  ;;  %v1517_v15 = vld [vmem:[%s2028_s1 + $0x410] ss:$8 sps:$4 sm:$0xff]  }
  0x4b   :  { %1011 = vmatpush1.bf16.msra.mxu0 %v1426_v16  ;;  %v1539_v16 = vmov 0  }
  0x4c   :  { %1052 = vmatpush1.bf16.msra.mxu1 %v1429_v17  ;;  %1012 = vmatprep.subr.bf16.mxu0 %v1434_v18  ;;  %v1522_v17 = vld [vmem:[%s2028_s1 + $0x424] ss:$8 sps:$4 sm:$0xff]   ;;  %v1520_v18 = vld [vmem:[%s2028_s1 + $0x420] ss:$8 sps:$4 sm:$0xff]  }
  0x4d   :  { %1053 = vmatprep.subr.bf16.mxu1 %v1437_v19  ;;  %v1525_v19 = vld [vmem:[%s2028_s1 + $0x434] ss:$8 sps:$4 sm:$0xff]  }
  0x4f   :  { %1013 = vmatpush1.bf16.msra.mxu0 %v1432_v20  ;;  %v1523_v20 = vld [vmem:[%s2028_s1 + $0x430] ss:$8 sps:$4 sm:$0xff]  }
  0x50   :  { %1054 = vmatpush1.bf16.msra.mxu1 %v1435_v21  ;;  %1014 = vmatprep.subr.bf16.mxu0 %v1440_v22  ;;  %v1528_v21 = vld [vmem:[%s2028_s1 + $0x444] ss:$8 sps:$4 sm:$0xff]   ;;  %v1526_v22 = vld [vmem:[%s2028_s1 + $0x440] ss:$8 sps:$4 sm:$0xff]  }
  0x51   :  { %1055 = vmatprep.subr.bf16.mxu1 %v1443_v23  ;;  %v1531_v23 = vld [vmem:[%s2028_s1 + $0x454] ss:$8 sps:$4 sm:$0xff]  }
  0x53   :  { %1015 = vmatpush1.bf16.msra.mxu0 %v1438_v24  ;;  %v1529_v24 = vld [vmem:[%s2028_s1 + $0x450] ss:$8 sps:$4 sm:$0xff]  }
  0x54   :  { %1056 = vmatpush1.bf16.msra.mxu1 %v1441_v25  ;;  %1016 = vmatprep.subr.bf16.mxu0 %v1446_v26  ;;  %v1534_v25 = vld [vmem:[%s2028_s1 + $0x464] ss:$8 sps:$4 sm:$0xff]   ;;  %v1532_v26 = vld [vmem:[%s2028_s1 + $0x460] ss:$8 sps:$4 sm:$0xff]  }
  0x55   :  { %1057 = vmatprep.subr.bf16.mxu1 %v1449_v27  ;;  %v1537_v27 = vld [vmem:[%s2028_s1 + $0x474] ss:$8 sps:$4 sm:$0xff]  }
  0x57   :  { %1017 = vmatpush1.bf16.msra.mxu0 %v1444_v28  ;;  %v1535_v28 = vld [vmem:[%s2028_s1 + $0x470] ss:$8 sps:$4 sm:$0xff]  }
  0x58   :  { %1058 = vmatpush1.bf16.msra.mxu1 %v1447_v29  ;;  %1018 = vmatprep.subr.bf16.mxu0 %v1452_v30  ;;  %v1538_v29 = vld [vmem:[%s2029_s0 + $0x20] ss:$0 sps:$4 sm:$0xff]  }
  0x59   :  { %1059 = vmatprep.subr.bf16.mxu1 %v1455_v31 }
  0x5b   :  { %1019 = vmatpush1.bf16.msra.mxu0 %v1450_v33 }
  0x5c   :  { %1060 = vmatpush1.bf16.msra.mxu1 %v1453_v34  ;;  %1020 = vmatprep.subr.bf16.mxu0 %v1458_v37 }
  0x5d   :  { %1061 = vmatprep.subr.bf16.mxu1 %v1461_v39 }
  0x5f   :  { %1021 = vmatpush1.bf16.msra.mxu0 %v1456_v40 }
  0x60   :  { %1062 = vmatpush1.bf16.msra.mxu1 %v1459_v41  ;;  %1022 = vmatprep.subr.bf16.mxu0 %v1464_v42 }
  0x61   :  { %1063 = vmatprep.subr.bf16.mxu1 %v1467_v43 }
  0x63   :  { %1023 = vmatpush1.bf16.msra.mxu0 %v1462_v44 }
  0x64   :  { %1064 = vmatpush1.bf16.msra.mxu1 %v1465_v45  ;;  %1024 = vmatprep.subr.bf16.mxu0 %v1470_v46 }
  0x65   :  { %1065 = vmatprep.subr.bf16.mxu1 %v1473_v47 }
  0x67   :  { %1025 = vmatpush1.bf16.msra.mxu0 %v1468_v48 }
  0x68   :  { %1066 = vmatpush1.bf16.msra.mxu1 %v1471_v49  ;;  %1026 = vmatprep.subr.bf16.mxu0 %v1476_v50 }
  0x69   :  { %1067 = vmatprep.subr.bf16.mxu1 %v1479_v51 }
  0x6b   :  { %1027 = vmatpush1.bf16.msra.mxu0 %v1474_v52  ;;  %v1140_v52 = vlaneseq }
  0x6c   :  { %1068 = vmatpush1.bf16.msra.mxu1 %v1477_v53  ;;  %1028 = vmatprep.subr.bf16.mxu0 %v1482_v54 }
  0x6d   :  { %1069 = vmatprep.subr.bf16.mxu1 %v1485_v55  ;;  %v1141_v53 = vshrl.u32 %v1140_v52, 7  ;;  %v1138_v55 = vld [vmem:[%s2030_s2] sm:$0x3] }
  0x6f   :  { %1029 = vmatpush1.bf16.msra.mxu0 %v1480_v56  ;;  %v1142_v54 = vsub.s32 0, %v1141_v53  ;;  %v1146_v56 = vsub.s32 1, %v1141_v53 }
  0x70   :  { %1070 = vmatpush1.bf16.msra.mxu1 %v1483_v57  ;;  %1030 = vmatprep.subr.bf16.mxu0 %v1488_v58 }
  0x71   :  { %1071 = vmatprep.subr.bf16.mxu1 %v1491_v59  ;;  %v1143_v57 = vrot.slane %v1138_v55, %v1142_v54  ;;  %v1147_v59 = vrot.slane %v1138_v55, %v1146_v56 }
  0x73   :  { %1031 = vmatpush1.bf16.msra.mxu0 %v1486_v60 }
  0x74   :  { %1072 = vmatpush1.bf16.msra.mxu1 %v1489_v61  ;;  %1032 = vmatprep.subr.bf16.mxu0 %v1494_v62 }
  0x75   :  { %1073 = vmatprep.subr.bf16.mxu1 %v1497_v63 }
  0x77   :  { %1033 = vmatpush1.bf16.msra.mxu0 %v1492_v0 }
  0x78   :  { %1074 = vmatpush1.bf16.msra.mxu1 %v1495_v1  ;;  %1034 = vmatprep.subr.bf16.mxu0 %v1500_v2 }
  0x79   :  { %1075 = vmatprep.subr.bf16.mxu1 %v1503_v3 }
  0x7b   :  { %1035 = vmatpush1.bf16.msra.mxu0 %v1498_v4 }
  0x7c   :  { %1076 = vmatpush1.bf16.msra.mxu1 %v1501_v5  ;;  %1036 = vmatprep.subr.bf16.mxu0 %v1506_v6 }
  0x7d   :  { %1077 = vmatprep.subr.bf16.mxu1 %v1509_v7 }
  0x7f   :  { %1037 = vmatpush1.bf16.msra.mxu0 %v1504_v8 }
  0x80   :  { %1078 = vmatpush1.bf16.msra.mxu1 %v1507_v9  ;;  %1088 = vmatprep.subr.bf16.mxu0 %v1514_v10 }
  0x82   :  { %1039 = vmatmul.mubr.bf16.vlgmr.msra.gmra.mrb[4].mxu0 %v1164_v11 }
  0x83   :  { %1080 = vmatmul.mubr.bf16.vlgmr.msra.gmra.mrb[4].mxu1 %v1166_v12  ;;  %1089 = vmatpush1.bf16.msra.mxu0 %v1512_v13 }
  0x84   :  { %1120 = vmatprep.mubr.bf16.mxu0 %v1539_v16  ;;  %1090 = vmatprep.subr.bf16.mxu0 %v1519_v14 }
  0x87   :  { %1091 = vmatpush1.bf16.msra.mxu0 %v1517_v15 }
  0x88   :  { %1092 = vmatprep.subr.bf16.mxu0 %v1522_v17 }
  0x8b   :  { %1093 = vmatpush1.bf16.msra.mxu0 %v1520_v18 }
  0x8c   :  { %1094 = vmatprep.subr.bf16.mxu0 %v1525_v19 }
  0x8f   :  { %1095 = vmatpush1.bf16.msra.mxu0 %v1523_v20 }
  0x90   :  { %1096 = vmatprep.subr.bf16.mxu0 %v1528_v21 }
  0x93   :  { %1097 = vmatpush1.bf16.msra.mxu0 %v1526_v22 }
  0x94   :  { %1098 = vmatprep.subr.bf16.mxu0 %v1531_v23 }
  0x97   :  { %1099 = vmatpush1.bf16.msra.mxu0 %v1529_v24 }
  0x98   :  { %1100 = vmatprep.subr.bf16.mxu0 %v1534_v25 }
  0x9b   :  { %1101 = vmatpush1.bf16.msra.mxu0 %v1532_v26 }
  0x9c   :  { %1102 = vmatprep.subr.bf16.mxu0 %v1537_v27 }
  0x9f   :  { %1103 = vmatpush1.bf16.msra.mxu0 %v1535_v28 }
  0xa2   :  { %1121 = vmatmul.mubr.bf16.vlgmr.msra.gmra.mrb[8].mxu0 %v1538_v29 }
 0x115   :  { %v958_v30 = vpop.f32.mrb[0].mxu0 }
 0x116   :  { %v999_v31 = vpop.f32.mrb[0].mxu1  ;;  %v960_v33 = vpop.f32.mrb[1].mxu0 }
 0x117   :  { %v1000_v32 = vadd.f32 %v999_v31, %v958_v30  ;;  %v1001_v34 = vpop.f32.mrb[1].mxu1  ;;  %v962_v36 = vpop.f32.mrb[2].mxu0 }
 0x118   :  { %v1002_v35 = vadd.f32 %v1001_v34, %v960_v33  ;;  %v1003_v37 = vpop.f32.mrb[2].mxu1  ;;  %v963_v38 = vpop.f32.mrb[3].mxu0 }
 0x119   :  { %v1004_v39 = vpop.f32.mrb[3].mxu1 }
 0x155   :  { %v1040_v40 = vpop.f32.mrb[4].mxu0 }
 0x156   :  { %v1081_v41 = vpop.f32.mrb[4].mxu1  ;;  %v1041_v42 = vadd.f32 %v1040_v40, %v1000_v32  ;;  %v1042_v43 = vpop.f32.mrb[5].mxu0 }
 0x157   :  { %v1083_v44 = vpop.f32.mrb[5].mxu1  ;;  %v1043_v45 = vadd.f32 %v1042_v43, %v1002_v35  ;;  %v1044_v46 = vpop.f32.mrb[6].mxu0 }
 0x158   :  { %v1085_v47 = vpop.f32.mrb[6].mxu1  ;;  %v1082_v48 = vadd.f32 %v1081_v41, %v1041_v42  ;;  %v1045_v49 = vpop.f32.mrb[7].mxu0 }
 0x159   :  { %v1086_v50 = vpop.f32.mrb[7].mxu1  ;;  %v1084_v51 = vadd.f32 %v1083_v44, %v1043_v45 }
 0x175   :  { %v1122_v58 = vpop.f32.mrb[8].mxu0 }
 0x176   :  { %v1123_v60 = vadd.f32 %v1122_v58, %v1082_v48  ;;  %v1124_v61 = vpop.f32.mrb[9].mxu0 }
 0x177   :  { %v1125_v62 = vadd.f32 %v1124_v61, %v1084_v51  ;;  %v1126_v63 = vpop.f32.mrb[10].mxu0 }
 0x178   :  { %v1150_v0 = vadd.f32 %v1143_v57, %v1123_v60  ;;  %v1127_v1 = vpop.f32.mrb[11].mxu0 }
 0x179   :  { %v1151_v2 = vadd.f32 %v1147_v59, %v1125_v62 }
 0x17a   :  { %v1152_v3 = vmax.f32 %v1150_v0, 0.0 }
 0x17b   :  { %v1153_v4 = vmax.f32 %v1151_v2, 0.0 }
 0x17c   :  { %1154 = vst [vmem:[%s2031_s3] sm:$0xff] %v1152_v3 }
 0x17d   :  { %1155 = vst [vmem:[%s2031_s3 + $0x8] sm:$0xff] %v1153_v4 }

// kernel: _lambda_.18
= control target key start
LH: loop header
LB: loop body
LE: loop exit
PB: predicated region body
PF: predicated region fallthrough
CT: control target
= control target key end

     0   :  { %s4251_s1 = inlined_call_operand.vmem [shape: bf16[2304,256], index: 1, kind: input, shape index: {}]   ;;  %s4252_s0 = inlined_call_operand.vmem [shape: bf16[8,2304], index: 0, kind: input, shape index: {}]   ;;  %s4253_s4 = inlined_call_operand.vmem [shape: bf16[128,256], index: 4, kind: input, shape index: {}]   ;;  %s4254_s3 = inlined_call_operand.vmem [shape: bf16[8,128], index: 3, kind: input, shape index: {}]   ;;  %s4255_s5 = inlined_call_operand.vmem [shape: f32[1,256], index: 5, kind: input, shape index: {}, may-alias: {2,5}]   ;;  %s4256_s2 = inlined_call_operand.vmem [shape: f32[1,256], index: 2, kind: input, shape index: {}, may-alias: {2,5}]   ;;  %s4257_s6 = inlined_call_operand.vmem [shape: f32[8,256], index: 6, kind: output, shape index: {}]  }
   0x1   :  { %v2745_v0 = vld [vmem:[%s4251_s1 + $0x4] ss:$8 sps:$4 sm:$0xff]   ;;  %v2749_v2 = vld [vmem:[%s4251_s1] ss:$8 sps:$4 sm:$0xff]   ;;  %v2751_v4 = vld [vmem:[%s4251_s1 + $0x14] ss:$8 sps:$4 sm:$0xff]  }
   0x2   :  { %v2747_v1 = vld [vmem:[%s4251_s1 + $0x504] ss:$8 sps:$4 sm:$0xff]   ;;  %1832 = vmatprep.subr.bf16.mxu1 %v2745_v0  ;;  %v2750_v3 = vld [vmem:[%s4251_s1 + $0x500] ss:$8 sps:$4 sm:$0xff]   ;;  %v2753_v5 = vld [vmem:[%s4251_s1 + $0x514] ss:$8 sps:$4 sm:$0xff]  }
   0x3   :  { %2037 = vmatprep.subr.bf16.mxu0 %v2747_v1  ;;  %1833 = vmatpush1.bf16.msra.mxu1 %v2749_v2  ;;  %v2755_v6 = vld [vmem:[%s4251_s1 + $0x10] ss:$8 sps:$4 sm:$0xff]   ;;  %v2757_v8 = vld [vmem:[%s4251_s1 + $0x24] ss:$8 sps:$4 sm:$0xff]   ;;  %v2761_v10 = vld [vmem:[%s4251_s1 + $0x20] ss:$8 sps:$4 sm:$0xff]  }
   0x4   :  { %2038 = vmatpush1.bf16.msra.mxu0 %v2750_v3  ;;  %1834 = vmatprep.subr.bf16.mxu1 %v2751_v4  ;;  %v2756_v7 = vld [vmem:[%s4251_s1 + $0x510] ss:$8 sps:$4 sm:$0xff]   ;;  %v2759_v9 = vld [vmem:[%s4251_s1 + $0x524] ss:$8 sps:$4 sm:$0xff]   ;;  %v2762_v11 = vld [vmem:[%s4251_s1 + $0x520] ss:$8 sps:$4 sm:$0xff]  }
   0x5   :  { %2039 = vmatprep.subr.bf16.mxu0 %v2753_v5  ;;  %v2763_v12 = vld [vmem:[%s4251_s1 + $0x34] ss:$8 sps:$4 sm:$0xff]   ;;  %v2767_v14 = vld [vmem:[%s4251_s1 + $0x30] ss:$8 sps:$4 sm:$0xff]   ;;  %v2769_v16 = vld [vmem:[%s4251_s1 + $0x44] ss:$8 sps:$4 sm:$0xff]  }
   0x6   :  { %v2765_v13 = vld [vmem:[%s4251_s1 + $0x534] ss:$8 sps:$4 sm:$0xff]   ;;  %v2768_v15 = vld [vmem:[%s4251_s1 + $0x530] ss:$8 sps:$4 sm:$0xff]   ;;  %v2771_v17 = vld [vmem:[%s4251_s1 + $0x544] ss:$8 sps:$4 sm:$0xff]  }
   0x7   :  { %1835 = vmatpush1.bf16.msra.mxu1 %v2755_v6  ;;  %v2773_v18 = vld [vmem:[%s4251_s1 + $0x40] ss:$8 sps:$4 sm:$0xff]   ;;  %v2775_v20 = vld [vmem:[%s4251_s1 + $0x54] ss:$8 sps:$4 sm:$0xff]   ;;  %v2779_v22 = vld [vmem:[%s4251_s1 + $0x50] ss:$8 sps:$4 sm:$0xff]  }
   0x8   :  { %2040 = vmatpush1.bf16.msra.mxu0 %v2756_v7  ;;  %1836 = vmatprep.subr.bf16.mxu1 %v2757_v8  ;;  %v2774_v19 = vld [vmem:[%s4251_s1 + $0x540] ss:$8 sps:$4 sm:$0xff]   ;;  %v2777_v21 = vld [vmem:[%s4251_s1 + $0x554] ss:$8 sps:$4 sm:$0xff]   ;;  %v2780_v23 = vld [vmem:[%s4251_s1 + $0x550] ss:$8 sps:$4 sm:$0xff]  }
   0x9   :  { %2041 = vmatprep.subr.bf16.mxu0 %v2759_v9  ;;  %v2781_v24 = vld [vmem:[%s4251_s1 + $0x64] ss:$8 sps:$4 sm:$0xff]   ;;  %v2785_v26 = vld [vmem:[%s4251_s1 + $0x60] ss:$8 sps:$4 sm:$0xff]   ;;  %v2787_v28 = vld [vmem:[%s4251_s1 + $0x74] ss:$8 sps:$4 sm:$0xff]  }
   0xa   :  { %v2783_v25 = vld [vmem:[%s4251_s1 + $0x564] ss:$8 sps:$4 sm:$0xff]   ;;  %v2786_v27 = vld [vmem:[%s4251_s1 + $0x560] ss:$8 sps:$4 sm:$0xff]   ;;  %v2789_v29 = vld [vmem:[%s4251_s1 + $0x574] ss:$8 sps:$4 sm:$0xff]  }
   0xb   :  { %1837 = vmatpush1.bf16.msra.mxu1 %v2761_v10  ;;  %v2791_v30 = vld [vmem:[%s4251_s1 + $0x70] ss:$8 sps:$4 sm:$0xff]   ;;  %v2793_v32 = vld [vmem:[%s4251_s1 + $0x84] ss:$8 sps:$4 sm:$0xff]   ;;  %v2797_v34 = vld [vmem:[%s4251_s1 + $0x80] ss:$8 sps:$4 sm:$0xff]  }
   0xc   :  { %2042 = vmatpush1.bf16.msra.mxu0 %v2762_v11  ;;  %1838 = vmatprep.subr.bf16.mxu1 %v2763_v12  ;;  %v2792_v31 = vld [vmem:[%s4251_s1 + $0x570] ss:$8 sps:$4 sm:$0xff]   ;;  %v2795_v33 = vld [vmem:[%s4251_s1 + $0x584] ss:$8 sps:$4 sm:$0xff]   ;;  %v2798_v35 = vld [vmem:[%s4251_s1 + $0x580] ss:$8 sps:$4 sm:$0xff]  }
   0xd   :  { %2043 = vmatprep.subr.bf16.mxu0 %v2765_v13  ;;  %v2799_v36 = vld [vmem:[%s4251_s1 + $0x94] ss:$8 sps:$4 sm:$0xff]   ;;  %v2803_v38 = vld [vmem:[%s4251_s1 + $0x90] ss:$8 sps:$4 sm:$0xff]   ;;  %v2805_v40 = vld [vmem:[%s4251_s1 + $0xa4] ss:$8 sps:$4 sm:$0xff]  }
   0xe   :  { %v2801_v37 = vld [vmem:[%s4251_s1 + $0x594] ss:$8 sps:$4 sm:$0xff]   ;;  %v2804_v39 = vld [vmem:[%s4251_s1 + $0x590] ss:$8 sps:$4 sm:$0xff]   ;;  %v2807_v41 = vld [vmem:[%s4251_s1 + $0x5a4] ss:$8 sps:$4 sm:$0xff]  }
   0xf   :  { %1839 = vmatpush1.bf16.msra.mxu1 %v2767_v14  ;;  %v2809_v42 = vld [vmem:[%s4251_s1 + $0xa0] ss:$8 sps:$4 sm:$0xff]   ;;  %v2811_v44 = vld [vmem:[%s4251_s1 + $0xb4] ss:$8 sps:$4 sm:$0xff]   ;;  %v2815_v47 = vld [vmem:[%s4251_s1 + $0xb0] ss:$8 sps:$4 sm:$0xff]  }
  0x10   :  { %2044 = vmatpush1.bf16.msra.mxu0 %v2768_v15  ;;  %1840 = vmatprep.subr.bf16.mxu1 %v2769_v16  ;;  %v2810_v43 = vld [vmem:[%s4251_s1 + $0x5a0] ss:$8 sps:$4 sm:$0xff]   ;;  %v2813_v45 = vld [vmem:[%s4251_s1 + $0x5b4] ss:$8 sps:$4 sm:$0xff]   ;;  %v2816_v49 = vld [vmem:[%s4251_s1 + $0x5b0] ss:$8 sps:$4 sm:$0xff]  }
  0x11   :  { %2045 = vmatprep.subr.bf16.mxu0 %v2771_v17  ;;  %v32_v46 = vld [vmem:[%s4252_s0] sm:$0xff]  ;;  %v37_v50 = vld [vmem:[%s4252_s0 + $0x28] sm:$0xff]  ;;  %v2823_v56 = vld [vmem:[%s4251_s1 + $0xd4] ss:$8 sps:$4 sm:$0xff]  }
  0x12   :  { %v2385_v48 = vcombine.high %v32_v46, %v32_v46  ;;  %v2817_v51 = vld [vmem:[%s4251_s1 + $0xc4] ss:$8 sps:$4 sm:$0xff]   ;;  %v2395_v53 = vcombine.high %v37_v50, %v37_v50  ;;  %v2821_v54 = vld [vmem:[%s4251_s1 + $0xc0] ss:$8 sps:$4 sm:$0xff]   ;;  %v2825_v57 = vld [vmem:[%s4251_s1 + $0x5d4] ss:$8 sps:$4 sm:$0xff]   ;;  %v2384_v6 = vcombine.low %v32_v46, %v32_v46  ;;  %v2394_v7 = vcombine.low %v37_v50, %v37_v50 }
  0x13   :  { %1841 = vmatpush1.bf16.msra.mxu1 %v2773_v18  ;;  %v2819_v52 = vld [vmem:[%s4251_s1 + $0x5c4] ss:$8 sps:$4 sm:$0xff]   ;;  %v2822_v55 = vld [vmem:[%s4251_s1 + $0x5c0] ss:$8 sps:$4 sm:$0xff]   ;;  %v2827_v58 = vld [vmem:[%s4251_s1 + $0xd0] ss:$8 sps:$4 sm:$0xff]  }
  0x14   :  { %2046 = vmatpush1.bf16.msra.mxu0 %v2774_v19  ;;  %1842 = vmatprep.subr.bf16.mxu1 %v2775_v20  ;;  %v2828_v59 = vld [vmem:[%s4251_s1 + $0x5d0] ss:$8 sps:$4 sm:$0xff]   ;;  %v2829_v60 = vld [vmem:[%s4251_s1 + $0xe4] ss:$8 sps:$4 sm:$0xff]   ;;  %v2833_v62 = vld [vmem:[%s4251_s1 + $0xe0] ss:$8 sps:$4 sm:$0xff]  }
  0x15   :  { %2047 = vmatprep.subr.bf16.mxu0 %v2777_v21  ;;  %1864 = vmatprep.mubr.bf16.mxu1 %v2385_v48  ;;  %v2831_v61 = vld [vmem:[%s4251_s1 + $0x5e4] ss:$8 sps:$4 sm:$0xff]   ;;  %v2834_v63 = vld [vmem:[%s4251_s1 + $0x5e0] ss:$8 sps:$4 sm:$0xff]   ;;  %v2835_v0 = vld [vmem:[%s4251_s1 + $0xf4] ss:$8 sps:$4 sm:$0xff]  }
  0x16   :  { %2069 = vmatprep.mubr.bf16.mxu0 %v2395_v53  ;;  %v2837_v1 = vld [vmem:[%s4251_s1 + $0x5f4] ss:$8 sps:$4 sm:$0xff]   ;;  %v2839_v2 = vld [vmem:[%s4251_s1 + $0xf0] ss:$8 sps:$4 sm:$0xff]   ;;  %v2845_v4 = vld [vmem:[%s4251_s1 + $0x104] ss:$8 sps:$4 sm:$0xff]  }
  0x17   :  { %1843 = vmatpush1.bf16.msra.mxu1 %v2779_v22  ;;  %v2840_v3 = vld [vmem:[%s4251_s1 + $0x5f0] ss:$8 sps:$4 sm:$0xff]   ;;  %v2850_v5 = vld [vmem:[%s4251_s1 + $0x604] ss:$8 sps:$4 sm:$0xff]   ;;  %v2843_v8 = vld [vmem:[%s4251_s1 + $0x100] ss:$8 sps:$4 sm:$0xff]  }
  0x18   :  { %2048 = vmatpush1.bf16.msra.mxu0 %v2780_v23  ;;  %1844 = vmatprep.subr.bf16.mxu1 %v2781_v24  ;;  %v2848_v9 = vld [vmem:[%s4251_s1 + $0x600] ss:$8 sps:$4 sm:$0xff]   ;;  %v2853_v10 = vld [vmem:[%s4251_s1 + $0x114] ss:$8 sps:$4 sm:$0xff]   ;;  %v2851_v12 = vld [vmem:[%s4251_s1 + $0x110] ss:$8 sps:$4 sm:$0xff]  }
  0x19   :  { %2049 = vmatprep.subr.bf16.mxu0 %v2783_v25  ;;  %v2856_v11 = vld [vmem:[%s4251_s1 + $0x614] ss:$8 sps:$4 sm:$0xff]   ;;  %v2854_v13 = vld [vmem:[%s4251_s1 + $0x610] ss:$8 sps:$4 sm:$0xff]   ;;  %v2859_v14 = vld [vmem:[%s4251_s1 + $0x124] ss:$8 sps:$4 sm:$0xff]  }
  0x1a   :  { %v2862_v15 = vld [vmem:[%s4251_s1 + $0x624] ss:$8 sps:$4 sm:$0xff]   ;;  %v2857_v16 = vld [vmem:[%s4251_s1 + $0x120] ss:$8 sps:$4 sm:$0xff]   ;;  %v2865_v18 = vld [vmem:[%s4251_s1 + $0x134] ss:$8 sps:$4 sm:$0xff]  }
  0x1b   :  { %1845 = vmatpush1.bf16.msra.mxu1 %v2785_v26  ;;  %v2860_v17 = vld [vmem:[%s4251_s1 + $0x620] ss:$8 sps:$4 sm:$0xff]   ;;  %v2868_v19 = vld [vmem:[%s4251_s1 + $0x634] ss:$8 sps:$4 sm:$0xff]   ;;  %v2863_v20 = vld [vmem:[%s4251_s1 + $0x130] ss:$8 sps:$4 sm:$0xff]  }
  0x1c   :  { %2050 = vmatpush1.bf16.msra.mxu0 %v2786_v27  ;;  %1846 = vmatprep.subr.bf16.mxu1 %v2787_v28  ;;  %v2866_v21 = vld [vmem:[%s4251_s1 + $0x630] ss:$8 sps:$4 sm:$0xff]   ;;  %v2871_v22 = vld [vmem:[%s4251_s1 + $0x144] ss:$8 sps:$4 sm:$0xff]   ;;  %v2869_v24 = vld [vmem:[%s4251_s1 + $0x140] ss:$8 sps:$4 sm:$0xff]  }
  0x1d   :  { %2051 = vmatprep.subr.bf16.mxu0 %v2789_v29  ;;  %v2874_v23 = vld [vmem:[%s4251_s1 + $0x644] ss:$8 sps:$4 sm:$0xff]   ;;  %v2872_v25 = vld [vmem:[%s4251_s1 + $0x640] ss:$8 sps:$4 sm:$0xff]   ;;  %v2877_v26 = vld [vmem:[%s4251_s1 + $0x154] ss:$8 sps:$4 sm:$0xff]  }
  0x1e   :  { %v2880_v27 = vld [vmem:[%s4251_s1 + $0x654] ss:$8 sps:$4 sm:$0xff]   ;;  %v2875_v28 = vld [vmem:[%s4251_s1 + $0x150] ss:$8 sps:$4 sm:$0xff]   ;;  %v2907_v50 = vld [vmem:[%s4251_s1 + $0x1a4] ss:$8 sps:$4 sm:$0xff]  }
  0x1f   :  { %1847 = vmatpush1.bf16.msra.mxu1 %v2791_v30  ;;  %v2878_v29 = vld [vmem:[%s4251_s1 + $0x650] ss:$8 sps:$4 sm:$0xff]   ;;  %v2883_v30 = vld [vmem:[%s4251_s1 + $0x164] ss:$8 sps:$4 sm:$0xff]   ;;  %v2901_v46 = vld [vmem:[%s4251_s1 + $0x194] ss:$8 sps:$4 sm:$0xff]  }
  0x20   :  { %2052 = vmatpush1.bf16.msra.mxu0 %v2792_v31  ;;  %1848 = vmatprep.subr.bf16.mxu1 %v2793_v32  ;;  %v2886_v31 = vld [vmem:[%s4251_s1 + $0x664] ss:$8 sps:$4 sm:$0xff]   ;;  %v2899_v48 = vld [vmem:[%s4251_s1 + $0x190] ss:$8 sps:$4 sm:$0xff]   ;;  %v2908_v53 = vld [vmem:[%s4251_s1 + $0x6a0] ss:$8 sps:$4 sm:$0xff]  }
  0x21   :  { %2053 = vmatprep.subr.bf16.mxu0 %v2795_v33  ;;  %v3534_v32 = vld [vmem:[%s4252_s0 + $0x8] sm:$0xff] }
  0x22   :  { %v2881_v33 = vld [vmem:[%s4251_s1 + $0x160] ss:$8 sps:$4 sm:$0xff]  }
  0x23   :  { %1849 = vmatpush1.bf16.msra.mxu1 %v2797_v34  ;;  %v2884_v34 = vld [vmem:[%s4251_s1 + $0x660] ss:$8 sps:$4 sm:$0xff]  }
  0x24   :  { %2054 = vmatpush1.bf16.msra.mxu0 %v2798_v35  ;;  %1850 = vmatprep.subr.bf16.mxu1 %v2799_v36  ;;  %v2387_v35 = vcombine.high %v3534_v32, %v3534_v32  ;;  %v3547_v36 = vld [vmem:[%s4252_s0 + $0x30] sm:$0xff] }
  0x25   :  { %2055 = vmatprep.subr.bf16.mxu0 %v2801_v37  ;;  %v2889_v37 = vld [vmem:[%s4251_s1 + $0x174] ss:$8 sps:$4 sm:$0xff]  }
  0x27   :  { %1851 = vmatpush1.bf16.msra.mxu1 %v2803_v38  ;;  %v2397_v38 = vcombine.high %v3547_v36, %v3547_v36 }
  0x28   :  { %2056 = vmatpush1.bf16.msra.mxu0 %v2804_v39  ;;  %1852 = vmatprep.subr.bf16.mxu1 %v2805_v40  ;;  %v2892_v39 = vld [vmem:[%s4251_s1 + $0x674] ss:$8 sps:$4 sm:$0xff]   ;;  %v2887_v40 = vld [vmem:[%s4251_s1 + $0x170] ss:$8 sps:$4 sm:$0xff]  }
  0x29   :  { %2057 = vmatprep.subr.bf16.mxu0 %v2807_v41  ;;  %v2890_v41 = vld [vmem:[%s4251_s1 + $0x670] ss:$8 sps:$4 sm:$0xff]  }
  0x2b   :  { %1853 = vmatpush1.bf16.msra.mxu1 %v2809_v42  ;;  %v2895_v42 = vld [vmem:[%s4251_s1 + $0x184] ss:$8 sps:$4 sm:$0xff]  }
  0x2c   :  { %2058 = vmatpush1.bf16.msra.mxu0 %v2810_v43  ;;  %1854 = vmatprep.subr.bf16.mxu1 %v2811_v44  ;;  %v2898_v43 = vld [vmem:[%s4251_s1 + $0x684] ss:$8 sps:$4 sm:$0xff]   ;;  %v2893_v44 = vld [vmem:[%s4251_s1 + $0x180] ss:$8 sps:$4 sm:$0xff]  }
  0x2d   :  { %2059 = vmatprep.subr.bf16.mxu0 %v2813_v45  ;;  %v2896_v45 = vld [vmem:[%s4251_s1 + $0x680] ss:$8 sps:$4 sm:$0xff]  }
  0x2f   :  { %1855 = vmatpush1.bf16.msra.mxu1 %v2815_v47  ;;  %v2904_v47 = vld [vmem:[%s4251_s1 + $0x694] ss:$8 sps:$4 sm:$0xff]  }
  0x30   :  { %2060 = vmatpush1.bf16.msra.mxu0 %v2816_v49  ;;  %1856 = vmatprep.subr.bf16.mxu1 %v2817_v51  ;;  %v2902_v49 = vld [vmem:[%s4251_s1 + $0x690] ss:$8 sps:$4 sm:$0xff]   ;;  %v2910_v51 = vld [vmem:[%s4251_s1 + $0x6a4] ss:$8 sps:$4 sm:$0xff]  }
  0x31   :  { %2061 = vmatprep.subr.bf16.mxu0 %v2819_v52  ;;  %v2905_v52 = vld [vmem:[%s4251_s1 + $0x1a0] ss:$8 sps:$4 sm:$0xff]  }
  0x33   :  { %1857 = vmatpush1.bf16.msra.mxu1 %v2821_v54  ;;  %v2913_v54 = vld [vmem:[%s4251_s1 + $0x1b4] ss:$8 sps:$4 sm:$0xff]  }
  0x34   :  { %2062 = vmatpush1.bf16.msra.mxu0 %v2822_v55  ;;  %1858 = vmatprep.subr.bf16.mxu1 %v2823_v56  ;;  %v2916_v55 = vld [vmem:[%s4251_s1 + $0x6b4] ss:$8 sps:$4 sm:$0xff]   ;;  %v2911_v56 = vld [vmem:[%s4251_s1 + $0x1b0] ss:$8 sps:$4 sm:$0xff]  }
  0x35   :  { %2063 = vmatprep.subr.bf16.mxu0 %v2825_v57  ;;  %v2914_v57 = vld [vmem:[%s4251_s1 + $0x6b0] ss:$8 sps:$4 sm:$0xff]  }
  0x37   :  { %1859 = vmatpush1.bf16.msra.mxu1 %v2827_v58  ;;  %v2919_v58 = vld [vmem:[%s4251_s1 + $0x1c4] ss:$8 sps:$4 sm:$0xff]  }
  0x38   :  { %2064 = vmatpush1.bf16.msra.mxu0 %v2828_v59  ;;  %1860 = vmatprep.subr.bf16.mxu1 %v2829_v60  ;;  %v2922_v59 = vld [vmem:[%s4251_s1 + $0x6c4] ss:$8 sps:$4 sm:$0xff]   ;;  %v2917_v60 = vld [vmem:[%s4251_s1 + $0x1c0] ss:$8 sps:$4 sm:$0xff]  }
  0x39   :  { %2065 = vmatprep.subr.bf16.mxu0 %v2831_v61  ;;  %v2920_v61 = vld [vmem:[%s4251_s1 + $0x6c0] ss:$8 sps:$4 sm:$0xff]  }
  0x3b   :  { %1861 = vmatpush1.bf16.msra.mxu1 %v2833_v62  ;;  %v2925_v62 = vld [vmem:[%s4251_s1 + $0x1d4] ss:$8 sps:$4 sm:$0xff]  }
  0x3c   :  { %2066 = vmatpush1.bf16.msra.mxu0 %v2834_v63  ;;  %1862 = vmatprep.subr.bf16.mxu1 %v2835_v0  ;;  %v2928_v63 = vld [vmem:[%s4251_s1 + $0x6d4] ss:$8 sps:$4 sm:$0xff]   ;;  %v2923_v0 = vld [vmem:[%s4251_s1 + $0x1d0] ss:$8 sps:$4 sm:$0xff]  }
  0x3d   :  { %2067 = vmatprep.subr.bf16.mxu0 %v2837_v1  ;;  %v2926_v1 = vld [vmem:[%s4251_s1 + $0x6d0] ss:$8 sps:$4 sm:$0xff]  }
  0x3f   :  { %1863 = vmatpush1.bf16.msra.mxu1 %v2839_v2  ;;  %v2931_v2 = vld [vmem:[%s4251_s1 + $0x1e4] ss:$8 sps:$4 sm:$0xff]  }
  0x40   :  { %2068 = vmatpush1.bf16.msra.mxu0 %v2840_v3  ;;  %1873 = vmatprep.subr.bf16.mxu1 %v2845_v4  ;;  %v2934_v3 = vld [vmem:[%s4251_s1 + $0x6e4] ss:$8 sps:$4 sm:$0xff]   ;;  %v2929_v4 = vld [vmem:[%s4251_s1 + $0x1e0] ss:$8 sps:$4 sm:$0xff]  }
  0x41   :  { %2078 = vmatprep.subr.bf16.mxu0 %v2850_v5  ;;  %v2932_v5 = vld [vmem:[%s4251_s1 + $0x6e0] ss:$8 sps:$4 sm:$0xff]  }
  0x42   :  { %1865 = vmatmul.mubr.bf16.vlgmr.msra.gmra.mrb[0].mxu1 %v2384_v6  ;;  %v2937_v6 = vld [vmem:[%s4251_s1 + $0x1f4] ss:$8 sps:$4 sm:$0xff]  }
  0x43   :  { %2070 = vmatmul.mubr.bf16.vlgmr.msra.gmra.mrb[0].mxu0 %v2394_v7  ;;  %1874 = vmatpush1.bf16.msra.mxu1 %v2843_v8  ;;  %v2940_v7 = vld [vmem:[%s4251_s1 + $0x6f4] ss:$8 sps:$4 sm:$0xff]   ;;  %v2935_v8 = vld [vmem:[%s4251_s1 + $0x1f0] ss:$8 sps:$4 sm:$0xff]  }
  0x44   :  { %2079 = vmatpush1.bf16.msra.mxu0 %v2848_v9  ;;  %1875 = vmatprep.subr.bf16.mxu1 %v2853_v10  ;;  %v2938_v9 = vld [vmem:[%s4251_s1 + $0x6f0] ss:$8 sps:$4 sm:$0xff]   ;;  %v2945_v10 = vld [vmem:[%s4251_s1 + $0x204] ss:$8 sps:$4 sm:$0xff]  }
  0x45   :  { %2080 = vmatprep.subr.bf16.mxu0 %v2856_v11  ;;  %1905 = vmatprep.mubr.bf16.mxu1 %v2387_v35  ;;  %v2950_v11 = vld [vmem:[%s4251_s1 + $0x704] ss:$8 sps:$4 sm:$0xff]   ;;  %v2972_v35 = vld [vmem:[%s4251_s1 + $0x740] ss:$8 sps:$4 sm:$0xff]  }
  0x46   :  { %2110 = vmatprep.mubr.bf16.mxu0 %v2397_v38  ;;  %v2975_v38 = vld [vmem:[%s4251_s1 + $0x250] ss:$8 sps:$4 sm:$0xff]  }
  0x47   :  { %1876 = vmatpush1.bf16.msra.mxu1 %v2851_v12  ;;  %v2386_v12 = vcombine.low %v3534_v32, %v3534_v32  ;;  %v2971_v32 = vld [vmem:[%s4251_s1 + $0x244] ss:$8 sps:$4 sm:$0xff]  }
  0x48   :  { %2081 = vmatpush1.bf16.msra.mxu0 %v2854_v13  ;;  %1877 = vmatprep.subr.bf16.mxu1 %v2859_v14  ;;  %v2943_v13 = vld [vmem:[%s4251_s1 + $0x200] ss:$8 sps:$4 sm:$0xff]   ;;  %v2396_v14 = vcombine.low %v3547_v36, %v3547_v36  ;;  %v2977_v36 = vld [vmem:[%s4251_s1 + $0x254] ss:$8 sps:$4 sm:$0xff]  }
  0x49   :  { %2082 = vmatprep.subr.bf16.mxu0 %v2862_v15  ;;  %v2948_v15 = vld [vmem:[%s4251_s1 + $0x700] ss:$8 sps:$4 sm:$0xff]  }
  0x4b   :  { %1878 = vmatpush1.bf16.msra.mxu1 %v2857_v16  ;;  %v2953_v16 = vld [vmem:[%s4251_s1 + $0x214] ss:$8 sps:$4 sm:$0xff]  }
  0x4c   :  { %2083 = vmatpush1.bf16.msra.mxu0 %v2860_v17  ;;  %1879 = vmatprep.subr.bf16.mxu1 %v2865_v18  ;;  %v2956_v17 = vld [vmem:[%s4251_s1 + $0x714] ss:$8 sps:$4 sm:$0xff]  }
  0x4d   :  { %2084 = vmatprep.subr.bf16.mxu0 %v2868_v19  ;;  %v3684_v18 = vld [vmem:[%s4252_s0 + $0x10] sm:$0xff] }
  0x4e   :  { %v2389_v19 = vcombine.high %v3684_v18, %v3684_v18 }
  0x4f   :  { %1880 = vmatpush1.bf16.msra.mxu1 %v2863_v20  ;;  %v3691_v20 = vld [vmem:[%s4252_s0 + $0x38] sm:$0xff] }
  0x50   :  { %2085 = vmatpush1.bf16.msra.mxu0 %v2866_v21  ;;  %1881 = vmatprep.subr.bf16.mxu1 %v2871_v22  ;;  %v2951_v21 = vld [vmem:[%s4251_s1 + $0x210] ss:$8 sps:$4 sm:$0xff]  }
  0x51   :  { %2086 = vmatprep.subr.bf16.mxu0 %v2874_v23  ;;  %v2954_v22 = vld [vmem:[%s4251_s1 + $0x710] ss:$8 sps:$4 sm:$0xff]   ;;  %v2399_v23 = vcombine.high %v3691_v20, %v3691_v20 }
  0x53   :  { %1882 = vmatpush1.bf16.msra.mxu1 %v2869_v24  ;;  %v2959_v24 = vld [vmem:[%s4251_s1 + $0x224] ss:$8 sps:$4 sm:$0xff]  }
  0x54   :  { %2087 = vmatpush1.bf16.msra.mxu0 %v2872_v25  ;;  %1883 = vmatprep.subr.bf16.mxu1 %v2877_v26  ;;  %v2962_v25 = vld [vmem:[%s4251_s1 + $0x724] ss:$8 sps:$4 sm:$0xff]   ;;  %v2957_v26 = vld [vmem:[%s4251_s1 + $0x220] ss:$8 sps:$4 sm:$0xff]  }
  0x55   :  { %2088 = vmatprep.subr.bf16.mxu0 %v2880_v27  ;;  %v2960_v27 = vld [vmem:[%s4251_s1 + $0x720] ss:$8 sps:$4 sm:$0xff]  }
  0x57   :  { %1884 = vmatpush1.bf16.msra.mxu1 %v2875_v28  ;;  %v2965_v28 = vld [vmem:[%s4251_s1 + $0x234] ss:$8 sps:$4 sm:$0xff]  }
  0x58   :  { %2089 = vmatpush1.bf16.msra.mxu0 %v2878_v29  ;;  %1885 = vmatprep.subr.bf16.mxu1 %v2883_v30  ;;  %v2968_v29 = vld [vmem:[%s4251_s1 + $0x734] ss:$8 sps:$4 sm:$0xff]   ;;  %v2963_v30 = vld [vmem:[%s4251_s1 + $0x230] ss:$8 sps:$4 sm:$0xff]  }
  0x59   :  { %2090 = vmatprep.subr.bf16.mxu0 %v2886_v31  ;;  %v2966_v31 = vld [vmem:[%s4251_s1 + $0x730] ss:$8 sps:$4 sm:$0xff]  }
  0x5b   :  { %1886 = vmatpush1.bf16.msra.mxu1 %v2881_v33  ;;  %v2974_v33 = vld [vmem:[%s4251_s1 + $0x744] ss:$8 sps:$4 sm:$0xff]  }
  0x5c   :  { %2091 = vmatpush1.bf16.msra.mxu0 %v2884_v34  ;;  %1887 = vmatprep.subr.bf16.mxu1 %v2889_v37  ;;  %v2969_v34 = vld [vmem:[%s4251_s1 + $0x240] ss:$8 sps:$4 sm:$0xff]   ;;  %v2980_v37 = vld [vmem:[%s4251_s1 + $0x754] ss:$8 sps:$4 sm:$0xff]  }
  0x5d   :  { %2092 = vmatprep.subr.bf16.mxu0 %v2892_v39  ;;  %v2978_v39 = vld [vmem:[%s4251_s1 + $0x750] ss:$8 sps:$4 sm:$0xff]  }
  0x5f   :  { %1888 = vmatpush1.bf16.msra.mxu1 %v2887_v40  ;;  %v2983_v40 = vld [vmem:[%s4251_s1 + $0x264] ss:$8 sps:$4 sm:$0xff]  }
  0x60   :  { %2093 = vmatpush1.bf16.msra.mxu0 %v2890_v41  ;;  %1889 = vmatprep.subr.bf16.mxu1 %v2895_v42  ;;  %v2986_v41 = vld [vmem:[%s4251_s1 + $0x764] ss:$8 sps:$4 sm:$0xff]   ;;  %v2981_v42 = vld [vmem:[%s4251_s1 + $0x260] ss:$8 sps:$4 sm:$0xff]  }
  0x61   :  { %2094 = vmatprep.subr.bf16.mxu0 %v2898_v43  ;;  %v2984_v43 = vld [vmem:[%s4251_s1 + $0x760] ss:$8 sps:$4 sm:$0xff]  }
  0x63   :  { %1890 = vmatpush1.bf16.msra.mxu1 %v2893_v44  ;;  %v2989_v44 = vld [vmem:[%s4251_s1 + $0x274] ss:$8 sps:$4 sm:$0xff]  }
  0x64   :  { %2095 = vmatpush1.bf16.msra.mxu0 %v2896_v45  ;;  %1891 = vmatprep.subr.bf16.mxu1 %v2901_v46  ;;  %v2992_v45 = vld [vmem:[%s4251_s1 + $0x774] ss:$8 sps:$4 sm:$0xff]   ;;  %v2987_v46 = vld [vmem:[%s4251_s1 + $0x270] ss:$8 sps:$4 sm:$0xff]  }
  0x65   :  { %2096 = vmatprep.subr.bf16.mxu0 %v2904_v47  ;;  %v2990_v47 = vld [vmem:[%s4251_s1 + $0x770] ss:$8 sps:$4 sm:$0xff]  }
  0x67   :  { %1892 = vmatpush1.bf16.msra.mxu1 %v2899_v48  ;;  %v2995_v48 = vld [vmem:[%s4251_s1 + $0x284] ss:$8 sps:$4 sm:$0xff]  }
  0x68   :  { %2097 = vmatpush1.bf16.msra.mxu0 %v2902_v49  ;;  %1893 = vmatprep.subr.bf16.mxu1 %v2907_v50  ;;  %v2998_v49 = vld [vmem:[%s4251_s1 + $0x784] ss:$8 sps:$4 sm:$0xff]   ;;  %v2993_v50 = vld [vmem:[%s4251_s1 + $0x280] ss:$8 sps:$4 sm:$0xff]  }
  0x69   :  { %2098 = vmatprep.subr.bf16.mxu0 %v2910_v51  ;;  %v2996_v51 = vld [vmem:[%s4251_s1 + $0x780] ss:$8 sps:$4 sm:$0xff]  }
  0x6b   :  { %1894 = vmatpush1.bf16.msra.mxu1 %v2905_v52  ;;  %v3001_v52 = vld [vmem:[%s4251_s1 + $0x294] ss:$8 sps:$4 sm:$0xff]  }
  0x6c   :  { %2099 = vmatpush1.bf16.msra.mxu0 %v2908_v53  ;;  %1895 = vmatprep.subr.bf16.mxu1 %v2913_v54  ;;  %v3004_v53 = vld [vmem:[%s4251_s1 + $0x794] ss:$8 sps:$4 sm:$0xff]   ;;  %v2999_v54 = vld [vmem:[%s4251_s1 + $0x290] ss:$8 sps:$4 sm:$0xff]  }
  0x6d   :  { %2100 = vmatprep.subr.bf16.mxu0 %v2916_v55  ;;  %v3002_v55 = vld [vmem:[%s4251_s1 + $0x790] ss:$8 sps:$4 sm:$0xff]  }
  0x6f   :  { %1896 = vmatpush1.bf16.msra.mxu1 %v2911_v56  ;;  %v3007_v56 = vld [vmem:[%s4251_s1 + $0x2a4] ss:$8 sps:$4 sm:$0xff]  }
  0x70   :  { %2101 = vmatpush1.bf16.msra.mxu0 %v2914_v57  ;;  %1897 = vmatprep.subr.bf16.mxu1 %v2919_v58  ;;  %v3010_v57 = vld [vmem:[%s4251_s1 + $0x7a4] ss:$8 sps:$4 sm:$0xff]   ;;  %v3005_v58 = vld [vmem:[%s4251_s1 + $0x2a0] ss:$8 sps:$4 sm:$0xff]  }
  0x71   :  { %2102 = vmatprep.subr.bf16.mxu0 %v2922_v59  ;;  %v3008_v59 = vld [vmem:[%s4251_s1 + $0x7a0] ss:$8 sps:$4 sm:$0xff]  }
  0x73   :  { %1898 = vmatpush1.bf16.msra.mxu1 %v2917_v60  ;;  %v3013_v60 = vld [vmem:[%s4251_s1 + $0x2b4] ss:$8 sps:$4 sm:$0xff]  }
  0x74   :  { %2103 = vmatpush1.bf16.msra.mxu0 %v2920_v61  ;;  %1899 = vmatprep.subr.bf16.mxu1 %v2925_v62  ;;  %v3016_v61 = vld [vmem:[%s4251_s1 + $0x7b4] ss:$8 sps:$4 sm:$0xff]   ;;  %v3011_v62 = vld [vmem:[%s4251_s1 + $0x2b0] ss:$8 sps:$4 sm:$0xff]  }
  0x75   :  { %2104 = vmatprep.subr.bf16.mxu0 %v2928_v63  ;;  %v3014_v63 = vld [vmem:[%s4251_s1 + $0x7b0] ss:$8 sps:$4 sm:$0xff]  }
  0x77   :  { %1900 = vmatpush1.bf16.msra.mxu1 %v2923_v0  ;;  %v3019_v0 = vld [vmem:[%s4251_s1 + $0x2c4] ss:$8 sps:$4 sm:$0xff]  }
  0x78   :  { %2105 = vmatpush1.bf16.msra.mxu0 %v2926_v1  ;;  %1901 = vmatprep.subr.bf16.mxu1 %v2931_v2  ;;  %v3022_v1 = vld [vmem:[%s4251_s1 + $0x7c4] ss:$8 sps:$4 sm:$0xff]   ;;  %v3017_v2 = vld [vmem:[%s4251_s1 + $0x2c0] ss:$8 sps:$4 sm:$0xff]  }
  0x79   :  { %2106 = vmatprep.subr.bf16.mxu0 %v2934_v3  ;;  %v3020_v3 = vld [vmem:[%s4251_s1 + $0x7c0] ss:$8 sps:$4 sm:$0xff]  }
  0x7b   :  { %1902 = vmatpush1.bf16.msra.mxu1 %v2929_v4  ;;  %v3025_v4 = vld [vmem:[%s4251_s1 + $0x2d4] ss:$8 sps:$4 sm:$0xff]  }
  0x7c   :  { %2107 = vmatpush1.bf16.msra.mxu0 %v2932_v5  ;;  %1903 = vmatprep.subr.bf16.mxu1 %v2937_v6  ;;  %v3028_v5 = vld [vmem:[%s4251_s1 + $0x7d4] ss:$8 sps:$4 sm:$0xff]   ;;  %v3023_v6 = vld [vmem:[%s4251_s1 + $0x2d0] ss:$8 sps:$4 sm:$0xff]  }
  0x7d   :  { %2108 = vmatprep.subr.bf16.mxu0 %v2940_v7  ;;  %v3026_v7 = vld [vmem:[%s4251_s1 + $0x7d0] ss:$8 sps:$4 sm:$0xff]  }
  0x7f   :  { %1904 = vmatpush1.bf16.msra.mxu1 %v2935_v8  ;;  %v3031_v8 = vld [vmem:[%s4251_s1 + $0x2e4] ss:$8 sps:$4 sm:$0xff]  }
  0x80   :  { %2109 = vmatpush1.bf16.msra.mxu0 %v2938_v9  ;;  %1914 = vmatprep.subr.bf16.mxu1 %v2945_v10  ;;  %v3034_v9 = vld [vmem:[%s4251_s1 + $0x7e4] ss:$8 sps:$4 sm:$0xff]   ;;  %v3029_v10 = vld [vmem:[%s4251_s1 + $0x2e0] ss:$8 sps:$4 sm:$0xff]  }
  0x81   :  { %2119 = vmatprep.subr.bf16.mxu0 %v2950_v11  ;;  %v3032_v11 = vld [vmem:[%s4251_s1 + $0x7e0] ss:$8 sps:$4 sm:$0xff]  }
  0x82   :  { %1906 = vmatmul.mubr.bf16.vlgmr.msra.gmra.mrb[0].mxu1 %v2386_v12  ;;  %v3037_v12 = vld [vmem:[%s4251_s1 + $0x2f4] ss:$8 sps:$4 sm:$0xff]  }
  0x83   :  { %2111 = vmatmul.mubr.bf16.vlgmr.msra.gmra.mrb[0].mxu0 %v2396_v14  ;;  %1915 = vmatpush1.bf16.msra.mxu1 %v2943_v13  ;;  %v3040_v13 = vld [vmem:[%s4251_s1 + $0x7f4] ss:$8 sps:$4 sm:$0xff]   ;;  %v3035_v14 = vld [vmem:[%s4251_s1 + $0x2f0] ss:$8 sps:$4 sm:$0xff]  }
  0x84   :  { %2120 = vmatpush1.bf16.msra.mxu0 %v2948_v15  ;;  %1916 = vmatprep.subr.bf16.mxu1 %v2953_v16  ;;  %v3038_v15 = vld [vmem:[%s4251_s1 + $0x7f0] ss:$8 sps:$4 sm:$0xff]   ;;  %v3045_v16 = vld [vmem:[%s4251_s1 + $0x304] ss:$8 sps:$4 sm:$0xff]  }
  0x85   :  { %2121 = vmatprep.subr.bf16.mxu0 %v2956_v17  ;;  %1946 = vmatprep.mubr.bf16.mxu1 %v2389_v19  ;;  %v3050_v17 = vld [vmem:[%s4251_s1 + $0x804] ss:$8 sps:$4 sm:$0xff]   ;;  %v3043_v19 = vld [vmem:[%s4251_s1 + $0x300] ss:$8 sps:$4 sm:$0xff]  }
  0x86   :  { %2151 = vmatprep.mubr.bf16.mxu0 %v2399_v23  ;;  %v2398_v23 = vcombine.low %v3691_v20, %v3691_v20 }
  0x87   :  { %1917 = vmatpush1.bf16.msra.mxu1 %v2951_v21  ;;  %v3048_v21 = vld [vmem:[%s4251_s1 + $0x800] ss:$8 sps:$4 sm:$0xff]  }
  0x88   :  { %2122 = vmatpush1.bf16.msra.mxu0 %v2954_v22  ;;  %1918 = vmatprep.subr.bf16.mxu1 %v2959_v24  ;;  %v2388_v22 = vcombine.low %v3684_v18, %v3684_v18  ;;  %v3888_v24 = vld [vmem:[%s4252_s0 + $0x18] sm:$0xff] }
  0x89   :  { %2123 = vmatprep.subr.bf16.mxu0 %v2962_v25  ;;  %v3893_v25 = vld [vmem:[%s4252_s0 + $0x40] sm:$0xff]  ;;  %v3056_v18 = vld [vmem:[%s4251_s1 + $0x814] ss:$8 sps:$4 sm:$0xff]   ;;  %v2391_v20 = vcombine.high %v3888_v24, %v3888_v24 }
  0x8b   :  { %1919 = vmatpush1.bf16.msra.mxu1 %v2957_v26  ;;  %v3053_v26 = vld [vmem:[%s4251_s1 + $0x314] ss:$8 sps:$4 sm:$0xff]  }
  0x8c   :  { %2124 = vmatpush1.bf16.msra.mxu0 %v2960_v27  ;;  %1920 = vmatprep.subr.bf16.mxu1 %v2965_v28  ;;  %v2401_v27 = vcombine.high %v3893_v25, %v3893_v25  ;;  %v3051_v28 = vld [vmem:[%s4251_s1 + $0x310] ss:$8 sps:$4 sm:$0xff]  }
  0x8d   :  { %2125 = vmatprep.subr.bf16.mxu0 %v2968_v29  ;;  %v3054_v29 = vld [vmem:[%s4251_s1 + $0x810] ss:$8 sps:$4 sm:$0xff]  }
  0x8f   :  { %1921 = vmatpush1.bf16.msra.mxu1 %v2963_v30  ;;  %v3059_v30 = vld [vmem:[%s4251_s1 + $0x324] ss:$8 sps:$4 sm:$0xff]  }
  0x90   :  { %2126 = vmatpush1.bf16.msra.mxu0 %v2966_v31  ;;  %1922 = vmatprep.subr.bf16.mxu1 %v2971_v32  ;;  %v3062_v31 = vld [vmem:[%s4251_s1 + $0x824] ss:$8 sps:$4 sm:$0xff]   ;;  %v3057_v32 = vld [vmem:[%s4251_s1 + $0x320] ss:$8 sps:$4 sm:$0xff]  }
  0x91   :  { %2127 = vmatprep.subr.bf16.mxu0 %v2974_v33  ;;  %v3060_v33 = vld [vmem:[%s4251_s1 + $0x820] ss:$8 sps:$4 sm:$0xff]  }
  0x93   :  { %1923 = vmatpush1.bf16.msra.mxu1 %v2969_v34  ;;  %v3065_v34 = vld [vmem:[%s4251_s1 + $0x334] ss:$8 sps:$4 sm:$0xff]  }
  0x94   :  { %2128 = vmatpush1.bf16.msra.mxu0 %v2972_v35  ;;  %1924 = vmatprep.subr.bf16.mxu1 %v2977_v36  ;;  %v3068_v35 = vld [vmem:[%s4251_s1 + $0x834] ss:$8 sps:$4 sm:$0xff]   ;;  %v3063_v36 = vld [vmem:[%s4251_s1 + $0x330] ss:$8 sps:$4 sm:$0xff]  }
  0x95   :  { %2129 = vmatprep.subr.bf16.mxu0 %v2980_v37  ;;  %v3066_v37 = vld [vmem:[%s4251_s1 + $0x830] ss:$8 sps:$4 sm:$0xff]  }
  0x97   :  { %1925 = vmatpush1.bf16.msra.mxu1 %v2975_v38  ;;  %v3071_v38 = vld [vmem:[%s4251_s1 + $0x344] ss:$8 sps:$4 sm:$0xff]  }
  0x98   :  { %2130 = vmatpush1.bf16.msra.mxu0 %v2978_v39  ;;  %1926 = vmatprep.subr.bf16.mxu1 %v2983_v40  ;;  %v3074_v39 = vld [vmem:[%s4251_s1 + $0x844] ss:$8 sps:$4 sm:$0xff]   ;;  %v3069_v40 = vld [vmem:[%s4251_s1 + $0x340] ss:$8 sps:$4 sm:$0xff]  }
  0x99   :  { %2131 = vmatprep.subr.bf16.mxu0 %v2986_v41  ;;  %v3072_v41 = vld [vmem:[%s4251_s1 + $0x840] ss:$8 sps:$4 sm:$0xff]  }
  0x9b   :  { %1927 = vmatpush1.bf16.msra.mxu1 %v2981_v42  ;;  %v3077_v42 = vld [vmem:[%s4251_s1 + $0x354] ss:$8 sps:$4 sm:$0xff]  }
  0x9c   :  { %2132 = vmatpush1.bf16.msra.mxu0 %v2984_v43  ;;  %1928 = vmatprep.subr.bf16.mxu1 %v2989_v44  ;;  %v3080_v43 = vld [vmem:[%s4251_s1 + $0x854] ss:$8 sps:$4 sm:$0xff]   ;;  %v3075_v44 = vld [vmem:[%s4251_s1 + $0x350] ss:$8 sps:$4 sm:$0xff]  }
  0x9d   :  { %2133 = vmatprep.subr.bf16.mxu0 %v2992_v45  ;;  %v3078_v45 = vld [vmem:[%s4251_s1 + $0x850] ss:$8 sps:$4 sm:$0xff]  }
  0x9f   :  { %1929 = vmatpush1.bf16.msra.mxu1 %v2987_v46  ;;  %v3083_v46 = vld [vmem:[%s4251_s1 + $0x364] ss:$8 sps:$4 sm:$0xff]  }
  0xa0   :  { %2134 = vmatpush1.bf16.msra.mxu0 %v2990_v47  ;;  %1930 = vmatprep.subr.bf16.mxu1 %v2995_v48  ;;  %v3086_v47 = vld [vmem:[%s4251_s1 + $0x864] ss:$8 sps:$4 sm:$0xff]   ;;  %v3081_v48 = vld [vmem:[%s4251_s1 + $0x360] ss:$8 sps:$4 sm:$0xff]  }
  0xa1   :  { %2135 = vmatprep.subr.bf16.mxu0 %v2998_v49  ;;  %v3084_v49 = vld [vmem:[%s4251_s1 + $0x860] ss:$8 sps:$4 sm:$0xff]  }
  0xa3   :  { %1931 = vmatpush1.bf16.msra.mxu1 %v2993_v50  ;;  %v3089_v50 = vld [vmem:[%s4251_s1 + $0x374] ss:$8 sps:$4 sm:$0xff]  }
  0xa4   :  { %2136 = vmatpush1.bf16.msra.mxu0 %v2996_v51  ;;  %1932 = vmatprep.subr.bf16.mxu1 %v3001_v52  ;;  %v3092_v51 = vld [vmem:[%s4251_s1 + $0x874] ss:$8 sps:$4 sm:$0xff]   ;;  %v3087_v52 = vld [vmem:[%s4251_s1 + $0x370] ss:$8 sps:$4 sm:$0xff]  }
  0xa5   :  { %2137 = vmatprep.subr.bf16.mxu0 %v3004_v53  ;;  %v3090_v53 = vld [vmem:[%s4251_s1 + $0x870] ss:$8 sps:$4 sm:$0xff]  }
  0xa7   :  { %1933 = vmatpush1.bf16.msra.mxu1 %v2999_v54  ;;  %v3095_v54 = vld [vmem:[%s4251_s1 + $0x384] ss:$8 sps:$4 sm:$0xff]  }
  0xa8   :  { %2138 = vmatpush1.bf16.msra.mxu0 %v3002_v55  ;;  %1934 = vmatprep.subr.bf16.mxu1 %v3007_v56  ;;  %v3098_v55 = vld [vmem:[%s4251_s1 + $0x884] ss:$8 sps:$4 sm:$0xff]   ;;  %v3093_v56 = vld [vmem:[%s4251_s1 + $0x380] ss:$8 sps:$4 sm:$0xff]  }
  0xa9   :  { %2139 = vmatprep.subr.bf16.mxu0 %v3010_v57  ;;  %v3096_v57 = vld [vmem:[%s4251_s1 + $0x880] ss:$8 sps:$4 sm:$0xff]  }
  0xab   :  { %1935 = vmatpush1.bf16.msra.mxu1 %v3005_v58  ;;  %v3101_v58 = vld [vmem:[%s4251_s1 + $0x394] ss:$8 sps:$4 sm:$0xff]  }
  0xac   :  { %2140 = vmatpush1.bf16.msra.mxu0 %v3008_v59  ;;  %1936 = vmatprep.subr.bf16.mxu1 %v3013_v60  ;;  %v3104_v59 = vld [vmem:[%s4251_s1 + $0x894] ss:$8 sps:$4 sm:$0xff]   ;;  %v3099_v60 = vld [vmem:[%s4251_s1 + $0x390] ss:$8 sps:$4 sm:$0xff]  }
  0xad   :  { %2141 = vmatprep.subr.bf16.mxu0 %v3016_v61  ;;  %v3102_v61 = vld [vmem:[%s4251_s1 + $0x890] ss:$8 sps:$4 sm:$0xff]  }
  0xaf   :  { %1937 = vmatpush1.bf16.msra.mxu1 %v3011_v62  ;;  %v3107_v62 = vld [vmem:[%s4251_s1 + $0x3a4] ss:$8 sps:$4 sm:$0xff]  }
  0xb0   :  { %2142 = vmatpush1.bf16.msra.mxu0 %v3014_v63  ;;  %1938 = vmatprep.subr.bf16.mxu1 %v3019_v0  ;;  %v3110_v63 = vld [vmem:[%s4251_s1 + $0x8a4] ss:$8 sps:$4 sm:$0xff]   ;;  %v3105_v0 = vld [vmem:[%s4251_s1 + $0x3a0] ss:$8 sps:$4 sm:$0xff]  }
  0xb1   :  { %2143 = vmatprep.subr.bf16.mxu0 %v3022_v1  ;;  %v3108_v1 = vld [vmem:[%s4251_s1 + $0x8a0] ss:$8 sps:$4 sm:$0xff]  }
  0xb3   :  { %1939 = vmatpush1.bf16.msra.mxu1 %v3017_v2  ;;  %v3113_v2 = vld [vmem:[%s4251_s1 + $0x3b4] ss:$8 sps:$4 sm:$0xff]  }
  0xb4   :  { %2144 = vmatpush1.bf16.msra.mxu0 %v3020_v3  ;;  %1940 = vmatprep.subr.bf16.mxu1 %v3025_v4  ;;  %v3116_v3 = vld [vmem:[%s4251_s1 + $0x8b4] ss:$8 sps:$4 sm:$0xff]   ;;  %v3111_v4 = vld [vmem:[%s4251_s1 + $0x3b0] ss:$8 sps:$4 sm:$0xff]  }
  0xb5   :  { %2145 = vmatprep.subr.bf16.mxu0 %v3028_v5  ;;  %v3114_v5 = vld [vmem:[%s4251_s1 + $0x8b0] ss:$8 sps:$4 sm:$0xff]  }
  0xb7   :  { %1941 = vmatpush1.bf16.msra.mxu1 %v3023_v6  ;;  %v3119_v6 = vld [vmem:[%s4251_s1 + $0x3c4] ss:$8 sps:$4 sm:$0xff]  }
  0xb8   :  { %2146 = vmatpush1.bf16.msra.mxu0 %v3026_v7  ;;  %1942 = vmatprep.subr.bf16.mxu1 %v3031_v8  ;;  %v3122_v7 = vld [vmem:[%s4251_s1 + $0x8c4] ss:$8 sps:$4 sm:$0xff]   ;;  %v3117_v8 = vld [vmem:[%s4251_s1 + $0x3c0] ss:$8 sps:$4 sm:$0xff]  }
  0xb9   :  { %2147 = vmatprep.subr.bf16.mxu0 %v3034_v9  ;;  %v3120_v9 = vld [vmem:[%s4251_s1 + $0x8c0] ss:$8 sps:$4 sm:$0xff]  }
  0xbb   :  { %1943 = vmatpush1.bf16.msra.mxu1 %v3029_v10  ;;  %v3125_v10 = vld [vmem:[%s4251_s1 + $0x3d4] ss:$8 sps:$4 sm:$0xff]  }
  0xbc   :  { %2148 = vmatpush1.bf16.msra.mxu0 %v3032_v11  ;;  %1944 = vmatprep.subr.bf16.mxu1 %v3037_v12  ;;  %v3128_v11 = vld [vmem:[%s4251_s1 + $0x8d4] ss:$8 sps:$4 sm:$0xff]   ;;  %v3123_v12 = vld [vmem:[%s4251_s1 + $0x3d0] ss:$8 sps:$4 sm:$0xff]  }
  0xbd   :  { %2149 = vmatprep.subr.bf16.mxu0 %v3040_v13  ;;  %v3126_v13 = vld [vmem:[%s4251_s1 + $0x8d0] ss:$8 sps:$4 sm:$0xff]  }
  0xbf   :  { %1945 = vmatpush1.bf16.msra.mxu1 %v3035_v14  ;;  %v3131_v14 = vld [vmem:[%s4251_s1 + $0x3e4] ss:$8 sps:$4 sm:$0xff]  }
  0xc0   :  { %2150 = vmatpush1.bf16.msra.mxu0 %v3038_v15  ;;  %1955 = vmatprep.subr.bf16.mxu1 %v3045_v16  ;;  %v3134_v15 = vld [vmem:[%s4251_s1 + $0x8e4] ss:$8 sps:$4 sm:$0xff]   ;;  %v3129_v16 = vld [vmem:[%s4251_s1 + $0x3e0] ss:$8 sps:$4 sm:$0xff]  }
  0xc1   :  { %2160 = vmatprep.subr.bf16.mxu0 %v3050_v17  ;;  %v3132_v17 = vld [vmem:[%s4251_s1 + $0x8e0] ss:$8 sps:$4 sm:$0xff]  }
  0xc2   :  { %1947 = vmatmul.mubr.bf16.vlgmr.msra.gmra.mrb[0].mxu1 %v2388_v22  ;;  %v3135_v22 = vld [vmem:[%s4251_s1 + $0x3f0] ss:$8 sps:$4 sm:$0xff]  }
  0xc3   :  { %2152 = vmatmul.mubr.bf16.vlgmr.msra.gmra.mrb[0].mxu0 %v2398_v23  ;;  %1956 = vmatpush1.bf16.msra.mxu1 %v3043_v19  ;;  %v3137_v19 = vld [vmem:[%s4251_s1 + $0x3f4] ss:$8 sps:$4 sm:$0xff]   ;;  %v3138_v23 = vld [vmem:[%s4251_s1 + $0x8f0] ss:$8 sps:$4 sm:$0xff]  }
  0xc4   :  { %2161 = vmatpush1.bf16.msra.mxu0 %v3048_v21  ;;  %1957 = vmatprep.subr.bf16.mxu1 %v3053_v26  ;;  %v3140_v21 = vld [vmem:[%s4251_s1 + $0x8f4] ss:$8 sps:$4 sm:$0xff]   ;;  %v3145_v26 = vld [vmem:[%s4251_s1 + $0x404] ss:$8 sps:$4 sm:$0xff]  }
  0xc5   :  { %2162 = vmatprep.subr.bf16.mxu0 %v3056_v18  ;;  %1987 = vmatprep.mubr.bf16.mxu1 %v2391_v20  ;;  %v3150_v18 = vld [vmem:[%s4253_s4 + $0x4] ss:$8 sps:$4 sm:$0xff]   ;;  %v2390_v20 = vcombine.low %v3888_v24, %v3888_v24  ;;  %v3153_v24 = vld [vmem:[%s4251_s1 + $0x414] ss:$8 sps:$4 sm:$0xff]  }
  0xc6   :  { %2192 = vmatprep.mubr.bf16.mxu0 %v2401_v27  ;;  %v2400_v27 = vcombine.low %v3893_v25, %v3893_v25  ;;  %v3156_v25 = vld [vmem:[%s4253_s4 + $0x14] ss:$8 sps:$4 sm:$0xff]  }
  0xc7   :  { %1958 = vmatpush1.bf16.msra.mxu1 %v3051_v28  ;;  %v4092_v28 = vld [vmem:[%s4252_s0 + $0x20] sm:$0xff] }
  0xc8   :  { %2163 = vmatpush1.bf16.msra.mxu0 %v3054_v29  ;;  %1959 = vmatprep.subr.bf16.mxu1 %v3059_v30  ;;  %v3143_v29 = vld [vmem:[%s4251_s1 + $0x400] ss:$8 sps:$4 sm:$0xff]  }
  0xc9   :  { %2164 = vmatprep.subr.bf16.mxu0 %v3062_v31  ;;  %v3148_v30 = vld [vmem:[%s4253_s4] ss:$8 sps:$4 sm:$0xff]   ;;  %v2393_v31 = vcombine.high %v4092_v28, %v4092_v28 }
  0xcb   :  { %1960 = vmatpush1.bf16.msra.mxu1 %v3057_v32  ;;  %v3151_v32 = vld [vmem:[%s4251_s1 + $0x410] ss:$8 sps:$4 sm:$0xff]  }
  0xcc   :  { %2165 = vmatpush1.bf16.msra.mxu0 %v3060_v33  ;;  %1961 = vmatprep.subr.bf16.mxu1 %v3065_v34  ;;  %v3154_v33 = vld [vmem:[%s4253_s4 + $0x10] ss:$8 sps:$4 sm:$0xff]   ;;  %v3159_v34 = vld [vmem:[%s4251_s1 + $0x424] ss:$8 sps:$4 sm:$0xff]  }
  0xcd   :  { %2166 = vmatprep.subr.bf16.mxu0 %v3068_v35  ;;  %v3162_v35 = vld [vmem:[%s4253_s4 + $0x24] ss:$8 sps:$4 sm:$0xff]  }
  0xcf   :  { %1962 = vmatpush1.bf16.msra.mxu1 %v3063_v36  ;;  %v3219_v36 = vmov 0  }
  0xd0   :  { %2167 = vmatpush1.bf16.msra.mxu0 %v3066_v37  ;;  %1963 = vmatprep.subr.bf16.mxu1 %v3071_v38  ;;  %v3157_v37 = vld [vmem:[%s4251_s1 + $0x420] ss:$8 sps:$4 sm:$0xff]  }
  0xd1   :  { %2168 = vmatprep.subr.bf16.mxu0 %v3074_v39  ;;  %v3160_v38 = vld [vmem:[%s4253_s4 + $0x20] ss:$8 sps:$4 sm:$0xff]   ;;  %v3165_v39 = vld [vmem:[%s4251_s1 + $0x434] ss:$8 sps:$4 sm:$0xff]  }
  0xd3   :  { %1964 = vmatpush1.bf16.msra.mxu1 %v3069_v40  ;;  %v3168_v40 = vld [vmem:[%s4253_s4 + $0x34] ss:$8 sps:$4 sm:$0xff]  }
  0xd4   :  { %2169 = vmatpush1.bf16.msra.mxu0 %v3072_v41  ;;  %1965 = vmatprep.subr.bf16.mxu1 %v3077_v42  ;;  %v3163_v41 = vld [vmem:[%s4251_s1 + $0x430] ss:$8 sps:$4 sm:$0xff]  }
  0xd5   :  { %2170 = vmatprep.subr.bf16.mxu0 %v3080_v43  ;;  %v3166_v42 = vld [vmem:[%s4253_s4 + $0x30] ss:$8 sps:$4 sm:$0xff]   ;;  %v3171_v43 = vld [vmem:[%s4251_s1 + $0x444] ss:$8 sps:$4 sm:$0xff]  }
  0xd7   :  { %1966 = vmatpush1.bf16.msra.mxu1 %v3075_v44  ;;  %v3174_v44 = vld [vmem:[%s4253_s4 + $0x44] ss:$8 sps:$4 sm:$0xff]  }
  0xd8   :  { %2171 = vmatpush1.bf16.msra.mxu0 %v3078_v45  ;;  %1967 = vmatprep.subr.bf16.mxu1 %v3083_v46  ;;  %v3169_v45 = vld [vmem:[%s4251_s1 + $0x440] ss:$8 sps:$4 sm:$0xff]  }
  0xd9   :  { %2172 = vmatprep.subr.bf16.mxu0 %v3086_v47  ;;  %v3172_v46 = vld [vmem:[%s4253_s4 + $0x40] ss:$8 sps:$4 sm:$0xff]   ;;  %v3177_v47 = vld [vmem:[%s4251_s1 + $0x454] ss:$8 sps:$4 sm:$0xff]  }
  0xdb   :  { %1968 = vmatpush1.bf16.msra.mxu1 %v3081_v48  ;;  %v3180_v48 = vld [vmem:[%s4253_s4 + $0x54] ss:$8 sps:$4 sm:$0xff]  }
  0xdc   :  { %2173 = vmatpush1.bf16.msra.mxu0 %v3084_v49  ;;  %1969 = vmatprep.subr.bf16.mxu1 %v3089_v50  ;;  %v3175_v49 = vld [vmem:[%s4251_s1 + $0x450] ss:$8 sps:$4 sm:$0xff]  }
  0xdd   :  { %2174 = vmatprep.subr.bf16.mxu0 %v3092_v51  ;;  %v3178_v50 = vld [vmem:[%s4253_s4 + $0x50] ss:$8 sps:$4 sm:$0xff]   ;;  %v3183_v51 = vld [vmem:[%s4251_s1 + $0x464] ss:$8 sps:$4 sm:$0xff]  }
  0xdf   :  { %1970 = vmatpush1.bf16.msra.mxu1 %v3087_v52  ;;  %v3186_v52 = vld [vmem:[%s4253_s4 + $0x64] ss:$8 sps:$4 sm:$0xff]  }
  0xe0   :  { %2175 = vmatpush1.bf16.msra.mxu0 %v3090_v53  ;;  %1971 = vmatprep.subr.bf16.mxu1 %v3095_v54  ;;  %v3181_v53 = vld [vmem:[%s4251_s1 + $0x460] ss:$8 sps:$4 sm:$0xff]  }
  0xe1   :  { %2176 = vmatprep.subr.bf16.mxu0 %v3098_v55  ;;  %v3184_v54 = vld [vmem:[%s4253_s4 + $0x60] ss:$8 sps:$4 sm:$0xff]   ;;  %v3189_v55 = vld [vmem:[%s4251_s1 + $0x474] ss:$8 sps:$4 sm:$0xff]  }
  0xe3   :  { %1972 = vmatpush1.bf16.msra.mxu1 %v3093_v56  ;;  %v3192_v56 = vld [vmem:[%s4253_s4 + $0x74] ss:$8 sps:$4 sm:$0xff]  }
  0xe4   :  { %2177 = vmatpush1.bf16.msra.mxu0 %v3096_v57  ;;  %1973 = vmatprep.subr.bf16.mxu1 %v3101_v58  ;;  %v3187_v57 = vld [vmem:[%s4251_s1 + $0x470] ss:$8 sps:$4 sm:$0xff]  }
  0xe5   :  { %2178 = vmatprep.subr.bf16.mxu0 %v3104_v59  ;;  %v3190_v58 = vld [vmem:[%s4253_s4 + $0x70] ss:$8 sps:$4 sm:$0xff]   ;;  %v3195_v59 = vld [vmem:[%s4251_s1 + $0x484] ss:$8 sps:$4 sm:$0xff]  }
  0xe7   :  { %1974 = vmatpush1.bf16.msra.mxu1 %v3099_v60  ;;  %v3193_v60 = vld [vmem:[%s4251_s1 + $0x480] ss:$8 sps:$4 sm:$0xff]  }
  0xe8   :  { %2179 = vmatpush1.bf16.msra.mxu0 %v3102_v61  ;;  %1975 = vmatprep.subr.bf16.mxu1 %v3107_v62  ;;  %v2208_v61 = vld [vmem:[%s4254_s3] sm:$0xf]  ;;  %v3198_v62 = vld [vmem:[%s4251_s1 + $0x494] ss:$8 sps:$4 sm:$0xff]  }
  0xe9   :  { %2180 = vmatprep.subr.bf16.mxu0 %v3110_v63  ;;  %v3196_v63 = vld [vmem:[%s4251_s1 + $0x490] ss:$8 sps:$4 sm:$0xff]  }
  0xeb   :  { %1976 = vmatpush1.bf16.msra.mxu1 %v3105_v0  ;;  %v3201_v0 = vld [vmem:[%s4251_s1 + $0x4a4] ss:$8 sps:$4 sm:$0xff]  }
  0xec   :  { %2181 = vmatpush1.bf16.msra.mxu0 %v3108_v1  ;;  %1977 = vmatprep.subr.bf16.mxu1 %v3113_v2  ;;  %v3199_v1 = vld [vmem:[%s4251_s1 + $0x4a0] ss:$8 sps:$4 sm:$0xff]   ;;  %v3204_v2 = vld [vmem:[%s4251_s1 + $0x4b4] ss:$8 sps:$4 sm:$0xff]  }
  0xed   :  { %2182 = vmatprep.subr.bf16.mxu0 %v3116_v3  ;;  %v3202_v3 = vld [vmem:[%s4251_s1 + $0x4b0] ss:$8 sps:$4 sm:$0xff]  }
  0xef   :  { %1978 = vmatpush1.bf16.msra.mxu1 %v3111_v4  ;;  %v3207_v4 = vld [vmem:[%s4251_s1 + $0x4c4] ss:$8 sps:$4 sm:$0xff]  }
  0xf0   :  { %2183 = vmatpush1.bf16.msra.mxu0 %v3114_v5  ;;  %1979 = vmatprep.subr.bf16.mxu1 %v3119_v6  ;;  %v3205_v5 = vld [vmem:[%s4251_s1 + $0x4c0] ss:$8 sps:$4 sm:$0xff]   ;;  %v3210_v6 = vld [vmem:[%s4251_s1 + $0x4d4] ss:$8 sps:$4 sm:$0xff]  }
  0xf1   :  { %2184 = vmatprep.subr.bf16.mxu0 %v3122_v7  ;;  %v3208_v7 = vld [vmem:[%s4251_s1 + $0x4d0] ss:$8 sps:$4 sm:$0xff]  }
  0xf3   :  { %1980 = vmatpush1.bf16.msra.mxu1 %v3117_v8  ;;  %v3213_v8 = vld [vmem:[%s4251_s1 + $0x4e4] ss:$8 sps:$4 sm:$0xff]  }
  0xf4   :  { %2185 = vmatpush1.bf16.msra.mxu0 %v3120_v9  ;;  %1981 = vmatprep.subr.bf16.mxu1 %v3125_v10  ;;  %v3211_v9 = vld [vmem:[%s4251_s1 + $0x4e0] ss:$8 sps:$4 sm:$0xff]   ;;  %v3216_v10 = vld [vmem:[%s4251_s1 + $0x4f4] ss:$8 sps:$4 sm:$0xff]  }
  0xf5   :  { %2186 = vmatprep.subr.bf16.mxu0 %v3128_v11  ;;  %v3214_v11 = vld [vmem:[%s4251_s1 + $0x4f0] ss:$8 sps:$4 sm:$0xff]  }
  0xf7   :  { %1982 = vmatpush1.bf16.msra.mxu1 %v3123_v12  ;;  %v2392_v12 = vcombine.low %v4092_v28, %v4092_v28 }
  0xf8   :  { %2187 = vmatpush1.bf16.msra.mxu0 %v3126_v13  ;;  %1983 = vmatprep.subr.bf16.mxu1 %v3131_v14 }
  0xf9   :  { %2188 = vmatprep.subr.bf16.mxu0 %v3134_v15 }
  0xfb   :  { %1984 = vmatpush1.bf16.msra.mxu1 %v3129_v16 }
  0xfc   :  { %2189 = vmatpush1.bf16.msra.mxu0 %v3132_v17  ;;  %1985 = vmatprep.subr.bf16.mxu1 %v3137_v19  ;;  %v2227_v17 = vlaneseq }
  0xfd   :  { %2190 = vmatprep.subr.bf16.mxu0 %v3140_v21 }
  0xfe   :  { %v2228_v19 = vshrl.u32 %v2227_v17, 7 }
  0xff   :  { %1986 = vmatpush1.bf16.msra.mxu1 %v3135_v22  ;;  %v2225_v22 = vld [vmem:[%s4255_s5] sm:$0x3] }
 0x100   :  { %2191 = vmatpush1.bf16.msra.mxu0 %v3138_v23  ;;  %1996 = vmatprep.subr.bf16.mxu1 %v3145_v26  ;;  %v2229_v21 = vsub.s32 0, %v2228_v19  ;;  %v2233_v23 = vsub.s32 1, %v2228_v19 }
 0x101   :  { %2317 = vmatprep.subr.bf16.mxu0 %v3150_v18  ;;  %v2360_v18 = vld [vmem:[%s4256_s2] sm:$0x3] }
 0x102   :  { %1988 = vmatmul.mubr.bf16.vlgmr.msra.gmra.mrb[0].mxu1 %v2390_v20  ;;  %v2230_v26 = vrot.slane %v2225_v22, %v2229_v21  ;;  %v2234_v20 = vrot.slane %v2225_v22, %v2233_v23  ;;  %v2365_v28 = vrot.slane %v2360_v18, %v2229_v21 }
 0x103   :  { %2193 = vmatmul.mubr.bf16.vlgmr.msra.gmra.mrb[0].mxu0 %v2400_v27  ;;  %1997 = vmatpush1.bf16.msra.mxu1 %v3143_v29 }
 0x104   :  { %2318 = vmatpush1.bf16.msra.mxu0 %v3148_v30  ;;  %1998 = vmatprep.subr.bf16.mxu1 %v3153_v24  ;;  %v2369_v24 = vrot.slane %v2360_v18, %v2233_v23 }
 0x105   :  { %2319 = vmatprep.subr.bf16.mxu0 %v3156_v25  ;;  %2349 = vmatprep.mubr.bf16.mxu0 %v3219_v36 }
 0x106   :  { %2028 = vmatprep.mubr.bf16.mxu1 %v2393_v31 }
 0x107   :  { %1999 = vmatpush1.bf16.msra.mxu1 %v3151_v32 }
 0x108   :  { %2320 = vmatpush1.bf16.msra.mxu0 %v3154_v33  ;;  %2000 = vmatprep.subr.bf16.mxu1 %v3159_v34 }
 0x109   :  { %2321 = vmatprep.subr.bf16.mxu0 %v3162_v35 }
 0x10b   :  { %2001 = vmatpush1.bf16.msra.mxu1 %v3157_v37 }
 0x10c   :  { %2322 = vmatpush1.bf16.msra.mxu0 %v3160_v38  ;;  %2002 = vmatprep.subr.bf16.mxu1 %v3165_v39 }
 0x10d   :  { %2323 = vmatprep.subr.bf16.mxu0 %v3168_v40 }
 0x10f   :  { %2003 = vmatpush1.bf16.msra.mxu1 %v3163_v41 }
 0x110   :  { %2324 = vmatpush1.bf16.msra.mxu0 %v3166_v42  ;;  %2004 = vmatprep.subr.bf16.mxu1 %v3171_v43 }
 0x111   :  { %2325 = vmatprep.subr.bf16.mxu0 %v3174_v44 }
 0x113   :  { %2005 = vmatpush1.bf16.msra.mxu1 %v3169_v45 }
 0x114   :  { %2326 = vmatpush1.bf16.msra.mxu0 %v3172_v46  ;;  %2006 = vmatprep.subr.bf16.mxu1 %v3177_v47 }
 0x115   :  { %2327 = vmatprep.subr.bf16.mxu0 %v3180_v48 }
 0x117   :  { %2007 = vmatpush1.bf16.msra.mxu1 %v3175_v49 }
 0x118   :  { %2328 = vmatpush1.bf16.msra.mxu0 %v3178_v50  ;;  %2008 = vmatprep.subr.bf16.mxu1 %v3183_v51 }
 0x119   :  { %2329 = vmatprep.subr.bf16.mxu0 %v3186_v52 }
 0x11b   :  { %2009 = vmatpush1.bf16.msra.mxu1 %v3181_v53 }
 0x11c   :  { %2330 = vmatpush1.bf16.msra.mxu0 %v3184_v54  ;;  %2010 = vmatprep.subr.bf16.mxu1 %v3189_v55 }
 0x11d   :  { %2331 = vmatprep.subr.bf16.mxu0 %v3192_v56 }
 0x11f   :  { %2011 = vmatpush1.bf16.msra.mxu1 %v3187_v57 }
 0x120   :  { %2332 = vmatpush1.bf16.msra.mxu0 %v3190_v58  ;;  %2012 = vmatprep.subr.bf16.mxu1 %v3195_v59 }
 0x123   :  { %2350 = vmatmul.mubr.bf16.vlgmr.msra.gmra.mrb[0].mxu0 %v2208_v61  ;;  %2013 = vmatpush1.bf16.msra.mxu1 %v3193_v60 }
 0x124   :  { %2014 = vmatprep.subr.bf16.mxu1 %v3198_v62 }
 0x127   :  { %2015 = vmatpush1.bf16.msra.mxu1 %v3196_v63 }
 0x128   :  { %2016 = vmatprep.subr.bf16.mxu1 %v3201_v0 }
 0x12b   :  { %2017 = vmatpush1.bf16.msra.mxu1 %v3199_v1 }
 0x12c   :  { %2018 = vmatprep.subr.bf16.mxu1 %v3204_v2 }
 0x12f   :  { %2019 = vmatpush1.bf16.msra.mxu1 %v3202_v3 }
 0x130   :  { %2020 = vmatprep.subr.bf16.mxu1 %v3207_v4 }
 0x133   :  { %2021 = vmatpush1.bf16.msra.mxu1 %v3205_v5 }
 0x134   :  { %2022 = vmatprep.subr.bf16.mxu1 %v3210_v6 }
 0x137   :  { %2023 = vmatpush1.bf16.msra.mxu1 %v3208_v7 }
 0x138   :  { %2024 = vmatprep.subr.bf16.mxu1 %v3213_v8 }
 0x13b   :  { %2025 = vmatpush1.bf16.msra.mxu1 %v3211_v9 }
 0x13c   :  { %2026 = vmatprep.subr.bf16.mxu1 %v3216_v10 }
 0x13f   :  { %2027 = vmatpush1.bf16.msra.mxu1 %v3214_v11 }
 0x142   :  { %2029 = vmatmul.mubr.bf16.vlgmr.msra.gmra.mrb[0].mxu1 %v2392_v12 }
 0x1f6   :  { %v2351_v13 = vpop.f32.mrb[0].mxu0 }
 0x1f7   :  { %v2353_v14 = vpop.f32.mrb[1].mxu0 }
 0x1f8   :  { %v2355_v15 = vpop.f32.mrb[2].mxu0 }
 0x1f9   :  { %v2356_v16 = vpop.f32.mrb[3].mxu0 }
 0x215   :  { %v2030_v27 = vpop.f32.mrb[0].mxu1 }
 0x216   :  { %v2706_v29 = vadd.f32 %v2230_v26, %v2030_v27  ;;  %v2032_v30 = vpop.f32.mrb[1].mxu1 }
 0x217   :  { %v2709_v25 = vadd.f32 %v2234_v20, %v2032_v30  ;;  %v2034_v31 = vpop.f32.mrb[2].mxu1 }
 0x218   :  { %v2707_v32 = vadd.f32 %v2706_v29, %v2351_v13  ;;  %v2035_v33 = vpop.f32.mrb[3].mxu1 }
 0x219   :  { %v2710_v34 = vadd.f32 %v2709_v25, %v2353_v14 }
 0x21a   :  { %v2708_v35 = vadd.f32 %v2707_v32, %v2365_v28 }
 0x21b   :  { %v2711_v36 = vadd.f32 %v2710_v34, %v2369_v24 }
 0x21c   :  { %v2376_v37 = vmax.f32 %v2708_v35, 0.0 }
 0x21d   :  { %v2377_v38 = vmax.f32 %v2711_v36, 0.0 }
 0x21e   :  { %2378 = vst [vmem:[%s4257_s6] sm:$0xff] %v2376_v37 }
 0x21f   :  { %2379 = vst [vmem:[%s4257_s6 + $0x8] sm:$0xff] %v2377_v38 }

// kernel: _lambda_.19
= control target key start
LH: loop header
LB: loop body
LE: loop exit
PB: predicated region body
PF: predicated region fallthrough
CT: control target
= control target key end

     0   :  { %s4645_s12 = smov 0   ;;  %s4647_s13 = smov 0   ;;  %s5664_s0 = inlined_call_operand.vmem [shape: bf16[8,2304], index: 0, kind: input, shape index: {}]   ;;  %s5665_s1 = inlined_call_operand.vmem [shape: bf16[2304,512], index: 1, kind: input, shape index: {}]   ;;  %s5666_s2 = inlined_call_operand.vmem [shape: f32[1,512], index: 2, kind: input, shape index: {}]   ;;  %s5667_s3 = inlined_call_operand.vmem [shape: f32[8,512], index: 3, kind: output, shape index: {}]  }
   0x1   :  { %s4649_s14 = smov 0   ;;  %s4651_s15 = smov 0  }
   0x2   :  { %s4653_s16 = smov 0  }
   0x3 LB: > { %s28_s17 = sadd.s32 1, %s4619_s15  ;;  %p76_p1 = scmp.ne.s32.totalorder %s4611_s13, %s4607_s12  ;;  %s4623_s16 = sphi %s4653_s16, %s13_s16   ;;  %s4619_s15 = sphi %s4651_s15, %s5671_s15   ;;  %s4615_s14 = sphi %s4649_s14, %s5670_s14   ;;  %s4611_s13 = sphi %s4647_s13, %s5669_s13   ;;  %s4607_s12 = sphi %s4645_s12, %s5668_s12  }
   0x4   : > { %p30_p0 = scmp.ge.s32.totalorder %s28_s17, 2  ;;  %p77_p2 = scmp.eq.s32.totalorder %s4623_s16, 0 }
   0x5   : > { %s69_s19 = sadd.s32 1, %s4611_s13  ;;  %p3777_p5 = scmp.ge.s32.totalorder %s4623_s16, 2 }
   0x6   : > { %s5673_s17 = smov (%p30_p0, %s28_s17), 0  ;;  %p78_p3 = por %p77_p2, %p76_p1 }
   0x7   : > { %s65_s18 = ssub.s32 %s4619_s15, %s5673_s17  ;;  %169 = sbr.rel (%p3777_p5) target bundleno = 162 (0xa2), region = 20 }
   0x8   : > { %p67_p4 = scmp.eq.s32.totalorder %s65_s18, 0 }
   0xa   : > { %s4680_s20 = scalar_select %p67_p4, %s4611_s13, %s69_s19  }
   0xe   : > { %172 = sbr.rel (!%p78_p3) target bundleno = 162 (0xa2), region = 24  ;;  %s174_s21 = sand.u32 (%p78_p3), 1, %s4611_s13  }
   0xf   : > { %s4092_s22 = sshll.u32 (%p78_p3), %s4619_s15, 3  ;;  %s4093_s23 = smul.u32 (%p78_p3), 2304, %s174_s21 }
  0x10   : > { %s4688_s26 = scalar_lea.vmem (%p78_p3), %s5665_s1, %s4092_s22 }
  0x11   : > { %v784_v0 = vld [vmem:[%s4688_s26] sm:$0xff] (%p78_p3)  ;;  %v786_v1 = vld [vmem:[%s4688_s26 + $0x10] sm:$0xff] (%p78_p3)  ;;  %s4696_s27 = scalar_lea.vmem (%p78_p3), [#allocation3], %s4093_s23 }
  0x12   : > { %v788_v2 = vld [vmem:[%s4688_s26 + $0x20] sm:$0xff] (%p78_p3)  ;;  %v790_v3 = vld [vmem:[%s4688_s26 + $0x30] sm:$0xff] (%p78_p3)  ;;  %785 = vst [vmem:[%s4696_s27] sm:$0xff] (%p78_p3), %v784_v0  ;;  %787 = vst [vmem:[%s4696_s27 + $0x8] sm:$0xff] (%p78_p3), %v786_v1 }
  0x13   : > { %v792_v4 = vld [vmem:[%s4688_s26 + $0x40] sm:$0xff] (%p78_p3)  ;;  %v794_v5 = vld [vmem:[%s4688_s26 + $0x50] sm:$0xff] (%p78_p3)  ;;  %789 = vst [vmem:[%s4696_s27 + $0x10] sm:$0xff] (%p78_p3), %v788_v2  ;;  %791 = vst [vmem:[%s4696_s27 + $0x18] sm:$0xff] (%p78_p3), %v790_v3 }
  0x14   : > { %793 = vst [vmem:[%s4696_s27 + $0x20] sm:$0xff] (%p78_p3), %v792_v4  ;;  %795 = vst [vmem:[%s4696_s27 + $0x28] sm:$0xff] (%p78_p3), %v794_v5  ;;  %v796_v6 = vld [vmem:[%s4688_s26 + $0x60] sm:$0xff] (%p78_p3)  ;;  %v798_v7 = vld [vmem:[%s4688_s26 + $0x70] sm:$0xff] (%p78_p3) }
  0x15   : > { %v800_v8 = vld [vmem:[%s4688_s26 + $0x80] sm:$0xff]  ;;  %797 = vst [vmem:[%s4696_s27 + $0x30] sm:$0xff] %v796_v6  ;;  %799 = vst [vmem:[%s4696_s27 + $0x38] sm:$0xff] %v798_v7  ;;  %v802_v9 = vld [vmem:[%s4688_s26 + $0x90] sm:$0xff] }
  0x16   : > { %801 = vst [vmem:[%s4696_s27 + $0x40] sm:$0xff] %v800_v8  ;;  %v804_v10 = vld [vmem:[%s4688_s26 + $0xa0] sm:$0xff]  ;;  %v806_v11 = vld [vmem:[%s4688_s26 + $0xb0] sm:$0xff]  ;;  %803 = vst [vmem:[%s4696_s27 + $0x48] sm:$0xff] %v802_v9 }
  0x17   : > { %805 = vst [vmem:[%s4696_s27 + $0x50] sm:$0xff] %v804_v10  ;;  %807 = vst [vmem:[%s4696_s27 + $0x58] sm:$0xff] %v806_v11  ;;  %v808_v12 = vld [vmem:[%s4688_s26 + $0xc0] sm:$0xff]  ;;  %v810_v13 = vld [vmem:[%s4688_s26 + $0xd0] sm:$0xff] }
  0x18   : > { %v812_v14 = vld [vmem:[%s4688_s26 + $0xe0] sm:$0xff]  ;;  %809 = vst [vmem:[%s4696_s27 + $0x60] sm:$0xff] %v808_v12  ;;  %811 = vst [vmem:[%s4696_s27 + $0x68] sm:$0xff] %v810_v13  ;;  %v814_v15 = vld [vmem:[%s4688_s26 + $0xf0] sm:$0xff] }
  0x19   : > { %813 = vst [vmem:[%s4696_s27 + $0x70] sm:$0xff] %v812_v14  ;;  %v816_v16 = vld [vmem:[%s4688_s26 + $0x100] sm:$0xff]  ;;  %v818_v17 = vld [vmem:[%s4688_s26 + $0x110] sm:$0xff]  ;;  %815 = vst [vmem:[%s4696_s27 + $0x78] sm:$0xff] %v814_v15 }
  0x1a   : > { %817 = vst [vmem:[%s4696_s27 + $0x80] sm:$0xff] %v816_v16  ;;  %819 = vst [vmem:[%s4696_s27 + $0x88] sm:$0xff] %v818_v17  ;;  %v820_v18 = vld [vmem:[%s4688_s26 + $0x120] sm:$0xff]  ;;  %v822_v19 = vld [vmem:[%s4688_s26 + $0x130] sm:$0xff] }
  0x1b   : > { %v824_v20 = vld [vmem:[%s4688_s26 + $0x140] sm:$0xff]  ;;  %821 = vst [vmem:[%s4696_s27 + $0x90] sm:$0xff] %v820_v18  ;;  %823 = vst [vmem:[%s4696_s27 + $0x98] sm:$0xff] %v822_v19  ;;  %v826_v21 = vld [vmem:[%s4688_s26 + $0x150] sm:$0xff] }
  0x1c   : > { %825 = vst [vmem:[%s4696_s27 + $0xa0] sm:$0xff] %v824_v20  ;;  %v828_v22 = vld [vmem:[%s4688_s26 + $0x160] sm:$0xff]  ;;  %v830_v23 = vld [vmem:[%s4688_s26 + $0x170] sm:$0xff]  ;;  %827 = vst [vmem:[%s4696_s27 + $0xa8] sm:$0xff] %v826_v21 }
  0x1d   : > { %829 = vst [vmem:[%s4696_s27 + $0xb0] sm:$0xff] %v828_v22  ;;  %831 = vst [vmem:[%s4696_s27 + $0xb8] sm:$0xff] %v830_v23  ;;  %v832_v24 = vld [vmem:[%s4688_s26 + $0x180] sm:$0xff]  ;;  %v834_v25 = vld [vmem:[%s4688_s26 + $0x190] sm:$0xff] }
  0x1e   : > { %v836_v26 = vld [vmem:[%s4688_s26 + $0x1a0] sm:$0xff]  ;;  %833 = vst [vmem:[%s4696_s27 + $0xc0] sm:$0xff] %v832_v24  ;;  %835 = vst [vmem:[%s4696_s27 + $0xc8] sm:$0xff] %v834_v25  ;;  %v838_v27 = vld [vmem:[%s4688_s26 + $0x1b0] sm:$0xff] }
  0x1f   : > { %837 = vst [vmem:[%s4696_s27 + $0xd0] sm:$0xff] %v836_v26  ;;  %v840_v28 = vld [vmem:[%s4688_s26 + $0x1c0] sm:$0xff]  ;;  %v842_v29 = vld [vmem:[%s4688_s26 + $0x1d0] sm:$0xff]  ;;  %839 = vst [vmem:[%s4696_s27 + $0xd8] sm:$0xff] %v838_v27 }
  0x20   : > { %841 = vst [vmem:[%s4696_s27 + $0xe0] sm:$0xff] %v840_v28  ;;  %843 = vst [vmem:[%s4696_s27 + $0xe8] sm:$0xff] %v842_v29  ;;  %v844_v30 = vld [vmem:[%s4688_s26 + $0x1e0] sm:$0xff]  ;;  %v846_v31 = vld [vmem:[%s4688_s26 + $0x1f0] sm:$0xff] }
  0x21   : > { %v848_v32 = vld [vmem:[%s4688_s26 + $0x200] sm:$0xff]  ;;  %845 = vst [vmem:[%s4696_s27 + $0xf0] sm:$0xff] %v844_v30  ;;  %847 = vst [vmem:[%s4696_s27 + $0xf8] sm:$0xff] %v846_v31  ;;  %v850_v33 = vld [vmem:[%s4688_s26 + $0x210] sm:$0xff] }
  0x22   : > { %849 = vst [vmem:[%s4696_s27 + $0x100] sm:$0xff] %v848_v32  ;;  %v852_v34 = vld [vmem:[%s4688_s26 + $0x220] sm:$0xff]  ;;  %v854_v35 = vld [vmem:[%s4688_s26 + $0x230] sm:$0xff]  ;;  %851 = vst [vmem:[%s4696_s27 + $0x108] sm:$0xff] %v850_v33 }
  0x23   : > { %853 = vst [vmem:[%s4696_s27 + $0x110] sm:$0xff] %v852_v34  ;;  %855 = vst [vmem:[%s4696_s27 + $0x118] sm:$0xff] %v854_v35  ;;  %v856_v36 = vld [vmem:[%s4688_s26 + $0x240] sm:$0xff]  ;;  %v858_v37 = vld [vmem:[%s4688_s26 + $0x250] sm:$0xff] }
  0x24   : > { %v860_v38 = vld [vmem:[%s4688_s26 + $0x260] sm:$0xff]  ;;  %857 = vst [vmem:[%s4696_s27 + $0x120] sm:$0xff] %v856_v36  ;;  %859 = vst [vmem:[%s4696_s27 + $0x128] sm:$0xff] %v858_v37  ;;  %v862_v39 = vld [vmem:[%s4688_s26 + $0x270] sm:$0xff] }
  0x25   : > { %861 = vst [vmem:[%s4696_s27 + $0x130] sm:$0xff] %v860_v38  ;;  %v864_v40 = vld [vmem:[%s4688_s26 + $0x280] sm:$0xff]  ;;  %v866_v41 = vld [vmem:[%s4688_s26 + $0x290] sm:$0xff]  ;;  %863 = vst [vmem:[%s4696_s27 + $0x138] sm:$0xff] %v862_v39 }
  0x26   : > { %865 = vst [vmem:[%s4696_s27 + $0x140] sm:$0xff] %v864_v40  ;;  %867 = vst [vmem:[%s4696_s27 + $0x148] sm:$0xff] %v866_v41  ;;  %v868_v42 = vld [vmem:[%s4688_s26 + $0x2a0] sm:$0xff]  ;;  %v870_v43 = vld [vmem:[%s4688_s26 + $0x2b0] sm:$0xff] }
  0x27   : > { %v872_v44 = vld [vmem:[%s4688_s26 + $0x2c0] sm:$0xff]  ;;  %869 = vst [vmem:[%s4696_s27 + $0x150] sm:$0xff] %v868_v42  ;;  %871 = vst [vmem:[%s4696_s27 + $0x158] sm:$0xff] %v870_v43  ;;  %v874_v45 = vld [vmem:[%s4688_s26 + $0x2d0] sm:$0xff] }
  0x28   : > { %873 = vst [vmem:[%s4696_s27 + $0x160] sm:$0xff] %v872_v44  ;;  %v876_v46 = vld [vmem:[%s4688_s26 + $0x2e0] sm:$0xff]  ;;  %v878_v47 = vld [vmem:[%s4688_s26 + $0x2f0] sm:$0xff]  ;;  %875 = vst [vmem:[%s4696_s27 + $0x168] sm:$0xff] %v874_v45 }
  0x29   : > { %877 = vst [vmem:[%s4696_s27 + $0x170] sm:$0xff] %v876_v46  ;;  %879 = vst [vmem:[%s4696_s27 + $0x178] sm:$0xff] %v878_v47  ;;  %v880_v48 = vld [vmem:[%s4688_s26 + $0x300] sm:$0xff]  ;;  %v882_v49 = vld [vmem:[%s4688_s26 + $0x310] sm:$0xff] }
  0x2a   : > { %v884_v50 = vld [vmem:[%s4688_s26 + $0x320] sm:$0xff]  ;;  %881 = vst [vmem:[%s4696_s27 + $0x180] sm:$0xff] %v880_v48  ;;  %883 = vst [vmem:[%s4696_s27 + $0x188] sm:$0xff] %v882_v49  ;;  %v886_v51 = vld [vmem:[%s4688_s26 + $0x330] sm:$0xff] }
  0x2b   : > { %885 = vst [vmem:[%s4696_s27 + $0x190] sm:$0xff] %v884_v50  ;;  %v888_v52 = vld [vmem:[%s4688_s26 + $0x340] sm:$0xff]  ;;  %v890_v53 = vld [vmem:[%s4688_s26 + $0x350] sm:$0xff]  ;;  %887 = vst [vmem:[%s4696_s27 + $0x198] sm:$0xff] %v886_v51 }
  0x2c   : > { %889 = vst [vmem:[%s4696_s27 + $0x1a0] sm:$0xff] %v888_v52  ;;  %891 = vst [vmem:[%s4696_s27 + $0x1a8] sm:$0xff] %v890_v53  ;;  %v892_v54 = vld [vmem:[%s4688_s26 + $0x360] sm:$0xff]  ;;  %v894_v55 = vld [vmem:[%s4688_s26 + $0x370] sm:$0xff] }
  0x2d   : > { %v896_v56 = vld [vmem:[%s4688_s26 + $0x380] sm:$0xff]  ;;  %893 = vst [vmem:[%s4696_s27 + $0x1b0] sm:$0xff] %v892_v54  ;;  %895 = vst [vmem:[%s4696_s27 + $0x1b8] sm:$0xff] %v894_v55  ;;  %v898_v57 = vld [vmem:[%s4688_s26 + $0x390] sm:$0xff] }
  0x2e   : > { %897 = vst [vmem:[%s4696_s27 + $0x1c0] sm:$0xff] %v896_v56  ;;  %v900_v58 = vld [vmem:[%s4688_s26 + $0x3a0] sm:$0xff]  ;;  %v902_v59 = vld [vmem:[%s4688_s26 + $0x3b0] sm:$0xff]  ;;  %899 = vst [vmem:[%s4696_s27 + $0x1c8] sm:$0xff] %v898_v57 }
  0x2f   : > { %901 = vst [vmem:[%s4696_s27 + $0x1d0] sm:$0xff] %v900_v58  ;;  %903 = vst [vmem:[%s4696_s27 + $0x1d8] sm:$0xff] %v902_v59  ;;  %v904_v60 = vld [vmem:[%s4688_s26 + $0x3c0] sm:$0xff]  ;;  %v906_v61 = vld [vmem:[%s4688_s26 + $0x3d0] sm:$0xff] }
  0x30   : > { %v908_v62 = vld [vmem:[%s4688_s26 + $0x3e0] sm:$0xff]  ;;  %905 = vst [vmem:[%s4696_s27 + $0x1e0] sm:$0xff] %v904_v60  ;;  %907 = vst [vmem:[%s4696_s27 + $0x1e8] sm:$0xff] %v906_v61  ;;  %v910_v63 = vld [vmem:[%s4688_s26 + $0x3f0] sm:$0xff] }
  0x31   : > { %909 = vst [vmem:[%s4696_s27 + $0x1f0] sm:$0xff] %v908_v62  ;;  %v912_v0 = vld [vmem:[%s4688_s26 + $0x400] sm:$0xff]  ;;  %v914_v1 = vld [vmem:[%s4688_s26 + $0x410] sm:$0xff]  ;;  %911 = vst [vmem:[%s4696_s27 + $0x1f8] sm:$0xff] %v910_v63 }
  0x32   : > { %913 = vst [vmem:[%s4696_s27 + $0x200] sm:$0xff] %v912_v0  ;;  %915 = vst [vmem:[%s4696_s27 + $0x208] sm:$0xff] %v914_v1  ;;  %v916_v2 = vld [vmem:[%s4688_s26 + $0x420] sm:$0xff]  ;;  %v918_v3 = vld [vmem:[%s4688_s26 + $0x430] sm:$0xff] }
  0x33   : > { %v920_v4 = vld [vmem:[%s4688_s26 + $0x440] sm:$0xff]  ;;  %917 = vst [vmem:[%s4696_s27 + $0x210] sm:$0xff] %v916_v2  ;;  %919 = vst [vmem:[%s4696_s27 + $0x218] sm:$0xff] %v918_v3  ;;  %v922_v5 = vld [vmem:[%s4688_s26 + $0x450] sm:$0xff] }
  0x34   : > { %921 = vst [vmem:[%s4696_s27 + $0x220] sm:$0xff] %v920_v4  ;;  %v924_v6 = vld [vmem:[%s4688_s26 + $0x460] sm:$0xff]  ;;  %v926_v7 = vld [vmem:[%s4688_s26 + $0x470] sm:$0xff]  ;;  %923 = vst [vmem:[%s4696_s27 + $0x228] sm:$0xff] %v922_v5 }
  0x35   : > { %925 = vst [vmem:[%s4696_s27 + $0x230] sm:$0xff] %v924_v6  ;;  %927 = vst [vmem:[%s4696_s27 + $0x238] sm:$0xff] %v926_v7  ;;  %v928_v8 = vld [vmem:[%s4688_s26 + $0x480] sm:$0xff]  ;;  %v930_v9 = vld [vmem:[%s4688_s26 + $0x490] sm:$0xff] }
  0x36   : > { %v932_v10 = vld [vmem:[%s4688_s26 + $0x4a0] sm:$0xff]  ;;  %929 = vst [vmem:[%s4696_s27 + $0x240] sm:$0xff] %v928_v8  ;;  %931 = vst [vmem:[%s4696_s27 + $0x248] sm:$0xff] %v930_v9  ;;  %v934_v11 = vld [vmem:[%s4688_s26 + $0x4b0] sm:$0xff] }
  0x37   : > { %933 = vst [vmem:[%s4696_s27 + $0x250] sm:$0xff] %v932_v10  ;;  %v936_v12 = vld [vmem:[%s4688_s26 + $0x4c0] sm:$0xff]  ;;  %v938_v13 = vld [vmem:[%s4688_s26 + $0x4d0] sm:$0xff]  ;;  %935 = vst [vmem:[%s4696_s27 + $0x258] sm:$0xff] %v934_v11 }
  0x38   : > { %937 = vst [vmem:[%s4696_s27 + $0x260] sm:$0xff] %v936_v12  ;;  %939 = vst [vmem:[%s4696_s27 + $0x268] sm:$0xff] %v938_v13  ;;  %v940_v14 = vld [vmem:[%s4688_s26 + $0x4e0] sm:$0xff]  ;;  %v942_v15 = vld [vmem:[%s4688_s26 + $0x4f0] sm:$0xff] }
  0x39   : > { %v944_v16 = vld [vmem:[%s4688_s26 + $0x500] sm:$0xff]  ;;  %941 = vst [vmem:[%s4696_s27 + $0x270] sm:$0xff] %v940_v14  ;;  %943 = vst [vmem:[%s4696_s27 + $0x278] sm:$0xff] %v942_v15  ;;  %v946_v17 = vld [vmem:[%s4688_s26 + $0x510] sm:$0xff] }
  0x3a   : > { %945 = vst [vmem:[%s4696_s27 + $0x280] sm:$0xff] %v944_v16  ;;  %v948_v18 = vld [vmem:[%s4688_s26 + $0x520] sm:$0xff]  ;;  %v950_v19 = vld [vmem:[%s4688_s26 + $0x530] sm:$0xff]  ;;  %947 = vst [vmem:[%s4696_s27 + $0x288] sm:$0xff] %v946_v17 }
  0x3b   : > { %949 = vst [vmem:[%s4696_s27 + $0x290] sm:$0xff] %v948_v18  ;;  %951 = vst [vmem:[%s4696_s27 + $0x298] sm:$0xff] %v950_v19  ;;  %v952_v20 = vld [vmem:[%s4688_s26 + $0x540] sm:$0xff]  ;;  %v954_v21 = vld [vmem:[%s4688_s26 + $0x550] sm:$0xff] }
  0x3c   : > { %v956_v22 = vld [vmem:[%s4688_s26 + $0x560] sm:$0xff]  ;;  %953 = vst [vmem:[%s4696_s27 + $0x2a0] sm:$0xff] %v952_v20  ;;  %955 = vst [vmem:[%s4696_s27 + $0x2a8] sm:$0xff] %v954_v21  ;;  %v958_v23 = vld [vmem:[%s4688_s26 + $0x570] sm:$0xff] }
  0x3d   : > { %957 = vst [vmem:[%s4696_s27 + $0x2b0] sm:$0xff] %v956_v22  ;;  %v960_v24 = vld [vmem:[%s4688_s26 + $0x580] sm:$0xff]  ;;  %v962_v25 = vld [vmem:[%s4688_s26 + $0x590] sm:$0xff]  ;;  %959 = vst [vmem:[%s4696_s27 + $0x2b8] sm:$0xff] %v958_v23 }
  0x3e   : > { %961 = vst [vmem:[%s4696_s27 + $0x2c0] sm:$0xff] %v960_v24  ;;  %963 = vst [vmem:[%s4696_s27 + $0x2c8] sm:$0xff] %v962_v25  ;;  %v964_v26 = vld [vmem:[%s4688_s26 + $0x5a0] sm:$0xff]  ;;  %v966_v27 = vld [vmem:[%s4688_s26 + $0x5b0] sm:$0xff] }
  0x3f   : > { %v968_v28 = vld [vmem:[%s4688_s26 + $0x5c0] sm:$0xff]  ;;  %965 = vst [vmem:[%s4696_s27 + $0x2d0] sm:$0xff] %v964_v26  ;;  %967 = vst [vmem:[%s4696_s27 + $0x2d8] sm:$0xff] %v966_v27  ;;  %v970_v29 = vld [vmem:[%s4688_s26 + $0x5d0] sm:$0xff] }
  0x40   : > { %969 = vst [vmem:[%s4696_s27 + $0x2e0] sm:$0xff] %v968_v28  ;;  %v972_v30 = vld [vmem:[%s4688_s26 + $0x5e0] sm:$0xff]  ;;  %v974_v31 = vld [vmem:[%s4688_s26 + $0x5f0] sm:$0xff]  ;;  %971 = vst [vmem:[%s4696_s27 + $0x2e8] sm:$0xff] %v970_v29 }
  0x41   : > { %973 = vst [vmem:[%s4696_s27 + $0x2f0] sm:$0xff] %v972_v30  ;;  %975 = vst [vmem:[%s4696_s27 + $0x2f8] sm:$0xff] %v974_v31  ;;  %v976_v32 = vld [vmem:[%s4688_s26 + $0x600] sm:$0xff]  ;;  %v978_v33 = vld [vmem:[%s4688_s26 + $0x610] sm:$0xff] }
  0x42   : > { %v980_v34 = vld [vmem:[%s4688_s26 + $0x620] sm:$0xff]  ;;  %977 = vst [vmem:[%s4696_s27 + $0x300] sm:$0xff] %v976_v32  ;;  %979 = vst [vmem:[%s4696_s27 + $0x308] sm:$0xff] %v978_v33  ;;  %v982_v35 = vld [vmem:[%s4688_s26 + $0x630] sm:$0xff] }
  0x43   : > { %981 = vst [vmem:[%s4696_s27 + $0x310] sm:$0xff] %v980_v34  ;;  %v984_v36 = vld [vmem:[%s4688_s26 + $0x640] sm:$0xff]  ;;  %v986_v37 = vld [vmem:[%s4688_s26 + $0x650] sm:$0xff]  ;;  %983 = vst [vmem:[%s4696_s27 + $0x318] sm:$0xff] %v982_v35 }
  0x44   : > { %985 = vst [vmem:[%s4696_s27 + $0x320] sm:$0xff] %v984_v36  ;;  %987 = vst [vmem:[%s4696_s27 + $0x328] sm:$0xff] %v986_v37  ;;  %v988_v38 = vld [vmem:[%s4688_s26 + $0x660] sm:$0xff]  ;;  %v990_v39 = vld [vmem:[%s4688_s26 + $0x670] sm:$0xff] }
  0x45   : > { %v992_v40 = vld [vmem:[%s4688_s26 + $0x680] sm:$0xff]  ;;  %989 = vst [vmem:[%s4696_s27 + $0x330] sm:$0xff] %v988_v38  ;;  %991 = vst [vmem:[%s4696_s27 + $0x338] sm:$0xff] %v990_v39  ;;  %v994_v41 = vld [vmem:[%s4688_s26 + $0x690] sm:$0xff] }
  0x46   : > { %993 = vst [vmem:[%s4696_s27 + $0x340] sm:$0xff] %v992_v40  ;;  %v996_v42 = vld [vmem:[%s4688_s26 + $0x6a0] sm:$0xff]  ;;  %v998_v43 = vld [vmem:[%s4688_s26 + $0x6b0] sm:$0xff]  ;;  %995 = vst [vmem:[%s4696_s27 + $0x348] sm:$0xff] %v994_v41 }
  0x47   : > { %997 = vst [vmem:[%s4696_s27 + $0x350] sm:$0xff] %v996_v42  ;;  %999 = vst [vmem:[%s4696_s27 + $0x358] sm:$0xff] %v998_v43  ;;  %v1000_v44 = vld [vmem:[%s4688_s26 + $0x6c0] sm:$0xff]  ;;  %v1002_v45 = vld [vmem:[%s4688_s26 + $0x6d0] sm:$0xff] }
  0x48   : > { %v1004_v46 = vld [vmem:[%s4688_s26 + $0x6e0] sm:$0xff]  ;;  %1001 = vst [vmem:[%s4696_s27 + $0x360] sm:$0xff] %v1000_v44  ;;  %1003 = vst [vmem:[%s4696_s27 + $0x368] sm:$0xff] %v1002_v45  ;;  %v1006_v47 = vld [vmem:[%s4688_s26 + $0x6f0] sm:$0xff] }
  0x49   : > { %1005 = vst [vmem:[%s4696_s27 + $0x370] sm:$0xff] %v1004_v46  ;;  %v1008_v48 = vld [vmem:[%s4688_s26 + $0x700] sm:$0xff]  ;;  %v1010_v49 = vld [vmem:[%s4688_s26 + $0x710] sm:$0xff]  ;;  %1007 = vst [vmem:[%s4696_s27 + $0x378] sm:$0xff] %v1006_v47 }
  0x4a   : > { %1009 = vst [vmem:[%s4696_s27 + $0x380] sm:$0xff] %v1008_v48  ;;  %1011 = vst [vmem:[%s4696_s27 + $0x388] sm:$0xff] %v1010_v49  ;;  %v1012_v50 = vld [vmem:[%s4688_s26 + $0x720] sm:$0xff]  ;;  %v1014_v51 = vld [vmem:[%s4688_s26 + $0x730] sm:$0xff] }
  0x4b   : > { %v1016_v52 = vld [vmem:[%s4688_s26 + $0x740] sm:$0xff]  ;;  %1013 = vst [vmem:[%s4696_s27 + $0x390] sm:$0xff] %v1012_v50  ;;  %1015 = vst [vmem:[%s4696_s27 + $0x398] sm:$0xff] %v1014_v51  ;;  %v1018_v53 = vld [vmem:[%s4688_s26 + $0x750] sm:$0xff] }
  0x4c   : > { %1017 = vst [vmem:[%s4696_s27 + $0x3a0] sm:$0xff] %v1016_v52  ;;  %v1020_v54 = vld [vmem:[%s4688_s26 + $0x760] sm:$0xff]  ;;  %v1022_v55 = vld [vmem:[%s4688_s26 + $0x770] sm:$0xff]  ;;  %1019 = vst [vmem:[%s4696_s27 + $0x3a8] sm:$0xff] %v1018_v53 }
  0x4d   : > { %1021 = vst [vmem:[%s4696_s27 + $0x3b0] sm:$0xff] %v1020_v54  ;;  %1023 = vst [vmem:[%s4696_s27 + $0x3b8] sm:$0xff] %v1022_v55  ;;  %v1024_v56 = vld [vmem:[%s4688_s26 + $0x780] sm:$0xff]  ;;  %v1026_v57 = vld [vmem:[%s4688_s26 + $0x790] sm:$0xff] }
  0x4e   : > { %v1028_v58 = vld [vmem:[%s4688_s26 + $0x7a0] sm:$0xff]  ;;  %1025 = vst [vmem:[%s4696_s27 + $0x3c0] sm:$0xff] %v1024_v56  ;;  %1027 = vst [vmem:[%s4696_s27 + $0x3c8] sm:$0xff] %v1026_v57  ;;  %v1030_v59 = vld [vmem:[%s4688_s26 + $0x7b0] sm:$0xff] }
  0x4f   : > { %1029 = vst [vmem:[%s4696_s27 + $0x3d0] sm:$0xff] %v1028_v58  ;;  %v1032_v60 = vld [vmem:[%s4688_s26 + $0x7c0] sm:$0xff]  ;;  %v1034_v61 = vld [vmem:[%s4688_s26 + $0x7d0] sm:$0xff]  ;;  %1031 = vst [vmem:[%s4696_s27 + $0x3d8] sm:$0xff] %v1030_v59 }
  0x50   : > { %1033 = vst [vmem:[%s4696_s27 + $0x3e0] sm:$0xff] %v1032_v60  ;;  %1035 = vst [vmem:[%s4696_s27 + $0x3e8] sm:$0xff] %v1034_v61  ;;  %v1036_v62 = vld [vmem:[%s4688_s26 + $0x7e0] sm:$0xff]  ;;  %v1038_v63 = vld [vmem:[%s4688_s26 + $0x7f0] sm:$0xff] }
  0x51   : > { %v1040_v0 = vld [vmem:[%s4688_s26 + $0x800] sm:$0xff]  ;;  %1037 = vst [vmem:[%s4696_s27 + $0x3f0] sm:$0xff] %v1036_v62  ;;  %1039 = vst [vmem:[%s4696_s27 + $0x3f8] sm:$0xff] %v1038_v63  ;;  %v1042_v1 = vld [vmem:[%s4688_s26 + $0x810] sm:$0xff] }
  0x52   : > { %1041 = vst [vmem:[%s4696_s27 + $0x400] sm:$0xff] %v1040_v0  ;;  %v1044_v2 = vld [vmem:[%s4688_s26 + $0x820] sm:$0xff]  ;;  %v1046_v3 = vld [vmem:[%s4688_s26 + $0x830] sm:$0xff]  ;;  %1043 = vst [vmem:[%s4696_s27 + $0x408] sm:$0xff] %v1042_v1 }
  0x53   : > { %1045 = vst [vmem:[%s4696_s27 + $0x410] sm:$0xff] %v1044_v2  ;;  %1047 = vst [vmem:[%s4696_s27 + $0x418] sm:$0xff] %v1046_v3  ;;  %v1048_v4 = vld [vmem:[%s4688_s26 + $0x840] sm:$0xff]  ;;  %v1050_v5 = vld [vmem:[%s4688_s26 + $0x850] sm:$0xff] }
  0x54   : > { %v1052_v6 = vld [vmem:[%s4688_s26 + $0x860] sm:$0xff]  ;;  %1049 = vst [vmem:[%s4696_s27 + $0x420] sm:$0xff] %v1048_v4  ;;  %1051 = vst [vmem:[%s4696_s27 + $0x428] sm:$0xff] %v1050_v5  ;;  %v1054_v7 = vld [vmem:[%s4688_s26 + $0x870] sm:$0xff] }
  0x55   : > { %1053 = vst [vmem:[%s4696_s27 + $0x430] sm:$0xff] %v1052_v6  ;;  %v1056_v8 = vld [vmem:[%s4688_s26 + $0x880] sm:$0xff]  ;;  %v1058_v9 = vld [vmem:[%s4688_s26 + $0x890] sm:$0xff]  ;;  %1055 = vst [vmem:[%s4696_s27 + $0x438] sm:$0xff] %v1054_v7 }
  0x56   : > { %1057 = vst [vmem:[%s4696_s27 + $0x440] sm:$0xff] %v1056_v8  ;;  %1059 = vst [vmem:[%s4696_s27 + $0x448] sm:$0xff] %v1058_v9  ;;  %v1060_v10 = vld [vmem:[%s4688_s26 + $0x8a0] sm:$0xff]  ;;  %v1062_v11 = vld [vmem:[%s4688_s26 + $0x8b0] sm:$0xff] }
  0x57   : > { %v1064_v12 = vld [vmem:[%s4688_s26 + $0x8c0] sm:$0xff]  ;;  %1061 = vst [vmem:[%s4696_s27 + $0x450] sm:$0xff] %v1060_v10  ;;  %1063 = vst [vmem:[%s4696_s27 + $0x458] sm:$0xff] %v1062_v11  ;;  %v1066_v13 = vld [vmem:[%s4688_s26 + $0x8d0] sm:$0xff] }
  0x58   : > { %1065 = vst [vmem:[%s4696_s27 + $0x460] sm:$0xff] %v1064_v12  ;;  %v1068_v14 = vld [vmem:[%s4688_s26 + $0x8e0] sm:$0xff]  ;;  %v1070_v15 = vld [vmem:[%s4688_s26 + $0x8f0] sm:$0xff]  ;;  %1067 = vst [vmem:[%s4696_s27 + $0x468] sm:$0xff] %v1066_v13 }
  0x59   : > { %1069 = vst [vmem:[%s4696_s27 + $0x470] sm:$0xff] %v1068_v14  ;;  %1071 = vst [vmem:[%s4696_s27 + $0x478] sm:$0xff] %v1070_v15  ;;  %v1072_v16 = vld [vmem:[%s4688_s26 + $0x900] sm:$0xff]  ;;  %v1074_v17 = vld [vmem:[%s4688_s26 + $0x910] sm:$0xff] }
  0x5a   : > { %v1076_v18 = vld [vmem:[%s4688_s26 + $0x920] sm:$0xff]  ;;  %1073 = vst [vmem:[%s4696_s27 + $0x480] sm:$0xff] %v1072_v16  ;;  %1075 = vst [vmem:[%s4696_s27 + $0x488] sm:$0xff] %v1074_v17  ;;  %v1078_v19 = vld [vmem:[%s4688_s26 + $0x930] sm:$0xff] }
  0x5b   : > { %1077 = vst [vmem:[%s4696_s27 + $0x490] sm:$0xff] %v1076_v18  ;;  %v1080_v20 = vld [vmem:[%s4688_s26 + $0x940] sm:$0xff]  ;;  %v1082_v21 = vld [vmem:[%s4688_s26 + $0x950] sm:$0xff]  ;;  %1079 = vst [vmem:[%s4696_s27 + $0x498] sm:$0xff] %v1078_v19 }
  0x5c   : > { %1081 = vst [vmem:[%s4696_s27 + $0x4a0] sm:$0xff] %v1080_v20  ;;  %1083 = vst [vmem:[%s4696_s27 + $0x4a8] sm:$0xff] %v1082_v21  ;;  %v1084_v22 = vld [vmem:[%s4688_s26 + $0x960] sm:$0xff]  ;;  %v1086_v23 = vld [vmem:[%s4688_s26 + $0x970] sm:$0xff] }
  0x5d   : > { %v1088_v24 = vld [vmem:[%s4688_s26 + $0x980] sm:$0xff]  ;;  %1085 = vst [vmem:[%s4696_s27 + $0x4b0] sm:$0xff] %v1084_v22  ;;  %1087 = vst [vmem:[%s4696_s27 + $0x4b8] sm:$0xff] %v1086_v23  ;;  %v1090_v25 = vld [vmem:[%s4688_s26 + $0x990] sm:$0xff] }
  0x5e   : > { %1089 = vst [vmem:[%s4696_s27 + $0x4c0] sm:$0xff] %v1088_v24  ;;  %v1092_v26 = vld [vmem:[%s4688_s26 + $0x9a0] sm:$0xff]  ;;  %v1094_v27 = vld [vmem:[%s4688_s26 + $0x9b0] sm:$0xff]  ;;  %1091 = vst [vmem:[%s4696_s27 + $0x4c8] sm:$0xff] %v1090_v25 }
  0x5f   : > { %1093 = vst [vmem:[%s4696_s27 + $0x4d0] sm:$0xff] %v1092_v26  ;;  %1095 = vst [vmem:[%s4696_s27 + $0x4d8] sm:$0xff] %v1094_v27  ;;  %v1096_v28 = vld [vmem:[%s4688_s26 + $0x9c0] sm:$0xff]  ;;  %v1098_v29 = vld [vmem:[%s4688_s26 + $0x9d0] sm:$0xff] }
  0x60   : > { %v1100_v30 = vld [vmem:[%s4688_s26 + $0x9e0] sm:$0xff]  ;;  %1097 = vst [vmem:[%s4696_s27 + $0x4e0] sm:$0xff] %v1096_v28  ;;  %1099 = vst [vmem:[%s4696_s27 + $0x4e8] sm:$0xff] %v1098_v29  ;;  %v1102_v31 = vld [vmem:[%s4688_s26 + $0x9f0] sm:$0xff] }
  0x61   : > { %1101 = vst [vmem:[%s4696_s27 + $0x4f0] sm:$0xff] %v1100_v30  ;;  %v1104_v32 = vld [vmem:[%s4688_s26 + $0xa00] sm:$0xff]  ;;  %v1106_v33 = vld [vmem:[%s4688_s26 + $0xa10] sm:$0xff]  ;;  %1103 = vst [vmem:[%s4696_s27 + $0x4f8] sm:$0xff] %v1102_v31 }
  0x62   : > { %1105 = vst [vmem:[%s4696_s27 + $0x500] sm:$0xff] %v1104_v32  ;;  %1107 = vst [vmem:[%s4696_s27 + $0x508] sm:$0xff] %v1106_v33  ;;  %v1108_v34 = vld [vmem:[%s4688_s26 + $0xa20] sm:$0xff]  ;;  %v1110_v35 = vld [vmem:[%s4688_s26 + $0xa30] sm:$0xff] }
  0x63   : > { %v1112_v36 = vld [vmem:[%s4688_s26 + $0xa40] sm:$0xff]  ;;  %1109 = vst [vmem:[%s4696_s27 + $0x510] sm:$0xff] %v1108_v34  ;;  %1111 = vst [vmem:[%s4696_s27 + $0x518] sm:$0xff] %v1110_v35  ;;  %v1114_v37 = vld [vmem:[%s4688_s26 + $0xa50] sm:$0xff] }
  0x64   : > { %1113 = vst [vmem:[%s4696_s27 + $0x520] sm:$0xff] %v1112_v36  ;;  %v1116_v38 = vld [vmem:[%s4688_s26 + $0xa60] sm:$0xff]  ;;  %v1118_v39 = vld [vmem:[%s4688_s26 + $0xa70] sm:$0xff]  ;;  %1115 = vst [vmem:[%s4696_s27 + $0x528] sm:$0xff] %v1114_v37 }
  0x65   : > { %1117 = vst [vmem:[%s4696_s27 + $0x530] sm:$0xff] %v1116_v38  ;;  %1119 = vst [vmem:[%s4696_s27 + $0x538] sm:$0xff] %v1118_v39  ;;  %v1120_v40 = vld [vmem:[%s4688_s26 + $0xa80] sm:$0xff]  ;;  %v1122_v41 = vld [vmem:[%s4688_s26 + $0xa90] sm:$0xff] }
  0x66   : > { %v1124_v42 = vld [vmem:[%s4688_s26 + $0xaa0] sm:$0xff]  ;;  %1121 = vst [vmem:[%s4696_s27 + $0x540] sm:$0xff] %v1120_v40  ;;  %1123 = vst [vmem:[%s4696_s27 + $0x548] sm:$0xff] %v1122_v41  ;;  %v1126_v43 = vld [vmem:[%s4688_s26 + $0xab0] sm:$0xff] }
  0x67   : > { %1125 = vst [vmem:[%s4696_s27 + $0x550] sm:$0xff] %v1124_v42  ;;  %v1128_v44 = vld [vmem:[%s4688_s26 + $0xac0] sm:$0xff]  ;;  %v1130_v45 = vld [vmem:[%s4688_s26 + $0xad0] sm:$0xff]  ;;  %1127 = vst [vmem:[%s4696_s27 + $0x558] sm:$0xff] %v1126_v43 }
  0x68   : > { %1129 = vst [vmem:[%s4696_s27 + $0x560] sm:$0xff] %v1128_v44  ;;  %1131 = vst [vmem:[%s4696_s27 + $0x568] sm:$0xff] %v1130_v45  ;;  %v1132_v46 = vld [vmem:[%s4688_s26 + $0xae0] sm:$0xff]  ;;  %v1134_v47 = vld [vmem:[%s4688_s26 + $0xaf0] sm:$0xff] }
  0x69   : > { %v1136_v48 = vld [vmem:[%s4688_s26 + $0xb00] sm:$0xff]  ;;  %1133 = vst [vmem:[%s4696_s27 + $0x570] sm:$0xff] %v1132_v46  ;;  %1135 = vst [vmem:[%s4696_s27 + $0x578] sm:$0xff] %v1134_v47  ;;  %v1138_v49 = vld [vmem:[%s4688_s26 + $0xb10] sm:$0xff] }
  0x6a   : > { %1137 = vst [vmem:[%s4696_s27 + $0x580] sm:$0xff] %v1136_v48  ;;  %v1140_v50 = vld [vmem:[%s4688_s26 + $0xb20] sm:$0xff]  ;;  %v1142_v51 = vld [vmem:[%s4688_s26 + $0xb30] sm:$0xff]  ;;  %1139 = vst [vmem:[%s4696_s27 + $0x588] sm:$0xff] %v1138_v49 }
  0x6b   : > { %1141 = vst [vmem:[%s4696_s27 + $0x590] sm:$0xff] %v1140_v50  ;;  %1143 = vst [vmem:[%s4696_s27 + $0x598] sm:$0xff] %v1142_v51  ;;  %v1144_v52 = vld [vmem:[%s4688_s26 + $0xb40] sm:$0xff]  ;;  %v1146_v53 = vld [vmem:[%s4688_s26 + $0xb50] sm:$0xff] }
  0x6c   : > { %v1148_v54 = vld [vmem:[%s4688_s26 + $0xb60] sm:$0xff]  ;;  %1145 = vst [vmem:[%s4696_s27 + $0x5a0] sm:$0xff] %v1144_v52  ;;  %1147 = vst [vmem:[%s4696_s27 + $0x5a8] sm:$0xff] %v1146_v53  ;;  %v1150_v55 = vld [vmem:[%s4688_s26 + $0xb70] sm:$0xff] }
  0x6d   : > { %1149 = vst [vmem:[%s4696_s27 + $0x5b0] sm:$0xff] %v1148_v54  ;;  %v1152_v56 = vld [vmem:[%s4688_s26 + $0xb80] sm:$0xff]  ;;  %v1154_v57 = vld [vmem:[%s4688_s26 + $0xb90] sm:$0xff]  ;;  %1151 = vst [vmem:[%s4696_s27 + $0x5b8] sm:$0xff] %v1150_v55 }
  0x6e   : > { %1153 = vst [vmem:[%s4696_s27 + $0x5c0] sm:$0xff] %v1152_v56  ;;  %1155 = vst [vmem:[%s4696_s27 + $0x5c8] sm:$0xff] %v1154_v57  ;;  %v1156_v58 = vld [vmem:[%s4688_s26 + $0xba0] sm:$0xff]  ;;  %v1158_v59 = vld [vmem:[%s4688_s26 + $0xbb0] sm:$0xff] }
  0x6f   : > { %v1160_v60 = vld [vmem:[%s4688_s26 + $0xbc0] sm:$0xff]  ;;  %1157 = vst [vmem:[%s4696_s27 + $0x5d0] sm:$0xff] %v1156_v58  ;;  %1159 = vst [vmem:[%s4696_s27 + $0x5d8] sm:$0xff] %v1158_v59  ;;  %v1162_v61 = vld [vmem:[%s4688_s26 + $0xbd0] sm:$0xff] }
  0x70   : > { %1161 = vst [vmem:[%s4696_s27 + $0x5e0] sm:$0xff] %v1160_v60  ;;  %v1164_v62 = vld [vmem:[%s4688_s26 + $0xbe0] sm:$0xff]  ;;  %v1166_v63 = vld [vmem:[%s4688_s26 + $0xbf0] sm:$0xff]  ;;  %1163 = vst [vmem:[%s4696_s27 + $0x5e8] sm:$0xff] %v1162_v61 }
  0x71   : > { %1165 = vst [vmem:[%s4696_s27 + $0x5f0] sm:$0xff] %v1164_v62  ;;  %1167 = vst [vmem:[%s4696_s27 + $0x5f8] sm:$0xff] %v1166_v63  ;;  %v1168_v0 = vld [vmem:[%s4688_s26 + $0xc00] sm:$0xff]  ;;  %v1170_v1 = vld [vmem:[%s4688_s26 + $0xc10] sm:$0xff] }
  0x72   : > { %v1172_v2 = vld [vmem:[%s4688_s26 + $0xc20] sm:$0xff]  ;;  %1169 = vst [vmem:[%s4696_s27 + $0x600] sm:$0xff] %v1168_v0  ;;  %1171 = vst [vmem:[%s4696_s27 + $0x608] sm:$0xff] %v1170_v1  ;;  %v1174_v3 = vld [vmem:[%s4688_s26 + $0xc30] sm:$0xff] }
  0x73   : > { %1173 = vst [vmem:[%s4696_s27 + $0x610] sm:$0xff] %v1172_v2  ;;  %v1176_v4 = vld [vmem:[%s4688_s26 + $0xc40] sm:$0xff]  ;;  %v1178_v5 = vld [vmem:[%s4688_s26 + $0xc50] sm:$0xff]  ;;  %1175 = vst [vmem:[%s4696_s27 + $0x618] sm:$0xff] %v1174_v3 }
  0x74   : > { %1177 = vst [vmem:[%s4696_s27 + $0x620] sm:$0xff] %v1176_v4  ;;  %1179 = vst [vmem:[%s4696_s27 + $0x628] sm:$0xff] %v1178_v5  ;;  %v1180_v6 = vld [vmem:[%s4688_s26 + $0xc60] sm:$0xff]  ;;  %v1182_v7 = vld [vmem:[%s4688_s26 + $0xc70] sm:$0xff] }
  0x75   : > { %v1184_v8 = vld [vmem:[%s4688_s26 + $0xc80] sm:$0xff]  ;;  %1181 = vst [vmem:[%s4696_s27 + $0x630] sm:$0xff] %v1180_v6  ;;  %1183 = vst [vmem:[%s4696_s27 + $0x638] sm:$0xff] %v1182_v7  ;;  %v1186_v9 = vld [vmem:[%s4688_s26 + $0xc90] sm:$0xff] }
  0x76   : > { %1185 = vst [vmem:[%s4696_s27 + $0x640] sm:$0xff] %v1184_v8  ;;  %v1188_v10 = vld [vmem:[%s4688_s26 + $0xca0] sm:$0xff]  ;;  %v1190_v11 = vld [vmem:[%s4688_s26 + $0xcb0] sm:$0xff]  ;;  %1187 = vst [vmem:[%s4696_s27 + $0x648] sm:$0xff] %v1186_v9 }
  0x77   : > { %1189 = vst [vmem:[%s4696_s27 + $0x650] sm:$0xff] %v1188_v10  ;;  %1191 = vst [vmem:[%s4696_s27 + $0x658] sm:$0xff] %v1190_v11  ;;  %v1192_v12 = vld [vmem:[%s4688_s26 + $0xcc0] sm:$0xff]  ;;  %v1194_v13 = vld [vmem:[%s4688_s26 + $0xcd0] sm:$0xff] }
  0x78   : > { %v1196_v14 = vld [vmem:[%s4688_s26 + $0xce0] sm:$0xff]  ;;  %1193 = vst [vmem:[%s4696_s27 + $0x660] sm:$0xff] %v1192_v12  ;;  %1195 = vst [vmem:[%s4696_s27 + $0x668] sm:$0xff] %v1194_v13  ;;  %v1198_v15 = vld [vmem:[%s4688_s26 + $0xcf0] sm:$0xff] }
  0x79   : > { %1197 = vst [vmem:[%s4696_s27 + $0x670] sm:$0xff] %v1196_v14  ;;  %v1200_v16 = vld [vmem:[%s4688_s26 + $0xd00] sm:$0xff]  ;;  %v1202_v17 = vld [vmem:[%s4688_s26 + $0xd10] sm:$0xff]  ;;  %1199 = vst [vmem:[%s4696_s27 + $0x678] sm:$0xff] %v1198_v15 }
  0x7a   : > { %1201 = vst [vmem:[%s4696_s27 + $0x680] sm:$0xff] %v1200_v16  ;;  %1203 = vst [vmem:[%s4696_s27 + $0x688] sm:$0xff] %v1202_v17  ;;  %v1204_v18 = vld [vmem:[%s4688_s26 + $0xd20] sm:$0xff]  ;;  %v1206_v19 = vld [vmem:[%s4688_s26 + $0xd30] sm:$0xff] }
  0x7b   : > { %v1208_v20 = vld [vmem:[%s4688_s26 + $0xd40] sm:$0xff]  ;;  %1205 = vst [vmem:[%s4696_s27 + $0x690] sm:$0xff] %v1204_v18  ;;  %1207 = vst [vmem:[%s4696_s27 + $0x698] sm:$0xff] %v1206_v19  ;;  %v1210_v21 = vld [vmem:[%s4688_s26 + $0xd50] sm:$0xff] }
  0x7c   : > { %1209 = vst [vmem:[%s4696_s27 + $0x6a0] sm:$0xff] %v1208_v20  ;;  %v1212_v22 = vld [vmem:[%s4688_s26 + $0xd60] sm:$0xff]  ;;  %v1214_v23 = vld [vmem:[%s4688_s26 + $0xd70] sm:$0xff]  ;;  %1211 = vst [vmem:[%s4696_s27 + $0x6a8] sm:$0xff] %v1210_v21 }
  0x7d   : > { %1213 = vst [vmem:[%s4696_s27 + $0x6b0] sm:$0xff] %v1212_v22  ;;  %1215 = vst [vmem:[%s4696_s27 + $0x6b8] sm:$0xff] %v1214_v23  ;;  %v1216_v24 = vld [vmem:[%s4688_s26 + $0xd80] sm:$0xff]  ;;  %v1218_v25 = vld [vmem:[%s4688_s26 + $0xd90] sm:$0xff] }
  0x7e   : > { %v1220_v26 = vld [vmem:[%s4688_s26 + $0xda0] sm:$0xff]  ;;  %1217 = vst [vmem:[%s4696_s27 + $0x6c0] sm:$0xff] %v1216_v24  ;;  %1219 = vst [vmem:[%s4696_s27 + $0x6c8] sm:$0xff] %v1218_v25  ;;  %v1222_v27 = vld [vmem:[%s4688_s26 + $0xdb0] sm:$0xff] }
  0x7f   : > { %1221 = vst [vmem:[%s4696_s27 + $0x6d0] sm:$0xff] %v1220_v26  ;;  %v1224_v28 = vld [vmem:[%s4688_s26 + $0xdc0] sm:$0xff]  ;;  %v1226_v29 = vld [vmem:[%s4688_s26 + $0xdd0] sm:$0xff]  ;;  %1223 = vst [vmem:[%s4696_s27 + $0x6d8] sm:$0xff] %v1222_v27 }
  0x80   : > { %1225 = vst [vmem:[%s4696_s27 + $0x6e0] sm:$0xff] %v1224_v28  ;;  %1227 = vst [vmem:[%s4696_s27 + $0x6e8] sm:$0xff] %v1226_v29  ;;  %v1228_v30 = vld [vmem:[%s4688_s26 + $0xde0] sm:$0xff]  ;;  %v1230_v31 = vld [vmem:[%s4688_s26 + $0xdf0] sm:$0xff] }
  0x81   : > { %v1232_v32 = vld [vmem:[%s4688_s26 + $0xe00] sm:$0xff]  ;;  %1229 = vst [vmem:[%s4696_s27 + $0x6f0] sm:$0xff] %v1228_v30  ;;  %1231 = vst [vmem:[%s4696_s27 + $0x6f8] sm:$0xff] %v1230_v31  ;;  %v1234_v33 = vld [vmem:[%s4688_s26 + $0xe10] sm:$0xff] }
  0x82   : > { %1233 = vst [vmem:[%s4696_s27 + $0x700] sm:$0xff] %v1232_v32  ;;  %v1236_v34 = vld [vmem:[%s4688_s26 + $0xe20] sm:$0xff]  ;;  %v1238_v35 = vld [vmem:[%s4688_s26 + $0xe30] sm:$0xff]  ;;  %1235 = vst [vmem:[%s4696_s27 + $0x708] sm:$0xff] %v1234_v33 }
  0x83   : > { %1237 = vst [vmem:[%s4696_s27 + $0x710] sm:$0xff] %v1236_v34  ;;  %1239 = vst [vmem:[%s4696_s27 + $0x718] sm:$0xff] %v1238_v35  ;;  %v1240_v36 = vld [vmem:[%s4688_s26 + $0xe40] sm:$0xff]  ;;  %v1242_v37 = vld [vmem:[%s4688_s26 + $0xe50] sm:$0xff] }
  0x84   : > { %v1244_v38 = vld [vmem:[%s4688_s26 + $0xe60] sm:$0xff]  ;;  %1241 = vst [vmem:[%s4696_s27 + $0x720] sm:$0xff] %v1240_v36  ;;  %1243 = vst [vmem:[%s4696_s27 + $0x728] sm:$0xff] %v1242_v37  ;;  %v1246_v39 = vld [vmem:[%s4688_s26 + $0xe70] sm:$0xff] }
  0x85   : > { %1245 = vst [vmem:[%s4696_s27 + $0x730] sm:$0xff] %v1244_v38  ;;  %v1248_v40 = vld [vmem:[%s4688_s26 + $0xe80] sm:$0xff]  ;;  %v1250_v41 = vld [vmem:[%s4688_s26 + $0xe90] sm:$0xff]  ;;  %1247 = vst [vmem:[%s4696_s27 + $0x738] sm:$0xff] %v1246_v39 }
  0x86   : > { %1249 = vst [vmem:[%s4696_s27 + $0x740] sm:$0xff] %v1248_v40  ;;  %1251 = vst [vmem:[%s4696_s27 + $0x748] sm:$0xff] %v1250_v41  ;;  %v1252_v42 = vld [vmem:[%s4688_s26 + $0xea0] sm:$0xff]  ;;  %v1254_v43 = vld [vmem:[%s4688_s26 + $0xeb0] sm:$0xff] }
  0x87   : > { %v1256_v44 = vld [vmem:[%s4688_s26 + $0xec0] sm:$0xff]  ;;  %1253 = vst [vmem:[%s4696_s27 + $0x750] sm:$0xff] %v1252_v42  ;;  %1255 = vst [vmem:[%s4696_s27 + $0x758] sm:$0xff] %v1254_v43  ;;  %v1258_v45 = vld [vmem:[%s4688_s26 + $0xed0] sm:$0xff] }
  0x88   : > { %1257 = vst [vmem:[%s4696_s27 + $0x760] sm:$0xff] %v1256_v44  ;;  %v1260_v46 = vld [vmem:[%s4688_s26 + $0xee0] sm:$0xff]  ;;  %v1262_v47 = vld [vmem:[%s4688_s26 + $0xef0] sm:$0xff]  ;;  %1259 = vst [vmem:[%s4696_s27 + $0x768] sm:$0xff] %v1258_v45 }
  0x89   : > { %1261 = vst [vmem:[%s4696_s27 + $0x770] sm:$0xff] %v1260_v46  ;;  %1263 = vst [vmem:[%s4696_s27 + $0x778] sm:$0xff] %v1262_v47  ;;  %v1264_v48 = vld [vmem:[%s4688_s26 + $0xf00] sm:$0xff]  ;;  %v1266_v49 = vld [vmem:[%s4688_s26 + $0xf10] sm:$0xff] }
  0x8a   : > { %v1268_v50 = vld [vmem:[%s4688_s26 + $0xf20] sm:$0xff]  ;;  %1265 = vst [vmem:[%s4696_s27 + $0x780] sm:$0xff] %v1264_v48  ;;  %1267 = vst [vmem:[%s4696_s27 + $0x788] sm:$0xff] %v1266_v49  ;;  %v1270_v51 = vld [vmem:[%s4688_s26 + $0xf30] sm:$0xff] }
  0x8b   : > { %1269 = vst [vmem:[%s4696_s27 + $0x790] sm:$0xff] %v1268_v50  ;;  %v1272_v52 = vld [vmem:[%s4688_s26 + $0xf40] sm:$0xff]  ;;  %v1274_v53 = vld [vmem:[%s4688_s26 + $0xf50] sm:$0xff]  ;;  %1271 = vst [vmem:[%s4696_s27 + $0x798] sm:$0xff] %v1270_v51 }
  0x8c   : > { %1273 = vst [vmem:[%s4696_s27 + $0x7a0] sm:$0xff] %v1272_v52  ;;  %1275 = vst [vmem:[%s4696_s27 + $0x7a8] sm:$0xff] %v1274_v53  ;;  %v1276_v54 = vld [vmem:[%s4688_s26 + $0xf60] sm:$0xff]  ;;  %v1278_v55 = vld [vmem:[%s4688_s26 + $0xf70] sm:$0xff] }
  0x8d   : > { %v1280_v56 = vld [vmem:[%s4688_s26 + $0xf80] sm:$0xff]  ;;  %1277 = vst [vmem:[%s4696_s27 + $0x7b0] sm:$0xff] %v1276_v54  ;;  %1279 = vst [vmem:[%s4696_s27 + $0x7b8] sm:$0xff] %v1278_v55  ;;  %v1282_v57 = vld [vmem:[%s4688_s26 + $0xf90] sm:$0xff] }
  0x8e   : > { %1281 = vst [vmem:[%s4696_s27 + $0x7c0] sm:$0xff] %v1280_v56  ;;  %v1284_v58 = vld [vmem:[%s4688_s26 + $0xfa0] sm:$0xff]  ;;  %v1286_v59 = vld [vmem:[%s4688_s26 + $0xfb0] sm:$0xff]  ;;  %1283 = vst [vmem:[%s4696_s27 + $0x7c8] sm:$0xff] %v1282_v57 }
  0x8f   : > { %1285 = vst [vmem:[%s4696_s27 + $0x7d0] sm:$0xff] %v1284_v58  ;;  %1287 = vst [vmem:[%s4696_s27 + $0x7d8] sm:$0xff] %v1286_v59  ;;  %v1288_v60 = vld [vmem:[%s4688_s26 + $0xfc0] sm:$0xff]  ;;  %v1290_v61 = vld [vmem:[%s4688_s26 + $0xfd0] sm:$0xff] }
  0x90   : > { %v1292_v62 = vld [vmem:[%s4688_s26 + $0xfe0] sm:$0xff]  ;;  %1289 = vst [vmem:[%s4696_s27 + $0x7e0] sm:$0xff] %v1288_v60  ;;  %1291 = vst [vmem:[%s4696_s27 + $0x7e8] sm:$0xff] %v1290_v61  ;;  %v1294_v63 = vld [vmem:[%s4688_s26 + $0xff0] sm:$0xff] }
  0x91   : > { %1293 = vst [vmem:[%s4696_s27 + $0x7f0] sm:$0xff] %v1292_v62  ;;  %v1296_v0 = vld [vmem:[%s4688_s26 + $0x1000] sm:$0xff]  ;;  %v1298_v1 = vld [vmem:[%s4688_s26 + $0x1010] sm:$0xff]  ;;  %1295 = vst [vmem:[%s4696_s27 + $0x7f8] sm:$0xff] %v1294_v63 }
  0x92   : > { %1297 = vst [vmem:[%s4696_s27 + $0x800] sm:$0xff] %v1296_v0  ;;  %1299 = vst [vmem:[%s4696_s27 + $0x808] sm:$0xff] %v1298_v1  ;;  %v1300_v2 = vld [vmem:[%s4688_s26 + $0x1020] sm:$0xff]  ;;  %v1302_v3 = vld [vmem:[%s4688_s26 + $0x1030] sm:$0xff] }
  0x93   : > { %v1304_v4 = vld [vmem:[%s4688_s26 + $0x1040] sm:$0xff]  ;;  %1301 = vst [vmem:[%s4696_s27 + $0x810] sm:$0xff] %v1300_v2  ;;  %1303 = vst [vmem:[%s4696_s27 + $0x818] sm:$0xff] %v1302_v3  ;;  %v1306_v5 = vld [vmem:[%s4688_s26 + $0x1050] sm:$0xff] }
  0x94   : > { %1305 = vst [vmem:[%s4696_s27 + $0x820] sm:$0xff] %v1304_v4  ;;  %v1308_v6 = vld [vmem:[%s4688_s26 + $0x1060] sm:$0xff]  ;;  %v1310_v7 = vld [vmem:[%s4688_s26 + $0x1070] sm:$0xff]  ;;  %1307 = vst [vmem:[%s4696_s27 + $0x828] sm:$0xff] %v1306_v5 }
  0x95   : > { %1309 = vst [vmem:[%s4696_s27 + $0x830] sm:$0xff] %v1308_v6  ;;  %1311 = vst [vmem:[%s4696_s27 + $0x838] sm:$0xff] %v1310_v7  ;;  %v1312_v8 = vld [vmem:[%s4688_s26 + $0x1080] sm:$0xff]  ;;  %v1314_v9 = vld [vmem:[%s4688_s26 + $0x1090] sm:$0xff] }
  0x96   : > { %v1316_v10 = vld [vmem:[%s4688_s26 + $0x10a0] sm:$0xff]  ;;  %1313 = vst [vmem:[%s4696_s27 + $0x840] sm:$0xff] %v1312_v8  ;;  %1315 = vst [vmem:[%s4696_s27 + $0x848] sm:$0xff] %v1314_v9  ;;  %v1318_v11 = vld [vmem:[%s4688_s26 + $0x10b0] sm:$0xff] }
  0x97   : > { %1317 = vst [vmem:[%s4696_s27 + $0x850] sm:$0xff] %v1316_v10  ;;  %v1320_v12 = vld [vmem:[%s4688_s26 + $0x10c0] sm:$0xff]  ;;  %v1322_v13 = vld [vmem:[%s4688_s26 + $0x10d0] sm:$0xff]  ;;  %1319 = vst [vmem:[%s4696_s27 + $0x858] sm:$0xff] %v1318_v11 }
  0x98   : > { %1321 = vst [vmem:[%s4696_s27 + $0x860] sm:$0xff] %v1320_v12  ;;  %1323 = vst [vmem:[%s4696_s27 + $0x868] sm:$0xff] %v1322_v13  ;;  %v1324_v14 = vld [vmem:[%s4688_s26 + $0x10e0] sm:$0xff]  ;;  %v1326_v15 = vld [vmem:[%s4688_s26 + $0x10f0] sm:$0xff] }
  0x99   : > { %v1328_v16 = vld [vmem:[%s4688_s26 + $0x1100] sm:$0xff]  ;;  %1325 = vst [vmem:[%s4696_s27 + $0x870] sm:$0xff] %v1324_v14  ;;  %1327 = vst [vmem:[%s4696_s27 + $0x878] sm:$0xff] %v1326_v15  ;;  %v1330_v17 = vld [vmem:[%s4688_s26 + $0x1110] sm:$0xff] }
  0x9a   : > { %1329 = vst [vmem:[%s4696_s27 + $0x880] sm:$0xff] %v1328_v16  ;;  %v1332_v18 = vld [vmem:[%s4688_s26 + $0x1120] sm:$0xff]  ;;  %v1334_v19 = vld [vmem:[%s4688_s26 + $0x1130] sm:$0xff]  ;;  %1331 = vst [vmem:[%s4696_s27 + $0x888] sm:$0xff] %v1330_v17 }
  0x9b   : > { %1333 = vst [vmem:[%s4696_s27 + $0x890] sm:$0xff] %v1332_v18  ;;  %1335 = vst [vmem:[%s4696_s27 + $0x898] sm:$0xff] %v1334_v19  ;;  %v1336_v20 = vld [vmem:[%s4688_s26 + $0x1140] sm:$0xff]  ;;  %v1338_v21 = vld [vmem:[%s4688_s26 + $0x1150] sm:$0xff] }
  0x9c   : > { %v1340_v22 = vld [vmem:[%s4688_s26 + $0x1160] sm:$0xff]  ;;  %1337 = vst [vmem:[%s4696_s27 + $0x8a0] sm:$0xff] %v1336_v20  ;;  %1339 = vst [vmem:[%s4696_s27 + $0x8a8] sm:$0xff] %v1338_v21  ;;  %v1342_v23 = vld [vmem:[%s4688_s26 + $0x1170] sm:$0xff] }
  0x9d   : > { %1341 = vst [vmem:[%s4696_s27 + $0x8b0] sm:$0xff] %v1340_v22  ;;  %v1344_v24 = vld [vmem:[%s4688_s26 + $0x1180] sm:$0xff]  ;;  %v1346_v25 = vld [vmem:[%s4688_s26 + $0x1190] sm:$0xff]  ;;  %1343 = vst [vmem:[%s4696_s27 + $0x8b8] sm:$0xff] %v1342_v23 }
  0x9e   : > { %1345 = vst [vmem:[%s4696_s27 + $0x8c0] sm:$0xff] %v1344_v24  ;;  %1347 = vst [vmem:[%s4696_s27 + $0x8c8] sm:$0xff] %v1346_v25  ;;  %v1348_v26 = vld [vmem:[%s4688_s26 + $0x11a0] sm:$0xff]  ;;  %v1350_v27 = vld [vmem:[%s4688_s26 + $0x11b0] sm:$0xff] }
  0x9f   : > { %v1352_v28 = vld [vmem:[%s4688_s26 + $0x11c0] sm:$0xff]  ;;  %1349 = vst [vmem:[%s4696_s27 + $0x8d0] sm:$0xff] %v1348_v26  ;;  %1351 = vst [vmem:[%s4696_s27 + $0x8d8] sm:$0xff] %v1350_v27  ;;  %v1354_v29 = vld [vmem:[%s4688_s26 + $0x11d0] sm:$0xff] }
  0xa0   : > { %1353 = vst [vmem:[%s4696_s27 + $0x8e0] sm:$0xff] %v1352_v28  ;;  %v1356_v30 = vld [vmem:[%s4688_s26 + $0x11e0] sm:$0xff]  ;;  %v1358_v31 = vld [vmem:[%s4688_s26 + $0x11f0] sm:$0xff]  ;;  %1355 = vst [vmem:[%s4696_s27 + $0x8e8] sm:$0xff] %v1354_v29 }
  0xa1   : > { %1357 = vst [vmem:[%s4696_s27 + $0x8f0] sm:$0xff] %v1356_v30  ;;  %1359 = vst [vmem:[%s4696_s27 + $0x8f8] sm:$0xff] %v1358_v31 }
  0xa2 PF: > { %p3780_p6 = scmp.ge.s32.totalorder %s4623_s16, 1  ;;  %p1372_p7 = scmp.lt.s32.totalorder %s4623_s16, 3 }
  0xa4   : > { %p1373_p8 = pnand %p3780_p6, %p1372_p7 }
  0xa5   : > { %s1379_s28 = sand.u32 (!%p1373_p8), 1, %s4607_s12   ;;  %v5274_v32 = vld [vmem:[%s5664_s0] sm:$0xff] (!%p1373_p8)  ;;  %v5279_v33 = vld [vmem:[%s5664_s0 + $0x8] sm:$0xff] (!%p1373_p8) }
  0xa6   : > { %1376 = sbr.rel (%p1373_p8) target bundleno = 711 (0x2c7), region = 66  ;;  %v3785_v34 = vcombine.high (!%p1373_p8), %v5274_v32, %v5274_v32  ;;  %v3787_v35 = vcombine.high (!%p1373_p8), %v5279_v33, %v5279_v33 }
  0xa7   : > { %s4094_s6 = smul.u32 (!%p1373_p8), 2304, %s1379_s28  ;;  %s3781_s28 = sshll.u32 (!%p1373_p8), %s4615_s14, 1 }
  0xa8   : > { %3286 = vmatprep.mubr.bf16.mxu0 (!%p1373_p8), %v3785_v34  ;;  %3327 = vmatprep.mubr.bf16.mxu1 (!%p1373_p8), %v3787_v35  ;;  %p1432_p9 = scmp.lt.s32.totalorder (!%p1373_p8), %s3781_s28, 3 }
  0xa9   : > { %s5285_s7 = scalar_lea.vmem (!%p1373_p8), [#allocation3], %s4094_s6 }
  0xaa   : > { %v4135_v36 = vld [vmem:[%s5285_s7 + $0x4] ss:$8 sps:$4 sm:$0xff] (!%p1373_p8)   ;;  %v4139_v38 = vld [vmem:[%s5285_s7] ss:$8 sps:$4 sm:$0xff] (!%p1373_p8)   ;;  %v4141_v40 = vld [vmem:[%s5285_s7 + $0x14] ss:$8 sps:$4 sm:$0xff] (!%p1373_p8)  }
  0xab   : > { %v4137_v37 = vld [vmem:[%s5285_s7 + $0x104] ss:$8 sps:$4 sm:$0xff] (!%p1373_p8)   ;;  %3254 = vmatprep.subr.bf16.mxu0 (!%p1373_p8), %v4135_v36  ;;  %v4140_v39 = vld [vmem:[%s5285_s7 + $0x100] ss:$8 sps:$4 sm:$0xff] (!%p1373_p8)   ;;  %v4143_v41 = vld [vmem:[%s5285_s7 + $0x114] ss:$8 sps:$4 sm:$0xff] (!%p1373_p8)  }
  0xac   : > { %3295 = vmatprep.subr.bf16.mxu1 (!%p1373_p8), %v4137_v37  ;;  %3255 = vmatpush1.bf16.msra.mxu0 (!%p1373_p8), %v4139_v38  ;;  %v4145_v42 = vld [vmem:[%s5285_s7 + $0x10] ss:$8 sps:$4 sm:$0xff] (!%p1373_p8)   ;;  %v4147_v44 = vld [vmem:[%s5285_s7 + $0x24] ss:$8 sps:$4 sm:$0xff] (!%p1373_p8)   ;;  %v4151_v46 = vld [vmem:[%s5285_s7 + $0x20] ss:$8 sps:$4 sm:$0xff] (!%p1373_p8)  }
  0xad   : > { %3296 = vmatpush1.bf16.msra.mxu1 %v4140_v39  ;;  %3256 = vmatprep.subr.bf16.mxu0 %v4141_v40  ;;  %v4146_v43 = vld [vmem:[%s5285_s7 + $0x110] ss:$8 sps:$4 sm:$0xff]   ;;  %v4149_v45 = vld [vmem:[%s5285_s7 + $0x124] ss:$8 sps:$4 sm:$0xff]   ;;  %v4152_v47 = vld [vmem:[%s5285_s7 + $0x120] ss:$8 sps:$4 sm:$0xff]  }
  0xae   : > { %3297 = vmatprep.subr.bf16.mxu1 %v4143_v41  ;;  %v4153_v48 = vld [vmem:[%s5285_s7 + $0x34] ss:$8 sps:$4 sm:$0xff]   ;;  %v4157_v50 = vld [vmem:[%s5285_s7 + $0x30] ss:$8 sps:$4 sm:$0xff]   ;;  %v4159_v52 = vld [vmem:[%s5285_s7 + $0x44] ss:$8 sps:$4 sm:$0xff]   ;;  %v3784_v41 = vcombine.low %v5274_v32, %v5274_v32 }
  0xaf   : > { %v4155_v49 = vld [vmem:[%s5285_s7 + $0x134] ss:$8 sps:$4 sm:$0xff]   ;;  %v4158_v51 = vld [vmem:[%s5285_s7 + $0x130] ss:$8 sps:$4 sm:$0xff]   ;;  %v4161_v53 = vld [vmem:[%s5285_s7 + $0x144] ss:$8 sps:$4 sm:$0xff]  }
  0xb0   : > { %3257 = vmatpush1.bf16.msra.mxu0 %v4145_v42  ;;  %v4163_v54 = vld [vmem:[%s5285_s7 + $0x40] ss:$8 sps:$4 sm:$0xff]   ;;  %v4165_v56 = vld [vmem:[%s5285_s7 + $0x54] ss:$8 sps:$4 sm:$0xff]   ;;  %v4169_v58 = vld [vmem:[%s5285_s7 + $0x50] ss:$8 sps:$4 sm:$0xff]   ;;  %v3786_v42 = vcombine.low %v5279_v33, %v5279_v33 }
  0xb1   : > { %3298 = vmatpush1.bf16.msra.mxu1 %v4146_v43  ;;  %3258 = vmatprep.subr.bf16.mxu0 %v4147_v44  ;;  %v4164_v55 = vld [vmem:[%s5285_s7 + $0x140] ss:$8 sps:$4 sm:$0xff]   ;;  %v4167_v57 = vld [vmem:[%s5285_s7 + $0x154] ss:$8 sps:$4 sm:$0xff]   ;;  %v4170_v59 = vld [vmem:[%s5285_s7 + $0x150] ss:$8 sps:$4 sm:$0xff]  }
  0xb2   : > { %3299 = vmatprep.subr.bf16.mxu1 %v4149_v45  ;;  %v4171_v60 = vld [vmem:[%s5285_s7 + $0x64] ss:$8 sps:$4 sm:$0xff]   ;;  %v4175_v62 = vld [vmem:[%s5285_s7 + $0x60] ss:$8 sps:$4 sm:$0xff]   ;;  %v4177_v0 = vld [vmem:[%s5285_s7 + $0x74] ss:$8 sps:$4 sm:$0xff]  }
  0xb3   : > { %v4173_v61 = vld [vmem:[%s5285_s7 + $0x164] ss:$8 sps:$4 sm:$0xff]   ;;  %v4176_v63 = vld [vmem:[%s5285_s7 + $0x160] ss:$8 sps:$4 sm:$0xff]   ;;  %v4179_v1 = vld [vmem:[%s5285_s7 + $0x174] ss:$8 sps:$4 sm:$0xff]  }
  0xb4   : > { %3259 = vmatpush1.bf16.msra.mxu0 %v4151_v46  ;;  %v4181_v2 = vld [vmem:[%s5285_s7 + $0x70] ss:$8 sps:$4 sm:$0xff]   ;;  %v4183_v4 = vld [vmem:[%s5285_s7 + $0x84] ss:$8 sps:$4 sm:$0xff]   ;;  %v4187_v6 = vld [vmem:[%s5285_s7 + $0x80] ss:$8 sps:$4 sm:$0xff]  }
  0xb5   : > { %3300 = vmatpush1.bf16.msra.mxu1 %v4152_v47  ;;  %3260 = vmatprep.subr.bf16.mxu0 %v4153_v48  ;;  %v4182_v3 = vld [vmem:[%s5285_s7 + $0x170] ss:$8 sps:$4 sm:$0xff]   ;;  %v4185_v5 = vld [vmem:[%s5285_s7 + $0x184] ss:$8 sps:$4 sm:$0xff]   ;;  %v4188_v7 = vld [vmem:[%s5285_s7 + $0x180] ss:$8 sps:$4 sm:$0xff]  }
  0xb6   : > { %3301 = vmatprep.subr.bf16.mxu1 %v4155_v49  ;;  %v4189_v8 = vld [vmem:[%s5285_s7 + $0x94] ss:$8 sps:$4 sm:$0xff]   ;;  %v4193_v10 = vld [vmem:[%s5285_s7 + $0x90] ss:$8 sps:$4 sm:$0xff]   ;;  %v4195_v12 = vld [vmem:[%s5285_s7 + $0xa4] ss:$8 sps:$4 sm:$0xff]  }
  0xb7   : > { %v4191_v9 = vld [vmem:[%s5285_s7 + $0x194] ss:$8 sps:$4 sm:$0xff]   ;;  %v4194_v11 = vld [vmem:[%s5285_s7 + $0x190] ss:$8 sps:$4 sm:$0xff]   ;;  %v4197_v13 = vld [vmem:[%s5285_s7 + $0x1a4] ss:$8 sps:$4 sm:$0xff]  }
  0xb8   : > { %3261 = vmatpush1.bf16.msra.mxu0 %v4157_v50  ;;  %v4199_v14 = vld [vmem:[%s5285_s7 + $0xa0] ss:$8 sps:$4 sm:$0xff]   ;;  %v4201_v16 = vld [vmem:[%s5285_s7 + $0xb4] ss:$8 sps:$4 sm:$0xff]   ;;  %v4205_v18 = vld [vmem:[%s5285_s7 + $0xb0] ss:$8 sps:$4 sm:$0xff]  }
  0xb9   : > { %3302 = vmatpush1.bf16.msra.mxu1 %v4158_v51  ;;  %3262 = vmatprep.subr.bf16.mxu0 %v4159_v52  ;;  %v4200_v15 = vld [vmem:[%s5285_s7 + $0x1a0] ss:$8 sps:$4 sm:$0xff]   ;;  %v4203_v17 = vld [vmem:[%s5285_s7 + $0x1b4] ss:$8 sps:$4 sm:$0xff]   ;;  %v4206_v19 = vld [vmem:[%s5285_s7 + $0x1b0] ss:$8 sps:$4 sm:$0xff]  }
  0xba   : > { %3303 = vmatprep.subr.bf16.mxu1 %v4161_v53  ;;  %v4207_v20 = vld [vmem:[%s5285_s7 + $0xc4] ss:$8 sps:$4 sm:$0xff]   ;;  %v4211_v22 = vld [vmem:[%s5285_s7 + $0xc0] ss:$8 sps:$4 sm:$0xff]   ;;  %v4213_v24 = vld [vmem:[%s5285_s7 + $0xd4] ss:$8 sps:$4 sm:$0xff]  }
  0xbb   : > { %v4209_v21 = vld [vmem:[%s5285_s7 + $0x1c4] ss:$8 sps:$4 sm:$0xff]   ;;  %v4212_v23 = vld [vmem:[%s5285_s7 + $0x1c0] ss:$8 sps:$4 sm:$0xff]   ;;  %v4215_v25 = vld [vmem:[%s5285_s7 + $0x1d4] ss:$8 sps:$4 sm:$0xff]  }
  0xbc   : > { %3263 = vmatpush1.bf16.msra.mxu0 %v4163_v54  ;;  %v4217_v26 = vld [vmem:[%s5285_s7 + $0xd0] ss:$8 sps:$4 sm:$0xff]   ;;  %v4219_v28 = vld [vmem:[%s5285_s7 + $0xe4] ss:$8 sps:$4 sm:$0xff]   ;;  %v4223_v30 = vld [vmem:[%s5285_s7 + $0xe0] ss:$8 sps:$4 sm:$0xff]  }
  0xbd   : > { %3304 = vmatpush1.bf16.msra.mxu1 %v4164_v55  ;;  %3264 = vmatprep.subr.bf16.mxu0 %v4165_v56  ;;  %v4218_v27 = vld [vmem:[%s5285_s7 + $0x1d0] ss:$8 sps:$4 sm:$0xff]   ;;  %v4221_v29 = vld [vmem:[%s5285_s7 + $0x1e4] ss:$8 sps:$4 sm:$0xff]   ;;  %v4224_v31 = vld [vmem:[%s5285_s7 + $0x1e0] ss:$8 sps:$4 sm:$0xff]  }
  0xbe   : > { %3305 = vmatprep.subr.bf16.mxu1 %v4167_v57  ;;  %v4225_v34 = vld [vmem:[%s5285_s7 + $0xf4] ss:$8 sps:$4 sm:$0xff]   ;;  %v4229_v36 = vld [vmem:[%s5285_s7 + $0xf0] ss:$8 sps:$4 sm:$0xff]   ;;  %v4237_v38 = vld [vmem:[%s5285_s7 + $0x204] ss:$8 sps:$4 sm:$0xff]  }
  0xbf   : > { %v4227_v35 = vld [vmem:[%s5285_s7 + $0x1f4] ss:$8 sps:$4 sm:$0xff]   ;;  %v4230_v37 = vld [vmem:[%s5285_s7 + $0x1f0] ss:$8 sps:$4 sm:$0xff]   ;;  %v4240_v39 = vld [vmem:[%s5285_s7 + $0x304] ss:$8 sps:$4 sm:$0xff]  }
  0xc0   : > { %3265 = vmatpush1.bf16.msra.mxu0 %v4169_v58  ;;  %v5356_v40 = vld [vmem:[%s5664_s0 + $0x10] sm:$0xff]  ;;  %v4235_v43 = vld [vmem:[%s5285_s7 + $0x200] ss:$8 sps:$4 sm:$0xff]   ;;  %v4249_v48 = vld [vmem:[%s5285_s7 + $0x224] ss:$8 sps:$4 sm:$0xff]   ;;  %s5675_s28 = smov (!%p1432_p9, %s3781_s28), 3 }
  0xc1   : > { %3306 = vmatpush1.bf16.msra.mxu1 %v4170_v59  ;;  %3266 = vmatprep.subr.bf16.mxu0 %v4171_v60  ;;  %v4238_v44 = vld [vmem:[%s5285_s7 + $0x300] ss:$8 sps:$4 sm:$0xff]   ;;  %v4243_v45 = vld [vmem:[%s5285_s7 + $0x214] ss:$8 sps:$4 sm:$0xff]   ;;  %v3789_v47 = vcombine.high %v5356_v40, %v5356_v40  ;;  %v4241_v32 = vld [vmem:[%s5285_s7 + $0x210] ss:$8 sps:$4 sm:$0xff]   ;;  %s1434_s4 = scalar_lea.vmem %s5666_s2, %s5675_s28 }
  0xc2   : > { %3307 = vmatprep.subr.bf16.mxu1 %v4173_v61  ;;  %v4246_v46 = vld [vmem:[%s5285_s7 + $0x314] ss:$8 sps:$4 sm:$0xff]   ;;  %v4244_v33 = vld [vmem:[%s5285_s7 + $0x310] ss:$8 sps:$4 sm:$0xff]   ;;  %v4252_v49 = vld [vmem:[%s5285_s7 + $0x324] ss:$8 sps:$4 sm:$0xff]  }
  0xc3   : > { %v4247_v50 = vld [vmem:[%s5285_s7 + $0x220] ss:$8 sps:$4 sm:$0xff]   ;;  %v4255_v52 = vld [vmem:[%s5285_s7 + $0x234] ss:$8 sps:$4 sm:$0xff]   ;;  %v4253_v54 = vld [vmem:[%s5285_s7 + $0x230] ss:$8 sps:$4 sm:$0xff]  }
  0xc4   : > { %3267 = vmatpush1.bf16.msra.mxu0 %v4175_v62  ;;  %v4250_v51 = vld [vmem:[%s5285_s7 + $0x320] ss:$8 sps:$4 sm:$0xff]   ;;  %v4258_v53 = vld [vmem:[%s5285_s7 + $0x334] ss:$8 sps:$4 sm:$0xff]   ;;  %v4256_v55 = vld [vmem:[%s5285_s7 + $0x330] ss:$8 sps:$4 sm:$0xff]  }
  0xc5   : > { %3308 = vmatpush1.bf16.msra.mxu1 %v4176_v63  ;;  %3268 = vmatprep.subr.bf16.mxu0 %v4177_v0  ;;  %v4261_v56 = vld [vmem:[%s5285_s7 + $0x244] ss:$8 sps:$4 sm:$0xff]   ;;  %v4259_v58 = vld [vmem:[%s5285_s7 + $0x240] ss:$8 sps:$4 sm:$0xff]   ;;  %v4267_v60 = vld [vmem:[%s5285_s7 + $0x254] ss:$8 sps:$4 sm:$0xff]  }
  0xc6   : > { %3309 = vmatprep.subr.bf16.mxu1 %v4179_v1  ;;  %v4264_v57 = vld [vmem:[%s5285_s7 + $0x344] ss:$8 sps:$4 sm:$0xff]   ;;  %v4262_v59 = vld [vmem:[%s5285_s7 + $0x340] ss:$8 sps:$4 sm:$0xff]   ;;  %v4270_v61 = vld [vmem:[%s5285_s7 + $0x354] ss:$8 sps:$4 sm:$0xff]  }
  0xc7   : > { %v4265_v62 = vld [vmem:[%s5285_s7 + $0x250] ss:$8 sps:$4 sm:$0xff]   ;;  %v4273_v0 = vld [vmem:[%s5285_s7 + $0x264] ss:$8 sps:$4 sm:$0xff]   ;;  %s3783_s5 = sshll.u32 %s5675_s28, 3 }
  0xc8   : > { %3269 = vmatpush1.bf16.msra.mxu0 %v4181_v2  ;;  %v4268_v63 = vld [vmem:[%s5285_s7 + $0x350] ss:$8 sps:$4 sm:$0xff]   ;;  %v4276_v1 = vld [vmem:[%s5285_s7 + $0x364] ss:$8 sps:$4 sm:$0xff]  }
  0xc9   : > { %3310 = vmatpush1.bf16.msra.mxu1 %v4182_v3  ;;  %3270 = vmatprep.subr.bf16.mxu0 %v4183_v4  ;;  %v5391_v2 = vld [vmem:[%s5664_s0 + $0x18] sm:$0xff]  ;;  %v4271_v3 = vld [vmem:[%s5285_s7 + $0x260] ss:$8 sps:$4 sm:$0xff]  }
  0xca   : > { %3311 = vmatprep.subr.bf16.mxu1 %v4185_v5  ;;  %v3791_v4 = vcombine.high %v5391_v2, %v5391_v2  ;;  %v4274_v5 = vld [vmem:[%s5285_s7 + $0x360] ss:$8 sps:$4 sm:$0xff]  }
  0xcc   : > { %3271 = vmatpush1.bf16.msra.mxu0 %v4187_v6  ;;  %v4279_v6 = vld [vmem:[%s5285_s7 + $0x274] ss:$8 sps:$4 sm:$0xff]  }
  0xcd   : > { %3312 = vmatpush1.bf16.msra.mxu1 %v4188_v7  ;;  %3272 = vmatprep.subr.bf16.mxu0 %v4189_v8  ;;  %v4282_v7 = vld [vmem:[%s5285_s7 + $0x374] ss:$8 sps:$4 sm:$0xff]   ;;  %v4277_v8 = vld [vmem:[%s5285_s7 + $0x270] ss:$8 sps:$4 sm:$0xff]  }
  0xce   : > { %3313 = vmatprep.subr.bf16.mxu1 %v4191_v9  ;;  %v4280_v9 = vld [vmem:[%s5285_s7 + $0x370] ss:$8 sps:$4 sm:$0xff]  }
  0xd0   : > { %3273 = vmatpush1.bf16.msra.mxu0 %v4193_v10  ;;  %v4285_v10 = vld [vmem:[%s5285_s7 + $0x284] ss:$8 sps:$4 sm:$0xff]  }
  0xd1   : > { %3314 = vmatpush1.bf16.msra.mxu1 %v4194_v11  ;;  %3274 = vmatprep.subr.bf16.mxu0 %v4195_v12  ;;  %v4288_v11 = vld [vmem:[%s5285_s7 + $0x384] ss:$8 sps:$4 sm:$0xff]   ;;  %v4283_v12 = vld [vmem:[%s5285_s7 + $0x280] ss:$8 sps:$4 sm:$0xff]  }
  0xd2   : > { %3315 = vmatprep.subr.bf16.mxu1 %v4197_v13  ;;  %v4286_v13 = vld [vmem:[%s5285_s7 + $0x380] ss:$8 sps:$4 sm:$0xff]  }
  0xd4   : > { %3275 = vmatpush1.bf16.msra.mxu0 %v4199_v14  ;;  %v4291_v14 = vld [vmem:[%s5285_s7 + $0x294] ss:$8 sps:$4 sm:$0xff]  }
  0xd5   : > { %3316 = vmatpush1.bf16.msra.mxu1 %v4200_v15  ;;  %3276 = vmatprep.subr.bf16.mxu0 %v4201_v16  ;;  %v4294_v15 = vld [vmem:[%s5285_s7 + $0x394] ss:$8 sps:$4 sm:$0xff]   ;;  %v4289_v16 = vld [vmem:[%s5285_s7 + $0x290] ss:$8 sps:$4 sm:$0xff]  }
  0xd6   : > { %3317 = vmatprep.subr.bf16.mxu1 %v4203_v17  ;;  %v4292_v17 = vld [vmem:[%s5285_s7 + $0x390] ss:$8 sps:$4 sm:$0xff]  }
  0xd8   : > { %3277 = vmatpush1.bf16.msra.mxu0 %v4205_v18  ;;  %v4297_v18 = vld [vmem:[%s5285_s7 + $0x2a4] ss:$8 sps:$4 sm:$0xff]  }
  0xd9   : > { %3318 = vmatpush1.bf16.msra.mxu1 %v4206_v19  ;;  %3278 = vmatprep.subr.bf16.mxu0 %v4207_v20  ;;  %v4300_v19 = vld [vmem:[%s5285_s7 + $0x3a4] ss:$8 sps:$4 sm:$0xff]   ;;  %v4295_v20 = vld [vmem:[%s5285_s7 + $0x2a0] ss:$8 sps:$4 sm:$0xff]  }
  0xda   : > { %3319 = vmatprep.subr.bf16.mxu1 %v4209_v21  ;;  %v4298_v21 = vld [vmem:[%s5285_s7 + $0x3a0] ss:$8 sps:$4 sm:$0xff]  }
  0xdc   : > { %3279 = vmatpush1.bf16.msra.mxu0 %v4211_v22  ;;  %v4303_v22 = vld [vmem:[%s5285_s7 + $0x2b4] ss:$8 sps:$4 sm:$0xff]  }
  0xdd   : > { %3320 = vmatpush1.bf16.msra.mxu1 %v4212_v23  ;;  %3280 = vmatprep.subr.bf16.mxu0 %v4213_v24  ;;  %v4306_v23 = vld [vmem:[%s5285_s7 + $0x3b4] ss:$8 sps:$4 sm:$0xff]   ;;  %v4301_v24 = vld [vmem:[%s5285_s7 + $0x2b0] ss:$8 sps:$4 sm:$0xff]  }
  0xde   : > { %3321 = vmatprep.subr.bf16.mxu1 %v4215_v25  ;;  %v4304_v25 = vld [vmem:[%s5285_s7 + $0x3b0] ss:$8 sps:$4 sm:$0xff]  }
  0xe0   : > { %3281 = vmatpush1.bf16.msra.mxu0 %v4217_v26  ;;  %v4309_v26 = vld [vmem:[%s5285_s7 + $0x2c4] ss:$8 sps:$4 sm:$0xff]  }
  0xe1   : > { %3322 = vmatpush1.bf16.msra.mxu1 %v4218_v27  ;;  %3282 = vmatprep.subr.bf16.mxu0 %v4219_v28  ;;  %v4312_v27 = vld [vmem:[%s5285_s7 + $0x3c4] ss:$8 sps:$4 sm:$0xff]   ;;  %v4307_v28 = vld [vmem:[%s5285_s7 + $0x2c0] ss:$8 sps:$4 sm:$0xff]  }
  0xe2   : > { %3323 = vmatprep.subr.bf16.mxu1 %v4221_v29  ;;  %v4310_v29 = vld [vmem:[%s5285_s7 + $0x3c0] ss:$8 sps:$4 sm:$0xff]  }
  0xe4   : > { %3283 = vmatpush1.bf16.msra.mxu0 %v4223_v30  ;;  %v4315_v30 = vld [vmem:[%s5285_s7 + $0x2d4] ss:$8 sps:$4 sm:$0xff]  }
  0xe5   : > { %3324 = vmatpush1.bf16.msra.mxu1 %v4224_v31  ;;  %3284 = vmatprep.subr.bf16.mxu0 %v4225_v34  ;;  %v4318_v31 = vld [vmem:[%s5285_s7 + $0x3d4] ss:$8 sps:$4 sm:$0xff]   ;;  %v4313_v34 = vld [vmem:[%s5285_s7 + $0x2d0] ss:$8 sps:$4 sm:$0xff]  }
  0xe6   : > { %3325 = vmatprep.subr.bf16.mxu1 %v4227_v35  ;;  %v4316_v35 = vld [vmem:[%s5285_s7 + $0x3d0] ss:$8 sps:$4 sm:$0xff]  }
  0xe8   : > { %3285 = vmatpush1.bf16.msra.mxu0 %v4229_v36  ;;  %v4321_v36 = vld [vmem:[%s5285_s7 + $0x2e4] ss:$8 sps:$4 sm:$0xff]  }
  0xe9   : > { %3326 = vmatpush1.bf16.msra.mxu1 %v4230_v37  ;;  %3336 = vmatprep.subr.bf16.mxu0 %v4237_v38  ;;  %v4324_v37 = vld [vmem:[%s5285_s7 + $0x3e4] ss:$8 sps:$4 sm:$0xff]   ;;  %v4319_v38 = vld [vmem:[%s5285_s7 + $0x2e0] ss:$8 sps:$4 sm:$0xff]  }
  0xea   : > { %3377 = vmatprep.subr.bf16.mxu1 %v4240_v39  ;;  %v4322_v39 = vld [vmem:[%s5285_s7 + $0x3e0] ss:$8 sps:$4 sm:$0xff]  }
  0xeb   : > { %3287 = vmatmul.mubr.bf16.vlgmr.msra.gmra.mrb[0].mxu0 %v3784_v41  ;;  %v4327_v41 = vld [vmem:[%s5285_s7 + $0x2f4] ss:$8 sps:$4 sm:$0xff]  }
  0xec   : > { %3328 = vmatmul.mubr.bf16.vlgmr.msra.gmra.mrb[0].mxu1 %v3786_v42  ;;  %3337 = vmatpush1.bf16.msra.mxu0 %v4235_v43  ;;  %v4330_v42 = vld [vmem:[%s5285_s7 + $0x3f4] ss:$8 sps:$4 sm:$0xff]   ;;  %v4325_v43 = vld [vmem:[%s5285_s7 + $0x2f0] ss:$8 sps:$4 sm:$0xff]  }
  0xed   : > { %3378 = vmatpush1.bf16.msra.mxu1 %v4238_v44  ;;  %3338 = vmatprep.subr.bf16.mxu0 %v4243_v45  ;;  %v4328_v44 = vld [vmem:[%s5285_s7 + $0x3f0] ss:$8 sps:$4 sm:$0xff]   ;;  %v4335_v45 = vld [vmem:[%s5285_s7 + $0x404] ss:$8 sps:$4 sm:$0xff]  }
  0xee   : > { %3379 = vmatprep.subr.bf16.mxu1 %v4246_v46  ;;  %3368 = vmatprep.mubr.bf16.mxu0 %v3789_v47  ;;  %v4340_v46 = vld [vmem:[%s5285_s7 + $0x504] ss:$8 sps:$4 sm:$0xff]   ;;  %v3788_v47 = vcombine.low %v5356_v40, %v5356_v40 }
  0xef   : > { %3409 = vmatprep.mubr.bf16.mxu1 %v3791_v4  ;;  %v4367_v4 = vld [vmem:[%s5285_s7 + $0x454] ss:$8 sps:$4 sm:$0xff]  }
  0xf0   : > { %3339 = vmatpush1.bf16.msra.mxu0 %v4241_v32  ;;  %v4333_v32 = vld [vmem:[%s5285_s7 + $0x400] ss:$8 sps:$4 sm:$0xff]  }
  0xf1   : > { %3380 = vmatpush1.bf16.msra.mxu1 %v4244_v33  ;;  %3340 = vmatprep.subr.bf16.mxu0 %v4249_v48  ;;  %v3790_v33 = vcombine.low %v5391_v2, %v5391_v2  ;;  %v4338_v48 = vld [vmem:[%s5285_s7 + $0x500] ss:$8 sps:$4 sm:$0xff]  }
  0xf2   : > { %3381 = vmatprep.subr.bf16.mxu1 %v4252_v49  ;;  %v5444_v49 = vld [vmem:[%s5664_s0 + $0x20] sm:$0xff] }
  0xf3   : > { %v3793_v40 = vcombine.high %v5444_v49, %v5444_v49  ;;  %v4359_v2 = vld [vmem:[%s5285_s7 + $0x440] ss:$8 sps:$4 sm:$0xff]  }
  0xf4   : > { %3341 = vmatpush1.bf16.msra.mxu0 %v4247_v50  ;;  %v4343_v50 = vld [vmem:[%s5285_s7 + $0x414] ss:$8 sps:$4 sm:$0xff]  }
  0xf5   : > { %3382 = vmatpush1.bf16.msra.mxu1 %v4250_v51  ;;  %3342 = vmatprep.subr.bf16.mxu0 %v4255_v52  ;;  %v4346_v51 = vld [vmem:[%s5285_s7 + $0x514] ss:$8 sps:$4 sm:$0xff]   ;;  %v5453_v52 = vld [vmem:[%s5664_s0 + $0x28] sm:$0xff] }
  0xf6   : > { %3383 = vmatprep.subr.bf16.mxu1 %v4258_v53  ;;  %v4341_v53 = vld [vmem:[%s5285_s7 + $0x410] ss:$8 sps:$4 sm:$0xff]  }
  0xf8   : > { %3343 = vmatpush1.bf16.msra.mxu0 %v4253_v54  ;;  %v3795_v54 = vcombine.high %v5453_v52, %v5453_v52 }
  0xf9   : > { %3384 = vmatpush1.bf16.msra.mxu1 %v4256_v55  ;;  %3344 = vmatprep.subr.bf16.mxu0 %v4261_v56  ;;  %v4344_v55 = vld [vmem:[%s5285_s7 + $0x510] ss:$8 sps:$4 sm:$0xff]   ;;  %v4349_v56 = vld [vmem:[%s5285_s7 + $0x424] ss:$8 sps:$4 sm:$0xff]  }
  0xfa   : > { %3385 = vmatprep.subr.bf16.mxu1 %v4264_v57  ;;  %v4352_v57 = vld [vmem:[%s5285_s7 + $0x524] ss:$8 sps:$4 sm:$0xff]  }
  0xfc   : > { %3345 = vmatpush1.bf16.msra.mxu0 %v4259_v58  ;;  %v4347_v58 = vld [vmem:[%s5285_s7 + $0x420] ss:$8 sps:$4 sm:$0xff]  }
  0xfd   : > { %3386 = vmatpush1.bf16.msra.mxu1 %v4262_v59  ;;  %3346 = vmatprep.subr.bf16.mxu0 %v4267_v60  ;;  %v4350_v59 = vld [vmem:[%s5285_s7 + $0x520] ss:$8 sps:$4 sm:$0xff]   ;;  %v4355_v60 = vld [vmem:[%s5285_s7 + $0x434] ss:$8 sps:$4 sm:$0xff]  }
  0xfe   : > { %3387 = vmatprep.subr.bf16.mxu1 %v4270_v61  ;;  %v4358_v61 = vld [vmem:[%s5285_s7 + $0x534] ss:$8 sps:$4 sm:$0xff]  }
 0x100   : > { %3347 = vmatpush1.bf16.msra.mxu0 %v4265_v62  ;;  %v4353_v62 = vld [vmem:[%s5285_s7 + $0x430] ss:$8 sps:$4 sm:$0xff]  }
 0x101   : > { %3388 = vmatpush1.bf16.msra.mxu1 %v4268_v63  ;;  %3348 = vmatprep.subr.bf16.mxu0 %v4273_v0  ;;  %v4356_v63 = vld [vmem:[%s5285_s7 + $0x530] ss:$8 sps:$4 sm:$0xff]   ;;  %v4361_v0 = vld [vmem:[%s5285_s7 + $0x444] ss:$8 sps:$4 sm:$0xff]  }
 0x102   : > { %3389 = vmatprep.subr.bf16.mxu1 %v4276_v1  ;;  %v4364_v1 = vld [vmem:[%s5285_s7 + $0x544] ss:$8 sps:$4 sm:$0xff]  }
 0x104   : > { %3349 = vmatpush1.bf16.msra.mxu0 %v4271_v3  ;;  %v4362_v3 = vld [vmem:[%s5285_s7 + $0x540] ss:$8 sps:$4 sm:$0xff]  }
 0x105   : > { %3390 = vmatpush1.bf16.msra.mxu1 %v4274_v5  ;;  %3350 = vmatprep.subr.bf16.mxu0 %v4279_v6  ;;  %v4370_v5 = vld [vmem:[%s5285_s7 + $0x554] ss:$8 sps:$4 sm:$0xff]   ;;  %v4365_v6 = vld [vmem:[%s5285_s7 + $0x450] ss:$8 sps:$4 sm:$0xff]  }
 0x106   : > { %3391 = vmatprep.subr.bf16.mxu1 %v4282_v7  ;;  %v4368_v7 = vld [vmem:[%s5285_s7 + $0x550] ss:$8 sps:$4 sm:$0xff]  }
 0x108   : > { %3351 = vmatpush1.bf16.msra.mxu0 %v4277_v8  ;;  %v4373_v8 = vld [vmem:[%s5285_s7 + $0x464] ss:$8 sps:$4 sm:$0xff]  }
 0x109   : > { %3392 = vmatpush1.bf16.msra.mxu1 %v4280_v9  ;;  %3352 = vmatprep.subr.bf16.mxu0 %v4285_v10  ;;  %v4376_v9 = vld [vmem:[%s5285_s7 + $0x564] ss:$8 sps:$4 sm:$0xff]   ;;  %v4371_v10 = vld [vmem:[%s5285_s7 + $0x460] ss:$8 sps:$4 sm:$0xff]  }
 0x10a   : > { %3393 = vmatprep.subr.bf16.mxu1 %v4288_v11  ;;  %v4374_v11 = vld [vmem:[%s5285_s7 + $0x560] ss:$8 sps:$4 sm:$0xff]  }
 0x10c   : > { %3353 = vmatpush1.bf16.msra.mxu0 %v4283_v12  ;;  %v4379_v12 = vld [vmem:[%s5285_s7 + $0x474] ss:$8 sps:$4 sm:$0xff]  }
 0x10d   : > { %3394 = vmatpush1.bf16.msra.mxu1 %v4286_v13  ;;  %3354 = vmatprep.subr.bf16.mxu0 %v4291_v14  ;;  %v4382_v13 = vld [vmem:[%s5285_s7 + $0x574] ss:$8 sps:$4 sm:$0xff]   ;;  %v4377_v14 = vld [vmem:[%s5285_s7 + $0x470] ss:$8 sps:$4 sm:$0xff]  }
 0x10e   : > { %3395 = vmatprep.subr.bf16.mxu1 %v4294_v15  ;;  %v4380_v15 = vld [vmem:[%s5285_s7 + $0x570] ss:$8 sps:$4 sm:$0xff]  }
 0x110   : > { %3355 = vmatpush1.bf16.msra.mxu0 %v4289_v16  ;;  %v4385_v16 = vld [vmem:[%s5285_s7 + $0x484] ss:$8 sps:$4 sm:$0xff]  }
 0x111   : > { %3396 = vmatpush1.bf16.msra.mxu1 %v4292_v17  ;;  %3356 = vmatprep.subr.bf16.mxu0 %v4297_v18  ;;  %v4388_v17 = vld [vmem:[%s5285_s7 + $0x584] ss:$8 sps:$4 sm:$0xff]   ;;  %v4383_v18 = vld [vmem:[%s5285_s7 + $0x480] ss:$8 sps:$4 sm:$0xff]  }
 0x112   : > { %3397 = vmatprep.subr.bf16.mxu1 %v4300_v19  ;;  %v4386_v19 = vld [vmem:[%s5285_s7 + $0x580] ss:$8 sps:$4 sm:$0xff]  }
 0x114   : > { %3357 = vmatpush1.bf16.msra.mxu0 %v4295_v20  ;;  %v4391_v20 = vld [vmem:[%s5285_s7 + $0x494] ss:$8 sps:$4 sm:$0xff]  }
 0x115   : > { %3398 = vmatpush1.bf16.msra.mxu1 %v4298_v21  ;;  %3358 = vmatprep.subr.bf16.mxu0 %v4303_v22  ;;  %v4394_v21 = vld [vmem:[%s5285_s7 + $0x594] ss:$8 sps:$4 sm:$0xff]   ;;  %v4389_v22 = vld [vmem:[%s5285_s7 + $0x490] ss:$8 sps:$4 sm:$0xff]  }
 0x116   : > { %3399 = vmatprep.subr.bf16.mxu1 %v4306_v23  ;;  %v4392_v23 = vld [vmem:[%s5285_s7 + $0x590] ss:$8 sps:$4 sm:$0xff]  }
 0x118   : > { %3359 = vmatpush1.bf16.msra.mxu0 %v4301_v24  ;;  %v4397_v24 = vld [vmem:[%s5285_s7 + $0x4a4] ss:$8 sps:$4 sm:$0xff]  }
 0x119   : > { %3400 = vmatpush1.bf16.msra.mxu1 %v4304_v25  ;;  %3360 = vmatprep.subr.bf16.mxu0 %v4309_v26  ;;  %v4400_v25 = vld [vmem:[%s5285_s7 + $0x5a4] ss:$8 sps:$4 sm:$0xff]   ;;  %v4395_v26 = vld [vmem:[%s5285_s7 + $0x4a0] ss:$8 sps:$4 sm:$0xff]  }
 0x11a   : > { %3401 = vmatprep.subr.bf16.mxu1 %v4312_v27  ;;  %v4398_v27 = vld [vmem:[%s5285_s7 + $0x5a0] ss:$8 sps:$4 sm:$0xff]  }
 0x11c   : > { %3361 = vmatpush1.bf16.msra.mxu0 %v4307_v28  ;;  %v4403_v28 = vld [vmem:[%s5285_s7 + $0x4b4] ss:$8 sps:$4 sm:$0xff]  }
 0x11d   : > { %3402 = vmatpush1.bf16.msra.mxu1 %v4310_v29  ;;  %3362 = vmatprep.subr.bf16.mxu0 %v4315_v30  ;;  %v4406_v29 = vld [vmem:[%s5285_s7 + $0x5b4] ss:$8 sps:$4 sm:$0xff]   ;;  %v4401_v30 = vld [vmem:[%s5285_s7 + $0x4b0] ss:$8 sps:$4 sm:$0xff]  }
 0x11e   : > { %3403 = vmatprep.subr.bf16.mxu1 %v4318_v31  ;;  %v4404_v31 = vld [vmem:[%s5285_s7 + $0x5b0] ss:$8 sps:$4 sm:$0xff]  }
 0x120   : > { %3363 = vmatpush1.bf16.msra.mxu0 %v4313_v34  ;;  %v4409_v34 = vld [vmem:[%s5285_s7 + $0x4c4] ss:$8 sps:$4 sm:$0xff]  }
 0x121   : > { %3404 = vmatpush1.bf16.msra.mxu1 %v4316_v35  ;;  %3364 = vmatprep.subr.bf16.mxu0 %v4321_v36  ;;  %v4412_v35 = vld [vmem:[%s5285_s7 + $0x5c4] ss:$8 sps:$4 sm:$0xff]   ;;  %v4407_v36 = vld [vmem:[%s5285_s7 + $0x4c0] ss:$8 sps:$4 sm:$0xff]  }
 0x122   : > { %3405 = vmatprep.subr.bf16.mxu1 %v4324_v37  ;;  %v4410_v37 = vld [vmem:[%s5285_s7 + $0x5c0] ss:$8 sps:$4 sm:$0xff]  }
 0x124   : > { %3365 = vmatpush1.bf16.msra.mxu0 %v4319_v38  ;;  %v4415_v38 = vld [vmem:[%s5285_s7 + $0x4d4] ss:$8 sps:$4 sm:$0xff]  }
 0x125   : > { %3406 = vmatpush1.bf16.msra.mxu1 %v4322_v39  ;;  %3366 = vmatprep.subr.bf16.mxu0 %v4327_v41  ;;  %v4418_v39 = vld [vmem:[%s5285_s7 + $0x5d4] ss:$8 sps:$4 sm:$0xff]   ;;  %v4413_v41 = vld [vmem:[%s5285_s7 + $0x4d0] ss:$8 sps:$4 sm:$0xff]  }
 0x126   : > { %3407 = vmatprep.subr.bf16.mxu1 %v4330_v42  ;;  %v4416_v42 = vld [vmem:[%s5285_s7 + $0x5d0] ss:$8 sps:$4 sm:$0xff]  }
 0x128   : > { %3367 = vmatpush1.bf16.msra.mxu0 %v4325_v43  ;;  %v4421_v43 = vld [vmem:[%s5285_s7 + $0x4e4] ss:$8 sps:$4 sm:$0xff]  }
 0x129   : > { %3408 = vmatpush1.bf16.msra.mxu1 %v4328_v44  ;;  %3418 = vmatprep.subr.bf16.mxu0 %v4335_v45  ;;  %v4424_v44 = vld [vmem:[%s5285_s7 + $0x5e4] ss:$8 sps:$4 sm:$0xff]   ;;  %v4419_v45 = vld [vmem:[%s5285_s7 + $0x4e0] ss:$8 sps:$4 sm:$0xff]  }
 0x12a   : > { %3459 = vmatprep.subr.bf16.mxu1 %v4340_v46  ;;  %v4422_v46 = vld [vmem:[%s5285_s7 + $0x5e0] ss:$8 sps:$4 sm:$0xff]  }
 0x12b   : > { %3369 = vmatmul.mubr.bf16.vlgmr.msra.gmra.mrb[4].mxu0 %v3788_v47  ;;  %v4427_v47 = vld [vmem:[%s5285_s7 + $0x4f4] ss:$8 sps:$4 sm:$0xff]  }
 0x12c   : > { %3410 = vmatmul.mubr.bf16.vlgmr.msra.gmra.mrb[4].mxu1 %v3790_v33  ;;  %3419 = vmatpush1.bf16.msra.mxu0 %v4333_v32  ;;  %v4430_v32 = vld [vmem:[%s5285_s7 + $0x5f4] ss:$8 sps:$4 sm:$0xff]   ;;  %v4425_v33 = vld [vmem:[%s5285_s7 + $0x4f0] ss:$8 sps:$4 sm:$0xff]  }
 0x12d   : > { %3460 = vmatpush1.bf16.msra.mxu1 %v4338_v48  ;;  %3420 = vmatprep.subr.bf16.mxu0 %v4343_v50  ;;  %v4428_v48 = vld [vmem:[%s5285_s7 + $0x5f0] ss:$8 sps:$4 sm:$0xff]   ;;  %v4435_v50 = vld [vmem:[%s5285_s7 + $0x604] ss:$8 sps:$4 sm:$0xff]  }
 0x12e   : > { %3461 = vmatprep.subr.bf16.mxu1 %v4346_v51  ;;  %3450 = vmatprep.mubr.bf16.mxu0 %v3793_v40  ;;  %v4440_v51 = vld [vmem:[%s5285_s7 + $0x704] ss:$8 sps:$4 sm:$0xff]   ;;  %v4433_v40 = vld [vmem:[%s5285_s7 + $0x600] ss:$8 sps:$4 sm:$0xff]  }
 0x12f   : > { %3491 = vmatprep.mubr.bf16.mxu1 %v3795_v54  ;;  %v3792_v54 = vcombine.low %v5444_v49, %v5444_v49 }
 0x130   : > { %3421 = vmatpush1.bf16.msra.mxu0 %v4341_v53  ;;  %v5521_v53 = vld [vmem:[%s5664_s0 + $0x30] sm:$0xff] }
 0x131   : > { %3462 = vmatpush1.bf16.msra.mxu1 %v4344_v55  ;;  %3422 = vmatprep.subr.bf16.mxu0 %v4349_v56  ;;  %v3794_v55 = vcombine.low %v5453_v52, %v5453_v52  ;;  %v5530_v56 = vld [vmem:[%s5664_s0 + $0x38] sm:$0xff]  ;;  %v3797_v49 = vcombine.high %v5521_v53, %v5521_v53 }
 0x132   : > { %3463 = vmatprep.subr.bf16.mxu1 %v4352_v57  ;;  %v4438_v57 = vld [vmem:[%s5285_s7 + $0x700] ss:$8 sps:$4 sm:$0xff]   ;;  %v3799_v52 = vcombine.high %v5530_v56, %v5530_v56 }
 0x134   : > { %3423 = vmatpush1.bf16.msra.mxu0 %v4347_v58  ;;  %v4443_v58 = vld [vmem:[%s5285_s7 + $0x614] ss:$8 sps:$4 sm:$0xff]  }
 0x135   : > { %3464 = vmatpush1.bf16.msra.mxu1 %v4350_v59  ;;  %3424 = vmatprep.subr.bf16.mxu0 %v4355_v60  ;;  %v4446_v59 = vld [vmem:[%s5285_s7 + $0x714] ss:$8 sps:$4 sm:$0xff]   ;;  %v4441_v60 = vld [vmem:[%s5285_s7 + $0x610] ss:$8 sps:$4 sm:$0xff]  }
 0x136   : > { %3465 = vmatprep.subr.bf16.mxu1 %v4358_v61  ;;  %v4444_v61 = vld [vmem:[%s5285_s7 + $0x710] ss:$8 sps:$4 sm:$0xff]  }
 0x138   : > { %3425 = vmatpush1.bf16.msra.mxu0 %v4353_v62  ;;  %v4449_v62 = vld [vmem:[%s5285_s7 + $0x624] ss:$8 sps:$4 sm:$0xff]  }
 0x139   : > { %3466 = vmatpush1.bf16.msra.mxu1 %v4356_v63  ;;  %3426 = vmatprep.subr.bf16.mxu0 %v4361_v0  ;;  %v4452_v63 = vld [vmem:[%s5285_s7 + $0x724] ss:$8 sps:$4 sm:$0xff]   ;;  %v4447_v0 = vld [vmem:[%s5285_s7 + $0x620] ss:$8 sps:$4 sm:$0xff]  }
 0x13a   : > { %3467 = vmatprep.subr.bf16.mxu1 %v4364_v1  ;;  %v4450_v1 = vld [vmem:[%s5285_s7 + $0x720] ss:$8 sps:$4 sm:$0xff]  }
 0x13c   : > { %3427 = vmatpush1.bf16.msra.mxu0 %v4359_v2  ;;  %v4455_v2 = vld [vmem:[%s5285_s7 + $0x634] ss:$8 sps:$4 sm:$0xff]  }
 0x13d   : > { %3468 = vmatpush1.bf16.msra.mxu1 %v4362_v3  ;;  %3428 = vmatprep.subr.bf16.mxu0 %v4367_v4  ;;  %v4458_v3 = vld [vmem:[%s5285_s7 + $0x734] ss:$8 sps:$4 sm:$0xff]   ;;  %v4453_v4 = vld [vmem:[%s5285_s7 + $0x630] ss:$8 sps:$4 sm:$0xff]  }
 0x13e   : > { %3469 = vmatprep.subr.bf16.mxu1 %v4370_v5  ;;  %v4456_v5 = vld [vmem:[%s5285_s7 + $0x730] ss:$8 sps:$4 sm:$0xff]  }
 0x140   : > { %3429 = vmatpush1.bf16.msra.mxu0 %v4365_v6  ;;  %v4461_v6 = vld [vmem:[%s5285_s7 + $0x644] ss:$8 sps:$4 sm:$0xff]  }
 0x141   : > { %3470 = vmatpush1.bf16.msra.mxu1 %v4368_v7  ;;  %3430 = vmatprep.subr.bf16.mxu0 %v4373_v8  ;;  %v4464_v7 = vld [vmem:[%s5285_s7 + $0x744] ss:$8 sps:$4 sm:$0xff]   ;;  %v4459_v8 = vld [vmem:[%s5285_s7 + $0x640] ss:$8 sps:$4 sm:$0xff]  }
 0x142   : > { %3471 = vmatprep.subr.bf16.mxu1 %v4376_v9  ;;  %v4462_v9 = vld [vmem:[%s5285_s7 + $0x740] ss:$8 sps:$4 sm:$0xff]  }
 0x144   : > { %3431 = vmatpush1.bf16.msra.mxu0 %v4371_v10  ;;  %v4467_v10 = vld [vmem:[%s5285_s7 + $0x654] ss:$8 sps:$4 sm:$0xff]  }
 0x145   : > { %3472 = vmatpush1.bf16.msra.mxu1 %v4374_v11  ;;  %3432 = vmatprep.subr.bf16.mxu0 %v4379_v12  ;;  %v4470_v11 = vld [vmem:[%s5285_s7 + $0x754] ss:$8 sps:$4 sm:$0xff]   ;;  %v4465_v12 = vld [vmem:[%s5285_s7 + $0x650] ss:$8 sps:$4 sm:$0xff]  }
 0x146   : > { %3473 = vmatprep.subr.bf16.mxu1 %v4382_v13  ;;  %v4468_v13 = vld [vmem:[%s5285_s7 + $0x750] ss:$8 sps:$4 sm:$0xff]  }
 0x148   : > { %3433 = vmatpush1.bf16.msra.mxu0 %v4377_v14  ;;  %v4473_v14 = vld [vmem:[%s5285_s7 + $0x664] ss:$8 sps:$4 sm:$0xff]  }
 0x149   : > { %3474 = vmatpush1.bf16.msra.mxu1 %v4380_v15  ;;  %3434 = vmatprep.subr.bf16.mxu0 %v4385_v16  ;;  %v4476_v15 = vld [vmem:[%s5285_s7 + $0x764] ss:$8 sps:$4 sm:$0xff]   ;;  %v4471_v16 = vld [vmem:[%s5285_s7 + $0x660] ss:$8 sps:$4 sm:$0xff]  }
 0x14a   : > { %3475 = vmatprep.subr.bf16.mxu1 %v4388_v17  ;;  %v4474_v17 = vld [vmem:[%s5285_s7 + $0x760] ss:$8 sps:$4 sm:$0xff]  }
 0x14c   : > { %3435 = vmatpush1.bf16.msra.mxu0 %v4383_v18  ;;  %v4479_v18 = vld [vmem:[%s5285_s7 + $0x674] ss:$8 sps:$4 sm:$0xff]  }
 0x14d   : > { %3476 = vmatpush1.bf16.msra.mxu1 %v4386_v19  ;;  %3436 = vmatprep.subr.bf16.mxu0 %v4391_v20  ;;  %v4482_v19 = vld [vmem:[%s5285_s7 + $0x774] ss:$8 sps:$4 sm:$0xff]   ;;  %v4477_v20 = vld [vmem:[%s5285_s7 + $0x670] ss:$8 sps:$4 sm:$0xff]  }
 0x14e   : > { %3477 = vmatprep.subr.bf16.mxu1 %v4394_v21  ;;  %v4480_v21 = vld [vmem:[%s5285_s7 + $0x770] ss:$8 sps:$4 sm:$0xff]  }
 0x150   : > { %3437 = vmatpush1.bf16.msra.mxu0 %v4389_v22  ;;  %v4485_v22 = vld [vmem:[%s5285_s7 + $0x684] ss:$8 sps:$4 sm:$0xff]  }
 0x151   : > { %3478 = vmatpush1.bf16.msra.mxu1 %v4392_v23  ;;  %3438 = vmatprep.subr.bf16.mxu0 %v4397_v24  ;;  %v4488_v23 = vld [vmem:[%s5285_s7 + $0x784] ss:$8 sps:$4 sm:$0xff]   ;;  %v4483_v24 = vld [vmem:[%s5285_s7 + $0x680] ss:$8 sps:$4 sm:$0xff]  }
 0x152   : > { %3479 = vmatprep.subr.bf16.mxu1 %v4400_v25  ;;  %v4486_v25 = vld [vmem:[%s5285_s7 + $0x780] ss:$8 sps:$4 sm:$0xff]  }
 0x154   : > { %3439 = vmatpush1.bf16.msra.mxu0 %v4395_v26  ;;  %v4491_v26 = vld [vmem:[%s5285_s7 + $0x694] ss:$8 sps:$4 sm:$0xff]  }
 0x155   : > { %3480 = vmatpush1.bf16.msra.mxu1 %v4398_v27  ;;  %3440 = vmatprep.subr.bf16.mxu0 %v4403_v28  ;;  %v4494_v27 = vld [vmem:[%s5285_s7 + $0x794] ss:$8 sps:$4 sm:$0xff]   ;;  %v4489_v28 = vld [vmem:[%s5285_s7 + $0x690] ss:$8 sps:$4 sm:$0xff]  }
 0x156   : > { %3481 = vmatprep.subr.bf16.mxu1 %v4406_v29  ;;  %v4492_v29 = vld [vmem:[%s5285_s7 + $0x790] ss:$8 sps:$4 sm:$0xff]  }
 0x158   : > { %3441 = vmatpush1.bf16.msra.mxu0 %v4401_v30  ;;  %v4497_v30 = vld [vmem:[%s5285_s7 + $0x6a4] ss:$8 sps:$4 sm:$0xff]  }
 0x159   : > { %3482 = vmatpush1.bf16.msra.mxu1 %v4404_v31  ;;  %3442 = vmatprep.subr.bf16.mxu0 %v4409_v34  ;;  %v4500_v31 = vld [vmem:[%s5285_s7 + $0x7a4] ss:$8 sps:$4 sm:$0xff]   ;;  %v4495_v34 = vld [vmem:[%s5285_s7 + $0x6a0] ss:$8 sps:$4 sm:$0xff]  }
 0x15a   : > { %3483 = vmatprep.subr.bf16.mxu1 %v4412_v35  ;;  %v4498_v35 = vld [vmem:[%s5285_s7 + $0x7a0] ss:$8 sps:$4 sm:$0xff]  }
 0x15c   : > { %3443 = vmatpush1.bf16.msra.mxu0 %v4407_v36  ;;  %v4503_v36 = vld [vmem:[%s5285_s7 + $0x6b4] ss:$8 sps:$4 sm:$0xff]  }
 0x15d   : > { %3484 = vmatpush1.bf16.msra.mxu1 %v4410_v37  ;;  %3444 = vmatprep.subr.bf16.mxu0 %v4415_v38  ;;  %v4506_v37 = vld [vmem:[%s5285_s7 + $0x7b4] ss:$8 sps:$4 sm:$0xff]   ;;  %v4501_v38 = vld [vmem:[%s5285_s7 + $0x6b0] ss:$8 sps:$4 sm:$0xff]  }
 0x15e   : > { %3485 = vmatprep.subr.bf16.mxu1 %v4418_v39  ;;  %v4504_v39 = vld [vmem:[%s5285_s7 + $0x7b0] ss:$8 sps:$4 sm:$0xff]  }
 0x160   : > { %3445 = vmatpush1.bf16.msra.mxu0 %v4413_v41  ;;  %v4509_v41 = vld [vmem:[%s5285_s7 + $0x6c4] ss:$8 sps:$4 sm:$0xff]  }
 0x161   : > { %3486 = vmatpush1.bf16.msra.mxu1 %v4416_v42  ;;  %3446 = vmatprep.subr.bf16.mxu0 %v4421_v43  ;;  %v4512_v42 = vld [vmem:[%s5285_s7 + $0x7c4] ss:$8 sps:$4 sm:$0xff]   ;;  %v4507_v43 = vld [vmem:[%s5285_s7 + $0x6c0] ss:$8 sps:$4 sm:$0xff]  }
 0x162   : > { %3487 = vmatprep.subr.bf16.mxu1 %v4424_v44  ;;  %v4510_v44 = vld [vmem:[%s5285_s7 + $0x7c0] ss:$8 sps:$4 sm:$0xff]  }
 0x164   : > { %3447 = vmatpush1.bf16.msra.mxu0 %v4419_v45  ;;  %v4515_v45 = vld [vmem:[%s5285_s7 + $0x6d4] ss:$8 sps:$4 sm:$0xff]  }
 0x165   : > { %3488 = vmatpush1.bf16.msra.mxu1 %v4422_v46  ;;  %3448 = vmatprep.subr.bf16.mxu0 %v4427_v47  ;;  %v4518_v46 = vld [vmem:[%s5285_s7 + $0x7d4] ss:$8 sps:$4 sm:$0xff]   ;;  %v4513_v47 = vld [vmem:[%s5285_s7 + $0x6d0] ss:$8 sps:$4 sm:$0xff]  }
 0x166   : > { %3489 = vmatprep.subr.bf16.mxu1 %v4430_v32  ;;  %v4516_v32 = vld [vmem:[%s5285_s7 + $0x7d0] ss:$8 sps:$4 sm:$0xff]  }
 0x168   : > { %3449 = vmatpush1.bf16.msra.mxu0 %v4425_v33  ;;  %v4521_v33 = vld [vmem:[%s5285_s7 + $0x6e4] ss:$8 sps:$4 sm:$0xff]  }
 0x169   : > { %3490 = vmatpush1.bf16.msra.mxu1 %v4428_v48  ;;  %3500 = vmatprep.subr.bf16.mxu0 %v4435_v50  ;;  %v4524_v48 = vld [vmem:[%s5285_s7 + $0x7e4] ss:$8 sps:$4 sm:$0xff]   ;;  %v4519_v50 = vld [vmem:[%s5285_s7 + $0x6e0] ss:$8 sps:$4 sm:$0xff]  }
 0x16a   : > { %3541 = vmatprep.subr.bf16.mxu1 %v4440_v51  ;;  %v4522_v51 = vld [vmem:[%s5285_s7 + $0x7e0] ss:$8 sps:$4 sm:$0xff]  }
 0x16b   : > { %3451 = vmatmul.mubr.bf16.vlgmr.msra.gmra.mrb[8].mxu0 %v3792_v54  ;;  %v4530_v54 = vld [vmem:[%s5285_s7 + $0x7f4] ss:$8 sps:$4 sm:$0xff]  }
 0x16c   : > { %3492 = vmatmul.mubr.bf16.vlgmr.msra.gmra.mrb[8].mxu1 %v3794_v55  ;;  %3501 = vmatpush1.bf16.msra.mxu0 %v4433_v40  ;;  %v4527_v40 = vld [vmem:[%s5285_s7 + $0x6f4] ss:$8 sps:$4 sm:$0xff]   ;;  %v4525_v55 = vld [vmem:[%s5285_s7 + $0x6f0] ss:$8 sps:$4 sm:$0xff]  }
 0x16d   : > { %3542 = vmatpush1.bf16.msra.mxu1 %v4438_v57  ;;  %3502 = vmatprep.subr.bf16.mxu0 %v4443_v58  ;;  %v4528_v57 = vld [vmem:[%s5285_s7 + $0x7f0] ss:$8 sps:$4 sm:$0xff]   ;;  %v4535_v58 = vld [vmem:[%s5285_s7 + $0x804] ss:$8 sps:$4 sm:$0xff]  }
 0x16e   : > { %3543 = vmatprep.subr.bf16.mxu1 %v4446_v59  ;;  %3532 = vmatprep.mubr.bf16.mxu0 %v3797_v49  ;;  %v5601_v59 = vld [vmem:[%s5664_s0 + $0x40] sm:$0xff]  ;;  %v3796_v49 = vcombine.low %v5521_v53, %v5521_v53  ;;  %v4538_v53 = vld [vmem:[%s5285_s7 + $0x810] ss:$8 sps:$4 sm:$0xff]  }
 0x16f   : > { %3573 = vmatprep.mubr.bf16.mxu1 %v3799_v52  ;;  %v3798_v52 = vcombine.low %v5530_v56, %v5530_v56  ;;  %v4543_v56 = vld [vmem:[%s5285_s7 + $0x824] ss:$8 sps:$4 sm:$0xff]  }
 0x170   : > { %3503 = vmatpush1.bf16.msra.mxu0 %v4441_v60  ;;  %v4533_v60 = vld [vmem:[%s5285_s7 + $0x800] ss:$8 sps:$4 sm:$0xff]  }
 0x171   : > { %3544 = vmatpush1.bf16.msra.mxu1 %v4444_v61  ;;  %3504 = vmatprep.subr.bf16.mxu0 %v4449_v62  ;;  %v3801_v61 = vcombine.high %v5601_v59, %v5601_v59  ;;  %v4540_v62 = vld [vmem:[%s5285_s7 + $0x814] ss:$8 sps:$4 sm:$0xff]  }
 0x172   : > { %3545 = vmatprep.subr.bf16.mxu1 %v4452_v63  ;;  %v4541_v63 = vld [vmem:[%s5285_s7 + $0x820] ss:$8 sps:$4 sm:$0xff]  }
 0x174   : > { %3505 = vmatpush1.bf16.msra.mxu0 %v4447_v0  ;;  %v4546_v0 = vld [vmem:[%s5285_s7 + $0x834] ss:$8 sps:$4 sm:$0xff]  }
 0x175   : > { %3546 = vmatpush1.bf16.msra.mxu1 %v4450_v1  ;;  %3506 = vmatprep.subr.bf16.mxu0 %v4455_v2  ;;  %v4544_v1 = vld [vmem:[%s5285_s7 + $0x830] ss:$8 sps:$4 sm:$0xff]   ;;  %v4549_v2 = vld [vmem:[%s5285_s7 + $0x844] ss:$8 sps:$4 sm:$0xff]  }
 0x176   : > { %3547 = vmatprep.subr.bf16.mxu1 %v4458_v3  ;;  %v4547_v3 = vld [vmem:[%s5285_s7 + $0x840] ss:$8 sps:$4 sm:$0xff]  }
 0x178   : > { %3507 = vmatpush1.bf16.msra.mxu0 %v4453_v4  ;;  %v4552_v4 = vld [vmem:[%s5285_s7 + $0x854] ss:$8 sps:$4 sm:$0xff]  }
 0x179   : > { %3548 = vmatpush1.bf16.msra.mxu1 %v4456_v5  ;;  %3508 = vmatprep.subr.bf16.mxu0 %v4461_v6  ;;  %v4550_v5 = vld [vmem:[%s5285_s7 + $0x850] ss:$8 sps:$4 sm:$0xff]   ;;  %v4555_v6 = vld [vmem:[%s5285_s7 + $0x864] ss:$8 sps:$4 sm:$0xff]  }
 0x17a   : > { %3549 = vmatprep.subr.bf16.mxu1 %v4464_v7 }
 0x17c   : > { %3509 = vmatpush1.bf16.msra.mxu0 %v4459_v8 }
 0x17d   : > { %3550 = vmatpush1.bf16.msra.mxu1 %v4462_v9  ;;  %3510 = vmatprep.subr.bf16.mxu0 %v4467_v10 }
 0x17e   : > { %3551 = vmatprep.subr.bf16.mxu1 %v4470_v11 }
 0x180   : > { %3511 = vmatpush1.bf16.msra.mxu0 %v4465_v12 }
 0x181   : > { %3552 = vmatpush1.bf16.msra.mxu1 %v4468_v13  ;;  %3512 = vmatprep.subr.bf16.mxu0 %v4473_v14  ;;  %v4553_v14 = vld [vmem:[%s5285_s7 + $0x860] ss:$8 sps:$4 sm:$0xff]  }
 0x182   : > { %3553 = vmatprep.subr.bf16.mxu1 %v4476_v15 }
 0x184   : > { %3513 = vmatpush1.bf16.msra.mxu0 %v4471_v16 }
 0x185   : > { %3554 = vmatpush1.bf16.msra.mxu1 %v4474_v17  ;;  %3514 = vmatprep.subr.bf16.mxu0 %v4479_v18  ;;  %v4558_v17 = vld [vmem:[%s5285_s7 + $0x874] ss:$8 sps:$4 sm:$0xff]  }
 0x186   : > { %3555 = vmatprep.subr.bf16.mxu1 %v4482_v19  ;;  %v4556_v19 = vld [vmem:[%s5285_s7 + $0x870] ss:$8 sps:$4 sm:$0xff]  }
 0x188   : > { %3515 = vmatpush1.bf16.msra.mxu0 %v4477_v20  ;;  %v4561_v20 = vld [vmem:[%s5285_s7 + $0x884] ss:$8 sps:$4 sm:$0xff]  }
 0x189   : > { %3556 = vmatpush1.bf16.msra.mxu1 %v4480_v21  ;;  %3516 = vmatprep.subr.bf16.mxu0 %v4485_v22  ;;  %v4559_v21 = vld [vmem:[%s5285_s7 + $0x880] ss:$8 sps:$4 sm:$0xff]   ;;  %v4564_v22 = vld [vmem:[%s5285_s7 + $0x894] ss:$8 sps:$4 sm:$0xff]  }
 0x18a   : > { %3557 = vmatprep.subr.bf16.mxu1 %v4488_v23  ;;  %v4562_v23 = vld [vmem:[%s5285_s7 + $0x890] ss:$8 sps:$4 sm:$0xff]  }
 0x18c   : > { %3517 = vmatpush1.bf16.msra.mxu0 %v4483_v24  ;;  %v4567_v24 = vld [vmem:[%s5285_s7 + $0x8a4] ss:$8 sps:$4 sm:$0xff]  }
 0x18d   : > { %3558 = vmatpush1.bf16.msra.mxu1 %v4486_v25  ;;  %3518 = vmatprep.subr.bf16.mxu0 %v4491_v26  ;;  %v4565_v25 = vld [vmem:[%s5285_s7 + $0x8a0] ss:$8 sps:$4 sm:$0xff]   ;;  %v4570_v26 = vld [vmem:[%s5285_s7 + $0x8b4] ss:$8 sps:$4 sm:$0xff]  }
 0x18e   : > { %3559 = vmatprep.subr.bf16.mxu1 %v4494_v27  ;;  %v4568_v27 = vld [vmem:[%s5285_s7 + $0x8b0] ss:$8 sps:$4 sm:$0xff]  }
 0x190   : > { %3519 = vmatpush1.bf16.msra.mxu0 %v4489_v28  ;;  %v4573_v28 = vld [vmem:[%s5285_s7 + $0x8c4] ss:$8 sps:$4 sm:$0xff]  }
 0x191   : > { %3560 = vmatpush1.bf16.msra.mxu1 %v4492_v29  ;;  %3520 = vmatprep.subr.bf16.mxu0 %v4497_v30  ;;  %v4571_v29 = vld [vmem:[%s5285_s7 + $0x8c0] ss:$8 sps:$4 sm:$0xff]   ;;  %v4576_v30 = vld [vmem:[%s5285_s7 + $0x8d4] ss:$8 sps:$4 sm:$0xff]  }
 0x192   : > { %3561 = vmatprep.subr.bf16.mxu1 %v4500_v31  ;;  %v4574_v31 = vld [vmem:[%s5285_s7 + $0x8d0] ss:$8 sps:$4 sm:$0xff]  }
 0x194   : > { %3521 = vmatpush1.bf16.msra.mxu0 %v4495_v34  ;;  %v4579_v34 = vld [vmem:[%s5285_s7 + $0x8e4] ss:$8 sps:$4 sm:$0xff]  }
 0x195   : > { %3562 = vmatpush1.bf16.msra.mxu1 %v4498_v35  ;;  %3522 = vmatprep.subr.bf16.mxu0 %v4503_v36  ;;  %v4577_v35 = vld [vmem:[%s5285_s7 + $0x8e0] ss:$8 sps:$4 sm:$0xff]   ;;  %v4582_v36 = vld [vmem:[%s5285_s7 + $0x8f4] ss:$8 sps:$4 sm:$0xff]  }
 0x196   : > { %3563 = vmatprep.subr.bf16.mxu1 %v4506_v37  ;;  %v4580_v37 = vld [vmem:[%s5285_s7 + $0x8f0] ss:$8 sps:$4 sm:$0xff]   ;;  %s1444_s7 = scalar_lea.vmem %s5667_s3, %s3783_s5 }
 0x198   : > { %3523 = vmatpush1.bf16.msra.mxu0 %v4501_v38  ;;  %v3800_v38 = vcombine.low %v5601_v59, %v5601_v59 }
 0x199   : > { %3564 = vmatpush1.bf16.msra.mxu1 %v4504_v39  ;;  %3524 = vmatprep.subr.bf16.mxu0 %v4509_v41 }
 0x19a   : > { %3565 = vmatprep.subr.bf16.mxu1 %v4512_v42 }
 0x19c   : > { %3525 = vmatpush1.bf16.msra.mxu0 %v4507_v43 }
 0x19d   : > { %3566 = vmatpush1.bf16.msra.mxu1 %v4510_v44  ;;  %3526 = vmatprep.subr.bf16.mxu0 %v4515_v45 }
 0x19e   : > { %3567 = vmatprep.subr.bf16.mxu1 %v4518_v46 }
 0x1a0   : > { %3527 = vmatpush1.bf16.msra.mxu0 %v4513_v47 }
 0x1a1   : > { %3568 = vmatpush1.bf16.msra.mxu1 %v4516_v32  ;;  %3528 = vmatprep.subr.bf16.mxu0 %v4521_v33 }
 0x1a2   : > { %3569 = vmatprep.subr.bf16.mxu1 %v4524_v48 }
 0x1a4   : > { %3529 = vmatpush1.bf16.msra.mxu0 %v4519_v50 }
 0x1a5   : > { %3570 = vmatpush1.bf16.msra.mxu1 %v4522_v51  ;;  %3530 = vmatprep.subr.bf16.mxu0 %v4527_v40 }
 0x1a6   : > { %3571 = vmatprep.subr.bf16.mxu1 %v4530_v54 }
 0x1a8   : > { %3531 = vmatpush1.bf16.msra.mxu0 %v4525_v55 }
 0x1a9   : > { %3572 = vmatpush1.bf16.msra.mxu1 %v4528_v57  ;;  %3582 = vmatprep.subr.bf16.mxu0 %v4535_v58 }
 0x1ab   : > { %3533 = vmatmul.mubr.bf16.vlgmr.msra.gmra.mrb[12].mxu0 %v3796_v49 }
 0x1ac   : > { %3574 = vmatmul.mubr.bf16.vlgmr.msra.gmra.mrb[12].mxu1 %v3798_v52  ;;  %3583 = vmatpush1.bf16.msra.mxu0 %v4533_v60 }
 0x1ad   : > { %3614 = vmatprep.mubr.bf16.mxu0 %v3801_v61  ;;  %3584 = vmatprep.subr.bf16.mxu0 %v4540_v62 }
 0x1b0   : > { %3585 = vmatpush1.bf16.msra.mxu0 %v4538_v53 }
 0x1b1   : > { %3586 = vmatprep.subr.bf16.mxu0 %v4543_v56 }
 0x1b4   : > { %3587 = vmatpush1.bf16.msra.mxu0 %v4541_v63 }
 0x1b5   : > { %3588 = vmatprep.subr.bf16.mxu0 %v4546_v0 }
 0x1b8   : > { %3589 = vmatpush1.bf16.msra.mxu0 %v4544_v1 }
 0x1b9   : > { %3590 = vmatprep.subr.bf16.mxu0 %v4549_v2 }
 0x1bc   : > { %3591 = vmatpush1.bf16.msra.mxu0 %v4547_v3 }
 0x1bd   : > { %3592 = vmatprep.subr.bf16.mxu0 %v4552_v4 }
 0x1be   : > { %v3288_v7 = vpop.f32.mrb[0].mxu0 }
 0x1bf   : > { %v3329_v8 = vpop.f32.mrb[0].mxu1  ;;  %v3290_v10 = vpop.f32.mrb[1].mxu0 }
 0x1c0   : > { %v3330_v9 = vadd.f32 %v3329_v8, %v3288_v7  ;;  %v3331_v11 = vpop.f32.mrb[1].mxu1  ;;  %v3292_v13 = vpop.f32.mrb[2].mxu0  ;;  %3593 = vmatpush1.bf16.msra.mxu0 %v4550_v5 }
 0x1c1   : > { %v3332_v12 = vadd.f32 %v3331_v11, %v3290_v10  ;;  %v3333_v15 = vpop.f32.mrb[2].mxu1  ;;  %v3293_v16 = vpop.f32.mrb[3].mxu0  ;;  %3594 = vmatprep.subr.bf16.mxu0 %v4555_v6 }
 0x1c2   : > { %v3334_v18 = vpop.f32.mrb[3].mxu1 }
 0x1c4   : > { %3595 = vmatpush1.bf16.msra.mxu0 %v4553_v14 }
 0x1c5   : > { %3596 = vmatprep.subr.bf16.mxu0 %v4558_v17 }
 0x1c8   : > { %3597 = vmatpush1.bf16.msra.mxu0 %v4556_v19 }
 0x1c9   : > { %3598 = vmatprep.subr.bf16.mxu0 %v4561_v20 }
 0x1cc   : > { %3599 = vmatpush1.bf16.msra.mxu0 %v4559_v21 }
 0x1cd   : > { %3600 = vmatprep.subr.bf16.mxu0 %v4564_v22 }
 0x1d0   : > { %3601 = vmatpush1.bf16.msra.mxu0 %v4562_v23 }
 0x1d1   : > { %3602 = vmatprep.subr.bf16.mxu0 %v4567_v24 }
 0x1d4   : > { %3603 = vmatpush1.bf16.msra.mxu0 %v4565_v25 }
 0x1d5   : > { %3604 = vmatprep.subr.bf16.mxu0 %v4570_v26 }
 0x1d8   : > { %3605 = vmatpush1.bf16.msra.mxu0 %v4568_v27 }
 0x1d9   : > { %3606 = vmatprep.subr.bf16.mxu0 %v4573_v28 }
 0x1dc   : > { %3607 = vmatpush1.bf16.msra.mxu0 %v4571_v29 }
 0x1dd   : > { %3608 = vmatprep.subr.bf16.mxu0 %v4576_v30 }
 0x1e0   : > { %3609 = vmatpush1.bf16.msra.mxu0 %v4574_v31 }
 0x1e1   : > { %3610 = vmatprep.subr.bf16.mxu0 %v4579_v34 }
 0x1e4   : > { %3611 = vmatpush1.bf16.msra.mxu0 %v4577_v35 }
 0x1e5   : > { %3612 = vmatprep.subr.bf16.mxu0 %v4582_v36 }
 0x1e8   : > { %3613 = vmatpush1.bf16.msra.mxu0 %v4580_v37 }
 0x1eb   : > { %3615 = vmatmul.mubr.bf16.vlgmr.msra.gmra.mrb[16].mxu0 %v3800_v38 }
 0x1fe   : > { %v3370_v39 = vpop.f32.mrb[4].mxu0 }
 0x1ff   : > { %v3411_v41 = vpop.f32.mrb[4].mxu1  ;;  %v3371_v42 = vadd.f32 %v3370_v39, %v3330_v9  ;;  %v3372_v43 = vpop.f32.mrb[5].mxu0  ;;  %v3634_v9 = vlaneseq }
 0x200   : > { %v3413_v44 = vpop.f32.mrb[5].mxu1  ;;  %v3373_v45 = vadd.f32 %v3372_v43, %v3332_v12  ;;  %v3374_v46 = vpop.f32.mrb[6].mxu0  ;;  %v3632_v12 = vld [vmem:[%s1434_s4] sm:$0x3] }
 0x201   : > { %v3415_v47 = vpop.f32.mrb[6].mxu1  ;;  %v3412_v32 = vadd.f32 %v3411_v41, %v3371_v42  ;;  %v3375_v33 = vpop.f32.mrb[7].mxu0  ;;  %v3635_v10 = vshrl.u32 %v3634_v9, 7 }
 0x202   : > { %v3416_v48 = vpop.f32.mrb[7].mxu1  ;;  %v3414_v50 = vadd.f32 %v3413_v44, %v3373_v45 }
 0x203   : > { %v3636_v11 = vsub.s32 0, %v3635_v10  ;;  %v3640_v13 = vsub.s32 1, %v3635_v10 }
 0x205   : > { %v3637_v14 = vrot.slane %v3632_v12, %v3636_v11  ;;  %v3641_v16 = vrot.slane %v3632_v12, %v3640_v13 }
 0x23e   : > { %v3452_v51 = vpop.f32.mrb[8].mxu0 }
 0x23f   : > { %v3493_v40 = vpop.f32.mrb[8].mxu1  ;;  %v3453_v54 = vadd.f32 %v3452_v51, %v3412_v32  ;;  %v3454_v55 = vpop.f32.mrb[9].mxu0 }
 0x240   : > { %v3495_v57 = vpop.f32.mrb[9].mxu1  ;;  %v3455_v58 = vadd.f32 %v3454_v55, %v3414_v50  ;;  %v3456_v59 = vpop.f32.mrb[10].mxu0 }
 0x241   : > { %v3497_v49 = vpop.f32.mrb[10].mxu1  ;;  %v3494_v52 = vadd.f32 %v3493_v40, %v3453_v54  ;;  %v3457_v60 = vpop.f32.mrb[11].mxu0 }
 0x242   : > { %v3498_v61 = vpop.f32.mrb[11].mxu1  ;;  %v3496_v62 = vadd.f32 %v3495_v57, %v3455_v58 }
 0x27e   : > { %v3534_v53 = vpop.f32.mrb[12].mxu0 }
 0x27f   : > { %v3575_v56 = vpop.f32.mrb[12].mxu1  ;;  %v3535_v63 = vadd.f32 %v3534_v53, %v3494_v52  ;;  %v3536_v0 = vpop.f32.mrb[13].mxu0 }
 0x280   : > { %v3577_v1 = vpop.f32.mrb[13].mxu1  ;;  %v3537_v2 = vadd.f32 %v3536_v0, %v3496_v62  ;;  %v3538_v3 = vpop.f32.mrb[14].mxu0 }
 0x281   : > { %v3579_v4 = vpop.f32.mrb[14].mxu1  ;;  %v3576_v5 = vadd.f32 %v3575_v56, %v3535_v63  ;;  %v3539_v6 = vpop.f32.mrb[15].mxu0 }
 0x282   : > { %v3580_v7 = vpop.f32.mrb[15].mxu1  ;;  %v3578_v8 = vadd.f32 %v3577_v1, %v3537_v2 }
 0x2be   : > { %v3616_v15 = vpop.f32.mrb[16].mxu0 }
 0x2bf   : > { %v3617_v17 = vadd.f32 %v3616_v15, %v3576_v5  ;;  %v3618_v18 = vpop.f32.mrb[17].mxu0 }
 0x2c0   : > { %v3619_v19 = vadd.f32 %v3618_v18, %v3578_v8  ;;  %v3620_v20 = vpop.f32.mrb[18].mxu0 }
 0x2c1   : > { %v3644_v21 = vadd.f32 %v3637_v14, %v3617_v17  ;;  %v3621_v22 = vpop.f32.mrb[19].mxu0 }
 0x2c2   : > { %v3645_v23 = vadd.f32 %v3641_v16, %v3619_v19 }
 0x2c3   : > { %v3646_v24 = vmax.f32 %v3644_v21, 0.0 }
 0x2c4   : > { %v3647_v25 = vmax.f32 %v3645_v23, 0.0 }
 0x2c5   : > { %3648 = vst [vmem:[%s1444_s7] sm:$0xff] %v3646_v24 }
 0x2c6   : > { %3649 = vst [vmem:[%s1444_s7 + $0x8] sm:$0xff] %v3647_v25 }
 0x2c7 PF: > { %s13_s16 = sadd.s32 1, %s4623_s16   ;;  %s5668_s12 = smov %s4611_s13 }
 0x2c8   : > { %p10_p10 = scmp.ge.s32.totalorder %s13_s16, 4   ;;  %s5669_s13 = smov %s4680_s20 }
 0x2c9   : > { %s5670_s14 = smov %s4619_s15  ;;  %s5671_s15 = smov %s5673_s17 }
 0x2ca   :  { %12 = sbr.rel (!%p10_p10) target bundleno = 3 (0x3), region = 119 }

// kernel: _lambda_.21
= control target key start
LH: loop header
LB: loop body
LE: loop exit
PB: predicated region body
PF: predicated region fallthrough
CT: control target
= control target key end

     0   :  { %s92_s0 = inlined_call_operand.vmem [shape: f32[2,1,512], index: 0, kind: input, shape index: {}]   ;;  %s93_s1 = inlined_call_operand.hbm [shape: f32[2,512], index: 1, kind: output, shape index: {}]  }
   0x1   :  { %v41_v0 = vld [vmem:[%s92_s0] sm:$0xff]  }
   0x2   :  { %6 = vsyncpa [#allocation3], 0  ;;  %s66_s8 = smov [#allocation2]   ;;  %39 = vst.sshfl [vmem:[#allocation2] sm:$0xff pattern:$0x75316420] %v41_v0 }
   0x3   :  { %s31_s9 = sshll.u32 %s66_s8, 4  ;;  %s32_s9 = int_to_ptr.vmem [resolvable:$true] %s31_s9 }
   0x4   :  { %s42_s10 = scalar_lea.vmem %s32_s9, 128  ;;  %p47_p1 = scmp.lt.s32.totalorder %s32_s9, %s32_s9 }
   0x5   :  { %p43_p0 = scmp.ne.s32.totalorder %s32_s9, %s42_s10  ;;  %p48_p2 = scmp.lt.s32.totalorder %s42_s10, %s42_s10 }
   0x7   :  { %p49_p3 = por %p48_p2, %p47_p1 }
   0x9   :  { %p50_p4 = pnand %p49_p3, %p43_p0 }
   0xb   :  { %53 = shalt.err (!%p50_p4)
}
   0xc   :  { %s54_s13 = scalar_lea.hbm %s93_s1, 128 }
   0xd   :  { %p55_p5 = scmp.ne.s32.totalorder %s93_s1, %s54_s13  ;;  %p58_p6 = scmp.lt.u32.totalorder %s54_s13, %s93_s1 }
   0xf   :  { %p60_p7 = pnand %p58_p6, %p55_p5 }
  0x11   :  { %63 = shalt.err (!%p60_p7)
}
  0x12   :  { %34 = dma.vmem_to_hbm [thread:$0]  %s32_s9, 128, %s93_s1, [#allocation3]  }
  0x13   :  { %64 = dma.done.wait [#allocation3], 128  }
  0x14   :  { %65 = vsyncadd [#allocation3], 4294967168 }
  0x15   :  { %38 = vsyncpa [#allocation3], 1 }

// kernel: _lambda_.20
= control target key start
LH: loop header
LB: loop body
LE: loop exit
PB: predicated region body
PF: predicated region fallthrough
CT: control target
= control target key end

     0   :  { %s11851_s21 = smov 0   ;;  %s11853_s22 = smov 0   ;;  %s13946_s0 = inlined_call_operand.vmem [shape: bf16[8,4608], index: 0, kind: input, shape index: {}]   ;;  %s13947_s1 = inlined_call_operand.vmem [shape: bf16[4608,512], index: 1, kind: input, shape index: {}]   ;;  %s13948_s2 = inlined_call_operand.vmem [shape: f32[1,512], index: 2, kind: input, shape index: {}, may-alias: {2,5}]   ;;  %s13949_s3 = inlined_call_operand.vmem [shape: bf16[8,256], index: 3, kind: input, shape index: {}]   ;;  %s13950_s4 = inlined_call_operand.vmem [shape: bf16[256,512], index: 4, kind: input, shape index: {}]   ;;  %s13951_s5 = inlined_call_operand.vmem [shape: f32[1,512], index: 5, kind: input, shape index: {}, may-alias: {2,5}]   ;;  %s13952_s6 = inlined_call_operand.vmem [shape: f32[8,512], index: 6, kind: output, shape index: {}]  }
   0x1   :  { %s11855_s23 = smov 0   ;;  %s11857_s24 = smov 0  }
   0x2   :  { %s11859_s25 = smov 0  }
   0x3 LB: > { %s31_s26 = sadd.s32 1, %s11810_s24  ;;  %p79_p1 = scmp.ne.s32.totalorder %s11802_s22, %s11798_s21  ;;  %s11814_s25 = sphi %s11859_s25, %s16_s25   ;;  %s11810_s24 = sphi %s11857_s24, %s13957_s24   ;;  %s11806_s23 = sphi %s11855_s23, %s13956_s23   ;;  %s11802_s22 = sphi %s11853_s22, %s13955_s22   ;;  %s11798_s21 = sphi %s11851_s21, %s13954_s21  }
   0x4   : > { %p33_p0 = scmp.ge.s32.totalorder %s31_s26, 2  ;;  %p80_p2 = scmp.eq.s32.totalorder %s11814_s25, 0 }
   0x5   : > { %s72_s29 = sadd.s32 1, %s11802_s22  ;;  %p10048_p5 = scmp.ge.s32.totalorder %s11814_s25, 2 }
   0x6   : > { %s13959_s26 = smov (%p33_p0, %s31_s26), 0  ;;  %p11882_p3 = por %p80_p2, %p79_p1 }
   0x7   : > { %s68_s28 = ssub.s32 %s11810_s24, %s13959_s26  ;;  %258 = sbr.rel (%p10048_p5) target bundleno = 326 (0x146), region = 24 }
   0x8   : > { %p70_p4 = scmp.eq.s32.totalorder %s68_s28, 0 }
   0xa   : > { %s11890_s30 = scalar_select %p70_p4, %s11802_s22, %s72_s29  }
   0xe   : > { %261 = sbr.rel (!%p11882_p3) target bundleno = 306 (0x132), region = 28  ;;  %s263_s7 = sand.u32 (%p11882_p3), 1, %s11802_s22  }
   0xf   : > { %s10708_s8 = sshll.u32 (%p11882_p3), %s11810_s24, 3  ;;  %s10784_s9 = smul.u32 (%p11882_p3), 4608, %s263_s7 }
  0x10   : > { %s11900_s12 = scalar_lea.vmem (%p11882_p3), %s13947_s1, %s10708_s8 }
  0x11   : > { %v1452_v0 = vld [vmem:[%s11900_s12] sm:$0xff] (%p11882_p3)  ;;  %v1454_v1 = vld [vmem:[%s11900_s12 + $0x10] sm:$0xff] (%p11882_p3)  ;;  %s11908_s13 = scalar_lea.vmem (%p11882_p3), [#allocation3], %s10784_s9 }
  0x12   : > { %v1456_v2 = vld [vmem:[%s11900_s12 + $0x20] sm:$0xff] (%p11882_p3)  ;;  %v1458_v3 = vld [vmem:[%s11900_s12 + $0x30] sm:$0xff] (%p11882_p3)  ;;  %1453 = vst [vmem:[%s11908_s13] sm:$0xff] (%p11882_p3), %v1452_v0  ;;  %1455 = vst [vmem:[%s11908_s13 + $0x8] sm:$0xff] (%p11882_p3), %v1454_v1 }
  0x13   : > { %v1460_v4 = vld [vmem:[%s11900_s12 + $0x40] sm:$0xff] (%p11882_p3)  ;;  %v1462_v5 = vld [vmem:[%s11900_s12 + $0x50] sm:$0xff] (%p11882_p3)  ;;  %1457 = vst [vmem:[%s11908_s13 + $0x10] sm:$0xff] (%p11882_p3), %v1456_v2  ;;  %1459 = vst [vmem:[%s11908_s13 + $0x18] sm:$0xff] (%p11882_p3), %v1458_v3 }
  0x14   : > { %1461 = vst [vmem:[%s11908_s13 + $0x20] sm:$0xff] (%p11882_p3), %v1460_v4  ;;  %1463 = vst [vmem:[%s11908_s13 + $0x28] sm:$0xff] (%p11882_p3), %v1462_v5  ;;  %v1464_v6 = vld [vmem:[%s11900_s12 + $0x60] sm:$0xff] (%p11882_p3)  ;;  %v1466_v7 = vld [vmem:[%s11900_s12 + $0x70] sm:$0xff] (%p11882_p3) }
  0x15   : > { %v1468_v8 = vld [vmem:[%s11900_s12 + $0x80] sm:$0xff]  ;;  %1465 = vst [vmem:[%s11908_s13 + $0x30] sm:$0xff] %v1464_v6  ;;  %1467 = vst [vmem:[%s11908_s13 + $0x38] sm:$0xff] %v1466_v7  ;;  %v1470_v9 = vld [vmem:[%s11900_s12 + $0x90] sm:$0xff] }
  0x16   : > { %1469 = vst [vmem:[%s11908_s13 + $0x40] sm:$0xff] %v1468_v8  ;;  %v1472_v10 = vld [vmem:[%s11900_s12 + $0xa0] sm:$0xff]  ;;  %v1474_v11 = vld [vmem:[%s11900_s12 + $0xb0] sm:$0xff]  ;;  %1471 = vst [vmem:[%s11908_s13 + $0x48] sm:$0xff] %v1470_v9 }
  0x17   : > { %1473 = vst [vmem:[%s11908_s13 + $0x50] sm:$0xff] %v1472_v10  ;;  %1475 = vst [vmem:[%s11908_s13 + $0x58] sm:$0xff] %v1474_v11  ;;  %v1476_v12 = vld [vmem:[%s11900_s12 + $0xc0] sm:$0xff]  ;;  %v1478_v13 = vld [vmem:[%s11900_s12 + $0xd0] sm:$0xff] }
  0x18   : > { %v1480_v14 = vld [vmem:[%s11900_s12 + $0xe0] sm:$0xff]  ;;  %1477 = vst [vmem:[%s11908_s13 + $0x60] sm:$0xff] %v1476_v12  ;;  %1479 = vst [vmem:[%s11908_s13 + $0x68] sm:$0xff] %v1478_v13  ;;  %v1482_v15 = vld [vmem:[%s11900_s12 + $0xf0] sm:$0xff] }
  0x19   : > { %1481 = vst [vmem:[%s11908_s13 + $0x70] sm:$0xff] %v1480_v14  ;;  %v1484_v16 = vld [vmem:[%s11900_s12 + $0x100] sm:$0xff]  ;;  %v1486_v17 = vld [vmem:[%s11900_s12 + $0x110] sm:$0xff]  ;;  %1483 = vst [vmem:[%s11908_s13 + $0x78] sm:$0xff] %v1482_v15 }
  0x1a   : > { %1485 = vst [vmem:[%s11908_s13 + $0x80] sm:$0xff] %v1484_v16  ;;  %1487 = vst [vmem:[%s11908_s13 + $0x88] sm:$0xff] %v1486_v17  ;;  %v1488_v18 = vld [vmem:[%s11900_s12 + $0x120] sm:$0xff]  ;;  %v1490_v19 = vld [vmem:[%s11900_s12 + $0x130] sm:$0xff] }
  0x1b   : > { %v1492_v20 = vld [vmem:[%s11900_s12 + $0x140] sm:$0xff]  ;;  %1489 = vst [vmem:[%s11908_s13 + $0x90] sm:$0xff] %v1488_v18  ;;  %1491 = vst [vmem:[%s11908_s13 + $0x98] sm:$0xff] %v1490_v19  ;;  %v1494_v21 = vld [vmem:[%s11900_s12 + $0x150] sm:$0xff] }
  0x1c   : > { %1493 = vst [vmem:[%s11908_s13 + $0xa0] sm:$0xff] %v1492_v20  ;;  %v1496_v22 = vld [vmem:[%s11900_s12 + $0x160] sm:$0xff]  ;;  %v1498_v23 = vld [vmem:[%s11900_s12 + $0x170] sm:$0xff]  ;;  %1495 = vst [vmem:[%s11908_s13 + $0xa8] sm:$0xff] %v1494_v21 }
  0x1d   : > { %1497 = vst [vmem:[%s11908_s13 + $0xb0] sm:$0xff] %v1496_v22  ;;  %1499 = vst [vmem:[%s11908_s13 + $0xb8] sm:$0xff] %v1498_v23  ;;  %v1500_v24 = vld [vmem:[%s11900_s12 + $0x180] sm:$0xff]  ;;  %v1502_v25 = vld [vmem:[%s11900_s12 + $0x190] sm:$0xff] }
  0x1e   : > { %v1504_v26 = vld [vmem:[%s11900_s12 + $0x1a0] sm:$0xff]  ;;  %1501 = vst [vmem:[%s11908_s13 + $0xc0] sm:$0xff] %v1500_v24  ;;  %1503 = vst [vmem:[%s11908_s13 + $0xc8] sm:$0xff] %v1502_v25  ;;  %v1506_v27 = vld [vmem:[%s11900_s12 + $0x1b0] sm:$0xff] }
  0x1f   : > { %1505 = vst [vmem:[%s11908_s13 + $0xd0] sm:$0xff] %v1504_v26  ;;  %v1508_v28 = vld [vmem:[%s11900_s12 + $0x1c0] sm:$0xff]  ;;  %v1510_v29 = vld [vmem:[%s11900_s12 + $0x1d0] sm:$0xff]  ;;  %1507 = vst [vmem:[%s11908_s13 + $0xd8] sm:$0xff] %v1506_v27 }
  0x20   : > { %1509 = vst [vmem:[%s11908_s13 + $0xe0] sm:$0xff] %v1508_v28  ;;  %1511 = vst [vmem:[%s11908_s13 + $0xe8] sm:$0xff] %v1510_v29  ;;  %v1512_v30 = vld [vmem:[%s11900_s12 + $0x1e0] sm:$0xff]  ;;  %v1514_v31 = vld [vmem:[%s11900_s12 + $0x1f0] sm:$0xff] }
  0x21   : > { %v1516_v32 = vld [vmem:[%s11900_s12 + $0x200] sm:$0xff]  ;;  %1513 = vst [vmem:[%s11908_s13 + $0xf0] sm:$0xff] %v1512_v30  ;;  %1515 = vst [vmem:[%s11908_s13 + $0xf8] sm:$0xff] %v1514_v31  ;;  %v1518_v33 = vld [vmem:[%s11900_s12 + $0x210] sm:$0xff] }
  0x22   : > { %1517 = vst [vmem:[%s11908_s13 + $0x100] sm:$0xff] %v1516_v32  ;;  %v1520_v34 = vld [vmem:[%s11900_s12 + $0x220] sm:$0xff]  ;;  %v1522_v35 = vld [vmem:[%s11900_s12 + $0x230] sm:$0xff]  ;;  %1519 = vst [vmem:[%s11908_s13 + $0x108] sm:$0xff] %v1518_v33 }
  0x23   : > { %1521 = vst [vmem:[%s11908_s13 + $0x110] sm:$0xff] %v1520_v34  ;;  %1523 = vst [vmem:[%s11908_s13 + $0x118] sm:$0xff] %v1522_v35  ;;  %v1524_v36 = vld [vmem:[%s11900_s12 + $0x240] sm:$0xff]  ;;  %v1526_v37 = vld [vmem:[%s11900_s12 + $0x250] sm:$0xff] }
  0x24   : > { %v1528_v38 = vld [vmem:[%s11900_s12 + $0x260] sm:$0xff]  ;;  %1525 = vst [vmem:[%s11908_s13 + $0x120] sm:$0xff] %v1524_v36  ;;  %1527 = vst [vmem:[%s11908_s13 + $0x128] sm:$0xff] %v1526_v37  ;;  %v1530_v39 = vld [vmem:[%s11900_s12 + $0x270] sm:$0xff] }
  0x25   : > { %1529 = vst [vmem:[%s11908_s13 + $0x130] sm:$0xff] %v1528_v38  ;;  %v1532_v40 = vld [vmem:[%s11900_s12 + $0x280] sm:$0xff]  ;;  %v1534_v41 = vld [vmem:[%s11900_s12 + $0x290] sm:$0xff]  ;;  %1531 = vst [vmem:[%s11908_s13 + $0x138] sm:$0xff] %v1530_v39 }
  0x26   : > { %1533 = vst [vmem:[%s11908_s13 + $0x140] sm:$0xff] %v1532_v40  ;;  %1535 = vst [vmem:[%s11908_s13 + $0x148] sm:$0xff] %v1534_v41  ;;  %v1536_v42 = vld [vmem:[%s11900_s12 + $0x2a0] sm:$0xff]  ;;  %v1538_v43 = vld [vmem:[%s11900_s12 + $0x2b0] sm:$0xff] }
  0x27   : > { %v1540_v44 = vld [vmem:[%s11900_s12 + $0x2c0] sm:$0xff]  ;;  %1537 = vst [vmem:[%s11908_s13 + $0x150] sm:$0xff] %v1536_v42  ;;  %1539 = vst [vmem:[%s11908_s13 + $0x158] sm:$0xff] %v1538_v43  ;;  %v1542_v45 = vld [vmem:[%s11900_s12 + $0x2d0] sm:$0xff] }
  0x28   : > { %1541 = vst [vmem:[%s11908_s13 + $0x160] sm:$0xff] %v1540_v44  ;;  %v1544_v46 = vld [vmem:[%s11900_s12 + $0x2e0] sm:$0xff]  ;;  %v1546_v47 = vld [vmem:[%s11900_s12 + $0x2f0] sm:$0xff]  ;;  %1543 = vst [vmem:[%s11908_s13 + $0x168] sm:$0xff] %v1542_v45 }
  0x29   : > { %1545 = vst [vmem:[%s11908_s13 + $0x170] sm:$0xff] %v1544_v46  ;;  %1547 = vst [vmem:[%s11908_s13 + $0x178] sm:$0xff] %v1546_v47  ;;  %v1548_v48 = vld [vmem:[%s11900_s12 + $0x300] sm:$0xff]  ;;  %v1550_v49 = vld [vmem:[%s11900_s12 + $0x310] sm:$0xff] }
  0x2a   : > { %v1552_v50 = vld [vmem:[%s11900_s12 + $0x320] sm:$0xff]  ;;  %1549 = vst [vmem:[%s11908_s13 + $0x180] sm:$0xff] %v1548_v48  ;;  %1551 = vst [vmem:[%s11908_s13 + $0x188] sm:$0xff] %v1550_v49  ;;  %v1554_v51 = vld [vmem:[%s11900_s12 + $0x330] sm:$0xff] }
  0x2b   : > { %1553 = vst [vmem:[%s11908_s13 + $0x190] sm:$0xff] %v1552_v50  ;;  %v1556_v52 = vld [vmem:[%s11900_s12 + $0x340] sm:$0xff]  ;;  %v1558_v53 = vld [vmem:[%s11900_s12 + $0x350] sm:$0xff]  ;;  %1555 = vst [vmem:[%s11908_s13 + $0x198] sm:$0xff] %v1554_v51 }
  0x2c   : > { %1557 = vst [vmem:[%s11908_s13 + $0x1a0] sm:$0xff] %v1556_v52  ;;  %1559 = vst [vmem:[%s11908_s13 + $0x1a8] sm:$0xff] %v1558_v53  ;;  %v1560_v54 = vld [vmem:[%s11900_s12 + $0x360] sm:$0xff]  ;;  %v1562_v55 = vld [vmem:[%s11900_s12 + $0x370] sm:$0xff] }
  0x2d   : > { %v1564_v56 = vld [vmem:[%s11900_s12 + $0x380] sm:$0xff]  ;;  %1561 = vst [vmem:[%s11908_s13 + $0x1b0] sm:$0xff] %v1560_v54  ;;  %1563 = vst [vmem:[%s11908_s13 + $0x1b8] sm:$0xff] %v1562_v55  ;;  %v1566_v57 = vld [vmem:[%s11900_s12 + $0x390] sm:$0xff] }
  0x2e   : > { %1565 = vst [vmem:[%s11908_s13 + $0x1c0] sm:$0xff] %v1564_v56  ;;  %v1568_v58 = vld [vmem:[%s11900_s12 + $0x3a0] sm:$0xff]  ;;  %v1570_v59 = vld [vmem:[%s11900_s12 + $0x3b0] sm:$0xff]  ;;  %1567 = vst [vmem:[%s11908_s13 + $0x1c8] sm:$0xff] %v1566_v57 }
  0x2f   : > { %1569 = vst [vmem:[%s11908_s13 + $0x1d0] sm:$0xff] %v1568_v58  ;;  %1571 = vst [vmem:[%s11908_s13 + $0x1d8] sm:$0xff] %v1570_v59  ;;  %v1572_v60 = vld [vmem:[%s11900_s12 + $0x3c0] sm:$0xff]  ;;  %v1574_v61 = vld [vmem:[%s11900_s12 + $0x3d0] sm:$0xff] }
  0x30   : > { %v1576_v62 = vld [vmem:[%s11900_s12 + $0x3e0] sm:$0xff]  ;;  %1573 = vst [vmem:[%s11908_s13 + $0x1e0] sm:$0xff] %v1572_v60  ;;  %1575 = vst [vmem:[%s11908_s13 + $0x1e8] sm:$0xff] %v1574_v61  ;;  %v1578_v63 = vld [vmem:[%s11900_s12 + $0x3f0] sm:$0xff] }
  0x31   : > { %1577 = vst [vmem:[%s11908_s13 + $0x1f0] sm:$0xff] %v1576_v62  ;;  %v1580_v0 = vld [vmem:[%s11900_s12 + $0x400] sm:$0xff]  ;;  %v1582_v1 = vld [vmem:[%s11900_s12 + $0x410] sm:$0xff]  ;;  %1579 = vst [vmem:[%s11908_s13 + $0x1f8] sm:$0xff] %v1578_v63 }
  0x32   : > { %1581 = vst [vmem:[%s11908_s13 + $0x200] sm:$0xff] %v1580_v0  ;;  %1583 = vst [vmem:[%s11908_s13 + $0x208] sm:$0xff] %v1582_v1  ;;  %v1584_v2 = vld [vmem:[%s11900_s12 + $0x420] sm:$0xff]  ;;  %v1586_v3 = vld [vmem:[%s11900_s12 + $0x430] sm:$0xff] }
  0x33   : > { %v1588_v4 = vld [vmem:[%s11900_s12 + $0x440] sm:$0xff]  ;;  %1585 = vst [vmem:[%s11908_s13 + $0x210] sm:$0xff] %v1584_v2  ;;  %1587 = vst [vmem:[%s11908_s13 + $0x218] sm:$0xff] %v1586_v3  ;;  %v1590_v5 = vld [vmem:[%s11900_s12 + $0x450] sm:$0xff] }
  0x34   : > { %1589 = vst [vmem:[%s11908_s13 + $0x220] sm:$0xff] %v1588_v4  ;;  %v1592_v6 = vld [vmem:[%s11900_s12 + $0x460] sm:$0xff]  ;;  %v1594_v7 = vld [vmem:[%s11900_s12 + $0x470] sm:$0xff]  ;;  %1591 = vst [vmem:[%s11908_s13 + $0x228] sm:$0xff] %v1590_v5 }
  0x35   : > { %1593 = vst [vmem:[%s11908_s13 + $0x230] sm:$0xff] %v1592_v6  ;;  %1595 = vst [vmem:[%s11908_s13 + $0x238] sm:$0xff] %v1594_v7  ;;  %v1596_v8 = vld [vmem:[%s11900_s12 + $0x480] sm:$0xff]  ;;  %v1598_v9 = vld [vmem:[%s11900_s12 + $0x490] sm:$0xff] }
  0x36   : > { %v1600_v10 = vld [vmem:[%s11900_s12 + $0x4a0] sm:$0xff]  ;;  %1597 = vst [vmem:[%s11908_s13 + $0x240] sm:$0xff] %v1596_v8  ;;  %1599 = vst [vmem:[%s11908_s13 + $0x248] sm:$0xff] %v1598_v9  ;;  %v1602_v11 = vld [vmem:[%s11900_s12 + $0x4b0] sm:$0xff] }
  0x37   : > { %1601 = vst [vmem:[%s11908_s13 + $0x250] sm:$0xff] %v1600_v10  ;;  %v1604_v12 = vld [vmem:[%s11900_s12 + $0x4c0] sm:$0xff]  ;;  %v1606_v13 = vld [vmem:[%s11900_s12 + $0x4d0] sm:$0xff]  ;;  %1603 = vst [vmem:[%s11908_s13 + $0x258] sm:$0xff] %v1602_v11 }
  0x38   : > { %1605 = vst [vmem:[%s11908_s13 + $0x260] sm:$0xff] %v1604_v12  ;;  %1607 = vst [vmem:[%s11908_s13 + $0x268] sm:$0xff] %v1606_v13  ;;  %v1608_v14 = vld [vmem:[%s11900_s12 + $0x4e0] sm:$0xff]  ;;  %v1610_v15 = vld [vmem:[%s11900_s12 + $0x4f0] sm:$0xff] }
  0x39   : > { %v1612_v16 = vld [vmem:[%s11900_s12 + $0x500] sm:$0xff]  ;;  %1609 = vst [vmem:[%s11908_s13 + $0x270] sm:$0xff] %v1608_v14  ;;  %1611 = vst [vmem:[%s11908_s13 + $0x278] sm:$0xff] %v1610_v15  ;;  %v1614_v17 = vld [vmem:[%s11900_s12 + $0x510] sm:$0xff] }
  0x3a   : > { %1613 = vst [vmem:[%s11908_s13 + $0x280] sm:$0xff] %v1612_v16  ;;  %v1616_v18 = vld [vmem:[%s11900_s12 + $0x520] sm:$0xff]  ;;  %v1618_v19 = vld [vmem:[%s11900_s12 + $0x530] sm:$0xff]  ;;  %1615 = vst [vmem:[%s11908_s13 + $0x288] sm:$0xff] %v1614_v17 }
  0x3b   : > { %1617 = vst [vmem:[%s11908_s13 + $0x290] sm:$0xff] %v1616_v18  ;;  %1619 = vst [vmem:[%s11908_s13 + $0x298] sm:$0xff] %v1618_v19  ;;  %v1620_v20 = vld [vmem:[%s11900_s12 + $0x540] sm:$0xff]  ;;  %v1622_v21 = vld [vmem:[%s11900_s12 + $0x550] sm:$0xff] }
  0x3c   : > { %v1624_v22 = vld [vmem:[%s11900_s12 + $0x560] sm:$0xff]  ;;  %1621 = vst [vmem:[%s11908_s13 + $0x2a0] sm:$0xff] %v1620_v20  ;;  %1623 = vst [vmem:[%s11908_s13 + $0x2a8] sm:$0xff] %v1622_v21  ;;  %v1626_v23 = vld [vmem:[%s11900_s12 + $0x570] sm:$0xff] }
  0x3d   : > { %1625 = vst [vmem:[%s11908_s13 + $0x2b0] sm:$0xff] %v1624_v22  ;;  %v1628_v24 = vld [vmem:[%s11900_s12 + $0x580] sm:$0xff]  ;;  %v1630_v25 = vld [vmem:[%s11900_s12 + $0x590] sm:$0xff]  ;;  %1627 = vst [vmem:[%s11908_s13 + $0x2b8] sm:$0xff] %v1626_v23 }
  0x3e   : > { %1629 = vst [vmem:[%s11908_s13 + $0x2c0] sm:$0xff] %v1628_v24  ;;  %1631 = vst [vmem:[%s11908_s13 + $0x2c8] sm:$0xff] %v1630_v25  ;;  %v1632_v26 = vld [vmem:[%s11900_s12 + $0x5a0] sm:$0xff]  ;;  %v1634_v27 = vld [vmem:[%s11900_s12 + $0x5b0] sm:$0xff] }
  0x3f   : > { %v1636_v28 = vld [vmem:[%s11900_s12 + $0x5c0] sm:$0xff]  ;;  %1633 = vst [vmem:[%s11908_s13 + $0x2d0] sm:$0xff] %v1632_v26  ;;  %1635 = vst [vmem:[%s11908_s13 + $0x2d8] sm:$0xff] %v1634_v27  ;;  %v1638_v29 = vld [vmem:[%s11900_s12 + $0x5d0] sm:$0xff] }
  0x40   : > { %1637 = vst [vmem:[%s11908_s13 + $0x2e0] sm:$0xff] %v1636_v28  ;;  %v1640_v30 = vld [vmem:[%s11900_s12 + $0x5e0] sm:$0xff]  ;;  %v1642_v31 = vld [vmem:[%s11900_s12 + $0x5f0] sm:$0xff]  ;;  %1639 = vst [vmem:[%s11908_s13 + $0x2e8] sm:$0xff] %v1638_v29 }
  0x41   : > { %1641 = vst [vmem:[%s11908_s13 + $0x2f0] sm:$0xff] %v1640_v30  ;;  %1643 = vst [vmem:[%s11908_s13 + $0x2f8] sm:$0xff] %v1642_v31  ;;  %v1644_v32 = vld [vmem:[%s11900_s12 + $0x600] sm:$0xff]  ;;  %v1646_v33 = vld [vmem:[%s11900_s12 + $0x610] sm:$0xff] }
  0x42   : > { %v1648_v34 = vld [vmem:[%s11900_s12 + $0x620] sm:$0xff]  ;;  %1645 = vst [vmem:[%s11908_s13 + $0x300] sm:$0xff] %v1644_v32  ;;  %1647 = vst [vmem:[%s11908_s13 + $0x308] sm:$0xff] %v1646_v33  ;;  %v1650_v35 = vld [vmem:[%s11900_s12 + $0x630] sm:$0xff] }
  0x43   : > { %1649 = vst [vmem:[%s11908_s13 + $0x310] sm:$0xff] %v1648_v34  ;;  %v1652_v36 = vld [vmem:[%s11900_s12 + $0x640] sm:$0xff]  ;;  %v1654_v37 = vld [vmem:[%s11900_s12 + $0x650] sm:$0xff]  ;;  %1651 = vst [vmem:[%s11908_s13 + $0x318] sm:$0xff] %v1650_v35 }
  0x44   : > { %1653 = vst [vmem:[%s11908_s13 + $0x320] sm:$0xff] %v1652_v36  ;;  %1655 = vst [vmem:[%s11908_s13 + $0x328] sm:$0xff] %v1654_v37  ;;  %v1656_v38 = vld [vmem:[%s11900_s12 + $0x660] sm:$0xff]  ;;  %v1658_v39 = vld [vmem:[%s11900_s12 + $0x670] sm:$0xff] }
  0x45   : > { %v1660_v40 = vld [vmem:[%s11900_s12 + $0x680] sm:$0xff]  ;;  %1657 = vst [vmem:[%s11908_s13 + $0x330] sm:$0xff] %v1656_v38  ;;  %1659 = vst [vmem:[%s11908_s13 + $0x338] sm:$0xff] %v1658_v39  ;;  %v1662_v41 = vld [vmem:[%s11900_s12 + $0x690] sm:$0xff] }
  0x46   : > { %1661 = vst [vmem:[%s11908_s13 + $0x340] sm:$0xff] %v1660_v40  ;;  %v1664_v42 = vld [vmem:[%s11900_s12 + $0x6a0] sm:$0xff]  ;;  %v1666_v43 = vld [vmem:[%s11900_s12 + $0x6b0] sm:$0xff]  ;;  %1663 = vst [vmem:[%s11908_s13 + $0x348] sm:$0xff] %v1662_v41 }
  0x47   : > { %1665 = vst [vmem:[%s11908_s13 + $0x350] sm:$0xff] %v1664_v42  ;;  %1667 = vst [vmem:[%s11908_s13 + $0x358] sm:$0xff] %v1666_v43  ;;  %v1668_v44 = vld [vmem:[%s11900_s12 + $0x6c0] sm:$0xff]  ;;  %v1670_v45 = vld [vmem:[%s11900_s12 + $0x6d0] sm:$0xff] }
  0x48   : > { %v1672_v46 = vld [vmem:[%s11900_s12 + $0x6e0] sm:$0xff]  ;;  %1669 = vst [vmem:[%s11908_s13 + $0x360] sm:$0xff] %v1668_v44  ;;  %1671 = vst [vmem:[%s11908_s13 + $0x368] sm:$0xff] %v1670_v45  ;;  %v1674_v47 = vld [vmem:[%s11900_s12 + $0x6f0] sm:$0xff] }
  0x49   : > { %1673 = vst [vmem:[%s11908_s13 + $0x370] sm:$0xff] %v1672_v46  ;;  %v1676_v48 = vld [vmem:[%s11900_s12 + $0x700] sm:$0xff]  ;;  %v1678_v49 = vld [vmem:[%s11900_s12 + $0x710] sm:$0xff]  ;;  %1675 = vst [vmem:[%s11908_s13 + $0x378] sm:$0xff] %v1674_v47 }
  0x4a   : > { %1677 = vst [vmem:[%s11908_s13 + $0x380] sm:$0xff] %v1676_v48  ;;  %1679 = vst [vmem:[%s11908_s13 + $0x388] sm:$0xff] %v1678_v49  ;;  %v1680_v50 = vld [vmem:[%s11900_s12 + $0x720] sm:$0xff]  ;;  %v1682_v51 = vld [vmem:[%s11900_s12 + $0x730] sm:$0xff] }
  0x4b   : > { %v1684_v52 = vld [vmem:[%s11900_s12 + $0x740] sm:$0xff]  ;;  %1681 = vst [vmem:[%s11908_s13 + $0x390] sm:$0xff] %v1680_v50  ;;  %1683 = vst [vmem:[%s11908_s13 + $0x398] sm:$0xff] %v1682_v51  ;;  %v1686_v53 = vld [vmem:[%s11900_s12 + $0x750] sm:$0xff] }
  0x4c   : > { %1685 = vst [vmem:[%s11908_s13 + $0x3a0] sm:$0xff] %v1684_v52  ;;  %v1688_v54 = vld [vmem:[%s11900_s12 + $0x760] sm:$0xff]  ;;  %v1690_v55 = vld [vmem:[%s11900_s12 + $0x770] sm:$0xff]  ;;  %1687 = vst [vmem:[%s11908_s13 + $0x3a8] sm:$0xff] %v1686_v53 }
  0x4d   : > { %1689 = vst [vmem:[%s11908_s13 + $0x3b0] sm:$0xff] %v1688_v54  ;;  %1691 = vst [vmem:[%s11908_s13 + $0x3b8] sm:$0xff] %v1690_v55  ;;  %v1692_v56 = vld [vmem:[%s11900_s12 + $0x780] sm:$0xff]  ;;  %v1694_v57 = vld [vmem:[%s11900_s12 + $0x790] sm:$0xff] }
  0x4e   : > { %v1696_v58 = vld [vmem:[%s11900_s12 + $0x7a0] sm:$0xff]  ;;  %1693 = vst [vmem:[%s11908_s13 + $0x3c0] sm:$0xff] %v1692_v56  ;;  %1695 = vst [vmem:[%s11908_s13 + $0x3c8] sm:$0xff] %v1694_v57  ;;  %v1698_v59 = vld [vmem:[%s11900_s12 + $0x7b0] sm:$0xff] }
  0x4f   : > { %1697 = vst [vmem:[%s11908_s13 + $0x3d0] sm:$0xff] %v1696_v58  ;;  %v1700_v60 = vld [vmem:[%s11900_s12 + $0x7c0] sm:$0xff]  ;;  %v1702_v61 = vld [vmem:[%s11900_s12 + $0x7d0] sm:$0xff]  ;;  %1699 = vst [vmem:[%s11908_s13 + $0x3d8] sm:$0xff] %v1698_v59 }
  0x50   : > { %1701 = vst [vmem:[%s11908_s13 + $0x3e0] sm:$0xff] %v1700_v60  ;;  %1703 = vst [vmem:[%s11908_s13 + $0x3e8] sm:$0xff] %v1702_v61  ;;  %v1704_v62 = vld [vmem:[%s11900_s12 + $0x7e0] sm:$0xff]  ;;  %v1706_v63 = vld [vmem:[%s11900_s12 + $0x7f0] sm:$0xff] }
  0x51   : > { %v1708_v0 = vld [vmem:[%s11900_s12 + $0x800] sm:$0xff]  ;;  %1705 = vst [vmem:[%s11908_s13 + $0x3f0] sm:$0xff] %v1704_v62  ;;  %1707 = vst [vmem:[%s11908_s13 + $0x3f8] sm:$0xff] %v1706_v63  ;;  %v1710_v1 = vld [vmem:[%s11900_s12 + $0x810] sm:$0xff] }
  0x52   : > { %1709 = vst [vmem:[%s11908_s13 + $0x400] sm:$0xff] %v1708_v0  ;;  %v1712_v2 = vld [vmem:[%s11900_s12 + $0x820] sm:$0xff]  ;;  %v1714_v3 = vld [vmem:[%s11900_s12 + $0x830] sm:$0xff]  ;;  %1711 = vst [vmem:[%s11908_s13 + $0x408] sm:$0xff] %v1710_v1 }
  0x53   : > { %1713 = vst [vmem:[%s11908_s13 + $0x410] sm:$0xff] %v1712_v2  ;;  %1715 = vst [vmem:[%s11908_s13 + $0x418] sm:$0xff] %v1714_v3  ;;  %v1716_v4 = vld [vmem:[%s11900_s12 + $0x840] sm:$0xff]  ;;  %v1718_v5 = vld [vmem:[%s11900_s12 + $0x850] sm:$0xff] }
  0x54   : > { %v1720_v6 = vld [vmem:[%s11900_s12 + $0x860] sm:$0xff]  ;;  %1717 = vst [vmem:[%s11908_s13 + $0x420] sm:$0xff] %v1716_v4  ;;  %1719 = vst [vmem:[%s11908_s13 + $0x428] sm:$0xff] %v1718_v5  ;;  %v1722_v7 = vld [vmem:[%s11900_s12 + $0x870] sm:$0xff] }
  0x55   : > { %1721 = vst [vmem:[%s11908_s13 + $0x430] sm:$0xff] %v1720_v6  ;;  %v1724_v8 = vld [vmem:[%s11900_s12 + $0x880] sm:$0xff]  ;;  %v1726_v9 = vld [vmem:[%s11900_s12 + $0x890] sm:$0xff]  ;;  %1723 = vst [vmem:[%s11908_s13 + $0x438] sm:$0xff] %v1722_v7 }
  0x56   : > { %1725 = vst [vmem:[%s11908_s13 + $0x440] sm:$0xff] %v1724_v8  ;;  %1727 = vst [vmem:[%s11908_s13 + $0x448] sm:$0xff] %v1726_v9  ;;  %v1728_v10 = vld [vmem:[%s11900_s12 + $0x8a0] sm:$0xff]  ;;  %v1730_v11 = vld [vmem:[%s11900_s12 + $0x8b0] sm:$0xff] }
  0x57   : > { %v1732_v12 = vld [vmem:[%s11900_s12 + $0x8c0] sm:$0xff]  ;;  %1729 = vst [vmem:[%s11908_s13 + $0x450] sm:$0xff] %v1728_v10  ;;  %1731 = vst [vmem:[%s11908_s13 + $0x458] sm:$0xff] %v1730_v11  ;;  %v1734_v13 = vld [vmem:[%s11900_s12 + $0x8d0] sm:$0xff] }
  0x58   : > { %1733 = vst [vmem:[%s11908_s13 + $0x460] sm:$0xff] %v1732_v12  ;;  %v1736_v14 = vld [vmem:[%s11900_s12 + $0x8e0] sm:$0xff]  ;;  %v1738_v15 = vld [vmem:[%s11900_s12 + $0x8f0] sm:$0xff]  ;;  %1735 = vst [vmem:[%s11908_s13 + $0x468] sm:$0xff] %v1734_v13 }
  0x59   : > { %1737 = vst [vmem:[%s11908_s13 + $0x470] sm:$0xff] %v1736_v14  ;;  %1739 = vst [vmem:[%s11908_s13 + $0x478] sm:$0xff] %v1738_v15  ;;  %v1740_v16 = vld [vmem:[%s11900_s12 + $0x900] sm:$0xff]  ;;  %v1742_v17 = vld [vmem:[%s11900_s12 + $0x910] sm:$0xff] }
  0x5a   : > { %v1744_v18 = vld [vmem:[%s11900_s12 + $0x920] sm:$0xff]  ;;  %1741 = vst [vmem:[%s11908_s13 + $0x480] sm:$0xff] %v1740_v16  ;;  %1743 = vst [vmem:[%s11908_s13 + $0x488] sm:$0xff] %v1742_v17  ;;  %v1746_v19 = vld [vmem:[%s11900_s12 + $0x930] sm:$0xff] }
  0x5b   : > { %1745 = vst [vmem:[%s11908_s13 + $0x490] sm:$0xff] %v1744_v18  ;;  %v1748_v20 = vld [vmem:[%s11900_s12 + $0x940] sm:$0xff]  ;;  %v1750_v21 = vld [vmem:[%s11900_s12 + $0x950] sm:$0xff]  ;;  %1747 = vst [vmem:[%s11908_s13 + $0x498] sm:$0xff] %v1746_v19 }
  0x5c   : > { %1749 = vst [vmem:[%s11908_s13 + $0x4a0] sm:$0xff] %v1748_v20  ;;  %1751 = vst [vmem:[%s11908_s13 + $0x4a8] sm:$0xff] %v1750_v21  ;;  %v1752_v22 = vld [vmem:[%s11900_s12 + $0x960] sm:$0xff]  ;;  %v1754_v23 = vld [vmem:[%s11900_s12 + $0x970] sm:$0xff] }
  0x5d   : > { %v1756_v24 = vld [vmem:[%s11900_s12 + $0x980] sm:$0xff]  ;;  %1753 = vst [vmem:[%s11908_s13 + $0x4b0] sm:$0xff] %v1752_v22  ;;  %1755 = vst [vmem:[%s11908_s13 + $0x4b8] sm:$0xff] %v1754_v23  ;;  %v1758_v25 = vld [vmem:[%s11900_s12 + $0x990] sm:$0xff] }
  0x5e   : > { %1757 = vst [vmem:[%s11908_s13 + $0x4c0] sm:$0xff] %v1756_v24  ;;  %v1760_v26 = vld [vmem:[%s11900_s12 + $0x9a0] sm:$0xff]  ;;  %v1762_v27 = vld [vmem:[%s11900_s12 + $0x9b0] sm:$0xff]  ;;  %1759 = vst [vmem:[%s11908_s13 + $0x4c8] sm:$0xff] %v1758_v25 }
  0x5f   : > { %1761 = vst [vmem:[%s11908_s13 + $0x4d0] sm:$0xff] %v1760_v26  ;;  %1763 = vst [vmem:[%s11908_s13 + $0x4d8] sm:$0xff] %v1762_v27  ;;  %v1764_v28 = vld [vmem:[%s11900_s12 + $0x9c0] sm:$0xff]  ;;  %v1766_v29 = vld [vmem:[%s11900_s12 + $0x9d0] sm:$0xff] }
  0x60   : > { %v1768_v30 = vld [vmem:[%s11900_s12 + $0x9e0] sm:$0xff]  ;;  %1765 = vst [vmem:[%s11908_s13 + $0x4e0] sm:$0xff] %v1764_v28  ;;  %1767 = vst [vmem:[%s11908_s13 + $0x4e8] sm:$0xff] %v1766_v29  ;;  %v1770_v31 = vld [vmem:[%s11900_s12 + $0x9f0] sm:$0xff] }
  0x61   : > { %1769 = vst [vmem:[%s11908_s13 + $0x4f0] sm:$0xff] %v1768_v30  ;;  %v1772_v32 = vld [vmem:[%s11900_s12 + $0xa00] sm:$0xff]  ;;  %v1774_v33 = vld [vmem:[%s11900_s12 + $0xa10] sm:$0xff]  ;;  %1771 = vst [vmem:[%s11908_s13 + $0x4f8] sm:$0xff] %v1770_v31 }
  0x62   : > { %1773 = vst [vmem:[%s11908_s13 + $0x500] sm:$0xff] %v1772_v32  ;;  %1775 = vst [vmem:[%s11908_s13 + $0x508] sm:$0xff] %v1774_v33  ;;  %v1776_v34 = vld [vmem:[%s11900_s12 + $0xa20] sm:$0xff]  ;;  %v1778_v35 = vld [vmem:[%s11900_s12 + $0xa30] sm:$0xff] }
  0x63   : > { %v1780_v36 = vld [vmem:[%s11900_s12 + $0xa40] sm:$0xff]  ;;  %1777 = vst [vmem:[%s11908_s13 + $0x510] sm:$0xff] %v1776_v34  ;;  %1779 = vst [vmem:[%s11908_s13 + $0x518] sm:$0xff] %v1778_v35  ;;  %v1782_v37 = vld [vmem:[%s11900_s12 + $0xa50] sm:$0xff] }
  0x64   : > { %1781 = vst [vmem:[%s11908_s13 + $0x520] sm:$0xff] %v1780_v36  ;;  %v1784_v38 = vld [vmem:[%s11900_s12 + $0xa60] sm:$0xff]  ;;  %v1786_v39 = vld [vmem:[%s11900_s12 + $0xa70] sm:$0xff]  ;;  %1783 = vst [vmem:[%s11908_s13 + $0x528] sm:$0xff] %v1782_v37 }
  0x65   : > { %1785 = vst [vmem:[%s11908_s13 + $0x530] sm:$0xff] %v1784_v38  ;;  %1787 = vst [vmem:[%s11908_s13 + $0x538] sm:$0xff] %v1786_v39  ;;  %v1788_v40 = vld [vmem:[%s11900_s12 + $0xa80] sm:$0xff]  ;;  %v1790_v41 = vld [vmem:[%s11900_s12 + $0xa90] sm:$0xff] }
  0x66   : > { %v1792_v42 = vld [vmem:[%s11900_s12 + $0xaa0] sm:$0xff]  ;;  %1789 = vst [vmem:[%s11908_s13 + $0x540] sm:$0xff] %v1788_v40  ;;  %1791 = vst [vmem:[%s11908_s13 + $0x548] sm:$0xff] %v1790_v41  ;;  %v1794_v43 = vld [vmem:[%s11900_s12 + $0xab0] sm:$0xff] }
  0x67   : > { %1793 = vst [vmem:[%s11908_s13 + $0x550] sm:$0xff] %v1792_v42  ;;  %v1796_v44 = vld [vmem:[%s11900_s12 + $0xac0] sm:$0xff]  ;;  %v1798_v45 = vld [vmem:[%s11900_s12 + $0xad0] sm:$0xff]  ;;  %1795 = vst [vmem:[%s11908_s13 + $0x558] sm:$0xff] %v1794_v43 }
  0x68   : > { %1797 = vst [vmem:[%s11908_s13 + $0x560] sm:$0xff] %v1796_v44  ;;  %1799 = vst [vmem:[%s11908_s13 + $0x568] sm:$0xff] %v1798_v45  ;;  %v1800_v46 = vld [vmem:[%s11900_s12 + $0xae0] sm:$0xff]  ;;  %v1802_v47 = vld [vmem:[%s11900_s12 + $0xaf0] sm:$0xff] }
  0x69   : > { %v1804_v48 = vld [vmem:[%s11900_s12 + $0xb00] sm:$0xff]  ;;  %1801 = vst [vmem:[%s11908_s13 + $0x570] sm:$0xff] %v1800_v46  ;;  %1803 = vst [vmem:[%s11908_s13 + $0x578] sm:$0xff] %v1802_v47  ;;  %v1806_v49 = vld [vmem:[%s11900_s12 + $0xb10] sm:$0xff] }
  0x6a   : > { %1805 = vst [vmem:[%s11908_s13 + $0x580] sm:$0xff] %v1804_v48  ;;  %v1808_v50 = vld [vmem:[%s11900_s12 + $0xb20] sm:$0xff]  ;;  %v1810_v51 = vld [vmem:[%s11900_s12 + $0xb30] sm:$0xff]  ;;  %1807 = vst [vmem:[%s11908_s13 + $0x588] sm:$0xff] %v1806_v49 }
  0x6b   : > { %1809 = vst [vmem:[%s11908_s13 + $0x590] sm:$0xff] %v1808_v50  ;;  %1811 = vst [vmem:[%s11908_s13 + $0x598] sm:$0xff] %v1810_v51  ;;  %v1812_v52 = vld [vmem:[%s11900_s12 + $0xb40] sm:$0xff]  ;;  %v1814_v53 = vld [vmem:[%s11900_s12 + $0xb50] sm:$0xff] }
  0x6c   : > { %v1816_v54 = vld [vmem:[%s11900_s12 + $0xb60] sm:$0xff]  ;;  %1813 = vst [vmem:[%s11908_s13 + $0x5a0] sm:$0xff] %v1812_v52  ;;  %1815 = vst [vmem:[%s11908_s13 + $0x5a8] sm:$0xff] %v1814_v53  ;;  %v1818_v55 = vld [vmem:[%s11900_s12 + $0xb70] sm:$0xff] }
  0x6d   : > { %1817 = vst [vmem:[%s11908_s13 + $0x5b0] sm:$0xff] %v1816_v54  ;;  %v1820_v56 = vld [vmem:[%s11900_s12 + $0xb80] sm:$0xff]  ;;  %v1822_v57 = vld [vmem:[%s11900_s12 + $0xb90] sm:$0xff]  ;;  %1819 = vst [vmem:[%s11908_s13 + $0x5b8] sm:$0xff] %v1818_v55 }
  0x6e   : > { %1821 = vst [vmem:[%s11908_s13 + $0x5c0] sm:$0xff] %v1820_v56  ;;  %1823 = vst [vmem:[%s11908_s13 + $0x5c8] sm:$0xff] %v1822_v57  ;;  %v1824_v58 = vld [vmem:[%s11900_s12 + $0xba0] sm:$0xff]  ;;  %v1826_v59 = vld [vmem:[%s11900_s12 + $0xbb0] sm:$0xff] }
  0x6f   : > { %v1828_v60 = vld [vmem:[%s11900_s12 + $0xbc0] sm:$0xff]  ;;  %1825 = vst [vmem:[%s11908_s13 + $0x5d0] sm:$0xff] %v1824_v58  ;;  %1827 = vst [vmem:[%s11908_s13 + $0x5d8] sm:$0xff] %v1826_v59  ;;  %v1830_v61 = vld [vmem:[%s11900_s12 + $0xbd0] sm:$0xff] }
  0x70   : > { %1829 = vst [vmem:[%s11908_s13 + $0x5e0] sm:$0xff] %v1828_v60  ;;  %v1832_v62 = vld [vmem:[%s11900_s12 + $0xbe0] sm:$0xff]  ;;  %v1834_v63 = vld [vmem:[%s11900_s12 + $0xbf0] sm:$0xff]  ;;  %1831 = vst [vmem:[%s11908_s13 + $0x5e8] sm:$0xff] %v1830_v61 }
  0x71   : > { %1833 = vst [vmem:[%s11908_s13 + $0x5f0] sm:$0xff] %v1832_v62  ;;  %1835 = vst [vmem:[%s11908_s13 + $0x5f8] sm:$0xff] %v1834_v63  ;;  %v1836_v0 = vld [vmem:[%s11900_s12 + $0xc00] sm:$0xff]  ;;  %v1838_v1 = vld [vmem:[%s11900_s12 + $0xc10] sm:$0xff] }
  0x72   : > { %v1840_v2 = vld [vmem:[%s11900_s12 + $0xc20] sm:$0xff]  ;;  %1837 = vst [vmem:[%s11908_s13 + $0x600] sm:$0xff] %v1836_v0  ;;  %1839 = vst [vmem:[%s11908_s13 + $0x608] sm:$0xff] %v1838_v1  ;;  %v1842_v3 = vld [vmem:[%s11900_s12 + $0xc30] sm:$0xff] }
  0x73   : > { %1841 = vst [vmem:[%s11908_s13 + $0x610] sm:$0xff] %v1840_v2  ;;  %v1844_v4 = vld [vmem:[%s11900_s12 + $0xc40] sm:$0xff]  ;;  %v1846_v5 = vld [vmem:[%s11900_s12 + $0xc50] sm:$0xff]  ;;  %1843 = vst [vmem:[%s11908_s13 + $0x618] sm:$0xff] %v1842_v3 }
  0x74   : > { %1845 = vst [vmem:[%s11908_s13 + $0x620] sm:$0xff] %v1844_v4  ;;  %1847 = vst [vmem:[%s11908_s13 + $0x628] sm:$0xff] %v1846_v5  ;;  %v1848_v6 = vld [vmem:[%s11900_s12 + $0xc60] sm:$0xff]  ;;  %v1850_v7 = vld [vmem:[%s11900_s12 + $0xc70] sm:$0xff] }
  0x75   : > { %v1852_v8 = vld [vmem:[%s11900_s12 + $0xc80] sm:$0xff]  ;;  %1849 = vst [vmem:[%s11908_s13 + $0x630] sm:$0xff] %v1848_v6  ;;  %1851 = vst [vmem:[%s11908_s13 + $0x638] sm:$0xff] %v1850_v7  ;;  %v1854_v9 = vld [vmem:[%s11900_s12 + $0xc90] sm:$0xff] }
  0x76   : > { %1853 = vst [vmem:[%s11908_s13 + $0x640] sm:$0xff] %v1852_v8  ;;  %v1856_v10 = vld [vmem:[%s11900_s12 + $0xca0] sm:$0xff]  ;;  %v1858_v11 = vld [vmem:[%s11900_s12 + $0xcb0] sm:$0xff]  ;;  %1855 = vst [vmem:[%s11908_s13 + $0x648] sm:$0xff] %v1854_v9 }
  0x77   : > { %1857 = vst [vmem:[%s11908_s13 + $0x650] sm:$0xff] %v1856_v10  ;;  %1859 = vst [vmem:[%s11908_s13 + $0x658] sm:$0xff] %v1858_v11  ;;  %v1860_v12 = vld [vmem:[%s11900_s12 + $0xcc0] sm:$0xff]  ;;  %v1862_v13 = vld [vmem:[%s11900_s12 + $0xcd0] sm:$0xff] }
  0x78   : > { %v1864_v14 = vld [vmem:[%s11900_s12 + $0xce0] sm:$0xff]  ;;  %1861 = vst [vmem:[%s11908_s13 + $0x660] sm:$0xff] %v1860_v12  ;;  %1863 = vst [vmem:[%s11908_s13 + $0x668] sm:$0xff] %v1862_v13  ;;  %v1866_v15 = vld [vmem:[%s11900_s12 + $0xcf0] sm:$0xff] }
  0x79   : > { %1865 = vst [vmem:[%s11908_s13 + $0x670] sm:$0xff] %v1864_v14  ;;  %v1868_v16 = vld [vmem:[%s11900_s12 + $0xd00] sm:$0xff]  ;;  %v1870_v17 = vld [vmem:[%s11900_s12 + $0xd10] sm:$0xff]  ;;  %1867 = vst [vmem:[%s11908_s13 + $0x678] sm:$0xff] %v1866_v15 }
  0x7a   : > { %1869 = vst [vmem:[%s11908_s13 + $0x680] sm:$0xff] %v1868_v16  ;;  %1871 = vst [vmem:[%s11908_s13 + $0x688] sm:$0xff] %v1870_v17  ;;  %v1872_v18 = vld [vmem:[%s11900_s12 + $0xd20] sm:$0xff]  ;;  %v1874_v19 = vld [vmem:[%s11900_s12 + $0xd30] sm:$0xff] }
  0x7b   : > { %v1876_v20 = vld [vmem:[%s11900_s12 + $0xd40] sm:$0xff]  ;;  %1873 = vst [vmem:[%s11908_s13 + $0x690] sm:$0xff] %v1872_v18  ;;  %1875 = vst [vmem:[%s11908_s13 + $0x698] sm:$0xff] %v1874_v19  ;;  %v1878_v21 = vld [vmem:[%s11900_s12 + $0xd50] sm:$0xff] }
  0x7c   : > { %1877 = vst [vmem:[%s11908_s13 + $0x6a0] sm:$0xff] %v1876_v20  ;;  %v1880_v22 = vld [vmem:[%s11900_s12 + $0xd60] sm:$0xff]  ;;  %v1882_v23 = vld [vmem:[%s11900_s12 + $0xd70] sm:$0xff]  ;;  %1879 = vst [vmem:[%s11908_s13 + $0x6a8] sm:$0xff] %v1878_v21 }
  0x7d   : > { %1881 = vst [vmem:[%s11908_s13 + $0x6b0] sm:$0xff] %v1880_v22  ;;  %1883 = vst [vmem:[%s11908_s13 + $0x6b8] sm:$0xff] %v1882_v23  ;;  %v1884_v24 = vld [vmem:[%s11900_s12 + $0xd80] sm:$0xff]  ;;  %v1886_v25 = vld [vmem:[%s11900_s12 + $0xd90] sm:$0xff] }
  0x7e   : > { %v1888_v26 = vld [vmem:[%s11900_s12 + $0xda0] sm:$0xff]  ;;  %1885 = vst [vmem:[%s11908_s13 + $0x6c0] sm:$0xff] %v1884_v24  ;;  %1887 = vst [vmem:[%s11908_s13 + $0x6c8] sm:$0xff] %v1886_v25  ;;  %v1890_v27 = vld [vmem:[%s11900_s12 + $0xdb0] sm:$0xff] }
  0x7f   : > { %1889 = vst [vmem:[%s11908_s13 + $0x6d0] sm:$0xff] %v1888_v26  ;;  %v1892_v28 = vld [vmem:[%s11900_s12 + $0xdc0] sm:$0xff]  ;;  %v1894_v29 = vld [vmem:[%s11900_s12 + $0xdd0] sm:$0xff]  ;;  %1891 = vst [vmem:[%s11908_s13 + $0x6d8] sm:$0xff] %v1890_v27 }
  0x80   : > { %1893 = vst [vmem:[%s11908_s13 + $0x6e0] sm:$0xff] %v1892_v28  ;;  %1895 = vst [vmem:[%s11908_s13 + $0x6e8] sm:$0xff] %v1894_v29  ;;  %v1896_v30 = vld [vmem:[%s11900_s12 + $0xde0] sm:$0xff]  ;;  %v1898_v31 = vld [vmem:[%s11900_s12 + $0xdf0] sm:$0xff] }
  0x81   : > { %v1900_v32 = vld [vmem:[%s11900_s12 + $0xe00] sm:$0xff]  ;;  %1897 = vst [vmem:[%s11908_s13 + $0x6f0] sm:$0xff] %v1896_v30  ;;  %1899 = vst [vmem:[%s11908_s13 + $0x6f8] sm:$0xff] %v1898_v31  ;;  %v1902_v33 = vld [vmem:[%s11900_s12 + $0xe10] sm:$0xff] }
  0x82   : > { %1901 = vst [vmem:[%s11908_s13 + $0x700] sm:$0xff] %v1900_v32  ;;  %v1904_v34 = vld [vmem:[%s11900_s12 + $0xe20] sm:$0xff]  ;;  %v1906_v35 = vld [vmem:[%s11900_s12 + $0xe30] sm:$0xff]  ;;  %1903 = vst [vmem:[%s11908_s13 + $0x708] sm:$0xff] %v1902_v33 }
  0x83   : > { %1905 = vst [vmem:[%s11908_s13 + $0x710] sm:$0xff] %v1904_v34  ;;  %1907 = vst [vmem:[%s11908_s13 + $0x718] sm:$0xff] %v1906_v35  ;;  %v1908_v36 = vld [vmem:[%s11900_s12 + $0xe40] sm:$0xff]  ;;  %v1910_v37 = vld [vmem:[%s11900_s12 + $0xe50] sm:$0xff] }
  0x84   : > { %v1912_v38 = vld [vmem:[%s11900_s12 + $0xe60] sm:$0xff]  ;;  %1909 = vst [vmem:[%s11908_s13 + $0x720] sm:$0xff] %v1908_v36  ;;  %1911 = vst [vmem:[%s11908_s13 + $0x728] sm:$0xff] %v1910_v37  ;;  %v1914_v39 = vld [vmem:[%s11900_s12 + $0xe70] sm:$0xff] }
  0x85   : > { %1913 = vst [vmem:[%s11908_s13 + $0x730] sm:$0xff] %v1912_v38  ;;  %v1916_v40 = vld [vmem:[%s11900_s12 + $0xe80] sm:$0xff]  ;;  %v1918_v41 = vld [vmem:[%s11900_s12 + $0xe90] sm:$0xff]  ;;  %1915 = vst [vmem:[%s11908_s13 + $0x738] sm:$0xff] %v1914_v39 }
  0x86   : > { %1917 = vst [vmem:[%s11908_s13 + $0x740] sm:$0xff] %v1916_v40  ;;  %1919 = vst [vmem:[%s11908_s13 + $0x748] sm:$0xff] %v1918_v41  ;;  %v1920_v42 = vld [vmem:[%s11900_s12 + $0xea0] sm:$0xff]  ;;  %v1922_v43 = vld [vmem:[%s11900_s12 + $0xeb0] sm:$0xff] }
  0x87   : > { %v1924_v44 = vld [vmem:[%s11900_s12 + $0xec0] sm:$0xff]  ;;  %1921 = vst [vmem:[%s11908_s13 + $0x750] sm:$0xff] %v1920_v42  ;;  %1923 = vst [vmem:[%s11908_s13 + $0x758] sm:$0xff] %v1922_v43  ;;  %v1926_v45 = vld [vmem:[%s11900_s12 + $0xed0] sm:$0xff] }
  0x88   : > { %1925 = vst [vmem:[%s11908_s13 + $0x760] sm:$0xff] %v1924_v44  ;;  %v1928_v46 = vld [vmem:[%s11900_s12 + $0xee0] sm:$0xff]  ;;  %v1930_v47 = vld [vmem:[%s11900_s12 + $0xef0] sm:$0xff]  ;;  %1927 = vst [vmem:[%s11908_s13 + $0x768] sm:$0xff] %v1926_v45 }
  0x89   : > { %1929 = vst [vmem:[%s11908_s13 + $0x770] sm:$0xff] %v1928_v46  ;;  %1931 = vst [vmem:[%s11908_s13 + $0x778] sm:$0xff] %v1930_v47  ;;  %v1932_v48 = vld [vmem:[%s11900_s12 + $0xf00] sm:$0xff]  ;;  %v1934_v49 = vld [vmem:[%s11900_s12 + $0xf10] sm:$0xff] }
  0x8a   : > { %v1936_v50 = vld [vmem:[%s11900_s12 + $0xf20] sm:$0xff]  ;;  %1933 = vst [vmem:[%s11908_s13 + $0x780] sm:$0xff] %v1932_v48  ;;  %1935 = vst [vmem:[%s11908_s13 + $0x788] sm:$0xff] %v1934_v49  ;;  %v1938_v51 = vld [vmem:[%s11900_s12 + $0xf30] sm:$0xff] }
  0x8b   : > { %1937 = vst [vmem:[%s11908_s13 + $0x790] sm:$0xff] %v1936_v50  ;;  %v1940_v52 = vld [vmem:[%s11900_s12 + $0xf40] sm:$0xff]  ;;  %v1942_v53 = vld [vmem:[%s11900_s12 + $0xf50] sm:$0xff]  ;;  %1939 = vst [vmem:[%s11908_s13 + $0x798] sm:$0xff] %v1938_v51 }
  0x8c   : > { %1941 = vst [vmem:[%s11908_s13 + $0x7a0] sm:$0xff] %v1940_v52  ;;  %1943 = vst [vmem:[%s11908_s13 + $0x7a8] sm:$0xff] %v1942_v53  ;;  %v1944_v54 = vld [vmem:[%s11900_s12 + $0xf60] sm:$0xff]  ;;  %v1946_v55 = vld [vmem:[%s11900_s12 + $0xf70] sm:$0xff] }
  0x8d   : > { %v1948_v56 = vld [vmem:[%s11900_s12 + $0xf80] sm:$0xff]  ;;  %1945 = vst [vmem:[%s11908_s13 + $0x7b0] sm:$0xff] %v1944_v54  ;;  %1947 = vst [vmem:[%s11908_s13 + $0x7b8] sm:$0xff] %v1946_v55  ;;  %v1950_v57 = vld [vmem:[%s11900_s12 + $0xf90] sm:$0xff] }
  0x8e   : > { %1949 = vst [vmem:[%s11908_s13 + $0x7c0] sm:$0xff] %v1948_v56  ;;  %v1952_v58 = vld [vmem:[%s11900_s12 + $0xfa0] sm:$0xff]  ;;  %v1954_v59 = vld [vmem:[%s11900_s12 + $0xfb0] sm:$0xff]  ;;  %1951 = vst [vmem:[%s11908_s13 + $0x7c8] sm:$0xff] %v1950_v57 }
  0x8f   : > { %1953 = vst [vmem:[%s11908_s13 + $0x7d0] sm:$0xff] %v1952_v58  ;;  %1955 = vst [vmem:[%s11908_s13 + $0x7d8] sm:$0xff] %v1954_v59  ;;  %v1956_v60 = vld [vmem:[%s11900_s12 + $0xfc0] sm:$0xff]  ;;  %v1958_v61 = vld [vmem:[%s11900_s12 + $0xfd0] sm:$0xff] }
  0x90   : > { %v1960_v62 = vld [vmem:[%s11900_s12 + $0xfe0] sm:$0xff]  ;;  %1957 = vst [vmem:[%s11908_s13 + $0x7e0] sm:$0xff] %v1956_v60  ;;  %1959 = vst [vmem:[%s11908_s13 + $0x7e8] sm:$0xff] %v1958_v61  ;;  %v1962_v63 = vld [vmem:[%s11900_s12 + $0xff0] sm:$0xff] }
  0x91   : > { %1961 = vst [vmem:[%s11908_s13 + $0x7f0] sm:$0xff] %v1960_v62  ;;  %v1964_v0 = vld [vmem:[%s11900_s12 + $0x1000] sm:$0xff]  ;;  %v1966_v1 = vld [vmem:[%s11900_s12 + $0x1010] sm:$0xff]  ;;  %1963 = vst [vmem:[%s11908_s13 + $0x7f8] sm:$0xff] %v1962_v63 }
  0x92   : > { %1965 = vst [vmem:[%s11908_s13 + $0x800] sm:$0xff] %v1964_v0  ;;  %1967 = vst [vmem:[%s11908_s13 + $0x808] sm:$0xff] %v1966_v1  ;;  %v1968_v2 = vld [vmem:[%s11900_s12 + $0x1020] sm:$0xff]  ;;  %v1970_v3 = vld [vmem:[%s11900_s12 + $0x1030] sm:$0xff] }
  0x93   : > { %v1972_v4 = vld [vmem:[%s11900_s12 + $0x1040] sm:$0xff]  ;;  %1969 = vst [vmem:[%s11908_s13 + $0x810] sm:$0xff] %v1968_v2  ;;  %1971 = vst [vmem:[%s11908_s13 + $0x818] sm:$0xff] %v1970_v3  ;;  %v1974_v5 = vld [vmem:[%s11900_s12 + $0x1050] sm:$0xff] }
  0x94   : > { %1973 = vst [vmem:[%s11908_s13 + $0x820] sm:$0xff] %v1972_v4  ;;  %v1976_v6 = vld [vmem:[%s11900_s12 + $0x1060] sm:$0xff]  ;;  %v1978_v7 = vld [vmem:[%s11900_s12 + $0x1070] sm:$0xff]  ;;  %1975 = vst [vmem:[%s11908_s13 + $0x828] sm:$0xff] %v1974_v5 }
  0x95   : > { %1977 = vst [vmem:[%s11908_s13 + $0x830] sm:$0xff] %v1976_v6  ;;  %1979 = vst [vmem:[%s11908_s13 + $0x838] sm:$0xff] %v1978_v7  ;;  %v1980_v8 = vld [vmem:[%s11900_s12 + $0x1080] sm:$0xff]  ;;  %v1982_v9 = vld [vmem:[%s11900_s12 + $0x1090] sm:$0xff] }
  0x96   : > { %v1984_v10 = vld [vmem:[%s11900_s12 + $0x10a0] sm:$0xff]  ;;  %1981 = vst [vmem:[%s11908_s13 + $0x840] sm:$0xff] %v1980_v8  ;;  %1983 = vst [vmem:[%s11908_s13 + $0x848] sm:$0xff] %v1982_v9  ;;  %v1986_v11 = vld [vmem:[%s11900_s12 + $0x10b0] sm:$0xff] }
  0x97   : > { %1985 = vst [vmem:[%s11908_s13 + $0x850] sm:$0xff] %v1984_v10  ;;  %v1988_v12 = vld [vmem:[%s11900_s12 + $0x10c0] sm:$0xff]  ;;  %v1990_v13 = vld [vmem:[%s11900_s12 + $0x10d0] sm:$0xff]  ;;  %1987 = vst [vmem:[%s11908_s13 + $0x858] sm:$0xff] %v1986_v11 }
  0x98   : > { %1989 = vst [vmem:[%s11908_s13 + $0x860] sm:$0xff] %v1988_v12  ;;  %1991 = vst [vmem:[%s11908_s13 + $0x868] sm:$0xff] %v1990_v13  ;;  %v1992_v14 = vld [vmem:[%s11900_s12 + $0x10e0] sm:$0xff]  ;;  %v1994_v15 = vld [vmem:[%s11900_s12 + $0x10f0] sm:$0xff] }
  0x99   : > { %v1996_v16 = vld [vmem:[%s11900_s12 + $0x1100] sm:$0xff]  ;;  %1993 = vst [vmem:[%s11908_s13 + $0x870] sm:$0xff] %v1992_v14  ;;  %1995 = vst [vmem:[%s11908_s13 + $0x878] sm:$0xff] %v1994_v15  ;;  %v1998_v17 = vld [vmem:[%s11900_s12 + $0x1110] sm:$0xff] }
  0x9a   : > { %1997 = vst [vmem:[%s11908_s13 + $0x880] sm:$0xff] %v1996_v16  ;;  %v2000_v18 = vld [vmem:[%s11900_s12 + $0x1120] sm:$0xff]  ;;  %v2002_v19 = vld [vmem:[%s11900_s12 + $0x1130] sm:$0xff]  ;;  %1999 = vst [vmem:[%s11908_s13 + $0x888] sm:$0xff] %v1998_v17 }
  0x9b   : > { %2001 = vst [vmem:[%s11908_s13 + $0x890] sm:$0xff] %v2000_v18  ;;  %2003 = vst [vmem:[%s11908_s13 + $0x898] sm:$0xff] %v2002_v19  ;;  %v2004_v20 = vld [vmem:[%s11900_s12 + $0x1140] sm:$0xff]  ;;  %v2006_v21 = vld [vmem:[%s11900_s12 + $0x1150] sm:$0xff] }
  0x9c   : > { %v2008_v22 = vld [vmem:[%s11900_s12 + $0x1160] sm:$0xff]  ;;  %2005 = vst [vmem:[%s11908_s13 + $0x8a0] sm:$0xff] %v2004_v20  ;;  %2007 = vst [vmem:[%s11908_s13 + $0x8a8] sm:$0xff] %v2006_v21  ;;  %v2010_v23 = vld [vmem:[%s11900_s12 + $0x1170] sm:$0xff] }
  0x9d   : > { %2009 = vst [vmem:[%s11908_s13 + $0x8b0] sm:$0xff] %v2008_v22  ;;  %v2012_v24 = vld [vmem:[%s11900_s12 + $0x1180] sm:$0xff]  ;;  %v2014_v25 = vld [vmem:[%s11900_s12 + $0x1190] sm:$0xff]  ;;  %2011 = vst [vmem:[%s11908_s13 + $0x8b8] sm:$0xff] %v2010_v23 }
  0x9e   : > { %2013 = vst [vmem:[%s11908_s13 + $0x8c0] sm:$0xff] %v2012_v24  ;;  %2015 = vst [vmem:[%s11908_s13 + $0x8c8] sm:$0xff] %v2014_v25  ;;  %v2016_v26 = vld [vmem:[%s11900_s12 + $0x11a0] sm:$0xff]  ;;  %v2018_v27 = vld [vmem:[%s11900_s12 + $0x11b0] sm:$0xff] }
  0x9f   : > { %v2020_v28 = vld [vmem:[%s11900_s12 + $0x11c0] sm:$0xff]  ;;  %2017 = vst [vmem:[%s11908_s13 + $0x8d0] sm:$0xff] %v2016_v26  ;;  %2019 = vst [vmem:[%s11908_s13 + $0x8d8] sm:$0xff] %v2018_v27  ;;  %v2022_v29 = vld [vmem:[%s11900_s12 + $0x11d0] sm:$0xff] }
  0xa0   : > { %2021 = vst [vmem:[%s11908_s13 + $0x8e0] sm:$0xff] %v2020_v28  ;;  %v2024_v30 = vld [vmem:[%s11900_s12 + $0x11e0] sm:$0xff]  ;;  %v2026_v31 = vld [vmem:[%s11900_s12 + $0x11f0] sm:$0xff]  ;;  %2023 = vst [vmem:[%s11908_s13 + $0x8e8] sm:$0xff] %v2022_v29 }
  0xa1   : > { %2025 = vst [vmem:[%s11908_s13 + $0x8f0] sm:$0xff] %v2024_v30  ;;  %2027 = vst [vmem:[%s11908_s13 + $0x8f8] sm:$0xff] %v2026_v31  ;;  %v2028_v32 = vld [vmem:[%s11900_s12 + $0x1200] sm:$0xff]  ;;  %v2030_v33 = vld [vmem:[%s11900_s12 + $0x1210] sm:$0xff] }
  0xa2   : > { %v2032_v34 = vld [vmem:[%s11900_s12 + $0x1220] sm:$0xff]  ;;  %2029 = vst [vmem:[%s11908_s13 + $0x900] sm:$0xff] %v2028_v32  ;;  %2031 = vst [vmem:[%s11908_s13 + $0x908] sm:$0xff] %v2030_v33  ;;  %v2034_v35 = vld [vmem:[%s11900_s12 + $0x1230] sm:$0xff] }
  0xa3   : > { %2033 = vst [vmem:[%s11908_s13 + $0x910] sm:$0xff] %v2032_v34  ;;  %v2036_v36 = vld [vmem:[%s11900_s12 + $0x1240] sm:$0xff]  ;;  %v2038_v37 = vld [vmem:[%s11900_s12 + $0x1250] sm:$0xff]  ;;  %2035 = vst [vmem:[%s11908_s13 + $0x918] sm:$0xff] %v2034_v35 }
  0xa4   : > { %2037 = vst [vmem:[%s11908_s13 + $0x920] sm:$0xff] %v2036_v36  ;;  %2039 = vst [vmem:[%s11908_s13 + $0x928] sm:$0xff] %v2038_v37  ;;  %v2040_v38 = vld [vmem:[%s11900_s12 + $0x1260] sm:$0xff]  ;;  %v2042_v39 = vld [vmem:[%s11900_s12 + $0x1270] sm:$0xff] }
  0xa5   : > { %v2044_v40 = vld [vmem:[%s11900_s12 + $0x1280] sm:$0xff]  ;;  %2041 = vst [vmem:[%s11908_s13 + $0x930] sm:$0xff] %v2040_v38  ;;  %2043 = vst [vmem:[%s11908_s13 + $0x938] sm:$0xff] %v2042_v39  ;;  %v2046_v41 = vld [vmem:[%s11900_s12 + $0x1290] sm:$0xff] }
  0xa6   : > { %2045 = vst [vmem:[%s11908_s13 + $0x940] sm:$0xff] %v2044_v40  ;;  %v2048_v42 = vld [vmem:[%s11900_s12 + $0x12a0] sm:$0xff]  ;;  %v2050_v43 = vld [vmem:[%s11900_s12 + $0x12b0] sm:$0xff]  ;;  %2047 = vst [vmem:[%s11908_s13 + $0x948] sm:$0xff] %v2046_v41 }
  0xa7   : > { %2049 = vst [vmem:[%s11908_s13 + $0x950] sm:$0xff] %v2048_v42  ;;  %2051 = vst [vmem:[%s11908_s13 + $0x958] sm:$0xff] %v2050_v43  ;;  %v2052_v44 = vld [vmem:[%s11900_s12 + $0x12c0] sm:$0xff]  ;;  %v2054_v45 = vld [vmem:[%s11900_s12 + $0x12d0] sm:$0xff] }
  0xa8   : > { %v2056_v46 = vld [vmem:[%s11900_s12 + $0x12e0] sm:$0xff]  ;;  %2053 = vst [vmem:[%s11908_s13 + $0x960] sm:$0xff] %v2052_v44  ;;  %2055 = vst [vmem:[%s11908_s13 + $0x968] sm:$0xff] %v2054_v45  ;;  %v2058_v47 = vld [vmem:[%s11900_s12 + $0x12f0] sm:$0xff] }
  0xa9   : > { %2057 = vst [vmem:[%s11908_s13 + $0x970] sm:$0xff] %v2056_v46  ;;  %v2060_v48 = vld [vmem:[%s11900_s12 + $0x1300] sm:$0xff]  ;;  %v2062_v49 = vld [vmem:[%s11900_s12 + $0x1310] sm:$0xff]  ;;  %2059 = vst [vmem:[%s11908_s13 + $0x978] sm:$0xff] %v2058_v47 }
  0xaa   : > { %2061 = vst [vmem:[%s11908_s13 + $0x980] sm:$0xff] %v2060_v48  ;;  %2063 = vst [vmem:[%s11908_s13 + $0x988] sm:$0xff] %v2062_v49  ;;  %v2064_v50 = vld [vmem:[%s11900_s12 + $0x1320] sm:$0xff]  ;;  %v2066_v51 = vld [vmem:[%s11900_s12 + $0x1330] sm:$0xff] }
  0xab   : > { %v2068_v52 = vld [vmem:[%s11900_s12 + $0x1340] sm:$0xff]  ;;  %2065 = vst [vmem:[%s11908_s13 + $0x990] sm:$0xff] %v2064_v50  ;;  %2067 = vst [vmem:[%s11908_s13 + $0x998] sm:$0xff] %v2066_v51  ;;  %v2070_v53 = vld [vmem:[%s11900_s12 + $0x1350] sm:$0xff] }
  0xac   : > { %2069 = vst [vmem:[%s11908_s13 + $0x9a0] sm:$0xff] %v2068_v52  ;;  %v2072_v54 = vld [vmem:[%s11900_s12 + $0x1360] sm:$0xff]  ;;  %v2074_v55 = vld [vmem:[%s11900_s12 + $0x1370] sm:$0xff]  ;;  %2071 = vst [vmem:[%s11908_s13 + $0x9a8] sm:$0xff] %v2070_v53 }
  0xad   : > { %2073 = vst [vmem:[%s11908_s13 + $0x9b0] sm:$0xff] %v2072_v54  ;;  %2075 = vst [vmem:[%s11908_s13 + $0x9b8] sm:$0xff] %v2074_v55  ;;  %v2076_v56 = vld [vmem:[%s11900_s12 + $0x1380] sm:$0xff]  ;;  %v2078_v57 = vld [vmem:[%s11900_s12 + $0x1390] sm:$0xff] }
  0xae   : > { %v2080_v58 = vld [vmem:[%s11900_s12 + $0x13a0] sm:$0xff]  ;;  %2077 = vst [vmem:[%s11908_s13 + $0x9c0] sm:$0xff] %v2076_v56  ;;  %2079 = vst [vmem:[%s11908_s13 + $0x9c8] sm:$0xff] %v2078_v57  ;;  %v2082_v59 = vld [vmem:[%s11900_s12 + $0x13b0] sm:$0xff] }
  0xaf   : > { %2081 = vst [vmem:[%s11908_s13 + $0x9d0] sm:$0xff] %v2080_v58  ;;  %v2084_v60 = vld [vmem:[%s11900_s12 + $0x13c0] sm:$0xff]  ;;  %v2086_v61 = vld [vmem:[%s11900_s12 + $0x13d0] sm:$0xff]  ;;  %2083 = vst [vmem:[%s11908_s13 + $0x9d8] sm:$0xff] %v2082_v59 }
  0xb0   : > { %2085 = vst [vmem:[%s11908_s13 + $0x9e0] sm:$0xff] %v2084_v60  ;;  %2087 = vst [vmem:[%s11908_s13 + $0x9e8] sm:$0xff] %v2086_v61  ;;  %v2088_v62 = vld [vmem:[%s11900_s12 + $0x13e0] sm:$0xff]  ;;  %v2090_v63 = vld [vmem:[%s11900_s12 + $0x13f0] sm:$0xff] }
  0xb1   : > { %v2092_v0 = vld [vmem:[%s11900_s12 + $0x1400] sm:$0xff]  ;;  %2089 = vst [vmem:[%s11908_s13 + $0x9f0] sm:$0xff] %v2088_v62  ;;  %2091 = vst [vmem:[%s11908_s13 + $0x9f8] sm:$0xff] %v2090_v63  ;;  %v2094_v1 = vld [vmem:[%s11900_s12 + $0x1410] sm:$0xff] }
  0xb2   : > { %2093 = vst [vmem:[%s11908_s13 + $0xa00] sm:$0xff] %v2092_v0  ;;  %v2096_v2 = vld [vmem:[%s11900_s12 + $0x1420] sm:$0xff]  ;;  %v2098_v3 = vld [vmem:[%s11900_s12 + $0x1430] sm:$0xff]  ;;  %2095 = vst [vmem:[%s11908_s13 + $0xa08] sm:$0xff] %v2094_v1 }
  0xb3   : > { %2097 = vst [vmem:[%s11908_s13 + $0xa10] sm:$0xff] %v2096_v2  ;;  %2099 = vst [vmem:[%s11908_s13 + $0xa18] sm:$0xff] %v2098_v3  ;;  %v2100_v4 = vld [vmem:[%s11900_s12 + $0x1440] sm:$0xff]  ;;  %v2102_v5 = vld [vmem:[%s11900_s12 + $0x1450] sm:$0xff] }
  0xb4   : > { %v2104_v6 = vld [vmem:[%s11900_s12 + $0x1460] sm:$0xff]  ;;  %2101 = vst [vmem:[%s11908_s13 + $0xa20] sm:$0xff] %v2100_v4  ;;  %2103 = vst [vmem:[%s11908_s13 + $0xa28] sm:$0xff] %v2102_v5  ;;  %v2106_v7 = vld [vmem:[%s11900_s12 + $0x1470] sm:$0xff] }
  0xb5   : > { %2105 = vst [vmem:[%s11908_s13 + $0xa30] sm:$0xff] %v2104_v6  ;;  %v2108_v8 = vld [vmem:[%s11900_s12 + $0x1480] sm:$0xff]  ;;  %v2110_v9 = vld [vmem:[%s11900_s12 + $0x1490] sm:$0xff]  ;;  %2107 = vst [vmem:[%s11908_s13 + $0xa38] sm:$0xff] %v2106_v7 }
  0xb6   : > { %2109 = vst [vmem:[%s11908_s13 + $0xa40] sm:$0xff] %v2108_v8  ;;  %2111 = vst [vmem:[%s11908_s13 + $0xa48] sm:$0xff] %v2110_v9  ;;  %v2112_v10 = vld [vmem:[%s11900_s12 + $0x14a0] sm:$0xff]  ;;  %v2114_v11 = vld [vmem:[%s11900_s12 + $0x14b0] sm:$0xff] }
  0xb7   : > { %v2116_v12 = vld [vmem:[%s11900_s12 + $0x14c0] sm:$0xff]  ;;  %2113 = vst [vmem:[%s11908_s13 + $0xa50] sm:$0xff] %v2112_v10  ;;  %2115 = vst [vmem:[%s11908_s13 + $0xa58] sm:$0xff] %v2114_v11  ;;  %v2118_v13 = vld [vmem:[%s11900_s12 + $0x14d0] sm:$0xff] }
  0xb8   : > { %2117 = vst [vmem:[%s11908_s13 + $0xa60] sm:$0xff] %v2116_v12  ;;  %v2120_v14 = vld [vmem:[%s11900_s12 + $0x14e0] sm:$0xff]  ;;  %v2122_v15 = vld [vmem:[%s11900_s12 + $0x14f0] sm:$0xff]  ;;  %2119 = vst [vmem:[%s11908_s13 + $0xa68] sm:$0xff] %v2118_v13 }
  0xb9   : > { %2121 = vst [vmem:[%s11908_s13 + $0xa70] sm:$0xff] %v2120_v14  ;;  %2123 = vst [vmem:[%s11908_s13 + $0xa78] sm:$0xff] %v2122_v15  ;;  %v2124_v16 = vld [vmem:[%s11900_s12 + $0x1500] sm:$0xff]  ;;  %v2126_v17 = vld [vmem:[%s11900_s12 + $0x1510] sm:$0xff] }
  0xba   : > { %v2128_v18 = vld [vmem:[%s11900_s12 + $0x1520] sm:$0xff]  ;;  %2125 = vst [vmem:[%s11908_s13 + $0xa80] sm:$0xff] %v2124_v16  ;;  %2127 = vst [vmem:[%s11908_s13 + $0xa88] sm:$0xff] %v2126_v17  ;;  %v2130_v19 = vld [vmem:[%s11900_s12 + $0x1530] sm:$0xff] }
  0xbb   : > { %2129 = vst [vmem:[%s11908_s13 + $0xa90] sm:$0xff] %v2128_v18  ;;  %v2132_v20 = vld [vmem:[%s11900_s12 + $0x1540] sm:$0xff]  ;;  %v2134_v21 = vld [vmem:[%s11900_s12 + $0x1550] sm:$0xff]  ;;  %2131 = vst [vmem:[%s11908_s13 + $0xa98] sm:$0xff] %v2130_v19 }
  0xbc   : > { %2133 = vst [vmem:[%s11908_s13 + $0xaa0] sm:$0xff] %v2132_v20  ;;  %2135 = vst [vmem:[%s11908_s13 + $0xaa8] sm:$0xff] %v2134_v21  ;;  %v2136_v22 = vld [vmem:[%s11900_s12 + $0x1560] sm:$0xff]  ;;  %v2138_v23 = vld [vmem:[%s11900_s12 + $0x1570] sm:$0xff] }
  0xbd   : > { %v2140_v24 = vld [vmem:[%s11900_s12 + $0x1580] sm:$0xff]  ;;  %2137 = vst [vmem:[%s11908_s13 + $0xab0] sm:$0xff] %v2136_v22  ;;  %2139 = vst [vmem:[%s11908_s13 + $0xab8] sm:$0xff] %v2138_v23  ;;  %v2142_v25 = vld [vmem:[%s11900_s12 + $0x1590] sm:$0xff] }
  0xbe   : > { %2141 = vst [vmem:[%s11908_s13 + $0xac0] sm:$0xff] %v2140_v24  ;;  %v2144_v26 = vld [vmem:[%s11900_s12 + $0x15a0] sm:$0xff]  ;;  %v2146_v27 = vld [vmem:[%s11900_s12 + $0x15b0] sm:$0xff]  ;;  %2143 = vst [vmem:[%s11908_s13 + $0xac8] sm:$0xff] %v2142_v25 }
  0xbf   : > { %2145 = vst [vmem:[%s11908_s13 + $0xad0] sm:$0xff] %v2144_v26  ;;  %2147 = vst [vmem:[%s11908_s13 + $0xad8] sm:$0xff] %v2146_v27  ;;  %v2148_v28 = vld [vmem:[%s11900_s12 + $0x15c0] sm:$0xff]  ;;  %v2150_v29 = vld [vmem:[%s11900_s12 + $0x15d0] sm:$0xff] }
  0xc0   : > { %v2152_v30 = vld [vmem:[%s11900_s12 + $0x15e0] sm:$0xff]  ;;  %2149 = vst [vmem:[%s11908_s13 + $0xae0] sm:$0xff] %v2148_v28  ;;  %2151 = vst [vmem:[%s11908_s13 + $0xae8] sm:$0xff] %v2150_v29  ;;  %v2154_v31 = vld [vmem:[%s11900_s12 + $0x15f0] sm:$0xff] }
  0xc1   : > { %2153 = vst [vmem:[%s11908_s13 + $0xaf0] sm:$0xff] %v2152_v30  ;;  %v2156_v32 = vld [vmem:[%s11900_s12 + $0x1600] sm:$0xff]  ;;  %v2158_v33 = vld [vmem:[%s11900_s12 + $0x1610] sm:$0xff]  ;;  %2155 = vst [vmem:[%s11908_s13 + $0xaf8] sm:$0xff] %v2154_v31 }
  0xc2   : > { %2157 = vst [vmem:[%s11908_s13 + $0xb00] sm:$0xff] %v2156_v32  ;;  %2159 = vst [vmem:[%s11908_s13 + $0xb08] sm:$0xff] %v2158_v33  ;;  %v2160_v34 = vld [vmem:[%s11900_s12 + $0x1620] sm:$0xff]  ;;  %v2162_v35 = vld [vmem:[%s11900_s12 + $0x1630] sm:$0xff] }
  0xc3   : > { %v2164_v36 = vld [vmem:[%s11900_s12 + $0x1640] sm:$0xff]  ;;  %2161 = vst [vmem:[%s11908_s13 + $0xb10] sm:$0xff] %v2160_v34  ;;  %2163 = vst [vmem:[%s11908_s13 + $0xb18] sm:$0xff] %v2162_v35  ;;  %v2166_v37 = vld [vmem:[%s11900_s12 + $0x1650] sm:$0xff] }
  0xc4   : > { %2165 = vst [vmem:[%s11908_s13 + $0xb20] sm:$0xff] %v2164_v36  ;;  %v2168_v38 = vld [vmem:[%s11900_s12 + $0x1660] sm:$0xff]  ;;  %v2170_v39 = vld [vmem:[%s11900_s12 + $0x1670] sm:$0xff]  ;;  %2167 = vst [vmem:[%s11908_s13 + $0xb28] sm:$0xff] %v2166_v37 }
  0xc5   : > { %2169 = vst [vmem:[%s11908_s13 + $0xb30] sm:$0xff] %v2168_v38  ;;  %2171 = vst [vmem:[%s11908_s13 + $0xb38] sm:$0xff] %v2170_v39  ;;  %v2172_v40 = vld [vmem:[%s11900_s12 + $0x1680] sm:$0xff]  ;;  %v2174_v41 = vld [vmem:[%s11900_s12 + $0x1690] sm:$0xff] }
  0xc6   : > { %v2176_v42 = vld [vmem:[%s11900_s12 + $0x16a0] sm:$0xff]  ;;  %2173 = vst [vmem:[%s11908_s13 + $0xb40] sm:$0xff] %v2172_v40  ;;  %2175 = vst [vmem:[%s11908_s13 + $0xb48] sm:$0xff] %v2174_v41  ;;  %v2178_v43 = vld [vmem:[%s11900_s12 + $0x16b0] sm:$0xff] }
  0xc7   : > { %2177 = vst [vmem:[%s11908_s13 + $0xb50] sm:$0xff] %v2176_v42  ;;  %v2180_v44 = vld [vmem:[%s11900_s12 + $0x16c0] sm:$0xff]  ;;  %v2182_v45 = vld [vmem:[%s11900_s12 + $0x16d0] sm:$0xff]  ;;  %2179 = vst [vmem:[%s11908_s13 + $0xb58] sm:$0xff] %v2178_v43 }
  0xc8   : > { %2181 = vst [vmem:[%s11908_s13 + $0xb60] sm:$0xff] %v2180_v44  ;;  %2183 = vst [vmem:[%s11908_s13 + $0xb68] sm:$0xff] %v2182_v45  ;;  %v2184_v46 = vld [vmem:[%s11900_s12 + $0x16e0] sm:$0xff]  ;;  %v2186_v47 = vld [vmem:[%s11900_s12 + $0x16f0] sm:$0xff] }
  0xc9   : > { %v2188_v48 = vld [vmem:[%s11900_s12 + $0x1700] sm:$0xff]  ;;  %2185 = vst [vmem:[%s11908_s13 + $0xb70] sm:$0xff] %v2184_v46  ;;  %2187 = vst [vmem:[%s11908_s13 + $0xb78] sm:$0xff] %v2186_v47  ;;  %v2190_v49 = vld [vmem:[%s11900_s12 + $0x1710] sm:$0xff] }
  0xca   : > { %2189 = vst [vmem:[%s11908_s13 + $0xb80] sm:$0xff] %v2188_v48  ;;  %v2192_v50 = vld [vmem:[%s11900_s12 + $0x1720] sm:$0xff]  ;;  %v2194_v51 = vld [vmem:[%s11900_s12 + $0x1730] sm:$0xff]  ;;  %2191 = vst [vmem:[%s11908_s13 + $0xb88] sm:$0xff] %v2190_v49 }
  0xcb   : > { %2193 = vst [vmem:[%s11908_s13 + $0xb90] sm:$0xff] %v2192_v50  ;;  %2195 = vst [vmem:[%s11908_s13 + $0xb98] sm:$0xff] %v2194_v51  ;;  %v2196_v52 = vld [vmem:[%s11900_s12 + $0x1740] sm:$0xff]  ;;  %v2198_v53 = vld [vmem:[%s11900_s12 + $0x1750] sm:$0xff] }
  0xcc   : > { %v2200_v54 = vld [vmem:[%s11900_s12 + $0x1760] sm:$0xff]  ;;  %2197 = vst [vmem:[%s11908_s13 + $0xba0] sm:$0xff] %v2196_v52  ;;  %2199 = vst [vmem:[%s11908_s13 + $0xba8] sm:$0xff] %v2198_v53  ;;  %v2202_v55 = vld [vmem:[%s11900_s12 + $0x1770] sm:$0xff] }
  0xcd   : > { %2201 = vst [vmem:[%s11908_s13 + $0xbb0] sm:$0xff] %v2200_v54  ;;  %v2204_v56 = vld [vmem:[%s11900_s12 + $0x1780] sm:$0xff]  ;;  %v2206_v57 = vld [vmem:[%s11900_s12 + $0x1790] sm:$0xff]  ;;  %2203 = vst [vmem:[%s11908_s13 + $0xbb8] sm:$0xff] %v2202_v55 }
  0xce   : > { %2205 = vst [vmem:[%s11908_s13 + $0xbc0] sm:$0xff] %v2204_v56  ;;  %2207 = vst [vmem:[%s11908_s13 + $0xbc8] sm:$0xff] %v2206_v57  ;;  %v2208_v58 = vld [vmem:[%s11900_s12 + $0x17a0] sm:$0xff]  ;;  %v2210_v59 = vld [vmem:[%s11900_s12 + $0x17b0] sm:$0xff] }
  0xcf   : > { %v2212_v60 = vld [vmem:[%s11900_s12 + $0x17c0] sm:$0xff]  ;;  %2209 = vst [vmem:[%s11908_s13 + $0xbd0] sm:$0xff] %v2208_v58  ;;  %2211 = vst [vmem:[%s11908_s13 + $0xbd8] sm:$0xff] %v2210_v59  ;;  %v2214_v61 = vld [vmem:[%s11900_s12 + $0x17d0] sm:$0xff] }
  0xd0   : > { %2213 = vst [vmem:[%s11908_s13 + $0xbe0] sm:$0xff] %v2212_v60  ;;  %v2216_v62 = vld [vmem:[%s11900_s12 + $0x17e0] sm:$0xff]  ;;  %v2218_v63 = vld [vmem:[%s11900_s12 + $0x17f0] sm:$0xff]  ;;  %2215 = vst [vmem:[%s11908_s13 + $0xbe8] sm:$0xff] %v2214_v61 }
  0xd1   : > { %2217 = vst [vmem:[%s11908_s13 + $0xbf0] sm:$0xff] %v2216_v62  ;;  %2219 = vst [vmem:[%s11908_s13 + $0xbf8] sm:$0xff] %v2218_v63  ;;  %v2220_v0 = vld [vmem:[%s11900_s12 + $0x1800] sm:$0xff]  ;;  %v2222_v1 = vld [vmem:[%s11900_s12 + $0x1810] sm:$0xff] }
  0xd2   : > { %v2224_v2 = vld [vmem:[%s11900_s12 + $0x1820] sm:$0xff]  ;;  %2221 = vst [vmem:[%s11908_s13 + $0xc00] sm:$0xff] %v2220_v0  ;;  %2223 = vst [vmem:[%s11908_s13 + $0xc08] sm:$0xff] %v2222_v1  ;;  %v2226_v3 = vld [vmem:[%s11900_s12 + $0x1830] sm:$0xff] }
  0xd3   : > { %2225 = vst [vmem:[%s11908_s13 + $0xc10] sm:$0xff] %v2224_v2  ;;  %v2228_v4 = vld [vmem:[%s11900_s12 + $0x1840] sm:$0xff]  ;;  %v2230_v5 = vld [vmem:[%s11900_s12 + $0x1850] sm:$0xff]  ;;  %2227 = vst [vmem:[%s11908_s13 + $0xc18] sm:$0xff] %v2226_v3 }
  0xd4   : > { %2229 = vst [vmem:[%s11908_s13 + $0xc20] sm:$0xff] %v2228_v4  ;;  %2231 = vst [vmem:[%s11908_s13 + $0xc28] sm:$0xff] %v2230_v5  ;;  %v2232_v6 = vld [vmem:[%s11900_s12 + $0x1860] sm:$0xff]  ;;  %v2234_v7 = vld [vmem:[%s11900_s12 + $0x1870] sm:$0xff] }
  0xd5   : > { %v2236_v8 = vld [vmem:[%s11900_s12 + $0x1880] sm:$0xff]  ;;  %2233 = vst [vmem:[%s11908_s13 + $0xc30] sm:$0xff] %v2232_v6  ;;  %2235 = vst [vmem:[%s11908_s13 + $0xc38] sm:$0xff] %v2234_v7  ;;  %v2238_v9 = vld [vmem:[%s11900_s12 + $0x1890] sm:$0xff] }
  0xd6   : > { %2237 = vst [vmem:[%s11908_s13 + $0xc40] sm:$0xff] %v2236_v8  ;;  %v2240_v10 = vld [vmem:[%s11900_s12 + $0x18a0] sm:$0xff]  ;;  %v2242_v11 = vld [vmem:[%s11900_s12 + $0x18b0] sm:$0xff]  ;;  %2239 = vst [vmem:[%s11908_s13 + $0xc48] sm:$0xff] %v2238_v9 }
  0xd7   : > { %2241 = vst [vmem:[%s11908_s13 + $0xc50] sm:$0xff] %v2240_v10  ;;  %2243 = vst [vmem:[%s11908_s13 + $0xc58] sm:$0xff] %v2242_v11  ;;  %v2244_v12 = vld [vmem:[%s11900_s12 + $0x18c0] sm:$0xff]  ;;  %v2246_v13 = vld [vmem:[%s11900_s12 + $0x18d0] sm:$0xff] }
  0xd8   : > { %v2248_v14 = vld [vmem:[%s11900_s12 + $0x18e0] sm:$0xff]  ;;  %2245 = vst [vmem:[%s11908_s13 + $0xc60] sm:$0xff] %v2244_v12  ;;  %2247 = vst [vmem:[%s11908_s13 + $0xc68] sm:$0xff] %v2246_v13  ;;  %v2250_v15 = vld [vmem:[%s11900_s12 + $0x18f0] sm:$0xff] }
  0xd9   : > { %2249 = vst [vmem:[%s11908_s13 + $0xc70] sm:$0xff] %v2248_v14  ;;  %v2252_v16 = vld [vmem:[%s11900_s12 + $0x1900] sm:$0xff]  ;;  %v2254_v17 = vld [vmem:[%s11900_s12 + $0x1910] sm:$0xff]  ;;  %2251 = vst [vmem:[%s11908_s13 + $0xc78] sm:$0xff] %v2250_v15 }
  0xda   : > { %2253 = vst [vmem:[%s11908_s13 + $0xc80] sm:$0xff] %v2252_v16  ;;  %2255 = vst [vmem:[%s11908_s13 + $0xc88] sm:$0xff] %v2254_v17  ;;  %v2256_v18 = vld [vmem:[%s11900_s12 + $0x1920] sm:$0xff]  ;;  %v2258_v19 = vld [vmem:[%s11900_s12 + $0x1930] sm:$0xff] }
  0xdb   : > { %v2260_v20 = vld [vmem:[%s11900_s12 + $0x1940] sm:$0xff]  ;;  %2257 = vst [vmem:[%s11908_s13 + $0xc90] sm:$0xff] %v2256_v18  ;;  %2259 = vst [vmem:[%s11908_s13 + $0xc98] sm:$0xff] %v2258_v19  ;;  %v2262_v21 = vld [vmem:[%s11900_s12 + $0x1950] sm:$0xff] }
  0xdc   : > { %2261 = vst [vmem:[%s11908_s13 + $0xca0] sm:$0xff] %v2260_v20  ;;  %v2264_v22 = vld [vmem:[%s11900_s12 + $0x1960] sm:$0xff]  ;;  %v2266_v23 = vld [vmem:[%s11900_s12 + $0x1970] sm:$0xff]  ;;  %2263 = vst [vmem:[%s11908_s13 + $0xca8] sm:$0xff] %v2262_v21 }
  0xdd   : > { %2265 = vst [vmem:[%s11908_s13 + $0xcb0] sm:$0xff] %v2264_v22  ;;  %2267 = vst [vmem:[%s11908_s13 + $0xcb8] sm:$0xff] %v2266_v23  ;;  %v2268_v24 = vld [vmem:[%s11900_s12 + $0x1980] sm:$0xff]  ;;  %v2270_v25 = vld [vmem:[%s11900_s12 + $0x1990] sm:$0xff] }
  0xde   : > { %v2272_v26 = vld [vmem:[%s11900_s12 + $0x19a0] sm:$0xff]  ;;  %2269 = vst [vmem:[%s11908_s13 + $0xcc0] sm:$0xff] %v2268_v24  ;;  %2271 = vst [vmem:[%s11908_s13 + $0xcc8] sm:$0xff] %v2270_v25  ;;  %v2274_v27 = vld [vmem:[%s11900_s12 + $0x19b0] sm:$0xff] }
  0xdf   : > { %2273 = vst [vmem:[%s11908_s13 + $0xcd0] sm:$0xff] %v2272_v26  ;;  %v2276_v28 = vld [vmem:[%s11900_s12 + $0x19c0] sm:$0xff]  ;;  %v2278_v29 = vld [vmem:[%s11900_s12 + $0x19d0] sm:$0xff]  ;;  %2275 = vst [vmem:[%s11908_s13 + $0xcd8] sm:$0xff] %v2274_v27 }
  0xe0   : > { %2277 = vst [vmem:[%s11908_s13 + $0xce0] sm:$0xff] %v2276_v28  ;;  %2279 = vst [vmem:[%s11908_s13 + $0xce8] sm:$0xff] %v2278_v29  ;;  %v2280_v30 = vld [vmem:[%s11900_s12 + $0x19e0] sm:$0xff]  ;;  %v2282_v31 = vld [vmem:[%s11900_s12 + $0x19f0] sm:$0xff] }
  0xe1   : > { %v2284_v32 = vld [vmem:[%s11900_s12 + $0x1a00] sm:$0xff]  ;;  %2281 = vst [vmem:[%s11908_s13 + $0xcf0] sm:$0xff] %v2280_v30  ;;  %2283 = vst [vmem:[%s11908_s13 + $0xcf8] sm:$0xff] %v2282_v31  ;;  %v2286_v33 = vld [vmem:[%s11900_s12 + $0x1a10] sm:$0xff] }
  0xe2   : > { %2285 = vst [vmem:[%s11908_s13 + $0xd00] sm:$0xff] %v2284_v32  ;;  %v2288_v34 = vld [vmem:[%s11900_s12 + $0x1a20] sm:$0xff]  ;;  %v2290_v35 = vld [vmem:[%s11900_s12 + $0x1a30] sm:$0xff]  ;;  %2287 = vst [vmem:[%s11908_s13 + $0xd08] sm:$0xff] %v2286_v33 }
  0xe3   : > { %2289 = vst [vmem:[%s11908_s13 + $0xd10] sm:$0xff] %v2288_v34  ;;  %2291 = vst [vmem:[%s11908_s13 + $0xd18] sm:$0xff] %v2290_v35  ;;  %v2292_v36 = vld [vmem:[%s11900_s12 + $0x1a40] sm:$0xff]  ;;  %v2294_v37 = vld [vmem:[%s11900_s12 + $0x1a50] sm:$0xff] }
  0xe4   : > { %v2296_v38 = vld [vmem:[%s11900_s12 + $0x1a60] sm:$0xff]  ;;  %2293 = vst [vmem:[%s11908_s13 + $0xd20] sm:$0xff] %v2292_v36  ;;  %2295 = vst [vmem:[%s11908_s13 + $0xd28] sm:$0xff] %v2294_v37  ;;  %v2298_v39 = vld [vmem:[%s11900_s12 + $0x1a70] sm:$0xff] }
  0xe5   : > { %2297 = vst [vmem:[%s11908_s13 + $0xd30] sm:$0xff] %v2296_v38  ;;  %v2300_v40 = vld [vmem:[%s11900_s12 + $0x1a80] sm:$0xff]  ;;  %v2302_v41 = vld [vmem:[%s11900_s12 + $0x1a90] sm:$0xff]  ;;  %2299 = vst [vmem:[%s11908_s13 + $0xd38] sm:$0xff] %v2298_v39 }
  0xe6   : > { %2301 = vst [vmem:[%s11908_s13 + $0xd40] sm:$0xff] %v2300_v40  ;;  %2303 = vst [vmem:[%s11908_s13 + $0xd48] sm:$0xff] %v2302_v41  ;;  %v2304_v42 = vld [vmem:[%s11900_s12 + $0x1aa0] sm:$0xff]  ;;  %v2306_v43 = vld [vmem:[%s11900_s12 + $0x1ab0] sm:$0xff] }
  0xe7   : > { %v2308_v44 = vld [vmem:[%s11900_s12 + $0x1ac0] sm:$0xff]  ;;  %2305 = vst [vmem:[%s11908_s13 + $0xd50] sm:$0xff] %v2304_v42  ;;  %2307 = vst [vmem:[%s11908_s13 + $0xd58] sm:$0xff] %v2306_v43  ;;  %v2310_v45 = vld [vmem:[%s11900_s12 + $0x1ad0] sm:$0xff] }
  0xe8   : > { %2309 = vst [vmem:[%s11908_s13 + $0xd60] sm:$0xff] %v2308_v44  ;;  %v2312_v46 = vld [vmem:[%s11900_s12 + $0x1ae0] sm:$0xff]  ;;  %v2314_v47 = vld [vmem:[%s11900_s12 + $0x1af0] sm:$0xff]  ;;  %2311 = vst [vmem:[%s11908_s13 + $0xd68] sm:$0xff] %v2310_v45 }
  0xe9   : > { %2313 = vst [vmem:[%s11908_s13 + $0xd70] sm:$0xff] %v2312_v46  ;;  %2315 = vst [vmem:[%s11908_s13 + $0xd78] sm:$0xff] %v2314_v47  ;;  %v2316_v48 = vld [vmem:[%s11900_s12 + $0x1b00] sm:$0xff]  ;;  %v2318_v49 = vld [vmem:[%s11900_s12 + $0x1b10] sm:$0xff] }
  0xea   : > { %v2320_v50 = vld [vmem:[%s11900_s12 + $0x1b20] sm:$0xff]  ;;  %2317 = vst [vmem:[%s11908_s13 + $0xd80] sm:$0xff] %v2316_v48  ;;  %2319 = vst [vmem:[%s11908_s13 + $0xd88] sm:$0xff] %v2318_v49  ;;  %v2322_v51 = vld [vmem:[%s11900_s12 + $0x1b30] sm:$0xff] }
  0xeb   : > { %2321 = vst [vmem:[%s11908_s13 + $0xd90] sm:$0xff] %v2320_v50  ;;  %v2324_v52 = vld [vmem:[%s11900_s12 + $0x1b40] sm:$0xff]  ;;  %v2326_v53 = vld [vmem:[%s11900_s12 + $0x1b50] sm:$0xff]  ;;  %2323 = vst [vmem:[%s11908_s13 + $0xd98] sm:$0xff] %v2322_v51 }
  0xec   : > { %2325 = vst [vmem:[%s11908_s13 + $0xda0] sm:$0xff] %v2324_v52  ;;  %2327 = vst [vmem:[%s11908_s13 + $0xda8] sm:$0xff] %v2326_v53  ;;  %v2328_v54 = vld [vmem:[%s11900_s12 + $0x1b60] sm:$0xff]  ;;  %v2330_v55 = vld [vmem:[%s11900_s12 + $0x1b70] sm:$0xff] }
  0xed   : > { %v2332_v56 = vld [vmem:[%s11900_s12 + $0x1b80] sm:$0xff]  ;;  %2329 = vst [vmem:[%s11908_s13 + $0xdb0] sm:$0xff] %v2328_v54  ;;  %2331 = vst [vmem:[%s11908_s13 + $0xdb8] sm:$0xff] %v2330_v55  ;;  %v2334_v57 = vld [vmem:[%s11900_s12 + $0x1b90] sm:$0xff] }
  0xee   : > { %2333 = vst [vmem:[%s11908_s13 + $0xdc0] sm:$0xff] %v2332_v56  ;;  %v2336_v58 = vld [vmem:[%s11900_s12 + $0x1ba0] sm:$0xff]  ;;  %v2338_v59 = vld [vmem:[%s11900_s12 + $0x1bb0] sm:$0xff]  ;;  %2335 = vst [vmem:[%s11908_s13 + $0xdc8] sm:$0xff] %v2334_v57 }
  0xef   : > { %2337 = vst [vmem:[%s11908_s13 + $0xdd0] sm:$0xff] %v2336_v58  ;;  %2339 = vst [vmem:[%s11908_s13 + $0xdd8] sm:$0xff] %v2338_v59  ;;  %v2340_v60 = vld [vmem:[%s11900_s12 + $0x1bc0] sm:$0xff]  ;;  %v2342_v61 = vld [vmem:[%s11900_s12 + $0x1bd0] sm:$0xff] }
  0xf0   : > { %v2344_v62 = vld [vmem:[%s11900_s12 + $0x1be0] sm:$0xff]  ;;  %2341 = vst [vmem:[%s11908_s13 + $0xde0] sm:$0xff] %v2340_v60  ;;  %2343 = vst [vmem:[%s11908_s13 + $0xde8] sm:$0xff] %v2342_v61  ;;  %v2346_v63 = vld [vmem:[%s11900_s12 + $0x1bf0] sm:$0xff] }
  0xf1   : > { %2345 = vst [vmem:[%s11908_s13 + $0xdf0] sm:$0xff] %v2344_v62  ;;  %v2348_v0 = vld [vmem:[%s11900_s12 + $0x1c00] sm:$0xff]  ;;  %v2350_v1 = vld [vmem:[%s11900_s12 + $0x1c10] sm:$0xff]  ;;  %2347 = vst [vmem:[%s11908_s13 + $0xdf8] sm:$0xff] %v2346_v63 }
  0xf2   : > { %2349 = vst [vmem:[%s11908_s13 + $0xe00] sm:$0xff] %v2348_v0  ;;  %2351 = vst [vmem:[%s11908_s13 + $0xe08] sm:$0xff] %v2350_v1  ;;  %v2352_v2 = vld [vmem:[%s11900_s12 + $0x1c20] sm:$0xff]  ;;  %v2354_v3 = vld [vmem:[%s11900_s12 + $0x1c30] sm:$0xff] }
  0xf3   : > { %v2356_v4 = vld [vmem:[%s11900_s12 + $0x1c40] sm:$0xff]  ;;  %2353 = vst [vmem:[%s11908_s13 + $0xe10] sm:$0xff] %v2352_v2  ;;  %2355 = vst [vmem:[%s11908_s13 + $0xe18] sm:$0xff] %v2354_v3  ;;  %v2358_v5 = vld [vmem:[%s11900_s12 + $0x1c50] sm:$0xff] }
  0xf4   : > { %2357 = vst [vmem:[%s11908_s13 + $0xe20] sm:$0xff] %v2356_v4  ;;  %v2360_v6 = vld [vmem:[%s11900_s12 + $0x1c60] sm:$0xff]  ;;  %v2362_v7 = vld [vmem:[%s11900_s12 + $0x1c70] sm:$0xff]  ;;  %2359 = vst [vmem:[%s11908_s13 + $0xe28] sm:$0xff] %v2358_v5 }
  0xf5   : > { %2361 = vst [vmem:[%s11908_s13 + $0xe30] sm:$0xff] %v2360_v6  ;;  %2363 = vst [vmem:[%s11908_s13 + $0xe38] sm:$0xff] %v2362_v7  ;;  %v2364_v8 = vld [vmem:[%s11900_s12 + $0x1c80] sm:$0xff]  ;;  %v2366_v9 = vld [vmem:[%s11900_s12 + $0x1c90] sm:$0xff] }
  0xf6   : > { %v2368_v10 = vld [vmem:[%s11900_s12 + $0x1ca0] sm:$0xff]  ;;  %2365 = vst [vmem:[%s11908_s13 + $0xe40] sm:$0xff] %v2364_v8  ;;  %2367 = vst [vmem:[%s11908_s13 + $0xe48] sm:$0xff] %v2366_v9  ;;  %v2370_v11 = vld [vmem:[%s11900_s12 + $0x1cb0] sm:$0xff] }
  0xf7   : > { %2369 = vst [vmem:[%s11908_s13 + $0xe50] sm:$0xff] %v2368_v10  ;;  %v2372_v12 = vld [vmem:[%s11900_s12 + $0x1cc0] sm:$0xff]  ;;  %v2374_v13 = vld [vmem:[%s11900_s12 + $0x1cd0] sm:$0xff]  ;;  %2371 = vst [vmem:[%s11908_s13 + $0xe58] sm:$0xff] %v2370_v11 }
  0xf8   : > { %2373 = vst [vmem:[%s11908_s13 + $0xe60] sm:$0xff] %v2372_v12  ;;  %2375 = vst [vmem:[%s11908_s13 + $0xe68] sm:$0xff] %v2374_v13  ;;  %v2376_v14 = vld [vmem:[%s11900_s12 + $0x1ce0] sm:$0xff]  ;;  %v2378_v15 = vld [vmem:[%s11900_s12 + $0x1cf0] sm:$0xff] }
  0xf9   : > { %v2380_v16 = vld [vmem:[%s11900_s12 + $0x1d00] sm:$0xff]  ;;  %2377 = vst [vmem:[%s11908_s13 + $0xe70] sm:$0xff] %v2376_v14  ;;  %2379 = vst [vmem:[%s11908_s13 + $0xe78] sm:$0xff] %v2378_v15  ;;  %v2382_v17 = vld [vmem:[%s11900_s12 + $0x1d10] sm:$0xff] }
  0xfa   : > { %2381 = vst [vmem:[%s11908_s13 + $0xe80] sm:$0xff] %v2380_v16  ;;  %v2384_v18 = vld [vmem:[%s11900_s12 + $0x1d20] sm:$0xff]  ;;  %v2386_v19 = vld [vmem:[%s11900_s12 + $0x1d30] sm:$0xff]  ;;  %2383 = vst [vmem:[%s11908_s13 + $0xe88] sm:$0xff] %v2382_v17 }
  0xfb   : > { %2385 = vst [vmem:[%s11908_s13 + $0xe90] sm:$0xff] %v2384_v18  ;;  %2387 = vst [vmem:[%s11908_s13 + $0xe98] sm:$0xff] %v2386_v19  ;;  %v2388_v20 = vld [vmem:[%s11900_s12 + $0x1d40] sm:$0xff]  ;;  %v2390_v21 = vld [vmem:[%s11900_s12 + $0x1d50] sm:$0xff] }
  0xfc   : > { %v2392_v22 = vld [vmem:[%s11900_s12 + $0x1d60] sm:$0xff]  ;;  %2389 = vst [vmem:[%s11908_s13 + $0xea0] sm:$0xff] %v2388_v20  ;;  %2391 = vst [vmem:[%s11908_s13 + $0xea8] sm:$0xff] %v2390_v21  ;;  %v2394_v23 = vld [vmem:[%s11900_s12 + $0x1d70] sm:$0xff] }
  0xfd   : > { %2393 = vst [vmem:[%s11908_s13 + $0xeb0] sm:$0xff] %v2392_v22  ;;  %v2396_v24 = vld [vmem:[%s11900_s12 + $0x1d80] sm:$0xff]  ;;  %v2398_v25 = vld [vmem:[%s11900_s12 + $0x1d90] sm:$0xff]  ;;  %2395 = vst [vmem:[%s11908_s13 + $0xeb8] sm:$0xff] %v2394_v23 }
  0xfe   : > { %2397 = vst [vmem:[%s11908_s13 + $0xec0] sm:$0xff] %v2396_v24  ;;  %2399 = vst [vmem:[%s11908_s13 + $0xec8] sm:$0xff] %v2398_v25  ;;  %v2400_v26 = vld [vmem:[%s11900_s12 + $0x1da0] sm:$0xff]  ;;  %v2402_v27 = vld [vmem:[%s11900_s12 + $0x1db0] sm:$0xff] }
  0xff   : > { %v2404_v28 = vld [vmem:[%s11900_s12 + $0x1dc0] sm:$0xff]  ;;  %2401 = vst [vmem:[%s11908_s13 + $0xed0] sm:$0xff] %v2400_v26  ;;  %2403 = vst [vmem:[%s11908_s13 + $0xed8] sm:$0xff] %v2402_v27  ;;  %v2406_v29 = vld [vmem:[%s11900_s12 + $0x1dd0] sm:$0xff] }
 0x100   : > { %2405 = vst [vmem:[%s11908_s13 + $0xee0] sm:$0xff] %v2404_v28  ;;  %v2408_v30 = vld [vmem:[%s11900_s12 + $0x1de0] sm:$0xff]  ;;  %v2410_v31 = vld [vmem:[%s11900_s12 + $0x1df0] sm:$0xff]  ;;  %2407 = vst [vmem:[%s11908_s13 + $0xee8] sm:$0xff] %v2406_v29 }
 0x101   : > { %2409 = vst [vmem:[%s11908_s13 + $0xef0] sm:$0xff] %v2408_v30  ;;  %2411 = vst [vmem:[%s11908_s13 + $0xef8] sm:$0xff] %v2410_v31  ;;  %v2412_v32 = vld [vmem:[%s11900_s12 + $0x1e00] sm:$0xff]  ;;  %v2414_v33 = vld [vmem:[%s11900_s12 + $0x1e10] sm:$0xff] }
 0x102   : > { %v2416_v34 = vld [vmem:[%s11900_s12 + $0x1e20] sm:$0xff]  ;;  %2413 = vst [vmem:[%s11908_s13 + $0xf00] sm:$0xff] %v2412_v32  ;;  %2415 = vst [vmem:[%s11908_s13 + $0xf08] sm:$0xff] %v2414_v33  ;;  %v2418_v35 = vld [vmem:[%s11900_s12 + $0x1e30] sm:$0xff] }
 0x103   : > { %2417 = vst [vmem:[%s11908_s13 + $0xf10] sm:$0xff] %v2416_v34  ;;  %v2420_v36 = vld [vmem:[%s11900_s12 + $0x1e40] sm:$0xff]  ;;  %v2422_v37 = vld [vmem:[%s11900_s12 + $0x1e50] sm:$0xff]  ;;  %2419 = vst [vmem:[%s11908_s13 + $0xf18] sm:$0xff] %v2418_v35 }
 0x104   : > { %2421 = vst [vmem:[%s11908_s13 + $0xf20] sm:$0xff] %v2420_v36  ;;  %2423 = vst [vmem:[%s11908_s13 + $0xf28] sm:$0xff] %v2422_v37  ;;  %v2424_v38 = vld [vmem:[%s11900_s12 + $0x1e60] sm:$0xff]  ;;  %v2426_v39 = vld [vmem:[%s11900_s12 + $0x1e70] sm:$0xff] }
 0x105   : > { %v2428_v40 = vld [vmem:[%s11900_s12 + $0x1e80] sm:$0xff]  ;;  %2425 = vst [vmem:[%s11908_s13 + $0xf30] sm:$0xff] %v2424_v38  ;;  %2427 = vst [vmem:[%s11908_s13 + $0xf38] sm:$0xff] %v2426_v39  ;;  %v2430_v41 = vld [vmem:[%s11900_s12 + $0x1e90] sm:$0xff] }
 0x106   : > { %2429 = vst [vmem:[%s11908_s13 + $0xf40] sm:$0xff] %v2428_v40  ;;  %v2432_v42 = vld [vmem:[%s11900_s12 + $0x1ea0] sm:$0xff]  ;;  %v2434_v43 = vld [vmem:[%s11900_s12 + $0x1eb0] sm:$0xff]  ;;  %2431 = vst [vmem:[%s11908_s13 + $0xf48] sm:$0xff] %v2430_v41 }
 0x107   : > { %2433 = vst [vmem:[%s11908_s13 + $0xf50] sm:$0xff] %v2432_v42  ;;  %2435 = vst [vmem:[%s11908_s13 + $0xf58] sm:$0xff] %v2434_v43  ;;  %v2436_v44 = vld [vmem:[%s11900_s12 + $0x1ec0] sm:$0xff]  ;;  %v2438_v45 = vld [vmem:[%s11900_s12 + $0x1ed0] sm:$0xff] }
 0x108   : > { %v2440_v46 = vld [vmem:[%s11900_s12 + $0x1ee0] sm:$0xff]  ;;  %2437 = vst [vmem:[%s11908_s13 + $0xf60] sm:$0xff] %v2436_v44  ;;  %2439 = vst [vmem:[%s11908_s13 + $0xf68] sm:$0xff] %v2438_v45  ;;  %v2442_v47 = vld [vmem:[%s11900_s12 + $0x1ef0] sm:$0xff] }
 0x109   : > { %2441 = vst [vmem:[%s11908_s13 + $0xf70] sm:$0xff] %v2440_v46  ;;  %v2444_v48 = vld [vmem:[%s11900_s12 + $0x1f00] sm:$0xff]  ;;  %v2446_v49 = vld [vmem:[%s11900_s12 + $0x1f10] sm:$0xff]  ;;  %2443 = vst [vmem:[%s11908_s13 + $0xf78] sm:$0xff] %v2442_v47 }
 0x10a   : > { %2445 = vst [vmem:[%s11908_s13 + $0xf80] sm:$0xff] %v2444_v48  ;;  %2447 = vst [vmem:[%s11908_s13 + $0xf88] sm:$0xff] %v2446_v49  ;;  %v2448_v50 = vld [vmem:[%s11900_s12 + $0x1f20] sm:$0xff]  ;;  %v2450_v51 = vld [vmem:[%s11900_s12 + $0x1f30] sm:$0xff] }
 0x10b   : > { %v2452_v52 = vld [vmem:[%s11900_s12 + $0x1f40] sm:$0xff]  ;;  %2449 = vst [vmem:[%s11908_s13 + $0xf90] sm:$0xff] %v2448_v50  ;;  %2451 = vst [vmem:[%s11908_s13 + $0xf98] sm:$0xff] %v2450_v51  ;;  %v2454_v53 = vld [vmem:[%s11900_s12 + $0x1f50] sm:$0xff] }
 0x10c   : > { %2453 = vst [vmem:[%s11908_s13 + $0xfa0] sm:$0xff] %v2452_v52  ;;  %v2456_v54 = vld [vmem:[%s11900_s12 + $0x1f60] sm:$0xff]  ;;  %v2458_v55 = vld [vmem:[%s11900_s12 + $0x1f70] sm:$0xff]  ;;  %2455 = vst [vmem:[%s11908_s13 + $0xfa8] sm:$0xff] %v2454_v53 }
 0x10d   : > { %2457 = vst [vmem:[%s11908_s13 + $0xfb0] sm:$0xff] %v2456_v54  ;;  %2459 = vst [vmem:[%s11908_s13 + $0xfb8] sm:$0xff] %v2458_v55  ;;  %v2460_v56 = vld [vmem:[%s11900_s12 + $0x1f80] sm:$0xff]  ;;  %v2462_v57 = vld [vmem:[%s11900_s12 + $0x1f90] sm:$0xff] }
 0x10e   : > { %v2464_v58 = vld [vmem:[%s11900_s12 + $0x1fa0] sm:$0xff]  ;;  %2461 = vst [vmem:[%s11908_s13 + $0xfc0] sm:$0xff] %v2460_v56  ;;  %2463 = vst [vmem:[%s11908_s13 + $0xfc8] sm:$0xff] %v2462_v57  ;;  %v2466_v59 = vld [vmem:[%s11900_s12 + $0x1fb0] sm:$0xff] }
 0x10f   : > { %2465 = vst [vmem:[%s11908_s13 + $0xfd0] sm:$0xff] %v2464_v58  ;;  %v2468_v60 = vld [vmem:[%s11900_s12 + $0x1fc0] sm:$0xff]  ;;  %v2470_v61 = vld [vmem:[%s11900_s12 + $0x1fd0] sm:$0xff]  ;;  %2467 = vst [vmem:[%s11908_s13 + $0xfd8] sm:$0xff] %v2466_v59 }
 0x110   : > { %2469 = vst [vmem:[%s11908_s13 + $0xfe0] sm:$0xff] %v2468_v60  ;;  %2471 = vst [vmem:[%s11908_s13 + $0xfe8] sm:$0xff] %v2470_v61  ;;  %v2472_v62 = vld [vmem:[%s11900_s12 + $0x1fe0] sm:$0xff]  ;;  %v2474_v63 = vld [vmem:[%s11900_s12 + $0x1ff0] sm:$0xff] }
 0x111   : > { %v2476_v0 = vld [vmem:[%s11900_s12 + $0x2000] sm:$0xff]  ;;  %2473 = vst [vmem:[%s11908_s13 + $0xff0] sm:$0xff] %v2472_v62  ;;  %2475 = vst [vmem:[%s11908_s13 + $0xff8] sm:$0xff] %v2474_v63  ;;  %v2478_v1 = vld [vmem:[%s11900_s12 + $0x2010] sm:$0xff] }
 0x112   : > { %2477 = vst [vmem:[%s11908_s13 + $0x1000] sm:$0xff] %v2476_v0  ;;  %v2480_v2 = vld [vmem:[%s11900_s12 + $0x2020] sm:$0xff]  ;;  %v2482_v3 = vld [vmem:[%s11900_s12 + $0x2030] sm:$0xff]  ;;  %2479 = vst [vmem:[%s11908_s13 + $0x1008] sm:$0xff] %v2478_v1 }
 0x113   : > { %2481 = vst [vmem:[%s11908_s13 + $0x1010] sm:$0xff] %v2480_v2  ;;  %2483 = vst [vmem:[%s11908_s13 + $0x1018] sm:$0xff] %v2482_v3  ;;  %v2484_v4 = vld [vmem:[%s11900_s12 + $0x2040] sm:$0xff]  ;;  %v2486_v5 = vld [vmem:[%s11900_s12 + $0x2050] sm:$0xff] }
 0x114   : > { %v2488_v6 = vld [vmem:[%s11900_s12 + $0x2060] sm:$0xff]  ;;  %2485 = vst [vmem:[%s11908_s13 + $0x1020] sm:$0xff] %v2484_v4  ;;  %2487 = vst [vmem:[%s11908_s13 + $0x1028] sm:$0xff] %v2486_v5  ;;  %v2490_v7 = vld [vmem:[%s11900_s12 + $0x2070] sm:$0xff] }
 0x115   : > { %2489 = vst [vmem:[%s11908_s13 + $0x1030] sm:$0xff] %v2488_v6  ;;  %v2492_v8 = vld [vmem:[%s11900_s12 + $0x2080] sm:$0xff]  ;;  %v2494_v9 = vld [vmem:[%s11900_s12 + $0x2090] sm:$0xff]  ;;  %2491 = vst [vmem:[%s11908_s13 + $0x1038] sm:$0xff] %v2490_v7 }
 0x116   : > { %2493 = vst [vmem:[%s11908_s13 + $0x1040] sm:$0xff] %v2492_v8  ;;  %2495 = vst [vmem:[%s11908_s13 + $0x1048] sm:$0xff] %v2494_v9  ;;  %v2496_v10 = vld [vmem:[%s11900_s12 + $0x20a0] sm:$0xff]  ;;  %v2498_v11 = vld [vmem:[%s11900_s12 + $0x20b0] sm:$0xff] }
 0x117   : > { %v2500_v12 = vld [vmem:[%s11900_s12 + $0x20c0] sm:$0xff]  ;;  %2497 = vst [vmem:[%s11908_s13 + $0x1050] sm:$0xff] %v2496_v10  ;;  %2499 = vst [vmem:[%s11908_s13 + $0x1058] sm:$0xff] %v2498_v11  ;;  %v2502_v13 = vld [vmem:[%s11900_s12 + $0x20d0] sm:$0xff] }
 0x118   : > { %2501 = vst [vmem:[%s11908_s13 + $0x1060] sm:$0xff] %v2500_v12  ;;  %v2504_v14 = vld [vmem:[%s11900_s12 + $0x20e0] sm:$0xff]  ;;  %v2506_v15 = vld [vmem:[%s11900_s12 + $0x20f0] sm:$0xff]  ;;  %2503 = vst [vmem:[%s11908_s13 + $0x1068] sm:$0xff] %v2502_v13 }
 0x119   : > { %2505 = vst [vmem:[%s11908_s13 + $0x1070] sm:$0xff] %v2504_v14  ;;  %2507 = vst [vmem:[%s11908_s13 + $0x1078] sm:$0xff] %v2506_v15  ;;  %v2508_v16 = vld [vmem:[%s11900_s12 + $0x2100] sm:$0xff]  ;;  %v2510_v17 = vld [vmem:[%s11900_s12 + $0x2110] sm:$0xff] }
 0x11a   : > { %v2512_v18 = vld [vmem:[%s11900_s12 + $0x2120] sm:$0xff]  ;;  %2509 = vst [vmem:[%s11908_s13 + $0x1080] sm:$0xff] %v2508_v16  ;;  %2511 = vst [vmem:[%s11908_s13 + $0x1088] sm:$0xff] %v2510_v17  ;;  %v2514_v19 = vld [vmem:[%s11900_s12 + $0x2130] sm:$0xff] }
 0x11b   : > { %2513 = vst [vmem:[%s11908_s13 + $0x1090] sm:$0xff] %v2512_v18  ;;  %v2516_v20 = vld [vmem:[%s11900_s12 + $0x2140] sm:$0xff]  ;;  %v2518_v21 = vld [vmem:[%s11900_s12 + $0x2150] sm:$0xff]  ;;  %2515 = vst [vmem:[%s11908_s13 + $0x1098] sm:$0xff] %v2514_v19 }
 0x11c   : > { %2517 = vst [vmem:[%s11908_s13 + $0x10a0] sm:$0xff] %v2516_v20  ;;  %2519 = vst [vmem:[%s11908_s13 + $0x10a8] sm:$0xff] %v2518_v21  ;;  %v2520_v22 = vld [vmem:[%s11900_s12 + $0x2160] sm:$0xff]  ;;  %v2522_v23 = vld [vmem:[%s11900_s12 + $0x2170] sm:$0xff] }
 0x11d   : > { %v2524_v24 = vld [vmem:[%s11900_s12 + $0x2180] sm:$0xff]  ;;  %2521 = vst [vmem:[%s11908_s13 + $0x10b0] sm:$0xff] %v2520_v22  ;;  %2523 = vst [vmem:[%s11908_s13 + $0x10b8] sm:$0xff] %v2522_v23  ;;  %v2526_v25 = vld [vmem:[%s11900_s12 + $0x2190] sm:$0xff] }
 0x11e   : > { %2525 = vst [vmem:[%s11908_s13 + $0x10c0] sm:$0xff] %v2524_v24  ;;  %v2528_v26 = vld [vmem:[%s11900_s12 + $0x21a0] sm:$0xff]  ;;  %v2530_v27 = vld [vmem:[%s11900_s12 + $0x21b0] sm:$0xff]  ;;  %2527 = vst [vmem:[%s11908_s13 + $0x10c8] sm:$0xff] %v2526_v25 }
 0x11f   : > { %2529 = vst [vmem:[%s11908_s13 + $0x10d0] sm:$0xff] %v2528_v26  ;;  %2531 = vst [vmem:[%s11908_s13 + $0x10d8] sm:$0xff] %v2530_v27  ;;  %v2532_v28 = vld [vmem:[%s11900_s12 + $0x21c0] sm:$0xff]  ;;  %v2534_v29 = vld [vmem:[%s11900_s12 + $0x21d0] sm:$0xff] }
 0x120   : > { %v2536_v30 = vld [vmem:[%s11900_s12 + $0x21e0] sm:$0xff]  ;;  %2533 = vst [vmem:[%s11908_s13 + $0x10e0] sm:$0xff] %v2532_v28  ;;  %2535 = vst [vmem:[%s11908_s13 + $0x10e8] sm:$0xff] %v2534_v29  ;;  %v2538_v31 = vld [vmem:[%s11900_s12 + $0x21f0] sm:$0xff] }
 0x121   : > { %2537 = vst [vmem:[%s11908_s13 + $0x10f0] sm:$0xff] %v2536_v30  ;;  %v2540_v32 = vld [vmem:[%s11900_s12 + $0x2200] sm:$0xff]  ;;  %v2542_v33 = vld [vmem:[%s11900_s12 + $0x2210] sm:$0xff]  ;;  %2539 = vst [vmem:[%s11908_s13 + $0x10f8] sm:$0xff] %v2538_v31 }
 0x122   : > { %2541 = vst [vmem:[%s11908_s13 + $0x1100] sm:$0xff] %v2540_v32  ;;  %2543 = vst [vmem:[%s11908_s13 + $0x1108] sm:$0xff] %v2542_v33  ;;  %v2544_v34 = vld [vmem:[%s11900_s12 + $0x2220] sm:$0xff]  ;;  %v2546_v35 = vld [vmem:[%s11900_s12 + $0x2230] sm:$0xff] }
 0x123   : > { %v2548_v36 = vld [vmem:[%s11900_s12 + $0x2240] sm:$0xff]  ;;  %2545 = vst [vmem:[%s11908_s13 + $0x1110] sm:$0xff] %v2544_v34  ;;  %2547 = vst [vmem:[%s11908_s13 + $0x1118] sm:$0xff] %v2546_v35  ;;  %v2550_v37 = vld [vmem:[%s11900_s12 + $0x2250] sm:$0xff] }
 0x124   : > { %2549 = vst [vmem:[%s11908_s13 + $0x1120] sm:$0xff] %v2548_v36  ;;  %v2552_v38 = vld [vmem:[%s11900_s12 + $0x2260] sm:$0xff]  ;;  %v2554_v39 = vld [vmem:[%s11900_s12 + $0x2270] sm:$0xff]  ;;  %2551 = vst [vmem:[%s11908_s13 + $0x1128] sm:$0xff] %v2550_v37 }
 0x125   : > { %2553 = vst [vmem:[%s11908_s13 + $0x1130] sm:$0xff] %v2552_v38  ;;  %2555 = vst [vmem:[%s11908_s13 + $0x1138] sm:$0xff] %v2554_v39  ;;  %v2556_v40 = vld [vmem:[%s11900_s12 + $0x2280] sm:$0xff]  ;;  %v2558_v41 = vld [vmem:[%s11900_s12 + $0x2290] sm:$0xff] }
 0x126   : > { %v2560_v42 = vld [vmem:[%s11900_s12 + $0x22a0] sm:$0xff]  ;;  %2557 = vst [vmem:[%s11908_s13 + $0x1140] sm:$0xff] %v2556_v40  ;;  %2559 = vst [vmem:[%s11908_s13 + $0x1148] sm:$0xff] %v2558_v41  ;;  %v2562_v43 = vld [vmem:[%s11900_s12 + $0x22b0] sm:$0xff] }
 0x127   : > { %2561 = vst [vmem:[%s11908_s13 + $0x1150] sm:$0xff] %v2560_v42  ;;  %v2564_v44 = vld [vmem:[%s11900_s12 + $0x22c0] sm:$0xff]  ;;  %v2566_v45 = vld [vmem:[%s11900_s12 + $0x22d0] sm:$0xff]  ;;  %2563 = vst [vmem:[%s11908_s13 + $0x1158] sm:$0xff] %v2562_v43 }
 0x128   : > { %2565 = vst [vmem:[%s11908_s13 + $0x1160] sm:$0xff] %v2564_v44  ;;  %2567 = vst [vmem:[%s11908_s13 + $0x1168] sm:$0xff] %v2566_v45  ;;  %v2568_v46 = vld [vmem:[%s11900_s12 + $0x22e0] sm:$0xff]  ;;  %v2570_v47 = vld [vmem:[%s11900_s12 + $0x22f0] sm:$0xff] }
 0x129   : > { %v2572_v48 = vld [vmem:[%s11900_s12 + $0x2300] sm:$0xff]  ;;  %2569 = vst [vmem:[%s11908_s13 + $0x1170] sm:$0xff] %v2568_v46  ;;  %2571 = vst [vmem:[%s11908_s13 + $0x1178] sm:$0xff] %v2570_v47  ;;  %v2574_v49 = vld [vmem:[%s11900_s12 + $0x2310] sm:$0xff] }
 0x12a   : > { %2573 = vst [vmem:[%s11908_s13 + $0x1180] sm:$0xff] %v2572_v48  ;;  %v2576_v50 = vld [vmem:[%s11900_s12 + $0x2320] sm:$0xff]  ;;  %v2578_v51 = vld [vmem:[%s11900_s12 + $0x2330] sm:$0xff]  ;;  %2575 = vst [vmem:[%s11908_s13 + $0x1188] sm:$0xff] %v2574_v49 }
 0x12b   : > { %2577 = vst [vmem:[%s11908_s13 + $0x1190] sm:$0xff] %v2576_v50  ;;  %2579 = vst [vmem:[%s11908_s13 + $0x1198] sm:$0xff] %v2578_v51  ;;  %v2580_v52 = vld [vmem:[%s11900_s12 + $0x2340] sm:$0xff]  ;;  %v2582_v53 = vld [vmem:[%s11900_s12 + $0x2350] sm:$0xff] }
 0x12c   : > { %v2584_v54 = vld [vmem:[%s11900_s12 + $0x2360] sm:$0xff]  ;;  %2581 = vst [vmem:[%s11908_s13 + $0x11a0] sm:$0xff] %v2580_v52  ;;  %2583 = vst [vmem:[%s11908_s13 + $0x11a8] sm:$0xff] %v2582_v53  ;;  %v2586_v55 = vld [vmem:[%s11900_s12 + $0x2370] sm:$0xff] }
 0x12d   : > { %2585 = vst [vmem:[%s11908_s13 + $0x11b0] sm:$0xff] %v2584_v54  ;;  %v2588_v56 = vld [vmem:[%s11900_s12 + $0x2380] sm:$0xff]  ;;  %v2590_v57 = vld [vmem:[%s11900_s12 + $0x2390] sm:$0xff]  ;;  %2587 = vst [vmem:[%s11908_s13 + $0x11b8] sm:$0xff] %v2586_v55 }
 0x12e   : > { %2589 = vst [vmem:[%s11908_s13 + $0x11c0] sm:$0xff] %v2588_v56  ;;  %2591 = vst [vmem:[%s11908_s13 + $0x11c8] sm:$0xff] %v2590_v57  ;;  %v2592_v58 = vld [vmem:[%s11900_s12 + $0x23a0] sm:$0xff]  ;;  %v2594_v59 = vld [vmem:[%s11900_s12 + $0x23b0] sm:$0xff] }
 0x12f   : > { %v2596_v60 = vld [vmem:[%s11900_s12 + $0x23c0] sm:$0xff]  ;;  %2593 = vst [vmem:[%s11908_s13 + $0x11d0] sm:$0xff] %v2592_v58  ;;  %2595 = vst [vmem:[%s11908_s13 + $0x11d8] sm:$0xff] %v2594_v59  ;;  %v2598_v61 = vld [vmem:[%s11900_s12 + $0x23d0] sm:$0xff] }
 0x130   : > { %2597 = vst [vmem:[%s11908_s13 + $0x11e0] sm:$0xff] %v2596_v60  ;;  %v2600_v62 = vld [vmem:[%s11900_s12 + $0x23e0] sm:$0xff]  ;;  %v2602_v63 = vld [vmem:[%s11900_s12 + $0x23f0] sm:$0xff]  ;;  %2599 = vst [vmem:[%s11908_s13 + $0x11e8] sm:$0xff] %v2598_v61 }
 0x131   : > { %2601 = vst [vmem:[%s11908_s13 + $0x11f0] sm:$0xff] %v2600_v62  ;;  %2603 = vst [vmem:[%s11908_s13 + $0x11f8] sm:$0xff] %v2602_v63 }
 0x132 PF: > { %4957 = sbr.rel (!%p11882_p3) target bundleno = 326 (0x146), region = 84  ;;  %s4959_s14 = sand.u32 (%p11882_p3), 1, %s11802_s22  }
 0x133   : > { %s10709_s15 = sshll.u32 (%p11882_p3), %s11810_s24, 3  ;;  %s10051_s16 = sshll.u32 (%p11882_p3), %s4959_s14, 8 }
 0x134   : > { %s13063_s19 = scalar_lea.vmem (%p11882_p3), %s13950_s4, %s10709_s15  ;;  %s13068_s20 = scalar_lea.vmem (%p11882_p3), [#allocation4], %s10051_s16 }
 0x135   : > { %v5054_v0 = vld [vmem:[%s13063_s19] sm:$0xff] (%p11882_p3)  ;;  %v5056_v1 = vld [vmem:[%s13063_s19 + $0x10] sm:$0xff] (%p11882_p3) }
 0x136   : > { %v5058_v2 = vld [vmem:[%s13063_s19 + $0x20] sm:$0xff] (%p11882_p3)  ;;  %5055 = vst [vmem:[%s13068_s20] sm:$0xff] (%p11882_p3), %v5054_v0  ;;  %5057 = vst [vmem:[%s13068_s20 + $0x8] sm:$0xff] (%p11882_p3), %v5056_v1  ;;  %v5060_v3 = vld [vmem:[%s13063_s19 + $0x30] sm:$0xff] (%p11882_p3) }
 0x137   : > { %5059 = vst [vmem:[%s13068_s20 + $0x10] sm:$0xff] (%p11882_p3), %v5058_v2  ;;  %v5062_v4 = vld [vmem:[%s13063_s19 + $0x40] sm:$0xff] (%p11882_p3)  ;;  %v5064_v5 = vld [vmem:[%s13063_s19 + $0x50] sm:$0xff] (%p11882_p3)  ;;  %5061 = vst [vmem:[%s13068_s20 + $0x18] sm:$0xff] (%p11882_p3), %v5060_v3 }
 0x138   : > { %5063 = vst [vmem:[%s13068_s20 + $0x20] sm:$0xff] (%p11882_p3), %v5062_v4  ;;  %5065 = vst [vmem:[%s13068_s20 + $0x28] sm:$0xff] (%p11882_p3), %v5064_v5  ;;  %v5066_v6 = vld [vmem:[%s13063_s19 + $0x60] sm:$0xff] (%p11882_p3)  ;;  %v5068_v7 = vld [vmem:[%s13063_s19 + $0x70] sm:$0xff] (%p11882_p3) }
 0x139   : > { %v5070_v8 = vld [vmem:[%s13063_s19 + $0x80] sm:$0xff]  ;;  %5067 = vst [vmem:[%s13068_s20 + $0x30] sm:$0xff] %v5066_v6  ;;  %5069 = vst [vmem:[%s13068_s20 + $0x38] sm:$0xff] %v5068_v7  ;;  %v5072_v9 = vld [vmem:[%s13063_s19 + $0x90] sm:$0xff] }
 0x13a   : > { %5071 = vst [vmem:[%s13068_s20 + $0x40] sm:$0xff] %v5070_v8  ;;  %v5074_v10 = vld [vmem:[%s13063_s19 + $0xa0] sm:$0xff]  ;;  %v5076_v11 = vld [vmem:[%s13063_s19 + $0xb0] sm:$0xff]  ;;  %5073 = vst [vmem:[%s13068_s20 + $0x48] sm:$0xff] %v5072_v9 }
 0x13b   : > { %5075 = vst [vmem:[%s13068_s20 + $0x50] sm:$0xff] %v5074_v10  ;;  %5077 = vst [vmem:[%s13068_s20 + $0x58] sm:$0xff] %v5076_v11  ;;  %v5078_v12 = vld [vmem:[%s13063_s19 + $0xc0] sm:$0xff]  ;;  %v5080_v13 = vld [vmem:[%s13063_s19 + $0xd0] sm:$0xff] }
 0x13c   : > { %v5082_v14 = vld [vmem:[%s13063_s19 + $0xe0] sm:$0xff]  ;;  %5079 = vst [vmem:[%s13068_s20 + $0x60] sm:$0xff] %v5078_v12  ;;  %5081 = vst [vmem:[%s13068_s20 + $0x68] sm:$0xff] %v5080_v13  ;;  %v5084_v15 = vld [vmem:[%s13063_s19 + $0xf0] sm:$0xff] }
 0x13d   : > { %5083 = vst [vmem:[%s13068_s20 + $0x70] sm:$0xff] %v5082_v14  ;;  %v5086_v16 = vld [vmem:[%s13063_s19 + $0x100] sm:$0xff]  ;;  %v5088_v17 = vld [vmem:[%s13063_s19 + $0x110] sm:$0xff]  ;;  %5085 = vst [vmem:[%s13068_s20 + $0x78] sm:$0xff] %v5084_v15 }
 0x13e   : > { %5087 = vst [vmem:[%s13068_s20 + $0x80] sm:$0xff] %v5086_v16  ;;  %5089 = vst [vmem:[%s13068_s20 + $0x88] sm:$0xff] %v5088_v17  ;;  %v5090_v18 = vld [vmem:[%s13063_s19 + $0x120] sm:$0xff]  ;;  %v5092_v19 = vld [vmem:[%s13063_s19 + $0x130] sm:$0xff] }
 0x13f   : > { %v5094_v20 = vld [vmem:[%s13063_s19 + $0x140] sm:$0xff]  ;;  %5091 = vst [vmem:[%s13068_s20 + $0x90] sm:$0xff] %v5090_v18  ;;  %5093 = vst [vmem:[%s13068_s20 + $0x98] sm:$0xff] %v5092_v19  ;;  %v5096_v21 = vld [vmem:[%s13063_s19 + $0x150] sm:$0xff] }
 0x140   : > { %5095 = vst [vmem:[%s13068_s20 + $0xa0] sm:$0xff] %v5094_v20  ;;  %v5098_v22 = vld [vmem:[%s13063_s19 + $0x160] sm:$0xff]  ;;  %v5100_v23 = vld [vmem:[%s13063_s19 + $0x170] sm:$0xff]  ;;  %5097 = vst [vmem:[%s13068_s20 + $0xa8] sm:$0xff] %v5096_v21 }
 0x141   : > { %5099 = vst [vmem:[%s13068_s20 + $0xb0] sm:$0xff] %v5098_v22  ;;  %5101 = vst [vmem:[%s13068_s20 + $0xb8] sm:$0xff] %v5100_v23  ;;  %v5102_v24 = vld [vmem:[%s13063_s19 + $0x180] sm:$0xff]  ;;  %v5104_v25 = vld [vmem:[%s13063_s19 + $0x190] sm:$0xff] }
 0x142   : > { %v5106_v26 = vld [vmem:[%s13063_s19 + $0x1a0] sm:$0xff]  ;;  %5103 = vst [vmem:[%s13068_s20 + $0xc0] sm:$0xff] %v5102_v24  ;;  %5105 = vst [vmem:[%s13068_s20 + $0xc8] sm:$0xff] %v5104_v25  ;;  %v5108_v27 = vld [vmem:[%s13063_s19 + $0x1b0] sm:$0xff] }
 0x143   : > { %5107 = vst [vmem:[%s13068_s20 + $0xd0] sm:$0xff] %v5106_v26  ;;  %v5110_v28 = vld [vmem:[%s13063_s19 + $0x1c0] sm:$0xff]  ;;  %v5112_v29 = vld [vmem:[%s13063_s19 + $0x1d0] sm:$0xff]  ;;  %5109 = vst [vmem:[%s13068_s20 + $0xd8] sm:$0xff] %v5108_v27 }
 0x144   : > { %5111 = vst [vmem:[%s13068_s20 + $0xe0] sm:$0xff] %v5110_v28  ;;  %5113 = vst [vmem:[%s13068_s20 + $0xe8] sm:$0xff] %v5112_v29  ;;  %v5114_v30 = vld [vmem:[%s13063_s19 + $0x1e0] sm:$0xff]  ;;  %v5116_v31 = vld [vmem:[%s13063_s19 + $0x1f0] sm:$0xff] }
 0x145   : > { %5115 = vst [vmem:[%s13068_s20 + $0xf0] sm:$0xff] %v5114_v30  ;;  %5117 = vst [vmem:[%s13068_s20 + $0xf8] sm:$0xff] %v5116_v31 }
 0x146 PF: > { %p10054_p6 = scmp.ge.s32.totalorder %s11814_s25, 1  ;;  %p5130_p7 = scmp.lt.s32.totalorder %s11814_s25, 3 }
 0x148   : > { %p5131_p8 = pnand %p10054_p6, %p5130_p7 }
 0x149   : > { %s5137_s27 = sand.u32 (!%p5131_p8), 1, %s11798_s21   ;;  %v13137_v32 = vld [vmem:[%s13946_s0] sm:$0xff] (!%p5131_p8)  ;;  %v13142_v33 = vld [vmem:[%s13946_s0 + $0x48] sm:$0xff] (!%p5131_p8) }
 0x14a   : > { %5134 = sbr.rel (%p5131_p8) target bundleno = 1196 (0x4ac), region = 126  ;;  %v10061_v34 = vcombine.high (!%p5131_p8), %v13137_v32, %v13137_v32  ;;  %v10079_v35 = vcombine.high (!%p5131_p8), %v13142_v33, %v13142_v33  ;;  %s10055_s8 = sshll.u32 (!%p5131_p8), %s5137_s27, 8 }
 0x14b   : > { %s10785_s9 = smul.u32 (!%p5131_p8), 4608, %s5137_s27 }
 0x14c   : > { %8881 = vmatprep.mubr.bf16.mxu1 (!%p5131_p8), %v10061_v34  ;;  %9250 = vmatprep.mubr.bf16.mxu0 (!%p5131_p8), %v10079_v35 }
 0x14d   : > { %s13150_s10 = scalar_lea.vmem (!%p5131_p8), [#allocation3], %s10785_s9  ;;  %s13730_s9 = scalar_lea.vmem (!%p5131_p8), [#allocation4], %s10055_s8 }
 0x14e   : > { %v10826_v36 = vld [vmem:[%s13150_s10 + $0x4] ss:$8 sps:$4 sm:$0xff] (!%p5131_p8)   ;;  %v10830_v38 = vld [vmem:[%s13150_s10] ss:$8 sps:$4 sm:$0xff] (!%p5131_p8)   ;;  %v10832_v40 = vld [vmem:[%s13150_s10 + $0x14] ss:$8 sps:$4 sm:$0xff] (!%p5131_p8)  }
 0x14f   : > { %v10828_v37 = vld [vmem:[%s13150_s10 + $0x904] ss:$8 sps:$4 sm:$0xff] (!%p5131_p8)   ;;  %8849 = vmatprep.subr.bf16.mxu1 (!%p5131_p8), %v10826_v36  ;;  %v10831_v39 = vld [vmem:[%s13150_s10 + $0x900] ss:$8 sps:$4 sm:$0xff] (!%p5131_p8)   ;;  %v10834_v41 = vld [vmem:[%s13150_s10 + $0x914] ss:$8 sps:$4 sm:$0xff] (!%p5131_p8)  }
 0x150   : > { %9218 = vmatprep.subr.bf16.mxu0 (!%p5131_p8), %v10828_v37  ;;  %8850 = vmatpush1.bf16.msra.mxu1 (!%p5131_p8), %v10830_v38  ;;  %v10836_v42 = vld [vmem:[%s13150_s10 + $0x10] ss:$8 sps:$4 sm:$0xff] (!%p5131_p8)   ;;  %v10838_v44 = vld [vmem:[%s13150_s10 + $0x24] ss:$8 sps:$4 sm:$0xff] (!%p5131_p8)   ;;  %v10842_v46 = vld [vmem:[%s13150_s10 + $0x20] ss:$8 sps:$4 sm:$0xff] (!%p5131_p8)  }
 0x151   : > { %9219 = vmatpush1.bf16.msra.mxu0 %v10831_v39  ;;  %8851 = vmatprep.subr.bf16.mxu1 %v10832_v40  ;;  %v10837_v43 = vld [vmem:[%s13150_s10 + $0x910] ss:$8 sps:$4 sm:$0xff]   ;;  %v10840_v45 = vld [vmem:[%s13150_s10 + $0x924] ss:$8 sps:$4 sm:$0xff]   ;;  %v10843_v47 = vld [vmem:[%s13150_s10 + $0x920] ss:$8 sps:$4 sm:$0xff]   ;;  %v10060_v40 = vcombine.low %v13137_v32, %v13137_v32 }
 0x152   : > { %9220 = vmatprep.subr.bf16.mxu0 %v10834_v41  ;;  %v10844_v48 = vld [vmem:[%s13150_s10 + $0x34] ss:$8 sps:$4 sm:$0xff]   ;;  %v10848_v50 = vld [vmem:[%s13150_s10 + $0x30] ss:$8 sps:$4 sm:$0xff]   ;;  %v10850_v52 = vld [vmem:[%s13150_s10 + $0x44] ss:$8 sps:$4 sm:$0xff]  }
 0x153   : > { %v10846_v49 = vld [vmem:[%s13150_s10 + $0x934] ss:$8 sps:$4 sm:$0xff]   ;;  %v10849_v51 = vld [vmem:[%s13150_s10 + $0x930] ss:$8 sps:$4 sm:$0xff]   ;;  %v10852_v53 = vld [vmem:[%s13150_s10 + $0x944] ss:$8 sps:$4 sm:$0xff]  }
 0x154   : > { %8852 = vmatpush1.bf16.msra.mxu1 %v10836_v42  ;;  %v10854_v54 = vld [vmem:[%s13150_s10 + $0x40] ss:$8 sps:$4 sm:$0xff]   ;;  %v10856_v56 = vld [vmem:[%s13150_s10 + $0x54] ss:$8 sps:$4 sm:$0xff]   ;;  %v10860_v58 = vld [vmem:[%s13150_s10 + $0x50] ss:$8 sps:$4 sm:$0xff]   ;;  %v10078_v42 = vcombine.low %v13142_v33, %v13142_v33 }
 0x155   : > { %9221 = vmatpush1.bf16.msra.mxu0 %v10837_v43  ;;  %8853 = vmatprep.subr.bf16.mxu1 %v10838_v44  ;;  %v10855_v55 = vld [vmem:[%s13150_s10 + $0x940] ss:$8 sps:$4 sm:$0xff]   ;;  %v10858_v57 = vld [vmem:[%s13150_s10 + $0x954] ss:$8 sps:$4 sm:$0xff]   ;;  %v10861_v59 = vld [vmem:[%s13150_s10 + $0x950] ss:$8 sps:$4 sm:$0xff]  }
 0x156   : > { %9222 = vmatprep.subr.bf16.mxu0 %v10840_v45  ;;  %v10862_v60 = vld [vmem:[%s13150_s10 + $0x64] ss:$8 sps:$4 sm:$0xff]   ;;  %v10866_v62 = vld [vmem:[%s13150_s10 + $0x60] ss:$8 sps:$4 sm:$0xff]   ;;  %v10868_v0 = vld [vmem:[%s13150_s10 + $0x74] ss:$8 sps:$4 sm:$0xff]  }
 0x157   : > { %v10864_v61 = vld [vmem:[%s13150_s10 + $0x964] ss:$8 sps:$4 sm:$0xff]   ;;  %v10867_v63 = vld [vmem:[%s13150_s10 + $0x960] ss:$8 sps:$4 sm:$0xff]   ;;  %v10870_v1 = vld [vmem:[%s13150_s10 + $0x974] ss:$8 sps:$4 sm:$0xff]  }
 0x158   : > { %8854 = vmatpush1.bf16.msra.mxu1 %v10842_v46  ;;  %v10872_v2 = vld [vmem:[%s13150_s10 + $0x70] ss:$8 sps:$4 sm:$0xff]   ;;  %v10874_v4 = vld [vmem:[%s13150_s10 + $0x84] ss:$8 sps:$4 sm:$0xff]   ;;  %v10878_v6 = vld [vmem:[%s13150_s10 + $0x80] ss:$8 sps:$4 sm:$0xff]  }
 0x159   : > { %9223 = vmatpush1.bf16.msra.mxu0 %v10843_v47  ;;  %8855 = vmatprep.subr.bf16.mxu1 %v10844_v48  ;;  %v10873_v3 = vld [vmem:[%s13150_s10 + $0x970] ss:$8 sps:$4 sm:$0xff]   ;;  %v10876_v5 = vld [vmem:[%s13150_s10 + $0x984] ss:$8 sps:$4 sm:$0xff]   ;;  %v10879_v7 = vld [vmem:[%s13150_s10 + $0x980] ss:$8 sps:$4 sm:$0xff]  }
 0x15a   : > { %9224 = vmatprep.subr.bf16.mxu0 %v10846_v49  ;;  %v10880_v8 = vld [vmem:[%s13150_s10 + $0x94] ss:$8 sps:$4 sm:$0xff]   ;;  %v10884_v10 = vld [vmem:[%s13150_s10 + $0x90] ss:$8 sps:$4 sm:$0xff]   ;;  %v10886_v12 = vld [vmem:[%s13150_s10 + $0xa4] ss:$8 sps:$4 sm:$0xff]  }
 0x15b   : > { %v10882_v9 = vld [vmem:[%s13150_s10 + $0x994] ss:$8 sps:$4 sm:$0xff]   ;;  %v10885_v11 = vld [vmem:[%s13150_s10 + $0x990] ss:$8 sps:$4 sm:$0xff]   ;;  %v10888_v13 = vld [vmem:[%s13150_s10 + $0x9a4] ss:$8 sps:$4 sm:$0xff]  }
 0x15c   : > { %8856 = vmatpush1.bf16.msra.mxu1 %v10848_v50  ;;  %v10890_v14 = vld [vmem:[%s13150_s10 + $0xa0] ss:$8 sps:$4 sm:$0xff]   ;;  %v10892_v16 = vld [vmem:[%s13150_s10 + $0xb4] ss:$8 sps:$4 sm:$0xff]   ;;  %v10896_v18 = vld [vmem:[%s13150_s10 + $0xb0] ss:$8 sps:$4 sm:$0xff]  }
 0x15d   : > { %9225 = vmatpush1.bf16.msra.mxu0 %v10849_v51  ;;  %8857 = vmatprep.subr.bf16.mxu1 %v10850_v52  ;;  %v10891_v15 = vld [vmem:[%s13150_s10 + $0x9a0] ss:$8 sps:$4 sm:$0xff]   ;;  %v10894_v17 = vld [vmem:[%s13150_s10 + $0x9b4] ss:$8 sps:$4 sm:$0xff]   ;;  %v10897_v19 = vld [vmem:[%s13150_s10 + $0x9b0] ss:$8 sps:$4 sm:$0xff]  }
 0x15e   : > { %9226 = vmatprep.subr.bf16.mxu0 %v10852_v53  ;;  %v10898_v20 = vld [vmem:[%s13150_s10 + $0xc4] ss:$8 sps:$4 sm:$0xff]   ;;  %v10902_v22 = vld [vmem:[%s13150_s10 + $0xc0] ss:$8 sps:$4 sm:$0xff]   ;;  %v10904_v24 = vld [vmem:[%s13150_s10 + $0xd4] ss:$8 sps:$4 sm:$0xff]  }
 0x15f   : > { %v10900_v21 = vld [vmem:[%s13150_s10 + $0x9c4] ss:$8 sps:$4 sm:$0xff]   ;;  %v10903_v23 = vld [vmem:[%s13150_s10 + $0x9c0] ss:$8 sps:$4 sm:$0xff]   ;;  %v10906_v25 = vld [vmem:[%s13150_s10 + $0x9d4] ss:$8 sps:$4 sm:$0xff]  }
 0x160   : > { %8858 = vmatpush1.bf16.msra.mxu1 %v10854_v54  ;;  %v10908_v26 = vld [vmem:[%s13150_s10 + $0xd0] ss:$8 sps:$4 sm:$0xff]   ;;  %v10910_v28 = vld [vmem:[%s13150_s10 + $0xe4] ss:$8 sps:$4 sm:$0xff]   ;;  %v10914_v30 = vld [vmem:[%s13150_s10 + $0xe0] ss:$8 sps:$4 sm:$0xff]  }
 0x161   : > { %9227 = vmatpush1.bf16.msra.mxu0 %v10855_v55  ;;  %8859 = vmatprep.subr.bf16.mxu1 %v10856_v56  ;;  %v10909_v27 = vld [vmem:[%s13150_s10 + $0x9d0] ss:$8 sps:$4 sm:$0xff]   ;;  %v10912_v29 = vld [vmem:[%s13150_s10 + $0x9e4] ss:$8 sps:$4 sm:$0xff]   ;;  %v10915_v31 = vld [vmem:[%s13150_s10 + $0x9e0] ss:$8 sps:$4 sm:$0xff]  }
 0x162   : > { %9228 = vmatprep.subr.bf16.mxu0 %v10858_v57  ;;  %v10916_v34 = vld [vmem:[%s13150_s10 + $0xf4] ss:$8 sps:$4 sm:$0xff]   ;;  %v10920_v36 = vld [vmem:[%s13150_s10 + $0xf0] ss:$8 sps:$4 sm:$0xff]   ;;  %v10926_v38 = vld [vmem:[%s13150_s10 + $0x104] ss:$8 sps:$4 sm:$0xff]  }
 0x163   : > { %v10918_v35 = vld [vmem:[%s13150_s10 + $0x9f4] ss:$8 sps:$4 sm:$0xff]   ;;  %v10921_v37 = vld [vmem:[%s13150_s10 + $0x9f0] ss:$8 sps:$4 sm:$0xff]   ;;  %v10931_v39 = vld [vmem:[%s13150_s10 + $0xa04] ss:$8 sps:$4 sm:$0xff]  }
 0x164   : > { %8860 = vmatpush1.bf16.msra.mxu1 %v10860_v58  ;;  %v10924_v41 = vld [vmem:[%s13150_s10 + $0x100] ss:$8 sps:$4 sm:$0xff]   ;;  %v10934_v44 = vld [vmem:[%s13150_s10 + $0x114] ss:$8 sps:$4 sm:$0xff]   ;;  %v10932_v32 = vld [vmem:[%s13150_s10 + $0x110] ss:$8 sps:$4 sm:$0xff]  }
 0x165   : > { %9229 = vmatpush1.bf16.msra.mxu0 %v10861_v59  ;;  %8861 = vmatprep.subr.bf16.mxu1 %v10862_v60  ;;  %v10929_v43 = vld [vmem:[%s13150_s10 + $0xa00] ss:$8 sps:$4 sm:$0xff]   ;;  %v10937_v45 = vld [vmem:[%s13150_s10 + $0xa14] ss:$8 sps:$4 sm:$0xff]   ;;  %v10935_v46 = vld [vmem:[%s13150_s10 + $0xa10] ss:$8 sps:$4 sm:$0xff]  }
 0x166   : > { %9230 = vmatprep.subr.bf16.mxu0 %v10864_v61  ;;  %v10940_v33 = vld [vmem:[%s13150_s10 + $0x124] ss:$8 sps:$4 sm:$0xff]   ;;  %v10938_v48 = vld [vmem:[%s13150_s10 + $0x120] ss:$8 sps:$4 sm:$0xff]   ;;  %v10946_v50 = vld [vmem:[%s13150_s10 + $0x134] ss:$8 sps:$4 sm:$0xff]  }
 0x167   : > { %v10943_v47 = vld [vmem:[%s13150_s10 + $0xa24] ss:$8 sps:$4 sm:$0xff]   ;;  %v10941_v49 = vld [vmem:[%s13150_s10 + $0xa20] ss:$8 sps:$4 sm:$0xff]   ;;  %v10949_v51 = vld [vmem:[%s13150_s10 + $0xa34] ss:$8 sps:$4 sm:$0xff]  }
 0x168   : > { %8862 = vmatpush1.bf16.msra.mxu1 %v10866_v62  ;;  %v10944_v52 = vld [vmem:[%s13150_s10 + $0x130] ss:$8 sps:$4 sm:$0xff]   ;;  %v10952_v54 = vld [vmem:[%s13150_s10 + $0x144] ss:$8 sps:$4 sm:$0xff]   ;;  %v10950_v56 = vld [vmem:[%s13150_s10 + $0x140] ss:$8 sps:$4 sm:$0xff]  }
 0x169   : > { %9231 = vmatpush1.bf16.msra.mxu0 %v10867_v63  ;;  %8863 = vmatprep.subr.bf16.mxu1 %v10868_v0  ;;  %v10947_v53 = vld [vmem:[%s13150_s10 + $0xa30] ss:$8 sps:$4 sm:$0xff]   ;;  %v10955_v55 = vld [vmem:[%s13150_s10 + $0xa44] ss:$8 sps:$4 sm:$0xff]   ;;  %v10953_v57 = vld [vmem:[%s13150_s10 + $0xa40] ss:$8 sps:$4 sm:$0xff]  }
 0x16a   : > { %9232 = vmatprep.subr.bf16.mxu0 %v10870_v1  ;;  %v10958_v58 = vld [vmem:[%s13150_s10 + $0x154] ss:$8 sps:$4 sm:$0xff]   ;;  %v10956_v60 = vld [vmem:[%s13150_s10 + $0x150] ss:$8 sps:$4 sm:$0xff]   ;;  %v10964_v62 = vld [vmem:[%s13150_s10 + $0x164] ss:$8 sps:$4 sm:$0xff]  }
 0x16b   : > { %v10961_v59 = vld [vmem:[%s13150_s10 + $0xa54] ss:$8 sps:$4 sm:$0xff]   ;;  %v10959_v61 = vld [vmem:[%s13150_s10 + $0xa50] ss:$8 sps:$4 sm:$0xff]   ;;  %v10967_v63 = vld [vmem:[%s13150_s10 + $0xa64] ss:$8 sps:$4 sm:$0xff]  }
 0x16c   : > { %8864 = vmatpush1.bf16.msra.mxu1 %v10872_v2  ;;  %v13249_v0 = vld [vmem:[%s13946_s0 + $0x8] sm:$0xff]  ;;  %v13256_v2 = vld [vmem:[%s13946_s0 + $0x50] sm:$0xff] }
 0x16d   : > { %9233 = vmatpush1.bf16.msra.mxu0 %v10873_v3  ;;  %8865 = vmatprep.subr.bf16.mxu1 %v10874_v4  ;;  %v10063_v1 = vcombine.high %v13249_v0, %v13249_v0  ;;  %v10962_v3 = vld [vmem:[%s13150_s10 + $0x160] ss:$8 sps:$4 sm:$0xff]  }
 0x16e   : > { %9234 = vmatprep.subr.bf16.mxu0 %v10876_v5  ;;  %v10965_v4 = vld [vmem:[%s13150_s10 + $0xa60] ss:$8 sps:$4 sm:$0xff]   ;;  %v10081_v5 = vcombine.high %v13256_v2, %v13256_v2 }
 0x170   : > { %8866 = vmatpush1.bf16.msra.mxu1 %v10878_v6  ;;  %v10970_v6 = vld [vmem:[%s13150_s10 + $0x174] ss:$8 sps:$4 sm:$0xff]  }
 0x171   : > { %9235 = vmatpush1.bf16.msra.mxu0 %v10879_v7  ;;  %8867 = vmatprep.subr.bf16.mxu1 %v10880_v8  ;;  %v10973_v7 = vld [vmem:[%s13150_s10 + $0xa74] ss:$8 sps:$4 sm:$0xff]   ;;  %v10968_v8 = vld [vmem:[%s13150_s10 + $0x170] ss:$8 sps:$4 sm:$0xff]  }
 0x172   : > { %9236 = vmatprep.subr.bf16.mxu0 %v10882_v9  ;;  %v10971_v9 = vld [vmem:[%s13150_s10 + $0xa70] ss:$8 sps:$4 sm:$0xff]  }
 0x174   : > { %8868 = vmatpush1.bf16.msra.mxu1 %v10884_v10  ;;  %v10976_v10 = vld [vmem:[%s13150_s10 + $0x184] ss:$8 sps:$4 sm:$0xff]  }
 0x175   : > { %9237 = vmatpush1.bf16.msra.mxu0 %v10885_v11  ;;  %8869 = vmatprep.subr.bf16.mxu1 %v10886_v12  ;;  %v10979_v11 = vld [vmem:[%s13150_s10 + $0xa84] ss:$8 sps:$4 sm:$0xff]   ;;  %v10974_v12 = vld [vmem:[%s13150_s10 + $0x180] ss:$8 sps:$4 sm:$0xff]  }
 0x176   : > { %9238 = vmatprep.subr.bf16.mxu0 %v10888_v13  ;;  %v10977_v13 = vld [vmem:[%s13150_s10 + $0xa80] ss:$8 sps:$4 sm:$0xff]  }
 0x178   : > { %8870 = vmatpush1.bf16.msra.mxu1 %v10890_v14  ;;  %v10982_v14 = vld [vmem:[%s13150_s10 + $0x194] ss:$8 sps:$4 sm:$0xff]  }
 0x179   : > { %9239 = vmatpush1.bf16.msra.mxu0 %v10891_v15  ;;  %8871 = vmatprep.subr.bf16.mxu1 %v10892_v16  ;;  %v10985_v15 = vld [vmem:[%s13150_s10 + $0xa94] ss:$8 sps:$4 sm:$0xff]   ;;  %v10980_v16 = vld [vmem:[%s13150_s10 + $0x190] ss:$8 sps:$4 sm:$0xff]  }
 0x17a   : > { %9240 = vmatprep.subr.bf16.mxu0 %v10894_v17  ;;  %v10983_v17 = vld [vmem:[%s13150_s10 + $0xa90] ss:$8 sps:$4 sm:$0xff]  }
 0x17c   : > { %8872 = vmatpush1.bf16.msra.mxu1 %v10896_v18  ;;  %v10988_v18 = vld [vmem:[%s13150_s10 + $0x1a4] ss:$8 sps:$4 sm:$0xff]  }
 0x17d   : > { %9241 = vmatpush1.bf16.msra.mxu0 %v10897_v19  ;;  %8873 = vmatprep.subr.bf16.mxu1 %v10898_v20  ;;  %v10991_v19 = vld [vmem:[%s13150_s10 + $0xaa4] ss:$8 sps:$4 sm:$0xff]   ;;  %v10986_v20 = vld [vmem:[%s13150_s10 + $0x1a0] ss:$8 sps:$4 sm:$0xff]  }
 0x17e   : > { %9242 = vmatprep.subr.bf16.mxu0 %v10900_v21  ;;  %v10989_v21 = vld [vmem:[%s13150_s10 + $0xaa0] ss:$8 sps:$4 sm:$0xff]  }
 0x180   : > { %8874 = vmatpush1.bf16.msra.mxu1 %v10902_v22  ;;  %v10994_v22 = vld [vmem:[%s13150_s10 + $0x1b4] ss:$8 sps:$4 sm:$0xff]  }
 0x181   : > { %9243 = vmatpush1.bf16.msra.mxu0 %v10903_v23  ;;  %8875 = vmatprep.subr.bf16.mxu1 %v10904_v24  ;;  %v10997_v23 = vld [vmem:[%s13150_s10 + $0xab4] ss:$8 sps:$4 sm:$0xff]   ;;  %v10992_v24 = vld [vmem:[%s13150_s10 + $0x1b0] ss:$8 sps:$4 sm:$0xff]  }
 0x182   : > { %9244 = vmatprep.subr.bf16.mxu0 %v10906_v25  ;;  %v10995_v25 = vld [vmem:[%s13150_s10 + $0xab0] ss:$8 sps:$4 sm:$0xff]  }
 0x184   : > { %8876 = vmatpush1.bf16.msra.mxu1 %v10908_v26  ;;  %v11000_v26 = vld [vmem:[%s13150_s10 + $0x1c4] ss:$8 sps:$4 sm:$0xff]  }
 0x185   : > { %9245 = vmatpush1.bf16.msra.mxu0 %v10909_v27  ;;  %8877 = vmatprep.subr.bf16.mxu1 %v10910_v28  ;;  %v11003_v27 = vld [vmem:[%s13150_s10 + $0xac4] ss:$8 sps:$4 sm:$0xff]   ;;  %v10998_v28 = vld [vmem:[%s13150_s10 + $0x1c0] ss:$8 sps:$4 sm:$0xff]  }
 0x186   : > { %9246 = vmatprep.subr.bf16.mxu0 %v10912_v29  ;;  %v11001_v29 = vld [vmem:[%s13150_s10 + $0xac0] ss:$8 sps:$4 sm:$0xff]  }
 0x188   : > { %8878 = vmatpush1.bf16.msra.mxu1 %v10914_v30  ;;  %v11006_v30 = vld [vmem:[%s13150_s10 + $0x1d4] ss:$8 sps:$4 sm:$0xff]  }
 0x189   : > { %9247 = vmatpush1.bf16.msra.mxu0 %v10915_v31  ;;  %8879 = vmatprep.subr.bf16.mxu1 %v10916_v34  ;;  %v11009_v31 = vld [vmem:[%s13150_s10 + $0xad4] ss:$8 sps:$4 sm:$0xff]   ;;  %v11004_v34 = vld [vmem:[%s13150_s10 + $0x1d0] ss:$8 sps:$4 sm:$0xff]  }
 0x18a   : > { %9248 = vmatprep.subr.bf16.mxu0 %v10918_v35  ;;  %v11007_v35 = vld [vmem:[%s13150_s10 + $0xad0] ss:$8 sps:$4 sm:$0xff]  }
 0x18c   : > { %8880 = vmatpush1.bf16.msra.mxu1 %v10920_v36  ;;  %v11012_v36 = vld [vmem:[%s13150_s10 + $0x1e4] ss:$8 sps:$4 sm:$0xff]  }
 0x18d   : > { %9249 = vmatpush1.bf16.msra.mxu0 %v10921_v37  ;;  %8890 = vmatprep.subr.bf16.mxu1 %v10926_v38  ;;  %v11015_v37 = vld [vmem:[%s13150_s10 + $0xae4] ss:$8 sps:$4 sm:$0xff]   ;;  %v11010_v38 = vld [vmem:[%s13150_s10 + $0x1e0] ss:$8 sps:$4 sm:$0xff]  }
 0x18e   : > { %9259 = vmatprep.subr.bf16.mxu0 %v10931_v39  ;;  %v11013_v39 = vld [vmem:[%s13150_s10 + $0xae0] ss:$8 sps:$4 sm:$0xff]  }
 0x18f   : > { %8882 = vmatmul.mubr.bf16.vlgmr.msra.gmra.mrb[0].mxu1 %v10060_v40  ;;  %v11018_v40 = vld [vmem:[%s13150_s10 + $0x1f4] ss:$8 sps:$4 sm:$0xff]  }
 0x190   : > { %9251 = vmatmul.mubr.bf16.vlgmr.msra.gmra.mrb[0].mxu0 %v10078_v42  ;;  %8891 = vmatpush1.bf16.msra.mxu1 %v10924_v41  ;;  %v11021_v41 = vld [vmem:[%s13150_s10 + $0xaf4] ss:$8 sps:$4 sm:$0xff]   ;;  %v11016_v42 = vld [vmem:[%s13150_s10 + $0x1f0] ss:$8 sps:$4 sm:$0xff]  }
 0x191   : > { %9260 = vmatpush1.bf16.msra.mxu0 %v10929_v43  ;;  %8892 = vmatprep.subr.bf16.mxu1 %v10934_v44  ;;  %v11019_v43 = vld [vmem:[%s13150_s10 + $0xaf0] ss:$8 sps:$4 sm:$0xff]   ;;  %v11026_v44 = vld [vmem:[%s13150_s10 + $0x204] ss:$8 sps:$4 sm:$0xff]  }
 0x192   : > { %9261 = vmatprep.subr.bf16.mxu0 %v10937_v45  ;;  %8922 = vmatprep.mubr.bf16.mxu1 %v10063_v1  ;;  %v11031_v45 = vld [vmem:[%s13150_s10 + $0xb04] ss:$8 sps:$4 sm:$0xff]  }
 0x193   : > { %9291 = vmatprep.mubr.bf16.mxu0 %v10081_v5  ;;  %v11055_v1 = vld [vmem:[%s13150_s10 + $0xb44] ss:$8 sps:$4 sm:$0xff]   ;;  %v11061_v5 = vld [vmem:[%s13150_s10 + $0xb54] ss:$8 sps:$4 sm:$0xff]  }
 0x194   : > { %8893 = vmatpush1.bf16.msra.mxu1 %v10932_v32  ;;  %v10062_v32 = vcombine.low %v13249_v0, %v13249_v0  ;;  %v11052_v0 = vld [vmem:[%s13150_s10 + $0x244] ss:$8 sps:$4 sm:$0xff]  }
 0x195   : > { %9262 = vmatpush1.bf16.msra.mxu0 %v10935_v46  ;;  %8894 = vmatprep.subr.bf16.mxu1 %v10940_v33  ;;  %v11024_v46 = vld [vmem:[%s13150_s10 + $0x200] ss:$8 sps:$4 sm:$0xff]   ;;  %v10080_v33 = vcombine.low %v13256_v2, %v13256_v2 }
 0x196   : > { %9263 = vmatprep.subr.bf16.mxu0 %v10943_v47  ;;  %v11029_v47 = vld [vmem:[%s13150_s10 + $0xb00] ss:$8 sps:$4 sm:$0xff]  }
 0x197   : > { %v11050_v2 = vld [vmem:[%s13150_s10 + $0x240] ss:$8 sps:$4 sm:$0xff]  }
 0x198   : > { %8895 = vmatpush1.bf16.msra.mxu1 %v10938_v48  ;;  %v11034_v48 = vld [vmem:[%s13150_s10 + $0x214] ss:$8 sps:$4 sm:$0xff]  }
 0x199   : > { %9264 = vmatpush1.bf16.msra.mxu0 %v10941_v49  ;;  %8896 = vmatprep.subr.bf16.mxu1 %v10946_v50  ;;  %v13310_v49 = vld [vmem:[%s13946_s0 + $0x10] sm:$0xff] }
 0x19a   : > { %9265 = vmatprep.subr.bf16.mxu0 %v10949_v51  ;;  %v11037_v50 = vld [vmem:[%s13150_s10 + $0xb14] ss:$8 sps:$4 sm:$0xff]   ;;  %v10065_v51 = vcombine.high %v13310_v49, %v13310_v49 }
 0x19c   : > { %8897 = vmatpush1.bf16.msra.mxu1 %v10944_v52  ;;  %v13318_v52 = vld [vmem:[%s13946_s0 + $0x58] sm:$0xff] }
 0x19d   : > { %9266 = vmatpush1.bf16.msra.mxu0 %v10947_v53  ;;  %8898 = vmatprep.subr.bf16.mxu1 %v10952_v54  ;;  %v11032_v53 = vld [vmem:[%s13150_s10 + $0x210] ss:$8 sps:$4 sm:$0xff]  }
 0x19e   : > { %9267 = vmatprep.subr.bf16.mxu0 %v10955_v55  ;;  %v11035_v54 = vld [vmem:[%s13150_s10 + $0xb10] ss:$8 sps:$4 sm:$0xff]   ;;  %v10083_v55 = vcombine.high %v13318_v52, %v13318_v52 }
 0x1a0   : > { %8899 = vmatpush1.bf16.msra.mxu1 %v10950_v56  ;;  %v11040_v56 = vld [vmem:[%s13150_s10 + $0x224] ss:$8 sps:$4 sm:$0xff]  }
 0x1a1   : > { %9268 = vmatpush1.bf16.msra.mxu0 %v10953_v57  ;;  %8900 = vmatprep.subr.bf16.mxu1 %v10958_v58  ;;  %v11043_v57 = vld [vmem:[%s13150_s10 + $0xb24] ss:$8 sps:$4 sm:$0xff]   ;;  %v11038_v58 = vld [vmem:[%s13150_s10 + $0x220] ss:$8 sps:$4 sm:$0xff]  }
 0x1a2   : > { %9269 = vmatprep.subr.bf16.mxu0 %v10961_v59  ;;  %v11041_v59 = vld [vmem:[%s13150_s10 + $0xb20] ss:$8 sps:$4 sm:$0xff]  }
 0x1a4   : > { %8901 = vmatpush1.bf16.msra.mxu1 %v10956_v60  ;;  %v11046_v60 = vld [vmem:[%s13150_s10 + $0x234] ss:$8 sps:$4 sm:$0xff]  }
 0x1a5   : > { %9270 = vmatpush1.bf16.msra.mxu0 %v10959_v61  ;;  %8902 = vmatprep.subr.bf16.mxu1 %v10964_v62  ;;  %v11049_v61 = vld [vmem:[%s13150_s10 + $0xb34] ss:$8 sps:$4 sm:$0xff]   ;;  %v11044_v62 = vld [vmem:[%s13150_s10 + $0x230] ss:$8 sps:$4 sm:$0xff]  }
 0x1a6   : > { %9271 = vmatprep.subr.bf16.mxu0 %v10967_v63  ;;  %v11047_v63 = vld [vmem:[%s13150_s10 + $0xb30] ss:$8 sps:$4 sm:$0xff]  }
 0x1a8   : > { %8903 = vmatpush1.bf16.msra.mxu1 %v10962_v3  ;;  %v11053_v3 = vld [vmem:[%s13150_s10 + $0xb40] ss:$8 sps:$4 sm:$0xff]  }
 0x1a9   : > { %9272 = vmatpush1.bf16.msra.mxu0 %v10965_v4  ;;  %8904 = vmatprep.subr.bf16.mxu1 %v10970_v6  ;;  %v11058_v4 = vld [vmem:[%s13150_s10 + $0x254] ss:$8 sps:$4 sm:$0xff]   ;;  %v11056_v6 = vld [vmem:[%s13150_s10 + $0x250] ss:$8 sps:$4 sm:$0xff]  }
 0x1aa   : > { %9273 = vmatprep.subr.bf16.mxu0 %v10973_v7  ;;  %v11059_v7 = vld [vmem:[%s13150_s10 + $0xb50] ss:$8 sps:$4 sm:$0xff]  }
 0x1ac   : > { %8905 = vmatpush1.bf16.msra.mxu1 %v10968_v8  ;;  %v11064_v8 = vld [vmem:[%s13150_s10 + $0x264] ss:$8 sps:$4 sm:$0xff]  }
 0x1ad   : > { %9274 = vmatpush1.bf16.msra.mxu0 %v10971_v9  ;;  %8906 = vmatprep.subr.bf16.mxu1 %v10976_v10  ;;  %v11067_v9 = vld [vmem:[%s13150_s10 + $0xb64] ss:$8 sps:$4 sm:$0xff]   ;;  %v11062_v10 = vld [vmem:[%s13150_s10 + $0x260] ss:$8 sps:$4 sm:$0xff]  }
 0x1ae   : > { %9275 = vmatprep.subr.bf16.mxu0 %v10979_v11  ;;  %v11065_v11 = vld [vmem:[%s13150_s10 + $0xb60] ss:$8 sps:$4 sm:$0xff]  }
 0x1b0   : > { %8907 = vmatpush1.bf16.msra.mxu1 %v10974_v12  ;;  %v11070_v12 = vld [vmem:[%s13150_s10 + $0x274] ss:$8 sps:$4 sm:$0xff]  }
 0x1b1   : > { %9276 = vmatpush1.bf16.msra.mxu0 %v10977_v13  ;;  %8908 = vmatprep.subr.bf16.mxu1 %v10982_v14  ;;  %v11073_v13 = vld [vmem:[%s13150_s10 + $0xb74] ss:$8 sps:$4 sm:$0xff]   ;;  %v11068_v14 = vld [vmem:[%s13150_s10 + $0x270] ss:$8 sps:$4 sm:$0xff]  }
 0x1b2   : > { %9277 = vmatprep.subr.bf16.mxu0 %v10985_v15  ;;  %v11071_v15 = vld [vmem:[%s13150_s10 + $0xb70] ss:$8 sps:$4 sm:$0xff]  }
 0x1b4   : > { %8909 = vmatpush1.bf16.msra.mxu1 %v10980_v16  ;;  %v11076_v16 = vld [vmem:[%s13150_s10 + $0x284] ss:$8 sps:$4 sm:$0xff]  }
 0x1b5   : > { %9278 = vmatpush1.bf16.msra.mxu0 %v10983_v17  ;;  %8910 = vmatprep.subr.bf16.mxu1 %v10988_v18  ;;  %v11079_v17 = vld [vmem:[%s13150_s10 + $0xb84] ss:$8 sps:$4 sm:$0xff]   ;;  %v11074_v18 = vld [vmem:[%s13150_s10 + $0x280] ss:$8 sps:$4 sm:$0xff]  }
 0x1b6   : > { %9279 = vmatprep.subr.bf16.mxu0 %v10991_v19  ;;  %v11077_v19 = vld [vmem:[%s13150_s10 + $0xb80] ss:$8 sps:$4 sm:$0xff]  }
 0x1b8   : > { %8911 = vmatpush1.bf16.msra.mxu1 %v10986_v20  ;;  %v11082_v20 = vld [vmem:[%s13150_s10 + $0x294] ss:$8 sps:$4 sm:$0xff]  }
 0x1b9   : > { %9280 = vmatpush1.bf16.msra.mxu0 %v10989_v21  ;;  %8912 = vmatprep.subr.bf16.mxu1 %v10994_v22  ;;  %v11085_v21 = vld [vmem:[%s13150_s10 + $0xb94] ss:$8 sps:$4 sm:$0xff]   ;;  %v11080_v22 = vld [vmem:[%s13150_s10 + $0x290] ss:$8 sps:$4 sm:$0xff]  }
 0x1ba   : > { %9281 = vmatprep.subr.bf16.mxu0 %v10997_v23  ;;  %v11083_v23 = vld [vmem:[%s13150_s10 + $0xb90] ss:$8 sps:$4 sm:$0xff]  }
 0x1bc   : > { %8913 = vmatpush1.bf16.msra.mxu1 %v10992_v24  ;;  %v11088_v24 = vld [vmem:[%s13150_s10 + $0x2a4] ss:$8 sps:$4 sm:$0xff]  }
 0x1bd   : > { %9282 = vmatpush1.bf16.msra.mxu0 %v10995_v25  ;;  %8914 = vmatprep.subr.bf16.mxu1 %v11000_v26  ;;  %v11091_v25 = vld [vmem:[%s13150_s10 + $0xba4] ss:$8 sps:$4 sm:$0xff]   ;;  %v11086_v26 = vld [vmem:[%s13150_s10 + $0x2a0] ss:$8 sps:$4 sm:$0xff]  }
 0x1be   : > { %9283 = vmatprep.subr.bf16.mxu0 %v11003_v27  ;;  %v11089_v27 = vld [vmem:[%s13150_s10 + $0xba0] ss:$8 sps:$4 sm:$0xff]  }
 0x1c0   : > { %8915 = vmatpush1.bf16.msra.mxu1 %v10998_v28  ;;  %v11094_v28 = vld [vmem:[%s13150_s10 + $0x2b4] ss:$8 sps:$4 sm:$0xff]  }
 0x1c1   : > { %9284 = vmatpush1.bf16.msra.mxu0 %v11001_v29  ;;  %8916 = vmatprep.subr.bf16.mxu1 %v11006_v30  ;;  %v11097_v29 = vld [vmem:[%s13150_s10 + $0xbb4] ss:$8 sps:$4 sm:$0xff]   ;;  %v11092_v30 = vld [vmem:[%s13150_s10 + $0x2b0] ss:$8 sps:$4 sm:$0xff]  }
 0x1c2   : > { %9285 = vmatprep.subr.bf16.mxu0 %v11009_v31  ;;  %v11095_v31 = vld [vmem:[%s13150_s10 + $0xbb0] ss:$8 sps:$4 sm:$0xff]  }
 0x1c4   : > { %8917 = vmatpush1.bf16.msra.mxu1 %v11004_v34  ;;  %v11100_v34 = vld [vmem:[%s13150_s10 + $0x2c4] ss:$8 sps:$4 sm:$0xff]  }
 0x1c5   : > { %9286 = vmatpush1.bf16.msra.mxu0 %v11007_v35  ;;  %8918 = vmatprep.subr.bf16.mxu1 %v11012_v36  ;;  %v11103_v35 = vld [vmem:[%s13150_s10 + $0xbc4] ss:$8 sps:$4 sm:$0xff]   ;;  %v11098_v36 = vld [vmem:[%s13150_s10 + $0x2c0] ss:$8 sps:$4 sm:$0xff]  }
 0x1c6   : > { %9287 = vmatprep.subr.bf16.mxu0 %v11015_v37  ;;  %v11101_v37 = vld [vmem:[%s13150_s10 + $0xbc0] ss:$8 sps:$4 sm:$0xff]  }
 0x1c8   : > { %8919 = vmatpush1.bf16.msra.mxu1 %v11010_v38  ;;  %v11106_v38 = vld [vmem:[%s13150_s10 + $0x2d4] ss:$8 sps:$4 sm:$0xff]  }
 0x1c9   : > { %9288 = vmatpush1.bf16.msra.mxu0 %v11013_v39  ;;  %8920 = vmatprep.subr.bf16.mxu1 %v11018_v40  ;;  %v11109_v39 = vld [vmem:[%s13150_s10 + $0xbd4] ss:$8 sps:$4 sm:$0xff]   ;;  %v11104_v40 = vld [vmem:[%s13150_s10 + $0x2d0] ss:$8 sps:$4 sm:$0xff]  }
 0x1ca   : > { %9289 = vmatprep.subr.bf16.mxu0 %v11021_v41  ;;  %v11107_v41 = vld [vmem:[%s13150_s10 + $0xbd0] ss:$8 sps:$4 sm:$0xff]  }
 0x1cc   : > { %8921 = vmatpush1.bf16.msra.mxu1 %v11016_v42  ;;  %v11112_v42 = vld [vmem:[%s13150_s10 + $0x2e4] ss:$8 sps:$4 sm:$0xff]  }
 0x1cd   : > { %9290 = vmatpush1.bf16.msra.mxu0 %v11019_v43  ;;  %8931 = vmatprep.subr.bf16.mxu1 %v11026_v44  ;;  %v11115_v43 = vld [vmem:[%s13150_s10 + $0xbe4] ss:$8 sps:$4 sm:$0xff]   ;;  %v11110_v44 = vld [vmem:[%s13150_s10 + $0x2e0] ss:$8 sps:$4 sm:$0xff]  }
 0x1ce   : > { %9300 = vmatprep.subr.bf16.mxu0 %v11031_v45  ;;  %v11113_v45 = vld [vmem:[%s13150_s10 + $0xbe0] ss:$8 sps:$4 sm:$0xff]  }
 0x1cf   : > { %8923 = vmatmul.mubr.bf16.vlgmr.msra.gmra.mrb[0].mxu1 %v10062_v32  ;;  %v11118_v32 = vld [vmem:[%s13150_s10 + $0x2f4] ss:$8 sps:$4 sm:$0xff]  }
 0x1d0   : > { %9292 = vmatmul.mubr.bf16.vlgmr.msra.gmra.mrb[0].mxu0 %v10080_v33  ;;  %8932 = vmatpush1.bf16.msra.mxu1 %v11024_v46  ;;  %v11121_v46 = vld [vmem:[%s13150_s10 + $0xbf4] ss:$8 sps:$4 sm:$0xff]   ;;  %v11116_v33 = vld [vmem:[%s13150_s10 + $0x2f0] ss:$8 sps:$4 sm:$0xff]  }
 0x1d1   : > { %9301 = vmatpush1.bf16.msra.mxu0 %v11029_v47  ;;  %8933 = vmatprep.subr.bf16.mxu1 %v11034_v48  ;;  %v11119_v47 = vld [vmem:[%s13150_s10 + $0xbf0] ss:$8 sps:$4 sm:$0xff]   ;;  %v11126_v48 = vld [vmem:[%s13150_s10 + $0x304] ss:$8 sps:$4 sm:$0xff]  }
 0x1d2   : > { %9302 = vmatprep.subr.bf16.mxu0 %v11037_v50  ;;  %8963 = vmatprep.mubr.bf16.mxu1 %v10065_v51  ;;  %v11131_v50 = vld [vmem:[%s13150_s10 + $0xc04] ss:$8 sps:$4 sm:$0xff]   ;;  %v13385_v51 = vld [vmem:[%s13946_s0 + $0x18] sm:$0xff] }
 0x1d3   : > { %9332 = vmatprep.mubr.bf16.mxu0 %v10083_v55  ;;  %v13394_v55 = vld [vmem:[%s13946_s0 + $0x60] sm:$0xff] }
 0x1d4   : > { %8934 = vmatpush1.bf16.msra.mxu1 %v11032_v53  ;;  %v10064_v53 = vcombine.low %v13310_v49, %v13310_v49  ;;  %v11137_v49 = vld [vmem:[%s13150_s10 + $0xc14] ss:$8 sps:$4 sm:$0xff]  }
 0x1d5   : > { %9303 = vmatpush1.bf16.msra.mxu0 %v11035_v54  ;;  %8935 = vmatprep.subr.bf16.mxu1 %v11040_v56  ;;  %v10082_v54 = vcombine.low %v13318_v52, %v13318_v52  ;;  %v11124_v56 = vld [vmem:[%s13150_s10 + $0x300] ss:$8 sps:$4 sm:$0xff]   ;;  %v10067_v52 = vcombine.high %v13385_v51, %v13385_v51 }
 0x1d6   : > { %9304 = vmatprep.subr.bf16.mxu0 %v11043_v57  ;;  %v11129_v57 = vld [vmem:[%s13150_s10 + $0xc00] ss:$8 sps:$4 sm:$0xff]  }
 0x1d8   : > { %8936 = vmatpush1.bf16.msra.mxu1 %v11038_v58  ;;  %v11134_v58 = vld [vmem:[%s13150_s10 + $0x314] ss:$8 sps:$4 sm:$0xff]  }
 0x1d9   : > { %9305 = vmatpush1.bf16.msra.mxu0 %v11041_v59  ;;  %8937 = vmatprep.subr.bf16.mxu1 %v11046_v60  ;;  %v10085_v59 = vcombine.high %v13394_v55, %v13394_v55  ;;  %v11132_v60 = vld [vmem:[%s13150_s10 + $0x310] ss:$8 sps:$4 sm:$0xff]  }
 0x1da   : > { %9306 = vmatprep.subr.bf16.mxu0 %v11049_v61  ;;  %v11135_v61 = vld [vmem:[%s13150_s10 + $0xc10] ss:$8 sps:$4 sm:$0xff]  }
 0x1dc   : > { %8938 = vmatpush1.bf16.msra.mxu1 %v11044_v62  ;;  %v11140_v62 = vld [vmem:[%s13150_s10 + $0x324] ss:$8 sps:$4 sm:$0xff]  }
 0x1dd   : > { %9307 = vmatpush1.bf16.msra.mxu0 %v11047_v63  ;;  %8939 = vmatprep.subr.bf16.mxu1 %v11052_v0  ;;  %v11143_v63 = vld [vmem:[%s13150_s10 + $0xc24] ss:$8 sps:$4 sm:$0xff]   ;;  %v11138_v0 = vld [vmem:[%s13150_s10 + $0x320] ss:$8 sps:$4 sm:$0xff]  }
 0x1de   : > { %9308 = vmatprep.subr.bf16.mxu0 %v11055_v1  ;;  %v11141_v1 = vld [vmem:[%s13150_s10 + $0xc20] ss:$8 sps:$4 sm:$0xff]  }
 0x1e0   : > { %8940 = vmatpush1.bf16.msra.mxu1 %v11050_v2  ;;  %v11146_v2 = vld [vmem:[%s13150_s10 + $0x334] ss:$8 sps:$4 sm:$0xff]  }
 0x1e1   : > { %9309 = vmatpush1.bf16.msra.mxu0 %v11053_v3  ;;  %8941 = vmatprep.subr.bf16.mxu1 %v11058_v4  ;;  %v11149_v3 = vld [vmem:[%s13150_s10 + $0xc34] ss:$8 sps:$4 sm:$0xff]   ;;  %v11144_v4 = vld [vmem:[%s13150_s10 + $0x330] ss:$8 sps:$4 sm:$0xff]  }
 0x1e2   : > { %9310 = vmatprep.subr.bf16.mxu0 %v11061_v5  ;;  %v11147_v5 = vld [vmem:[%s13150_s10 + $0xc30] ss:$8 sps:$4 sm:$0xff]  }
 0x1e4   : > { %8942 = vmatpush1.bf16.msra.mxu1 %v11056_v6  ;;  %v11152_v6 = vld [vmem:[%s13150_s10 + $0x344] ss:$8 sps:$4 sm:$0xff]  }
 0x1e5   : > { %9311 = vmatpush1.bf16.msra.mxu0 %v11059_v7  ;;  %8943 = vmatprep.subr.bf16.mxu1 %v11064_v8  ;;  %v11155_v7 = vld [vmem:[%s13150_s10 + $0xc44] ss:$8 sps:$4 sm:$0xff]   ;;  %v11150_v8 = vld [vmem:[%s13150_s10 + $0x340] ss:$8 sps:$4 sm:$0xff]  }
 0x1e6   : > { %9312 = vmatprep.subr.bf16.mxu0 %v11067_v9  ;;  %v11153_v9 = vld [vmem:[%s13150_s10 + $0xc40] ss:$8 sps:$4 sm:$0xff]  }
 0x1e8   : > { %8944 = vmatpush1.bf16.msra.mxu1 %v11062_v10  ;;  %v11158_v10 = vld [vmem:[%s13150_s10 + $0x354] ss:$8 sps:$4 sm:$0xff]  }
 0x1e9   : > { %9313 = vmatpush1.bf16.msra.mxu0 %v11065_v11  ;;  %8945 = vmatprep.subr.bf16.mxu1 %v11070_v12  ;;  %v11161_v11 = vld [vmem:[%s13150_s10 + $0xc54] ss:$8 sps:$4 sm:$0xff]   ;;  %v11156_v12 = vld [vmem:[%s13150_s10 + $0x350] ss:$8 sps:$4 sm:$0xff]  }
 0x1ea   : > { %9314 = vmatprep.subr.bf16.mxu0 %v11073_v13  ;;  %v11159_v13 = vld [vmem:[%s13150_s10 + $0xc50] ss:$8 sps:$4 sm:$0xff]  }
 0x1ec   : > { %8946 = vmatpush1.bf16.msra.mxu1 %v11068_v14  ;;  %v11164_v14 = vld [vmem:[%s13150_s10 + $0x364] ss:$8 sps:$4 sm:$0xff]  }
 0x1ed   : > { %9315 = vmatpush1.bf16.msra.mxu0 %v11071_v15  ;;  %8947 = vmatprep.subr.bf16.mxu1 %v11076_v16  ;;  %v11167_v15 = vld [vmem:[%s13150_s10 + $0xc64] ss:$8 sps:$4 sm:$0xff]   ;;  %v11162_v16 = vld [vmem:[%s13150_s10 + $0x360] ss:$8 sps:$4 sm:$0xff]  }
 0x1ee   : > { %9316 = vmatprep.subr.bf16.mxu0 %v11079_v17  ;;  %v11165_v17 = vld [vmem:[%s13150_s10 + $0xc60] ss:$8 sps:$4 sm:$0xff]  }
 0x1f0   : > { %8948 = vmatpush1.bf16.msra.mxu1 %v11074_v18  ;;  %v11170_v18 = vld [vmem:[%s13150_s10 + $0x374] ss:$8 sps:$4 sm:$0xff]  }
 0x1f1   : > { %9317 = vmatpush1.bf16.msra.mxu0 %v11077_v19  ;;  %8949 = vmatprep.subr.bf16.mxu1 %v11082_v20  ;;  %v11173_v19 = vld [vmem:[%s13150_s10 + $0xc74] ss:$8 sps:$4 sm:$0xff]   ;;  %v11168_v20 = vld [vmem:[%s13150_s10 + $0x370] ss:$8 sps:$4 sm:$0xff]  }
 0x1f2   : > { %9318 = vmatprep.subr.bf16.mxu0 %v11085_v21  ;;  %v11171_v21 = vld [vmem:[%s13150_s10 + $0xc70] ss:$8 sps:$4 sm:$0xff]  }
 0x1f4   : > { %8950 = vmatpush1.bf16.msra.mxu1 %v11080_v22  ;;  %v11176_v22 = vld [vmem:[%s13150_s10 + $0x384] ss:$8 sps:$4 sm:$0xff]  }
 0x1f5   : > { %9319 = vmatpush1.bf16.msra.mxu0 %v11083_v23  ;;  %8951 = vmatprep.subr.bf16.mxu1 %v11088_v24  ;;  %v11179_v23 = vld [vmem:[%s13150_s10 + $0xc84] ss:$8 sps:$4 sm:$0xff]   ;;  %v11174_v24 = vld [vmem:[%s13150_s10 + $0x380] ss:$8 sps:$4 sm:$0xff]  }
 0x1f6   : > { %9320 = vmatprep.subr.bf16.mxu0 %v11091_v25  ;;  %v11177_v25 = vld [vmem:[%s13150_s10 + $0xc80] ss:$8 sps:$4 sm:$0xff]  }
 0x1f8   : > { %8952 = vmatpush1.bf16.msra.mxu1 %v11086_v26  ;;  %v11182_v26 = vld [vmem:[%s13150_s10 + $0x394] ss:$8 sps:$4 sm:$0xff]  }
 0x1f9   : > { %9321 = vmatpush1.bf16.msra.mxu0 %v11089_v27  ;;  %8953 = vmatprep.subr.bf16.mxu1 %v11094_v28  ;;  %v11185_v27 = vld [vmem:[%s13150_s10 + $0xc94] ss:$8 sps:$4 sm:$0xff]   ;;  %v11180_v28 = vld [vmem:[%s13150_s10 + $0x390] ss:$8 sps:$4 sm:$0xff]  }
 0x1fa   : > { %9322 = vmatprep.subr.bf16.mxu0 %v11097_v29  ;;  %v11183_v29 = vld [vmem:[%s13150_s10 + $0xc90] ss:$8 sps:$4 sm:$0xff]  }
 0x1fc   : > { %8954 = vmatpush1.bf16.msra.mxu1 %v11092_v30  ;;  %v11188_v30 = vld [vmem:[%s13150_s10 + $0x3a4] ss:$8 sps:$4 sm:$0xff]  }
 0x1fd   : > { %9323 = vmatpush1.bf16.msra.mxu0 %v11095_v31  ;;  %8955 = vmatprep.subr.bf16.mxu1 %v11100_v34  ;;  %v11191_v31 = vld [vmem:[%s13150_s10 + $0xca4] ss:$8 sps:$4 sm:$0xff]   ;;  %v11186_v34 = vld [vmem:[%s13150_s10 + $0x3a0] ss:$8 sps:$4 sm:$0xff]  }
 0x1fe   : > { %9324 = vmatprep.subr.bf16.mxu0 %v11103_v35  ;;  %v11189_v35 = vld [vmem:[%s13150_s10 + $0xca0] ss:$8 sps:$4 sm:$0xff]  }
 0x200   : > { %8956 = vmatpush1.bf16.msra.mxu1 %v11098_v36  ;;  %v11194_v36 = vld [vmem:[%s13150_s10 + $0x3b4] ss:$8 sps:$4 sm:$0xff]  }
 0x201   : > { %9325 = vmatpush1.bf16.msra.mxu0 %v11101_v37  ;;  %8957 = vmatprep.subr.bf16.mxu1 %v11106_v38  ;;  %v11197_v37 = vld [vmem:[%s13150_s10 + $0xcb4] ss:$8 sps:$4 sm:$0xff]   ;;  %v11192_v38 = vld [vmem:[%s13150_s10 + $0x3b0] ss:$8 sps:$4 sm:$0xff]  }
 0x202   : > { %9326 = vmatprep.subr.bf16.mxu0 %v11109_v39  ;;  %v11195_v39 = vld [vmem:[%s13150_s10 + $0xcb0] ss:$8 sps:$4 sm:$0xff]  }
 0x204   : > { %8958 = vmatpush1.bf16.msra.mxu1 %v11104_v40  ;;  %v11200_v40 = vld [vmem:[%s13150_s10 + $0x3c4] ss:$8 sps:$4 sm:$0xff]  }
 0x205   : > { %9327 = vmatpush1.bf16.msra.mxu0 %v11107_v41  ;;  %8959 = vmatprep.subr.bf16.mxu1 %v11112_v42  ;;  %v11203_v41 = vld [vmem:[%s13150_s10 + $0xcc4] ss:$8 sps:$4 sm:$0xff]   ;;  %v11198_v42 = vld [vmem:[%s13150_s10 + $0x3c0] ss:$8 sps:$4 sm:$0xff]  }
 0x206   : > { %9328 = vmatprep.subr.bf16.mxu0 %v11115_v43  ;;  %v11201_v43 = vld [vmem:[%s13150_s10 + $0xcc0] ss:$8 sps:$4 sm:$0xff]  }
 0x208   : > { %8960 = vmatpush1.bf16.msra.mxu1 %v11110_v44  ;;  %v11206_v44 = vld [vmem:[%s13150_s10 + $0x3d4] ss:$8 sps:$4 sm:$0xff]  }
 0x209   : > { %9329 = vmatpush1.bf16.msra.mxu0 %v11113_v45  ;;  %8961 = vmatprep.subr.bf16.mxu1 %v11118_v32  ;;  %v11209_v45 = vld [vmem:[%s13150_s10 + $0xcd4] ss:$8 sps:$4 sm:$0xff]   ;;  %v11204_v32 = vld [vmem:[%s13150_s10 + $0x3d0] ss:$8 sps:$4 sm:$0xff]  }
 0x20a   : > { %9330 = vmatprep.subr.bf16.mxu0 %v11121_v46  ;;  %v11207_v46 = vld [vmem:[%s13150_s10 + $0xcd0] ss:$8 sps:$4 sm:$0xff]  }
 0x20c   : > { %8962 = vmatpush1.bf16.msra.mxu1 %v11116_v33  ;;  %v11212_v33 = vld [vmem:[%s13150_s10 + $0x3e4] ss:$8 sps:$4 sm:$0xff]  }
 0x20d   : > { %9331 = vmatpush1.bf16.msra.mxu0 %v11119_v47  ;;  %8972 = vmatprep.subr.bf16.mxu1 %v11126_v48  ;;  %v11215_v47 = vld [vmem:[%s13150_s10 + $0xce4] ss:$8 sps:$4 sm:$0xff]   ;;  %v11210_v48 = vld [vmem:[%s13150_s10 + $0x3e0] ss:$8 sps:$4 sm:$0xff]  }
 0x20e   : > { %9341 = vmatprep.subr.bf16.mxu0 %v11131_v50  ;;  %v11213_v50 = vld [vmem:[%s13150_s10 + $0xce0] ss:$8 sps:$4 sm:$0xff]  }
 0x20f   : > { %8964 = vmatmul.mubr.bf16.vlgmr.msra.gmra.mrb[0].mxu1 %v10064_v53  ;;  %v11218_v53 = vld [vmem:[%s13150_s10 + $0x3f4] ss:$8 sps:$4 sm:$0xff]  }
 0x210   : > { %9333 = vmatmul.mubr.bf16.vlgmr.msra.gmra.mrb[0].mxu0 %v10082_v54  ;;  %8973 = vmatpush1.bf16.msra.mxu1 %v11124_v56  ;;  %v11221_v54 = vld [vmem:[%s13150_s10 + $0xcf4] ss:$8 sps:$4 sm:$0xff]   ;;  %v11216_v56 = vld [vmem:[%s13150_s10 + $0x3f0] ss:$8 sps:$4 sm:$0xff]  }
 0x211   : > { %9342 = vmatpush1.bf16.msra.mxu0 %v11129_v57  ;;  %8974 = vmatprep.subr.bf16.mxu1 %v11134_v58  ;;  %v11219_v57 = vld [vmem:[%s13150_s10 + $0xcf0] ss:$8 sps:$4 sm:$0xff]   ;;  %v11226_v58 = vld [vmem:[%s13150_s10 + $0x404] ss:$8 sps:$4 sm:$0xff]  }
 0x212   : > { %9343 = vmatprep.subr.bf16.mxu0 %v11137_v49  ;;  %9004 = vmatprep.mubr.bf16.mxu1 %v10067_v52  ;;  %v11231_v49 = vld [vmem:[%s13150_s10 + $0xd04] ss:$8 sps:$4 sm:$0xff]   ;;  %v11224_v52 = vld [vmem:[%s13150_s10 + $0x400] ss:$8 sps:$4 sm:$0xff]  }
 0x213   : > { %9373 = vmatprep.mubr.bf16.mxu0 %v10085_v59  ;;  %v11229_v59 = vld [vmem:[%s13150_s10 + $0xd00] ss:$8 sps:$4 sm:$0xff]  }
 0x214   : > { %8975 = vmatpush1.bf16.msra.mxu1 %v11132_v60  ;;  %v10066_v60 = vcombine.low %v13385_v51, %v13385_v51  ;;  %v11234_v51 = vld [vmem:[%s13150_s10 + $0x414] ss:$8 sps:$4 sm:$0xff]  }
 0x215   : > { %9344 = vmatpush1.bf16.msra.mxu0 %v11135_v61  ;;  %8976 = vmatprep.subr.bf16.mxu1 %v11140_v62  ;;  %v10084_v61 = vcombine.low %v13394_v55, %v13394_v55  ;;  %v13473_v62 = vld [vmem:[%s13946_s0 + $0x20] sm:$0xff] }
 0x216   : > { %9345 = vmatprep.subr.bf16.mxu0 %v11143_v63  ;;  %v13478_v63 = vld [vmem:[%s13946_s0 + $0x68] sm:$0xff]  ;;  %v10069_v55 = vcombine.high %v13473_v62, %v13473_v62 }
 0x218   : > { %8977 = vmatpush1.bf16.msra.mxu1 %v11138_v0  ;;  %v11237_v0 = vld [vmem:[%s13150_s10 + $0xd14] ss:$8 sps:$4 sm:$0xff]  }
 0x219   : > { %9346 = vmatpush1.bf16.msra.mxu0 %v11141_v1  ;;  %8978 = vmatprep.subr.bf16.mxu1 %v11146_v2  ;;  %v10087_v1 = vcombine.high %v13478_v63, %v13478_v63  ;;  %v11232_v2 = vld [vmem:[%s13150_s10 + $0x410] ss:$8 sps:$4 sm:$0xff]  }
 0x21a   : > { %9347 = vmatprep.subr.bf16.mxu0 %v11149_v3  ;;  %v11235_v3 = vld [vmem:[%s13150_s10 + $0xd10] ss:$8 sps:$4 sm:$0xff]  }
 0x21c   : > { %8979 = vmatpush1.bf16.msra.mxu1 %v11144_v4  ;;  %v11240_v4 = vld [vmem:[%s13150_s10 + $0x424] ss:$8 sps:$4 sm:$0xff]  }
 0x21d   : > { %9348 = vmatpush1.bf16.msra.mxu0 %v11147_v5  ;;  %8980 = vmatprep.subr.bf16.mxu1 %v11152_v6  ;;  %v11243_v5 = vld [vmem:[%s13150_s10 + $0xd24] ss:$8 sps:$4 sm:$0xff]   ;;  %v11238_v6 = vld [vmem:[%s13150_s10 + $0x420] ss:$8 sps:$4 sm:$0xff]  }
 0x21e   : > { %9349 = vmatprep.subr.bf16.mxu0 %v11155_v7  ;;  %v11241_v7 = vld [vmem:[%s13150_s10 + $0xd20] ss:$8 sps:$4 sm:$0xff]  }
 0x220   : > { %8981 = vmatpush1.bf16.msra.mxu1 %v11150_v8  ;;  %v11246_v8 = vld [vmem:[%s13150_s10 + $0x434] ss:$8 sps:$4 sm:$0xff]  }
 0x221   : > { %9350 = vmatpush1.bf16.msra.mxu0 %v11153_v9  ;;  %8982 = vmatprep.subr.bf16.mxu1 %v11158_v10  ;;  %v11249_v9 = vld [vmem:[%s13150_s10 + $0xd34] ss:$8 sps:$4 sm:$0xff]   ;;  %v11244_v10 = vld [vmem:[%s13150_s10 + $0x430] ss:$8 sps:$4 sm:$0xff]  }
 0x222   : > { %9351 = vmatprep.subr.bf16.mxu0 %v11161_v11  ;;  %v11247_v11 = vld [vmem:[%s13150_s10 + $0xd30] ss:$8 sps:$4 sm:$0xff]  }
 0x224   : > { %8983 = vmatpush1.bf16.msra.mxu1 %v11156_v12  ;;  %v11252_v12 = vld [vmem:[%s13150_s10 + $0x444] ss:$8 sps:$4 sm:$0xff]  }
 0x225   : > { %9352 = vmatpush1.bf16.msra.mxu0 %v11159_v13  ;;  %8984 = vmatprep.subr.bf16.mxu1 %v11164_v14  ;;  %v11255_v13 = vld [vmem:[%s13150_s10 + $0xd44] ss:$8 sps:$4 sm:$0xff]   ;;  %v11250_v14 = vld [vmem:[%s13150_s10 + $0x440] ss:$8 sps:$4 sm:$0xff]  }
 0x226   : > { %9353 = vmatprep.subr.bf16.mxu0 %v11167_v15  ;;  %v11253_v15 = vld [vmem:[%s13150_s10 + $0xd40] ss:$8 sps:$4 sm:$0xff]  }
 0x228   : > { %8985 = vmatpush1.bf16.msra.mxu1 %v11162_v16  ;;  %v11258_v16 = vld [vmem:[%s13150_s10 + $0x454] ss:$8 sps:$4 sm:$0xff]  }
 0x229   : > { %9354 = vmatpush1.bf16.msra.mxu0 %v11165_v17  ;;  %8986 = vmatprep.subr.bf16.mxu1 %v11170_v18  ;;  %v11261_v17 = vld [vmem:[%s13150_s10 + $0xd54] ss:$8 sps:$4 sm:$0xff]   ;;  %v11256_v18 = vld [vmem:[%s13150_s10 + $0x450] ss:$8 sps:$4 sm:$0xff]  }
 0x22a   : > { %9355 = vmatprep.subr.bf16.mxu0 %v11173_v19  ;;  %v11259_v19 = vld [vmem:[%s13150_s10 + $0xd50] ss:$8 sps:$4 sm:$0xff]  }
 0x22c   : > { %8987 = vmatpush1.bf16.msra.mxu1 %v11168_v20  ;;  %v11264_v20 = vld [vmem:[%s13150_s10 + $0x464] ss:$8 sps:$4 sm:$0xff]  }
 0x22d   : > { %9356 = vmatpush1.bf16.msra.mxu0 %v11171_v21  ;;  %8988 = vmatprep.subr.bf16.mxu1 %v11176_v22  ;;  %v11267_v21 = vld [vmem:[%s13150_s10 + $0xd64] ss:$8 sps:$4 sm:$0xff]   ;;  %v11262_v22 = vld [vmem:[%s13150_s10 + $0x460] ss:$8 sps:$4 sm:$0xff]  }
 0x22e   : > { %9357 = vmatprep.subr.bf16.mxu0 %v11179_v23  ;;  %v11265_v23 = vld [vmem:[%s13150_s10 + $0xd60] ss:$8 sps:$4 sm:$0xff]  }
 0x230   : > { %8989 = vmatpush1.bf16.msra.mxu1 %v11174_v24  ;;  %v11270_v24 = vld [vmem:[%s13150_s10 + $0x474] ss:$8 sps:$4 sm:$0xff]  }
 0x231   : > { %9358 = vmatpush1.bf16.msra.mxu0 %v11177_v25  ;;  %8990 = vmatprep.subr.bf16.mxu1 %v11182_v26  ;;  %v11273_v25 = vld [vmem:[%s13150_s10 + $0xd74] ss:$8 sps:$4 sm:$0xff]   ;;  %v11268_v26 = vld [vmem:[%s13150_s10 + $0x470] ss:$8 sps:$4 sm:$0xff]  }
 0x232   : > { %9359 = vmatprep.subr.bf16.mxu0 %v11185_v27  ;;  %v11271_v27 = vld [vmem:[%s13150_s10 + $0xd70] ss:$8 sps:$4 sm:$0xff]  }
 0x234   : > { %8991 = vmatpush1.bf16.msra.mxu1 %v11180_v28  ;;  %v11276_v28 = vld [vmem:[%s13150_s10 + $0x484] ss:$8 sps:$4 sm:$0xff]  }
 0x235   : > { %9360 = vmatpush1.bf16.msra.mxu0 %v11183_v29  ;;  %8992 = vmatprep.subr.bf16.mxu1 %v11188_v30  ;;  %v11279_v29 = vld [vmem:[%s13150_s10 + $0xd84] ss:$8 sps:$4 sm:$0xff]   ;;  %v11274_v30 = vld [vmem:[%s13150_s10 + $0x480] ss:$8 sps:$4 sm:$0xff]  }
 0x236   : > { %9361 = vmatprep.subr.bf16.mxu0 %v11191_v31  ;;  %v11277_v31 = vld [vmem:[%s13150_s10 + $0xd80] ss:$8 sps:$4 sm:$0xff]  }
 0x238   : > { %8993 = vmatpush1.bf16.msra.mxu1 %v11186_v34  ;;  %v11282_v34 = vld [vmem:[%s13150_s10 + $0x494] ss:$8 sps:$4 sm:$0xff]  }
 0x239   : > { %9362 = vmatpush1.bf16.msra.mxu0 %v11189_v35  ;;  %8994 = vmatprep.subr.bf16.mxu1 %v11194_v36  ;;  %v11285_v35 = vld [vmem:[%s13150_s10 + $0xd94] ss:$8 sps:$4 sm:$0xff]   ;;  %v11280_v36 = vld [vmem:[%s13150_s10 + $0x490] ss:$8 sps:$4 sm:$0xff]  }
 0x23a   : > { %9363 = vmatprep.subr.bf16.mxu0 %v11197_v37  ;;  %v11283_v37 = vld [vmem:[%s13150_s10 + $0xd90] ss:$8 sps:$4 sm:$0xff]  }
 0x23c   : > { %8995 = vmatpush1.bf16.msra.mxu1 %v11192_v38  ;;  %v11288_v38 = vld [vmem:[%s13150_s10 + $0x4a4] ss:$8 sps:$4 sm:$0xff]  }
 0x23d   : > { %9364 = vmatpush1.bf16.msra.mxu0 %v11195_v39  ;;  %8996 = vmatprep.subr.bf16.mxu1 %v11200_v40  ;;  %v11291_v39 = vld [vmem:[%s13150_s10 + $0xda4] ss:$8 sps:$4 sm:$0xff]   ;;  %v11286_v40 = vld [vmem:[%s13150_s10 + $0x4a0] ss:$8 sps:$4 sm:$0xff]  }
 0x23e   : > { %9365 = vmatprep.subr.bf16.mxu0 %v11203_v41  ;;  %v11289_v41 = vld [vmem:[%s13150_s10 + $0xda0] ss:$8 sps:$4 sm:$0xff]  }
 0x240   : > { %8997 = vmatpush1.bf16.msra.mxu1 %v11198_v42  ;;  %v11294_v42 = vld [vmem:[%s13150_s10 + $0x4b4] ss:$8 sps:$4 sm:$0xff]  }
 0x241   : > { %9366 = vmatpush1.bf16.msra.mxu0 %v11201_v43  ;;  %8998 = vmatprep.subr.bf16.mxu1 %v11206_v44  ;;  %v11297_v43 = vld [vmem:[%s13150_s10 + $0xdb4] ss:$8 sps:$4 sm:$0xff]   ;;  %v11292_v44 = vld [vmem:[%s13150_s10 + $0x4b0] ss:$8 sps:$4 sm:$0xff]  }
 0x242   : > { %9367 = vmatprep.subr.bf16.mxu0 %v11209_v45  ;;  %v11295_v45 = vld [vmem:[%s13150_s10 + $0xdb0] ss:$8 sps:$4 sm:$0xff]  }
 0x244   : > { %8999 = vmatpush1.bf16.msra.mxu1 %v11204_v32  ;;  %v11300_v32 = vld [vmem:[%s13150_s10 + $0x4c4] ss:$8 sps:$4 sm:$0xff]  }
 0x245   : > { %9368 = vmatpush1.bf16.msra.mxu0 %v11207_v46  ;;  %9000 = vmatprep.subr.bf16.mxu1 %v11212_v33  ;;  %v11303_v46 = vld [vmem:[%s13150_s10 + $0xdc4] ss:$8 sps:$4 sm:$0xff]   ;;  %v11298_v33 = vld [vmem:[%s13150_s10 + $0x4c0] ss:$8 sps:$4 sm:$0xff]  }
 0x246   : > { %9369 = vmatprep.subr.bf16.mxu0 %v11215_v47  ;;  %v11301_v47 = vld [vmem:[%s13150_s10 + $0xdc0] ss:$8 sps:$4 sm:$0xff]  }
 0x248   : > { %9001 = vmatpush1.bf16.msra.mxu1 %v11210_v48  ;;  %v11306_v48 = vld [vmem:[%s13150_s10 + $0x4d4] ss:$8 sps:$4 sm:$0xff]  }
 0x249   : > { %9370 = vmatpush1.bf16.msra.mxu0 %v11213_v50  ;;  %9002 = vmatprep.subr.bf16.mxu1 %v11218_v53  ;;  %v11309_v50 = vld [vmem:[%s13150_s10 + $0xdd4] ss:$8 sps:$4 sm:$0xff]   ;;  %v11304_v53 = vld [vmem:[%s13150_s10 + $0x4d0] ss:$8 sps:$4 sm:$0xff]  }
 0x24a   : > { %9371 = vmatprep.subr.bf16.mxu0 %v11221_v54  ;;  %v11307_v54 = vld [vmem:[%s13150_s10 + $0xdd0] ss:$8 sps:$4 sm:$0xff]  }
 0x24c   : > { %9003 = vmatpush1.bf16.msra.mxu1 %v11216_v56  ;;  %v11312_v56 = vld [vmem:[%s13150_s10 + $0x4e4] ss:$8 sps:$4 sm:$0xff]  }
 0x24d   : > { %9372 = vmatpush1.bf16.msra.mxu0 %v11219_v57  ;;  %9013 = vmatprep.subr.bf16.mxu1 %v11226_v58  ;;  %v11315_v57 = vld [vmem:[%s13150_s10 + $0xde4] ss:$8 sps:$4 sm:$0xff]   ;;  %v11310_v58 = vld [vmem:[%s13150_s10 + $0x4e0] ss:$8 sps:$4 sm:$0xff]  }
 0x24e   : > { %9382 = vmatprep.subr.bf16.mxu0 %v11231_v49  ;;  %v11313_v49 = vld [vmem:[%s13150_s10 + $0xde0] ss:$8 sps:$4 sm:$0xff]  }
 0x24f   : > { %9005 = vmatmul.mubr.bf16.vlgmr.msra.gmra.mrb[0].mxu1 %v10066_v60  ;;  %v11316_v60 = vld [vmem:[%s13150_s10 + $0x4f0] ss:$8 sps:$4 sm:$0xff]  }
 0x250   : > { %9374 = vmatmul.mubr.bf16.vlgmr.msra.gmra.mrb[0].mxu0 %v10084_v61  ;;  %9014 = vmatpush1.bf16.msra.mxu1 %v11224_v52  ;;  %v11318_v52 = vld [vmem:[%s13150_s10 + $0x4f4] ss:$8 sps:$4 sm:$0xff]   ;;  %v11319_v61 = vld [vmem:[%s13150_s10 + $0xdf0] ss:$8 sps:$4 sm:$0xff]  }
 0x251   : > { %9383 = vmatpush1.bf16.msra.mxu0 %v11229_v59  ;;  %9015 = vmatprep.subr.bf16.mxu1 %v11234_v51  ;;  %v11321_v59 = vld [vmem:[%s13150_s10 + $0xdf4] ss:$8 sps:$4 sm:$0xff]   ;;  %v11326_v51 = vld [vmem:[%s13150_s10 + $0x504] ss:$8 sps:$4 sm:$0xff]  }
 0x252   : > { %9384 = vmatprep.subr.bf16.mxu0 %v11237_v0  ;;  %9045 = vmatprep.mubr.bf16.mxu1 %v10069_v55  ;;  %v11331_v0 = vld [vmem:[%s13150_s10 + $0xe04] ss:$8 sps:$4 sm:$0xff]  }
 0x253   : > { %9414 = vmatprep.mubr.bf16.mxu0 %v10087_v1  ;;  %v13549_v55 = vld [vmem:[%s13946_s0 + $0x28] sm:$0xff]  ;;  %v13554_v1 = vld [vmem:[%s13946_s0 + $0x70] sm:$0xff] }
 0x254   : > { %9016 = vmatpush1.bf16.msra.mxu1 %v11232_v2  ;;  %v10068_v2 = vcombine.low %v13473_v62, %v13473_v62  ;;  %v10089_v62 = vcombine.high %v13554_v1, %v13554_v1 }
 0x255   : > { %9385 = vmatpush1.bf16.msra.mxu0 %v11235_v3  ;;  %9017 = vmatprep.subr.bf16.mxu1 %v11240_v4  ;;  %v10086_v3 = vcombine.low %v13478_v63, %v13478_v63  ;;  %v11324_v4 = vld [vmem:[%s13150_s10 + $0x500] ss:$8 sps:$4 sm:$0xff]   ;;  %v11332_v63 = vld [vmem:[%s13150_s10 + $0x510] ss:$8 sps:$4 sm:$0xff]  }
 0x256   : > { %9386 = vmatprep.subr.bf16.mxu0 %v11243_v5  ;;  %v11329_v5 = vld [vmem:[%s13150_s10 + $0xe00] ss:$8 sps:$4 sm:$0xff]  }
 0x258   : > { %9018 = vmatpush1.bf16.msra.mxu1 %v11238_v6  ;;  %v11334_v6 = vld [vmem:[%s13150_s10 + $0x514] ss:$8 sps:$4 sm:$0xff]  }
 0x259   : > { %9387 = vmatpush1.bf16.msra.mxu0 %v11241_v7  ;;  %9019 = vmatprep.subr.bf16.mxu1 %v11246_v8  ;;  %v11337_v7 = vld [vmem:[%s13150_s10 + $0xe14] ss:$8 sps:$4 sm:$0xff]   ;;  %v10071_v8 = vcombine.high %v13549_v55, %v13549_v55 }
 0x25a   : > { %9388 = vmatprep.subr.bf16.mxu0 %v11249_v9  ;;  %v11335_v9 = vld [vmem:[%s13150_s10 + $0xe10] ss:$8 sps:$4 sm:$0xff]  }
 0x25c   : > { %9020 = vmatpush1.bf16.msra.mxu1 %v11244_v10  ;;  %v11340_v10 = vld [vmem:[%s13150_s10 + $0x524] ss:$8 sps:$4 sm:$0xff]  }
 0x25d   : > { %9389 = vmatpush1.bf16.msra.mxu0 %v11247_v11  ;;  %9021 = vmatprep.subr.bf16.mxu1 %v11252_v12  ;;  %v11343_v11 = vld [vmem:[%s13150_s10 + $0xe24] ss:$8 sps:$4 sm:$0xff]   ;;  %v11338_v12 = vld [vmem:[%s13150_s10 + $0x520] ss:$8 sps:$4 sm:$0xff]  }
 0x25e   : > { %9390 = vmatprep.subr.bf16.mxu0 %v11255_v13  ;;  %v11341_v13 = vld [vmem:[%s13150_s10 + $0xe20] ss:$8 sps:$4 sm:$0xff]  }
 0x260   : > { %9022 = vmatpush1.bf16.msra.mxu1 %v11250_v14  ;;  %v11346_v14 = vld [vmem:[%s13150_s10 + $0x534] ss:$8 sps:$4 sm:$0xff]  }
 0x261   : > { %9391 = vmatpush1.bf16.msra.mxu0 %v11253_v15  ;;  %9023 = vmatprep.subr.bf16.mxu1 %v11258_v16  ;;  %v11349_v15 = vld [vmem:[%s13150_s10 + $0xe34] ss:$8 sps:$4 sm:$0xff]   ;;  %v11344_v16 = vld [vmem:[%s13150_s10 + $0x530] ss:$8 sps:$4 sm:$0xff]  }
 0x262   : > { %9392 = vmatprep.subr.bf16.mxu0 %v11261_v17  ;;  %v11347_v17 = vld [vmem:[%s13150_s10 + $0xe30] ss:$8 sps:$4 sm:$0xff]  }
 0x264   : > { %9024 = vmatpush1.bf16.msra.mxu1 %v11256_v18  ;;  %v11352_v18 = vld [vmem:[%s13150_s10 + $0x544] ss:$8 sps:$4 sm:$0xff]  }
 0x265   : > { %9393 = vmatpush1.bf16.msra.mxu0 %v11259_v19  ;;  %9025 = vmatprep.subr.bf16.mxu1 %v11264_v20  ;;  %v11355_v19 = vld [vmem:[%s13150_s10 + $0xe44] ss:$8 sps:$4 sm:$0xff]   ;;  %v11350_v20 = vld [vmem:[%s13150_s10 + $0x540] ss:$8 sps:$4 sm:$0xff]  }
 0x266   : > { %9394 = vmatprep.subr.bf16.mxu0 %v11267_v21  ;;  %v11353_v21 = vld [vmem:[%s13150_s10 + $0xe40] ss:$8 sps:$4 sm:$0xff]  }
 0x268   : > { %9026 = vmatpush1.bf16.msra.mxu1 %v11262_v22  ;;  %v11358_v22 = vld [vmem:[%s13150_s10 + $0x554] ss:$8 sps:$4 sm:$0xff]  }
 0x269   : > { %9395 = vmatpush1.bf16.msra.mxu0 %v11265_v23  ;;  %9027 = vmatprep.subr.bf16.mxu1 %v11270_v24  ;;  %v11361_v23 = vld [vmem:[%s13150_s10 + $0xe54] ss:$8 sps:$4 sm:$0xff]   ;;  %v11356_v24 = vld [vmem:[%s13150_s10 + $0x550] ss:$8 sps:$4 sm:$0xff]  }
 0x26a   : > { %9396 = vmatprep.subr.bf16.mxu0 %v11273_v25  ;;  %v11359_v25 = vld [vmem:[%s13150_s10 + $0xe50] ss:$8 sps:$4 sm:$0xff]  }
 0x26c   : > { %9028 = vmatpush1.bf16.msra.mxu1 %v11268_v26  ;;  %v11364_v26 = vld [vmem:[%s13150_s10 + $0x564] ss:$8 sps:$4 sm:$0xff]  }
 0x26d   : > { %9397 = vmatpush1.bf16.msra.mxu0 %v11271_v27  ;;  %9029 = vmatprep.subr.bf16.mxu1 %v11276_v28  ;;  %v11367_v27 = vld [vmem:[%s13150_s10 + $0xe64] ss:$8 sps:$4 sm:$0xff]   ;;  %v11362_v28 = vld [vmem:[%s13150_s10 + $0x560] ss:$8 sps:$4 sm:$0xff]  }
 0x26e   : > { %9398 = vmatprep.subr.bf16.mxu0 %v11279_v29  ;;  %v11365_v29 = vld [vmem:[%s13150_s10 + $0xe60] ss:$8 sps:$4 sm:$0xff]  }
 0x270   : > { %9030 = vmatpush1.bf16.msra.mxu1 %v11274_v30  ;;  %v11370_v30 = vld [vmem:[%s13150_s10 + $0x574] ss:$8 sps:$4 sm:$0xff]  }
 0x271   : > { %9399 = vmatpush1.bf16.msra.mxu0 %v11277_v31  ;;  %9031 = vmatprep.subr.bf16.mxu1 %v11282_v34  ;;  %v11373_v31 = vld [vmem:[%s13150_s10 + $0xe74] ss:$8 sps:$4 sm:$0xff]   ;;  %v11368_v34 = vld [vmem:[%s13150_s10 + $0x570] ss:$8 sps:$4 sm:$0xff]  }
 0x272   : > { %9400 = vmatprep.subr.bf16.mxu0 %v11285_v35  ;;  %v11371_v35 = vld [vmem:[%s13150_s10 + $0xe70] ss:$8 sps:$4 sm:$0xff]  }
 0x274   : > { %9032 = vmatpush1.bf16.msra.mxu1 %v11280_v36  ;;  %v11376_v36 = vld [vmem:[%s13150_s10 + $0x584] ss:$8 sps:$4 sm:$0xff]  }
 0x275   : > { %9401 = vmatpush1.bf16.msra.mxu0 %v11283_v37  ;;  %9033 = vmatprep.subr.bf16.mxu1 %v11288_v38  ;;  %v11379_v37 = vld [vmem:[%s13150_s10 + $0xe84] ss:$8 sps:$4 sm:$0xff]   ;;  %v11374_v38 = vld [vmem:[%s13150_s10 + $0x580] ss:$8 sps:$4 sm:$0xff]  }
 0x276   : > { %9402 = vmatprep.subr.bf16.mxu0 %v11291_v39  ;;  %v11377_v39 = vld [vmem:[%s13150_s10 + $0xe80] ss:$8 sps:$4 sm:$0xff]  }
 0x278   : > { %9034 = vmatpush1.bf16.msra.mxu1 %v11286_v40  ;;  %v11382_v40 = vld [vmem:[%s13150_s10 + $0x594] ss:$8 sps:$4 sm:$0xff]  }
 0x279   : > { %9403 = vmatpush1.bf16.msra.mxu0 %v11289_v41  ;;  %9035 = vmatprep.subr.bf16.mxu1 %v11294_v42  ;;  %v11385_v41 = vld [vmem:[%s13150_s10 + $0xe94] ss:$8 sps:$4 sm:$0xff]   ;;  %v11380_v42 = vld [vmem:[%s13150_s10 + $0x590] ss:$8 sps:$4 sm:$0xff]  }
 0x27a   : > { %9404 = vmatprep.subr.bf16.mxu0 %v11297_v43  ;;  %v11383_v43 = vld [vmem:[%s13150_s10 + $0xe90] ss:$8 sps:$4 sm:$0xff]  }
 0x27c   : > { %9036 = vmatpush1.bf16.msra.mxu1 %v11292_v44  ;;  %v11388_v44 = vld [vmem:[%s13150_s10 + $0x5a4] ss:$8 sps:$4 sm:$0xff]  }
 0x27d   : > { %9405 = vmatpush1.bf16.msra.mxu0 %v11295_v45  ;;  %9037 = vmatprep.subr.bf16.mxu1 %v11300_v32  ;;  %v11391_v45 = vld [vmem:[%s13150_s10 + $0xea4] ss:$8 sps:$4 sm:$0xff]   ;;  %v11386_v32 = vld [vmem:[%s13150_s10 + $0x5a0] ss:$8 sps:$4 sm:$0xff]  }
 0x27e   : > { %9406 = vmatprep.subr.bf16.mxu0 %v11303_v46  ;;  %v11389_v46 = vld [vmem:[%s13150_s10 + $0xea0] ss:$8 sps:$4 sm:$0xff]  }
 0x280   : > { %9038 = vmatpush1.bf16.msra.mxu1 %v11298_v33  ;;  %v11394_v33 = vld [vmem:[%s13150_s10 + $0x5b4] ss:$8 sps:$4 sm:$0xff]  }
 0x281   : > { %9407 = vmatpush1.bf16.msra.mxu0 %v11301_v47  ;;  %9039 = vmatprep.subr.bf16.mxu1 %v11306_v48  ;;  %v11397_v47 = vld [vmem:[%s13150_s10 + $0xeb4] ss:$8 sps:$4 sm:$0xff]   ;;  %v11392_v48 = vld [vmem:[%s13150_s10 + $0x5b0] ss:$8 sps:$4 sm:$0xff]  }
 0x282   : > { %9408 = vmatprep.subr.bf16.mxu0 %v11309_v50  ;;  %v11395_v50 = vld [vmem:[%s13150_s10 + $0xeb0] ss:$8 sps:$4 sm:$0xff]  }
 0x284   : > { %9040 = vmatpush1.bf16.msra.mxu1 %v11304_v53  ;;  %v11400_v53 = vld [vmem:[%s13150_s10 + $0x5c4] ss:$8 sps:$4 sm:$0xff]  }
 0x285   : > { %9409 = vmatpush1.bf16.msra.mxu0 %v11307_v54  ;;  %9041 = vmatprep.subr.bf16.mxu1 %v11312_v56  ;;  %v11403_v54 = vld [vmem:[%s13150_s10 + $0xec4] ss:$8 sps:$4 sm:$0xff]   ;;  %v11398_v56 = vld [vmem:[%s13150_s10 + $0x5c0] ss:$8 sps:$4 sm:$0xff]  }
 0x286   : > { %9410 = vmatprep.subr.bf16.mxu0 %v11315_v57  ;;  %v11401_v57 = vld [vmem:[%s13150_s10 + $0xec0] ss:$8 sps:$4 sm:$0xff]  }
 0x288   : > { %9042 = vmatpush1.bf16.msra.mxu1 %v11310_v58  ;;  %v11406_v58 = vld [vmem:[%s13150_s10 + $0x5d4] ss:$8 sps:$4 sm:$0xff]  }
 0x289   : > { %9411 = vmatpush1.bf16.msra.mxu0 %v11313_v49  ;;  %9043 = vmatprep.subr.bf16.mxu1 %v11318_v52  ;;  %v11409_v49 = vld [vmem:[%s13150_s10 + $0xed4] ss:$8 sps:$4 sm:$0xff]   ;;  %v11404_v52 = vld [vmem:[%s13150_s10 + $0x5d0] ss:$8 sps:$4 sm:$0xff]  }
 0x28a   : > { %9412 = vmatprep.subr.bf16.mxu0 %v11321_v59  ;;  %v11407_v59 = vld [vmem:[%s13150_s10 + $0xed0] ss:$8 sps:$4 sm:$0xff]  }
 0x28c   : > { %9044 = vmatpush1.bf16.msra.mxu1 %v11316_v60  ;;  %v11412_v60 = vld [vmem:[%s13150_s10 + $0x5e4] ss:$8 sps:$4 sm:$0xff]  }
 0x28d   : > { %9413 = vmatpush1.bf16.msra.mxu0 %v11319_v61  ;;  %9054 = vmatprep.subr.bf16.mxu1 %v11326_v51  ;;  %v11415_v61 = vld [vmem:[%s13150_s10 + $0xee4] ss:$8 sps:$4 sm:$0xff]   ;;  %v11410_v51 = vld [vmem:[%s13150_s10 + $0x5e0] ss:$8 sps:$4 sm:$0xff]  }
 0x28e   : > { %9423 = vmatprep.subr.bf16.mxu0 %v11331_v0  ;;  %v11413_v0 = vld [vmem:[%s13150_s10 + $0xee0] ss:$8 sps:$4 sm:$0xff]  }
 0x28f   : > { %9046 = vmatmul.mubr.bf16.vlgmr.msra.gmra.mrb[0].mxu1 %v10068_v2  ;;  %v11418_v2 = vld [vmem:[%s13150_s10 + $0x5f4] ss:$8 sps:$4 sm:$0xff]  }
 0x290   : > { %9415 = vmatmul.mubr.bf16.vlgmr.msra.gmra.mrb[0].mxu0 %v10086_v3  ;;  %9055 = vmatpush1.bf16.msra.mxu1 %v11324_v4  ;;  %v11421_v3 = vld [vmem:[%s13150_s10 + $0xef4] ss:$8 sps:$4 sm:$0xff]   ;;  %v11416_v4 = vld [vmem:[%s13150_s10 + $0x5f0] ss:$8 sps:$4 sm:$0xff]  }
 0x291   : > { %9424 = vmatpush1.bf16.msra.mxu0 %v11329_v5  ;;  %9056 = vmatprep.subr.bf16.mxu1 %v11334_v6  ;;  %v11419_v5 = vld [vmem:[%s13150_s10 + $0xef0] ss:$8 sps:$4 sm:$0xff]   ;;  %v11426_v6 = vld [vmem:[%s13150_s10 + $0x604] ss:$8 sps:$4 sm:$0xff]  }
 0x292   : > { %9425 = vmatprep.subr.bf16.mxu0 %v11337_v7  ;;  %9086 = vmatprep.mubr.bf16.mxu1 %v10071_v8  ;;  %v11431_v7 = vld [vmem:[%s13150_s10 + $0xf04] ss:$8 sps:$4 sm:$0xff]   ;;  %v10070_v8 = vcombine.low %v13549_v55, %v13549_v55  ;;  %v11429_v55 = vld [vmem:[%s13150_s10 + $0xf00] ss:$8 sps:$4 sm:$0xff]  }
 0x293   : > { %9455 = vmatprep.mubr.bf16.mxu0 %v10089_v62  ;;  %v10088_v62 = vcombine.low %v13554_v1, %v13554_v1  ;;  %v11434_v1 = vld [vmem:[%s13150_s10 + $0x614] ss:$8 sps:$4 sm:$0xff]  }
 0x294   : > { %9057 = vmatpush1.bf16.msra.mxu1 %v11332_v63  ;;  %v13635_v63 = vld [vmem:[%s13946_s0 + $0x30] sm:$0xff] }
 0x295   : > { %9426 = vmatpush1.bf16.msra.mxu0 %v11335_v9  ;;  %9058 = vmatprep.subr.bf16.mxu1 %v11340_v10  ;;  %v13640_v9 = vld [vmem:[%s13946_s0 + $0x78] sm:$0xff]  ;;  %v11424_v10 = vld [vmem:[%s13150_s10 + $0x600] ss:$8 sps:$4 sm:$0xff]  }
 0x296   : > { %9427 = vmatprep.subr.bf16.mxu0 %v11343_v11  ;;  %v11437_v11 = vld [vmem:[%s13150_s10 + $0xf14] ss:$8 sps:$4 sm:$0xff]  }
 0x298   : > { %9059 = vmatpush1.bf16.msra.mxu1 %v11338_v12  ;;  %v10073_v12 = vcombine.high %v13635_v63, %v13635_v63 }
 0x299   : > { %9428 = vmatpush1.bf16.msra.mxu0 %v11341_v13  ;;  %9060 = vmatprep.subr.bf16.mxu1 %v11346_v14  ;;  %v10091_v13 = vcombine.high %v13640_v9, %v13640_v9  ;;  %v11432_v14 = vld [vmem:[%s13150_s10 + $0x610] ss:$8 sps:$4 sm:$0xff]  }
 0x29a   : > { %9429 = vmatprep.subr.bf16.mxu0 %v11349_v15  ;;  %v11435_v15 = vld [vmem:[%s13150_s10 + $0xf10] ss:$8 sps:$4 sm:$0xff]  }
 0x29c   : > { %9061 = vmatpush1.bf16.msra.mxu1 %v11344_v16  ;;  %v11440_v16 = vld [vmem:[%s13150_s10 + $0x624] ss:$8 sps:$4 sm:$0xff]  }
 0x29d   : > { %9430 = vmatpush1.bf16.msra.mxu0 %v11347_v17  ;;  %9062 = vmatprep.subr.bf16.mxu1 %v11352_v18  ;;  %v11443_v17 = vld [vmem:[%s13150_s10 + $0xf24] ss:$8 sps:$4 sm:$0xff]   ;;  %v11438_v18 = vld [vmem:[%s13150_s10 + $0x620] ss:$8 sps:$4 sm:$0xff]  }
 0x29e   : > { %9431 = vmatprep.subr.bf16.mxu0 %v11355_v19  ;;  %v11441_v19 = vld [vmem:[%s13150_s10 + $0xf20] ss:$8 sps:$4 sm:$0xff]  }
 0x2a0   : > { %9063 = vmatpush1.bf16.msra.mxu1 %v11350_v20  ;;  %v11446_v20 = vld [vmem:[%s13150_s10 + $0x634] ss:$8 sps:$4 sm:$0xff]  }
 0x2a1   : > { %9432 = vmatpush1.bf16.msra.mxu0 %v11353_v21  ;;  %9064 = vmatprep.subr.bf16.mxu1 %v11358_v22  ;;  %v11449_v21 = vld [vmem:[%s13150_s10 + $0xf34] ss:$8 sps:$4 sm:$0xff]   ;;  %v11444_v22 = vld [vmem:[%s13150_s10 + $0x630] ss:$8 sps:$4 sm:$0xff]  }
 0x2a2   : > { %9433 = vmatprep.subr.bf16.mxu0 %v11361_v23  ;;  %v11447_v23 = vld [vmem:[%s13150_s10 + $0xf30] ss:$8 sps:$4 sm:$0xff]  }
 0x2a4   : > { %9065 = vmatpush1.bf16.msra.mxu1 %v11356_v24  ;;  %v11452_v24 = vld [vmem:[%s13150_s10 + $0x644] ss:$8 sps:$4 sm:$0xff]  }
 0x2a5   : > { %9434 = vmatpush1.bf16.msra.mxu0 %v11359_v25  ;;  %9066 = vmatprep.subr.bf16.mxu1 %v11364_v26  ;;  %v11455_v25 = vld [vmem:[%s13150_s10 + $0xf44] ss:$8 sps:$4 sm:$0xff]   ;;  %v11450_v26 = vld [vmem:[%s13150_s10 + $0x640] ss:$8 sps:$4 sm:$0xff]  }
 0x2a6   : > { %9435 = vmatprep.subr.bf16.mxu0 %v11367_v27  ;;  %v11453_v27 = vld [vmem:[%s13150_s10 + $0xf40] ss:$8 sps:$4 sm:$0xff]  }
 0x2a8   : > { %9067 = vmatpush1.bf16.msra.mxu1 %v11362_v28  ;;  %v11458_v28 = vld [vmem:[%s13150_s10 + $0x654] ss:$8 sps:$4 sm:$0xff]  }
 0x2a9   : > { %9436 = vmatpush1.bf16.msra.mxu0 %v11365_v29  ;;  %9068 = vmatprep.subr.bf16.mxu1 %v11370_v30  ;;  %v11461_v29 = vld [vmem:[%s13150_s10 + $0xf54] ss:$8 sps:$4 sm:$0xff]   ;;  %v11456_v30 = vld [vmem:[%s13150_s10 + $0x650] ss:$8 sps:$4 sm:$0xff]  }
 0x2aa   : > { %9437 = vmatprep.subr.bf16.mxu0 %v11373_v31  ;;  %v11459_v31 = vld [vmem:[%s13150_s10 + $0xf50] ss:$8 sps:$4 sm:$0xff]  }
 0x2ac   : > { %9069 = vmatpush1.bf16.msra.mxu1 %v11368_v34  ;;  %v11464_v34 = vld [vmem:[%s13150_s10 + $0x664] ss:$8 sps:$4 sm:$0xff]  }
 0x2ad   : > { %9438 = vmatpush1.bf16.msra.mxu0 %v11371_v35  ;;  %9070 = vmatprep.subr.bf16.mxu1 %v11376_v36  ;;  %v11467_v35 = vld [vmem:[%s13150_s10 + $0xf64] ss:$8 sps:$4 sm:$0xff]   ;;  %v11462_v36 = vld [vmem:[%s13150_s10 + $0x660] ss:$8 sps:$4 sm:$0xff]  }
 0x2ae   : > { %9439 = vmatprep.subr.bf16.mxu0 %v11379_v37  ;;  %v11465_v37 = vld [vmem:[%s13150_s10 + $0xf60] ss:$8 sps:$4 sm:$0xff]  }
 0x2b0   : > { %9071 = vmatpush1.bf16.msra.mxu1 %v11374_v38  ;;  %v11470_v38 = vld [vmem:[%s13150_s10 + $0x674] ss:$8 sps:$4 sm:$0xff]  }
 0x2b1   : > { %9440 = vmatpush1.bf16.msra.mxu0 %v11377_v39  ;;  %9072 = vmatprep.subr.bf16.mxu1 %v11382_v40  ;;  %v11473_v39 = vld [vmem:[%s13150_s10 + $0xf74] ss:$8 sps:$4 sm:$0xff]   ;;  %v11468_v40 = vld [vmem:[%s13150_s10 + $0x670] ss:$8 sps:$4 sm:$0xff]  }
 0x2b2   : > { %9441 = vmatprep.subr.bf16.mxu0 %v11385_v41  ;;  %v11471_v41 = vld [vmem:[%s13150_s10 + $0xf70] ss:$8 sps:$4 sm:$0xff]  }
 0x2b4   : > { %9073 = vmatpush1.bf16.msra.mxu1 %v11380_v42  ;;  %v11476_v42 = vld [vmem:[%s13150_s10 + $0x684] ss:$8 sps:$4 sm:$0xff]  }
 0x2b5   : > { %9442 = vmatpush1.bf16.msra.mxu0 %v11383_v43  ;;  %9074 = vmatprep.subr.bf16.mxu1 %v11388_v44  ;;  %v11479_v43 = vld [vmem:[%s13150_s10 + $0xf84] ss:$8 sps:$4 sm:$0xff]   ;;  %v11474_v44 = vld [vmem:[%s13150_s10 + $0x680] ss:$8 sps:$4 sm:$0xff]  }
 0x2b6   : > { %9443 = vmatprep.subr.bf16.mxu0 %v11391_v45  ;;  %v11477_v45 = vld [vmem:[%s13150_s10 + $0xf80] ss:$8 sps:$4 sm:$0xff]  }
 0x2b8   : > { %9075 = vmatpush1.bf16.msra.mxu1 %v11386_v32  ;;  %v11482_v32 = vld [vmem:[%s13150_s10 + $0x694] ss:$8 sps:$4 sm:$0xff]  }
 0x2b9   : > { %9444 = vmatpush1.bf16.msra.mxu0 %v11389_v46  ;;  %9076 = vmatprep.subr.bf16.mxu1 %v11394_v33  ;;  %v11485_v46 = vld [vmem:[%s13150_s10 + $0xf94] ss:$8 sps:$4 sm:$0xff]   ;;  %v11480_v33 = vld [vmem:[%s13150_s10 + $0x690] ss:$8 sps:$4 sm:$0xff]  }
 0x2ba   : > { %9445 = vmatprep.subr.bf16.mxu0 %v11397_v47  ;;  %v11483_v47 = vld [vmem:[%s13150_s10 + $0xf90] ss:$8 sps:$4 sm:$0xff]  }
 0x2bc   : > { %9077 = vmatpush1.bf16.msra.mxu1 %v11392_v48  ;;  %v11488_v48 = vld [vmem:[%s13150_s10 + $0x6a4] ss:$8 sps:$4 sm:$0xff]  }
 0x2bd   : > { %9446 = vmatpush1.bf16.msra.mxu0 %v11395_v50  ;;  %9078 = vmatprep.subr.bf16.mxu1 %v11400_v53  ;;  %v11491_v50 = vld [vmem:[%s13150_s10 + $0xfa4] ss:$8 sps:$4 sm:$0xff]   ;;  %v11486_v53 = vld [vmem:[%s13150_s10 + $0x6a0] ss:$8 sps:$4 sm:$0xff]  }
 0x2be   : > { %9447 = vmatprep.subr.bf16.mxu0 %v11403_v54  ;;  %v11489_v54 = vld [vmem:[%s13150_s10 + $0xfa0] ss:$8 sps:$4 sm:$0xff]  }
 0x2c0   : > { %9079 = vmatpush1.bf16.msra.mxu1 %v11398_v56  ;;  %v11494_v56 = vld [vmem:[%s13150_s10 + $0x6b4] ss:$8 sps:$4 sm:$0xff]  }
 0x2c1   : > { %9448 = vmatpush1.bf16.msra.mxu0 %v11401_v57  ;;  %9080 = vmatprep.subr.bf16.mxu1 %v11406_v58  ;;  %v11497_v57 = vld [vmem:[%s13150_s10 + $0xfb4] ss:$8 sps:$4 sm:$0xff]   ;;  %v11492_v58 = vld [vmem:[%s13150_s10 + $0x6b0] ss:$8 sps:$4 sm:$0xff]  }
 0x2c2   : > { %9449 = vmatprep.subr.bf16.mxu0 %v11409_v49  ;;  %v11495_v49 = vld [vmem:[%s13150_s10 + $0xfb0] ss:$8 sps:$4 sm:$0xff]  }
 0x2c4   : > { %9081 = vmatpush1.bf16.msra.mxu1 %v11404_v52  ;;  %v11500_v52 = vld [vmem:[%s13150_s10 + $0x6c4] ss:$8 sps:$4 sm:$0xff]  }
 0x2c5   : > { %9450 = vmatpush1.bf16.msra.mxu0 %v11407_v59  ;;  %9082 = vmatprep.subr.bf16.mxu1 %v11412_v60  ;;  %v11503_v59 = vld [vmem:[%s13150_s10 + $0xfc4] ss:$8 sps:$4 sm:$0xff]   ;;  %v11498_v60 = vld [vmem:[%s13150_s10 + $0x6c0] ss:$8 sps:$4 sm:$0xff]  }
 0x2c6   : > { %9451 = vmatprep.subr.bf16.mxu0 %v11415_v61  ;;  %v11501_v61 = vld [vmem:[%s13150_s10 + $0xfc0] ss:$8 sps:$4 sm:$0xff]  }
 0x2c8   : > { %9083 = vmatpush1.bf16.msra.mxu1 %v11410_v51  ;;  %v11506_v51 = vld [vmem:[%s13150_s10 + $0x6d4] ss:$8 sps:$4 sm:$0xff]  }
 0x2c9   : > { %9452 = vmatpush1.bf16.msra.mxu0 %v11413_v0  ;;  %9084 = vmatprep.subr.bf16.mxu1 %v11418_v2  ;;  %v11509_v0 = vld [vmem:[%s13150_s10 + $0xfd4] ss:$8 sps:$4 sm:$0xff]   ;;  %v11504_v2 = vld [vmem:[%s13150_s10 + $0x6d0] ss:$8 sps:$4 sm:$0xff]  }
 0x2ca   : > { %9453 = vmatprep.subr.bf16.mxu0 %v11421_v3  ;;  %v11507_v3 = vld [vmem:[%s13150_s10 + $0xfd0] ss:$8 sps:$4 sm:$0xff]  }
 0x2cc   : > { %9085 = vmatpush1.bf16.msra.mxu1 %v11416_v4  ;;  %v11512_v4 = vld [vmem:[%s13150_s10 + $0x6e4] ss:$8 sps:$4 sm:$0xff]  }
 0x2cd   : > { %9454 = vmatpush1.bf16.msra.mxu0 %v11419_v5  ;;  %9095 = vmatprep.subr.bf16.mxu1 %v11426_v6  ;;  %v11515_v5 = vld [vmem:[%s13150_s10 + $0xfe4] ss:$8 sps:$4 sm:$0xff]   ;;  %v11510_v6 = vld [vmem:[%s13150_s10 + $0x6e0] ss:$8 sps:$4 sm:$0xff]  }
 0x2ce   : > { %9464 = vmatprep.subr.bf16.mxu0 %v11431_v7  ;;  %v11513_v7 = vld [vmem:[%s13150_s10 + $0xfe0] ss:$8 sps:$4 sm:$0xff]  }
 0x2cf   : > { %9087 = vmatmul.mubr.bf16.vlgmr.msra.gmra.mrb[0].mxu1 %v10070_v8  ;;  %v11518_v8 = vld [vmem:[%s13150_s10 + $0x6f4] ss:$8 sps:$4 sm:$0xff]  }
 0x2d0   : > { %9456 = vmatmul.mubr.bf16.vlgmr.msra.gmra.mrb[0].mxu0 %v10088_v62  ;;  %9096 = vmatpush1.bf16.msra.mxu1 %v11424_v10  ;;  %v11521_v62 = vld [vmem:[%s13150_s10 + $0xff4] ss:$8 sps:$4 sm:$0xff]   ;;  %v11516_v10 = vld [vmem:[%s13150_s10 + $0x6f0] ss:$8 sps:$4 sm:$0xff]  }
 0x2d1   : > { %9465 = vmatpush1.bf16.msra.mxu0 %v11429_v55  ;;  %9097 = vmatprep.subr.bf16.mxu1 %v11434_v1  ;;  %v11519_v55 = vld [vmem:[%s13150_s10 + $0xff0] ss:$8 sps:$4 sm:$0xff]   ;;  %v11526_v1 = vld [vmem:[%s13150_s10 + $0x704] ss:$8 sps:$4 sm:$0xff]  }
 0x2d2   : > { %9466 = vmatprep.subr.bf16.mxu0 %v11437_v11  ;;  %9127 = vmatprep.mubr.bf16.mxu1 %v10073_v12  ;;  %v11531_v11 = vld [vmem:[%s13150_s10 + $0x1004] ss:$8 sps:$4 sm:$0xff]   ;;  %v10072_v12 = vcombine.low %v13635_v63, %v13635_v63  ;;  %v11529_v63 = vld [vmem:[%s13150_s10 + $0x1000] ss:$8 sps:$4 sm:$0xff]  }
 0x2d3   : > { %9496 = vmatprep.mubr.bf16.mxu0 %v10091_v13  ;;  %v11524_v13 = vld [vmem:[%s13150_s10 + $0x700] ss:$8 sps:$4 sm:$0xff]  }
 0x2d4   : > { %9098 = vmatpush1.bf16.msra.mxu1 %v11432_v14  ;;  %v10090_v14 = vcombine.low %v13640_v9, %v13640_v9  ;;  %v11537_v9 = vld [vmem:[%s13150_s10 + $0x1014] ss:$8 sps:$4 sm:$0xff]  }
 0x2d5   : > { %9467 = vmatpush1.bf16.msra.mxu0 %v11435_v15  ;;  %9099 = vmatprep.subr.bf16.mxu1 %v11440_v16  ;;  %v13718_v15 = vld [vmem:[%s13946_s0 + $0x38] sm:$0xff]  ;;  %v13723_v16 = vld [vmem:[%s13946_s0 + $0x80] sm:$0xff] }
 0x2d6   : > { %9468 = vmatprep.subr.bf16.mxu0 %v11443_v17  ;;  %v11534_v17 = vld [vmem:[%s13150_s10 + $0x714] ss:$8 sps:$4 sm:$0xff]  }
 0x2d8   : > { %9100 = vmatpush1.bf16.msra.mxu1 %v11438_v18  ;;  %v11532_v18 = vld [vmem:[%s13150_s10 + $0x710] ss:$8 sps:$4 sm:$0xff]  }
 0x2d9   : > { %9469 = vmatpush1.bf16.msra.mxu0 %v11441_v19  ;;  %9101 = vmatprep.subr.bf16.mxu1 %v11446_v20  ;;  %v11535_v19 = vld [vmem:[%s13150_s10 + $0x1010] ss:$8 sps:$4 sm:$0xff]   ;;  %v10075_v20 = vcombine.high %v13718_v15, %v13718_v15 }
 0x2da   : > { %9470 = vmatprep.subr.bf16.mxu0 %v11449_v21  ;;  %v10093_v21 = vcombine.high %v13723_v16, %v13723_v16 }
 0x2dc   : > { %9102 = vmatpush1.bf16.msra.mxu1 %v11444_v22  ;;  %v11540_v22 = vld [vmem:[%s13150_s10 + $0x724] ss:$8 sps:$4 sm:$0xff]  }
 0x2dd   : > { %9471 = vmatpush1.bf16.msra.mxu0 %v11447_v23  ;;  %9103 = vmatprep.subr.bf16.mxu1 %v11452_v24  ;;  %v11543_v23 = vld [vmem:[%s13150_s10 + $0x1024] ss:$8 sps:$4 sm:$0xff]   ;;  %v11538_v24 = vld [vmem:[%s13150_s10 + $0x720] ss:$8 sps:$4 sm:$0xff]  }
 0x2de   : > { %9472 = vmatprep.subr.bf16.mxu0 %v11455_v25  ;;  %v11541_v25 = vld [vmem:[%s13150_s10 + $0x1020] ss:$8 sps:$4 sm:$0xff]  }
 0x2e0   : > { %9104 = vmatpush1.bf16.msra.mxu1 %v11450_v26  ;;  %v11546_v26 = vld [vmem:[%s13150_s10 + $0x734] ss:$8 sps:$4 sm:$0xff]  }
 0x2e1   : > { %9473 = vmatpush1.bf16.msra.mxu0 %v11453_v27  ;;  %9105 = vmatprep.subr.bf16.mxu1 %v11458_v28  ;;  %v11549_v27 = vld [vmem:[%s13150_s10 + $0x1034] ss:$8 sps:$4 sm:$0xff]   ;;  %v11544_v28 = vld [vmem:[%s13150_s10 + $0x730] ss:$8 sps:$4 sm:$0xff]  }
 0x2e2   : > { %9474 = vmatprep.subr.bf16.mxu0 %v11461_v29  ;;  %v11547_v29 = vld [vmem:[%s13150_s10 + $0x1030] ss:$8 sps:$4 sm:$0xff]  }
 0x2e4   : > { %9106 = vmatpush1.bf16.msra.mxu1 %v11456_v30  ;;  %v11552_v30 = vld [vmem:[%s13150_s10 + $0x744] ss:$8 sps:$4 sm:$0xff]  }
 0x2e5   : > { %9475 = vmatpush1.bf16.msra.mxu0 %v11459_v31  ;;  %9107 = vmatprep.subr.bf16.mxu1 %v11464_v34  ;;  %v11555_v31 = vld [vmem:[%s13150_s10 + $0x1044] ss:$8 sps:$4 sm:$0xff]   ;;  %v11550_v34 = vld [vmem:[%s13150_s10 + $0x740] ss:$8 sps:$4 sm:$0xff]  }
 0x2e6   : > { %9476 = vmatprep.subr.bf16.mxu0 %v11467_v35  ;;  %v11553_v35 = vld [vmem:[%s13150_s10 + $0x1040] ss:$8 sps:$4 sm:$0xff]  }
 0x2e8   : > { %9108 = vmatpush1.bf16.msra.mxu1 %v11462_v36  ;;  %v11558_v36 = vld [vmem:[%s13150_s10 + $0x754] ss:$8 sps:$4 sm:$0xff]  }
 0x2e9   : > { %9477 = vmatpush1.bf16.msra.mxu0 %v11465_v37  ;;  %9109 = vmatprep.subr.bf16.mxu1 %v11470_v38  ;;  %v11561_v37 = vld [vmem:[%s13150_s10 + $0x1054] ss:$8 sps:$4 sm:$0xff]   ;;  %v11556_v38 = vld [vmem:[%s13150_s10 + $0x750] ss:$8 sps:$4 sm:$0xff]  }
 0x2ea   : > { %9478 = vmatprep.subr.bf16.mxu0 %v11473_v39  ;;  %v11559_v39 = vld [vmem:[%s13150_s10 + $0x1050] ss:$8 sps:$4 sm:$0xff]  }
 0x2ec   : > { %9110 = vmatpush1.bf16.msra.mxu1 %v11468_v40  ;;  %v11564_v40 = vld [vmem:[%s13150_s10 + $0x764] ss:$8 sps:$4 sm:$0xff]  }
 0x2ed   : > { %9479 = vmatpush1.bf16.msra.mxu0 %v11471_v41  ;;  %9111 = vmatprep.subr.bf16.mxu1 %v11476_v42  ;;  %v11567_v41 = vld [vmem:[%s13150_s10 + $0x1064] ss:$8 sps:$4 sm:$0xff]   ;;  %v11562_v42 = vld [vmem:[%s13150_s10 + $0x760] ss:$8 sps:$4 sm:$0xff]  }
 0x2ee   : > { %9480 = vmatprep.subr.bf16.mxu0 %v11479_v43  ;;  %v11565_v43 = vld [vmem:[%s13150_s10 + $0x1060] ss:$8 sps:$4 sm:$0xff]  }
 0x2f0   : > { %9112 = vmatpush1.bf16.msra.mxu1 %v11474_v44  ;;  %v11570_v44 = vld [vmem:[%s13150_s10 + $0x774] ss:$8 sps:$4 sm:$0xff]  }
 0x2f1   : > { %9481 = vmatpush1.bf16.msra.mxu0 %v11477_v45  ;;  %9113 = vmatprep.subr.bf16.mxu1 %v11482_v32  ;;  %v11573_v45 = vld [vmem:[%s13150_s10 + $0x1074] ss:$8 sps:$4 sm:$0xff]   ;;  %v11568_v32 = vld [vmem:[%s13150_s10 + $0x770] ss:$8 sps:$4 sm:$0xff]  }
 0x2f2   : > { %9482 = vmatprep.subr.bf16.mxu0 %v11485_v46  ;;  %v11571_v46 = vld [vmem:[%s13150_s10 + $0x1070] ss:$8 sps:$4 sm:$0xff]  }
 0x2f4   : > { %9114 = vmatpush1.bf16.msra.mxu1 %v11480_v33  ;;  %v11576_v33 = vld [vmem:[%s13150_s10 + $0x784] ss:$8 sps:$4 sm:$0xff]  }
 0x2f5   : > { %9483 = vmatpush1.bf16.msra.mxu0 %v11483_v47  ;;  %9115 = vmatprep.subr.bf16.mxu1 %v11488_v48  ;;  %v11579_v47 = vld [vmem:[%s13150_s10 + $0x1084] ss:$8 sps:$4 sm:$0xff]   ;;  %v11574_v48 = vld [vmem:[%s13150_s10 + $0x780] ss:$8 sps:$4 sm:$0xff]  }
 0x2f6   : > { %9484 = vmatprep.subr.bf16.mxu0 %v11491_v50  ;;  %v11577_v50 = vld [vmem:[%s13150_s10 + $0x1080] ss:$8 sps:$4 sm:$0xff]  }
 0x2f8   : > { %9116 = vmatpush1.bf16.msra.mxu1 %v11486_v53  ;;  %v11582_v53 = vld [vmem:[%s13150_s10 + $0x794] ss:$8 sps:$4 sm:$0xff]  }
 0x2f9   : > { %9485 = vmatpush1.bf16.msra.mxu0 %v11489_v54  ;;  %9117 = vmatprep.subr.bf16.mxu1 %v11494_v56  ;;  %v11585_v54 = vld [vmem:[%s13150_s10 + $0x1094] ss:$8 sps:$4 sm:$0xff]   ;;  %v11580_v56 = vld [vmem:[%s13150_s10 + $0x790] ss:$8 sps:$4 sm:$0xff]  }
 0x2fa   : > { %9486 = vmatprep.subr.bf16.mxu0 %v11497_v57  ;;  %v11583_v57 = vld [vmem:[%s13150_s10 + $0x1090] ss:$8 sps:$4 sm:$0xff]  }
 0x2fc   : > { %9118 = vmatpush1.bf16.msra.mxu1 %v11492_v58  ;;  %v11588_v58 = vld [vmem:[%s13150_s10 + $0x7a4] ss:$8 sps:$4 sm:$0xff]  }
 0x2fd   : > { %9487 = vmatpush1.bf16.msra.mxu0 %v11495_v49  ;;  %9119 = vmatprep.subr.bf16.mxu1 %v11500_v52  ;;  %v11591_v49 = vld [vmem:[%s13150_s10 + $0x10a4] ss:$8 sps:$4 sm:$0xff]   ;;  %v11586_v52 = vld [vmem:[%s13150_s10 + $0x7a0] ss:$8 sps:$4 sm:$0xff]  }
 0x2fe   : > { %9488 = vmatprep.subr.bf16.mxu0 %v11503_v59  ;;  %v11589_v59 = vld [vmem:[%s13150_s10 + $0x10a0] ss:$8 sps:$4 sm:$0xff]  }
 0x300   : > { %9120 = vmatpush1.bf16.msra.mxu1 %v11498_v60  ;;  %v11594_v60 = vld [vmem:[%s13150_s10 + $0x7b4] ss:$8 sps:$4 sm:$0xff]  }
 0x301   : > { %9489 = vmatpush1.bf16.msra.mxu0 %v11501_v61  ;;  %9121 = vmatprep.subr.bf16.mxu1 %v11506_v51  ;;  %v11597_v61 = vld [vmem:[%s13150_s10 + $0x10b4] ss:$8 sps:$4 sm:$0xff]   ;;  %v11592_v51 = vld [vmem:[%s13150_s10 + $0x7b0] ss:$8 sps:$4 sm:$0xff]  }
 0x302   : > { %9490 = vmatprep.subr.bf16.mxu0 %v11509_v0  ;;  %v11595_v0 = vld [vmem:[%s13150_s10 + $0x10b0] ss:$8 sps:$4 sm:$0xff]  }
 0x304   : > { %9122 = vmatpush1.bf16.msra.mxu1 %v11504_v2  ;;  %v11600_v2 = vld [vmem:[%s13150_s10 + $0x7c4] ss:$8 sps:$4 sm:$0xff]  }
 0x305   : > { %9491 = vmatpush1.bf16.msra.mxu0 %v11507_v3  ;;  %9123 = vmatprep.subr.bf16.mxu1 %v11512_v4  ;;  %v11603_v3 = vld [vmem:[%s13150_s10 + $0x10c4] ss:$8 sps:$4 sm:$0xff]   ;;  %v11598_v4 = vld [vmem:[%s13150_s10 + $0x7c0] ss:$8 sps:$4 sm:$0xff]  }
 0x306   : > { %9492 = vmatprep.subr.bf16.mxu0 %v11515_v5  ;;  %v11601_v5 = vld [vmem:[%s13150_s10 + $0x10c0] ss:$8 sps:$4 sm:$0xff]  }
 0x308   : > { %9124 = vmatpush1.bf16.msra.mxu1 %v11510_v6  ;;  %v11606_v6 = vld [vmem:[%s13150_s10 + $0x7d4] ss:$8 sps:$4 sm:$0xff]  }
 0x309   : > { %9493 = vmatpush1.bf16.msra.mxu0 %v11513_v7  ;;  %9125 = vmatprep.subr.bf16.mxu1 %v11518_v8  ;;  %v11609_v7 = vld [vmem:[%s13150_s10 + $0x10d4] ss:$8 sps:$4 sm:$0xff]   ;;  %v11604_v8 = vld [vmem:[%s13150_s10 + $0x7d0] ss:$8 sps:$4 sm:$0xff]  }
 0x30a   : > { %9494 = vmatprep.subr.bf16.mxu0 %v11521_v62  ;;  %v11607_v62 = vld [vmem:[%s13150_s10 + $0x10d0] ss:$8 sps:$4 sm:$0xff]  }
 0x30c   : > { %9126 = vmatpush1.bf16.msra.mxu1 %v11516_v10  ;;  %v11612_v10 = vld [vmem:[%s13150_s10 + $0x7e4] ss:$8 sps:$4 sm:$0xff]  }
 0x30d   : > { %9495 = vmatpush1.bf16.msra.mxu0 %v11519_v55  ;;  %9136 = vmatprep.subr.bf16.mxu1 %v11526_v1  ;;  %v11615_v55 = vld [vmem:[%s13150_s10 + $0x10e4] ss:$8 sps:$4 sm:$0xff]   ;;  %v11610_v1 = vld [vmem:[%s13150_s10 + $0x7e0] ss:$8 sps:$4 sm:$0xff]  }
 0x30e   : > { %9505 = vmatprep.subr.bf16.mxu0 %v11531_v11  ;;  %v11613_v11 = vld [vmem:[%s13150_s10 + $0x10e0] ss:$8 sps:$4 sm:$0xff]  }
 0x30f   : > { %9128 = vmatmul.mubr.bf16.vlgmr.msra.gmra.mrb[0].mxu1 %v10072_v12  ;;  %v11618_v12 = vld [vmem:[%s13150_s10 + $0x7f4] ss:$8 sps:$4 sm:$0xff]  }
 0x310   : > { %9497 = vmatmul.mubr.bf16.vlgmr.msra.gmra.mrb[0].mxu0 %v10090_v14  ;;  %9137 = vmatpush1.bf16.msra.mxu1 %v11524_v13  ;;  %v11621_v13 = vld [vmem:[%s13150_s10 + $0x10f4] ss:$8 sps:$4 sm:$0xff]   ;;  %v11616_v14 = vld [vmem:[%s13150_s10 + $0x7f0] ss:$8 sps:$4 sm:$0xff]  }
 0x311   : > { %9506 = vmatpush1.bf16.msra.mxu0 %v11529_v63  ;;  %9138 = vmatprep.subr.bf16.mxu1 %v11534_v17  ;;  %v11619_v63 = vld [vmem:[%s13150_s10 + $0x10f0] ss:$8 sps:$4 sm:$0xff]   ;;  %v11626_v17 = vld [vmem:[%s13150_s10 + $0x804] ss:$8 sps:$4 sm:$0xff]  }
 0x312   : > { %9507 = vmatprep.subr.bf16.mxu0 %v11537_v9  ;;  %9168 = vmatprep.mubr.bf16.mxu1 %v10075_v20  ;;  %v11631_v9 = vld [vmem:[%s13150_s10 + $0x1104] ss:$8 sps:$4 sm:$0xff]  }
 0x313   : > { %9537 = vmatprep.mubr.bf16.mxu0 %v10093_v21  ;;  %v13803_v20 = vld [vmem:[%s13946_s0 + $0x40] sm:$0xff]  ;;  %v13808_v21 = vld [vmem:[%s13946_s0 + $0x88] sm:$0xff] }
 0x314   : > { %9139 = vmatpush1.bf16.msra.mxu1 %v11532_v18  ;;  %v10074_v18 = vcombine.low %v13718_v15, %v13718_v15  ;;  %v11629_v15 = vld [vmem:[%s13150_s10 + $0x1100] ss:$8 sps:$4 sm:$0xff]  }
 0x315   : > { %9508 = vmatpush1.bf16.msra.mxu0 %v11535_v19  ;;  %9140 = vmatprep.subr.bf16.mxu1 %v11540_v22  ;;  %v10092_v19 = vcombine.low %v13723_v16, %v13723_v16  ;;  %v11624_v22 = vld [vmem:[%s13150_s10 + $0x800] ss:$8 sps:$4 sm:$0xff]   ;;  %v11634_v16 = vld [vmem:[%s13150_s10 + $0x814] ss:$8 sps:$4 sm:$0xff]  }
 0x316   : > { %9509 = vmatprep.subr.bf16.mxu0 %v11543_v23  ;;  %v11637_v23 = vld [vmem:[%s13150_s10 + $0x1114] ss:$8 sps:$4 sm:$0xff]  }
 0x318   : > { %9141 = vmatpush1.bf16.msra.mxu1 %v11538_v24  ;;  %v10077_v24 = vcombine.high %v13803_v20, %v13803_v20 }
 0x319   : > { %9510 = vmatpush1.bf16.msra.mxu0 %v11541_v25  ;;  %9142 = vmatprep.subr.bf16.mxu1 %v11546_v26  ;;  %v10095_v25 = vcombine.high %v13808_v21, %v13808_v21  ;;  %v11632_v26 = vld [vmem:[%s13150_s10 + $0x810] ss:$8 sps:$4 sm:$0xff]  }
 0x31a   : > { %9511 = vmatprep.subr.bf16.mxu0 %v11549_v27  ;;  %v11635_v27 = vld [vmem:[%s13150_s10 + $0x1110] ss:$8 sps:$4 sm:$0xff]  }
 0x31c   : > { %9143 = vmatpush1.bf16.msra.mxu1 %v11544_v28  ;;  %v11640_v28 = vld [vmem:[%s13150_s10 + $0x824] ss:$8 sps:$4 sm:$0xff]  }
 0x31d   : > { %9512 = vmatpush1.bf16.msra.mxu0 %v11547_v29  ;;  %9144 = vmatprep.subr.bf16.mxu1 %v11552_v30  ;;  %v11643_v29 = vld [vmem:[%s13150_s10 + $0x1124] ss:$8 sps:$4 sm:$0xff]   ;;  %v11638_v30 = vld [vmem:[%s13150_s10 + $0x820] ss:$8 sps:$4 sm:$0xff]  }
 0x31e   : > { %9513 = vmatprep.subr.bf16.mxu0 %v11555_v31  ;;  %v11641_v31 = vld [vmem:[%s13150_s10 + $0x1120] ss:$8 sps:$4 sm:$0xff]  }
 0x320   : > { %9145 = vmatpush1.bf16.msra.mxu1 %v11550_v34  ;;  %v11646_v34 = vld [vmem:[%s13150_s10 + $0x834] ss:$8 sps:$4 sm:$0xff]  }
 0x321   : > { %9514 = vmatpush1.bf16.msra.mxu0 %v11553_v35  ;;  %9146 = vmatprep.subr.bf16.mxu1 %v11558_v36  ;;  %v11649_v35 = vld [vmem:[%s13150_s10 + $0x1134] ss:$8 sps:$4 sm:$0xff]   ;;  %v11644_v36 = vld [vmem:[%s13150_s10 + $0x830] ss:$8 sps:$4 sm:$0xff]  }
 0x322   : > { %9515 = vmatprep.subr.bf16.mxu0 %v11561_v37  ;;  %v11647_v37 = vld [vmem:[%s13150_s10 + $0x1130] ss:$8 sps:$4 sm:$0xff]  }
 0x324   : > { %9147 = vmatpush1.bf16.msra.mxu1 %v11556_v38  ;;  %v11652_v38 = vld [vmem:[%s13150_s10 + $0x844] ss:$8 sps:$4 sm:$0xff]  }
 0x325   : > { %9516 = vmatpush1.bf16.msra.mxu0 %v11559_v39  ;;  %9148 = vmatprep.subr.bf16.mxu1 %v11564_v40  ;;  %v11655_v39 = vld [vmem:[%s13150_s10 + $0x1144] ss:$8 sps:$4 sm:$0xff]   ;;  %v11650_v40 = vld [vmem:[%s13150_s10 + $0x840] ss:$8 sps:$4 sm:$0xff]  }
 0x326   : > { %9517 = vmatprep.subr.bf16.mxu0 %v11567_v41  ;;  %v11653_v41 = vld [vmem:[%s13150_s10 + $0x1140] ss:$8 sps:$4 sm:$0xff]  }
 0x328   : > { %9149 = vmatpush1.bf16.msra.mxu1 %v11562_v42  ;;  %v11658_v42 = vld [vmem:[%s13150_s10 + $0x854] ss:$8 sps:$4 sm:$0xff]  }
 0x329   : > { %9518 = vmatpush1.bf16.msra.mxu0 %v11565_v43  ;;  %9150 = vmatprep.subr.bf16.mxu1 %v11570_v44  ;;  %v11661_v43 = vld [vmem:[%s13150_s10 + $0x1154] ss:$8 sps:$4 sm:$0xff]   ;;  %v11656_v44 = vld [vmem:[%s13150_s10 + $0x850] ss:$8 sps:$4 sm:$0xff]  }
 0x32a   : > { %9519 = vmatprep.subr.bf16.mxu0 %v11573_v45  ;;  %v11659_v45 = vld [vmem:[%s13150_s10 + $0x1150] ss:$8 sps:$4 sm:$0xff]  }
 0x32c   : > { %9151 = vmatpush1.bf16.msra.mxu1 %v11568_v32  ;;  %v11664_v32 = vld [vmem:[%s13150_s10 + $0x864] ss:$8 sps:$4 sm:$0xff]  }
 0x32d   : > { %9520 = vmatpush1.bf16.msra.mxu0 %v11571_v46  ;;  %9152 = vmatprep.subr.bf16.mxu1 %v11576_v33  ;;  %v11667_v46 = vld [vmem:[%s13150_s10 + $0x1164] ss:$8 sps:$4 sm:$0xff]   ;;  %v11662_v33 = vld [vmem:[%s13150_s10 + $0x860] ss:$8 sps:$4 sm:$0xff]  }
 0x32e   : > { %9521 = vmatprep.subr.bf16.mxu0 %v11579_v47  ;;  %v11665_v47 = vld [vmem:[%s13150_s10 + $0x1160] ss:$8 sps:$4 sm:$0xff]  }
 0x330   : > { %9153 = vmatpush1.bf16.msra.mxu1 %v11574_v48  ;;  %v11670_v48 = vld [vmem:[%s13150_s10 + $0x874] ss:$8 sps:$4 sm:$0xff]  }
 0x331   : > { %9522 = vmatpush1.bf16.msra.mxu0 %v11577_v50  ;;  %9154 = vmatprep.subr.bf16.mxu1 %v11582_v53  ;;  %v11673_v50 = vld [vmem:[%s13150_s10 + $0x1174] ss:$8 sps:$4 sm:$0xff]   ;;  %v11668_v53 = vld [vmem:[%s13150_s10 + $0x870] ss:$8 sps:$4 sm:$0xff]  }
 0x332   : > { %9523 = vmatprep.subr.bf16.mxu0 %v11585_v54  ;;  %v11671_v54 = vld [vmem:[%s13150_s10 + $0x1170] ss:$8 sps:$4 sm:$0xff]  }
 0x334   : > { %9155 = vmatpush1.bf16.msra.mxu1 %v11580_v56  ;;  %v11676_v56 = vld [vmem:[%s13150_s10 + $0x884] ss:$8 sps:$4 sm:$0xff]  }
 0x335   : > { %9524 = vmatpush1.bf16.msra.mxu0 %v11583_v57  ;;  %9156 = vmatprep.subr.bf16.mxu1 %v11588_v58  ;;  %v11679_v57 = vld [vmem:[%s13150_s10 + $0x1184] ss:$8 sps:$4 sm:$0xff]   ;;  %v11674_v58 = vld [vmem:[%s13150_s10 + $0x880] ss:$8 sps:$4 sm:$0xff]  }
 0x336   : > { %9525 = vmatprep.subr.bf16.mxu0 %v11591_v49  ;;  %v11677_v49 = vld [vmem:[%s13150_s10 + $0x1180] ss:$8 sps:$4 sm:$0xff]  }
 0x338   : > { %9157 = vmatpush1.bf16.msra.mxu1 %v11586_v52  ;;  %v11682_v52 = vld [vmem:[%s13150_s10 + $0x894] ss:$8 sps:$4 sm:$0xff]  }
 0x339   : > { %9526 = vmatpush1.bf16.msra.mxu0 %v11589_v59  ;;  %9158 = vmatprep.subr.bf16.mxu1 %v11594_v60  ;;  %v11685_v59 = vld [vmem:[%s13150_s10 + $0x1194] ss:$8 sps:$4 sm:$0xff]   ;;  %v11680_v60 = vld [vmem:[%s13150_s10 + $0x890] ss:$8 sps:$4 sm:$0xff]  }
 0x33a   : > { %9527 = vmatprep.subr.bf16.mxu0 %v11597_v61  ;;  %v11683_v61 = vld [vmem:[%s13150_s10 + $0x1190] ss:$8 sps:$4 sm:$0xff]  }
 0x33c   : > { %9159 = vmatpush1.bf16.msra.mxu1 %v11592_v51  ;;  %v11688_v51 = vld [vmem:[%s13150_s10 + $0x8a4] ss:$8 sps:$4 sm:$0xff]  }
 0x33d   : > { %9528 = vmatpush1.bf16.msra.mxu0 %v11595_v0  ;;  %9160 = vmatprep.subr.bf16.mxu1 %v11600_v2  ;;  %v11691_v0 = vld [vmem:[%s13150_s10 + $0x11a4] ss:$8 sps:$4 sm:$0xff]   ;;  %v11686_v2 = vld [vmem:[%s13150_s10 + $0x8a0] ss:$8 sps:$4 sm:$0xff]  }
 0x33e   : > { %9529 = vmatprep.subr.bf16.mxu0 %v11603_v3  ;;  %v11689_v3 = vld [vmem:[%s13150_s10 + $0x11a0] ss:$8 sps:$4 sm:$0xff]  }
 0x340   : > { %9161 = vmatpush1.bf16.msra.mxu1 %v11598_v4  ;;  %v11694_v4 = vld [vmem:[%s13150_s10 + $0x8b4] ss:$8 sps:$4 sm:$0xff]  }
 0x341   : > { %9530 = vmatpush1.bf16.msra.mxu0 %v11601_v5  ;;  %9162 = vmatprep.subr.bf16.mxu1 %v11606_v6  ;;  %v11697_v5 = vld [vmem:[%s13150_s10 + $0x11b4] ss:$8 sps:$4 sm:$0xff]   ;;  %v11692_v6 = vld [vmem:[%s13150_s10 + $0x8b0] ss:$8 sps:$4 sm:$0xff]  }
 0x342   : > { %9531 = vmatprep.subr.bf16.mxu0 %v11609_v7  ;;  %v11695_v7 = vld [vmem:[%s13150_s10 + $0x11b0] ss:$8 sps:$4 sm:$0xff]  }
 0x344   : > { %9163 = vmatpush1.bf16.msra.mxu1 %v11604_v8  ;;  %v11700_v8 = vld [vmem:[%s13150_s10 + $0x8c4] ss:$8 sps:$4 sm:$0xff]  }
 0x345   : > { %9532 = vmatpush1.bf16.msra.mxu0 %v11607_v62  ;;  %9164 = vmatprep.subr.bf16.mxu1 %v11612_v10  ;;  %v11703_v62 = vld [vmem:[%s13150_s10 + $0x11c4] ss:$8 sps:$4 sm:$0xff]   ;;  %v11698_v10 = vld [vmem:[%s13150_s10 + $0x8c0] ss:$8 sps:$4 sm:$0xff]  }
 0x346   : > { %9533 = vmatprep.subr.bf16.mxu0 %v11615_v55  ;;  %v11701_v55 = vld [vmem:[%s13150_s10 + $0x11c0] ss:$8 sps:$4 sm:$0xff]  }
 0x348   : > { %9165 = vmatpush1.bf16.msra.mxu1 %v11610_v1  ;;  %v11706_v1 = vld [vmem:[%s13150_s10 + $0x8d4] ss:$8 sps:$4 sm:$0xff]  }
 0x349   : > { %9534 = vmatpush1.bf16.msra.mxu0 %v11613_v11  ;;  %9166 = vmatprep.subr.bf16.mxu1 %v11618_v12  ;;  %v11709_v11 = vld [vmem:[%s13150_s10 + $0x11d4] ss:$8 sps:$4 sm:$0xff]   ;;  %v11704_v12 = vld [vmem:[%s13150_s10 + $0x8d0] ss:$8 sps:$4 sm:$0xff]  }
 0x34a   : > { %9535 = vmatprep.subr.bf16.mxu0 %v11621_v13  ;;  %v11707_v13 = vld [vmem:[%s13150_s10 + $0x11d0] ss:$8 sps:$4 sm:$0xff]  }
 0x34c   : > { %9167 = vmatpush1.bf16.msra.mxu1 %v11616_v14  ;;  %v11712_v14 = vld [vmem:[%s13150_s10 + $0x8e4] ss:$8 sps:$4 sm:$0xff]  }
 0x34d   : > { %9536 = vmatpush1.bf16.msra.mxu0 %v11619_v63  ;;  %9177 = vmatprep.subr.bf16.mxu1 %v11626_v17  ;;  %v11715_v63 = vld [vmem:[%s13150_s10 + $0x11e4] ss:$8 sps:$4 sm:$0xff]   ;;  %v11710_v17 = vld [vmem:[%s13150_s10 + $0x8e0] ss:$8 sps:$4 sm:$0xff]  }
 0x34e   : > { %9546 = vmatprep.subr.bf16.mxu0 %v11631_v9  ;;  %v11713_v9 = vld [vmem:[%s13150_s10 + $0x11e0] ss:$8 sps:$4 sm:$0xff]  }
 0x34f   : > { %9169 = vmatmul.mubr.bf16.vlgmr.msra.gmra.mrb[0].mxu1 %v10074_v18  ;;  %v11718_v18 = vld [vmem:[%s13150_s10 + $0x8f4] ss:$8 sps:$4 sm:$0xff]  }
 0x350   : > { %9538 = vmatmul.mubr.bf16.vlgmr.msra.gmra.mrb[0].mxu0 %v10092_v19  ;;  %9178 = vmatpush1.bf16.msra.mxu1 %v11624_v22  ;;  %v11721_v19 = vld [vmem:[%s13150_s10 + $0x11f4] ss:$8 sps:$4 sm:$0xff]   ;;  %v11716_v22 = vld [vmem:[%s13150_s10 + $0x8f0] ss:$8 sps:$4 sm:$0xff]  }
 0x351   : > { %9547 = vmatpush1.bf16.msra.mxu0 %v11629_v15  ;;  %9179 = vmatprep.subr.bf16.mxu1 %v11634_v16  ;;  %v11719_v15 = vld [vmem:[%s13150_s10 + $0x11f0] ss:$8 sps:$4 sm:$0xff]   ;;  %v11728_v16 = vld [vmem:[%s13730_s9 + $0x4] ss:$8 sps:$4 sm:$0xff]   ;;  %s10056_s10 = sshll.u32 %s11806_s23, 1 }
 0x352   : > { %9548 = vmatprep.subr.bf16.mxu0 %v11637_v23  ;;  %9209 = vmatprep.mubr.bf16.mxu1 %v10077_v24  ;;  %v13880_v23 = vld [vmem:[%s13949_s3] sm:$0xff]  ;;  %v10076_v24 = vcombine.low %v13803_v20, %v13803_v20  ;;  %v11729_v20 = vld [vmem:[%s13730_s9 + $0x10] ss:$8 sps:$4 sm:$0xff]   ;;  %p5216_p9 = scmp.lt.s32.totalorder %s10056_s10, 3 }
 0x353   : > { %9578 = vmatprep.mubr.bf16.mxu0 %v10095_v25  ;;  %v10094_v25 = vcombine.low %v13808_v21, %v13808_v21  ;;  %v11734_v21 = vld [vmem:[%s13730_s9 + $0x24] ss:$8 sps:$4 sm:$0xff]  }
 0x354   : > { %9180 = vmatpush1.bf16.msra.mxu1 %v11632_v26  ;;  %v11726_v26 = vld [vmem:[%s13730_s9] ss:$8 sps:$4 sm:$0xff]   ;;  %s13961_s10 = smov (!%p5216_p9, %s10056_s10), 3 }
 0x355   : > { %9549 = vmatpush1.bf16.msra.mxu0 %v11635_v27  ;;  %9181 = vmatprep.subr.bf16.mxu1 %v11640_v28  ;;  %v10673_v27 = vcombine.high %v13880_v23, %v13880_v23  ;;  %v11731_v28 = vld [vmem:[%s13730_s9 + $0x14] ss:$8 sps:$4 sm:$0xff]   ;;  %s5229_s17 = scalar_lea.vmem %s13951_s5, %s13961_s10  ;;  %s5218_s20 = scalar_lea.vmem %s13948_s2, %s13961_s10 }
 0x356   : > { %9550 = vmatprep.subr.bf16.mxu0 %v11643_v29  ;;  %v11732_v29 = vld [vmem:[%s13730_s9 + $0x20] ss:$8 sps:$4 sm:$0xff]   ;;  %s10059_s23 = sshll.u32 %s13961_s10, 3 }
 0x357   : > { %s5239_s7 = scalar_lea.vmem %s13952_s6, %s10059_s23 }
 0x358   : > { %9182 = vmatpush1.bf16.msra.mxu1 %v11638_v30  ;;  %v11737_v30 = vld [vmem:[%s13730_s9 + $0x34] ss:$8 sps:$4 sm:$0xff]  }
 0x359   : > { %9551 = vmatpush1.bf16.msra.mxu0 %v11641_v31  ;;  %9183 = vmatprep.subr.bf16.mxu1 %v11646_v34  ;;  %v11735_v31 = vld [vmem:[%s13730_s9 + $0x30] ss:$8 sps:$4 sm:$0xff]   ;;  %v11740_v34 = vld [vmem:[%s13730_s9 + $0x44] ss:$8 sps:$4 sm:$0xff]  }
 0x35a   : > { %9552 = vmatprep.subr.bf16.mxu0 %v11649_v35  ;;  %v11738_v35 = vld [vmem:[%s13730_s9 + $0x40] ss:$8 sps:$4 sm:$0xff]  }
 0x35c   : > { %9184 = vmatpush1.bf16.msra.mxu1 %v11644_v36  ;;  %v11743_v36 = vld [vmem:[%s13730_s9 + $0x54] ss:$8 sps:$4 sm:$0xff]  }
 0x35d   : > { %9553 = vmatpush1.bf16.msra.mxu0 %v11647_v37  ;;  %9185 = vmatprep.subr.bf16.mxu1 %v11652_v38  ;;  %v11741_v37 = vld [vmem:[%s13730_s9 + $0x50] ss:$8 sps:$4 sm:$0xff]   ;;  %v11746_v38 = vld [vmem:[%s13730_s9 + $0x64] ss:$8 sps:$4 sm:$0xff]  }
 0x35e   : > { %9554 = vmatprep.subr.bf16.mxu0 %v11655_v39  ;;  %v11744_v39 = vld [vmem:[%s13730_s9 + $0x60] ss:$8 sps:$4 sm:$0xff]  }
 0x360   : > { %9186 = vmatpush1.bf16.msra.mxu1 %v11650_v40  ;;  %v11749_v40 = vld [vmem:[%s13730_s9 + $0x74] ss:$8 sps:$4 sm:$0xff]  }
 0x361   : > { %9555 = vmatpush1.bf16.msra.mxu0 %v11653_v41  ;;  %9187 = vmatprep.subr.bf16.mxu1 %v11658_v42  ;;  %v11747_v41 = vld [vmem:[%s13730_s9 + $0x70] ss:$8 sps:$4 sm:$0xff]   ;;  %v11752_v42 = vld [vmem:[%s13730_s9 + $0x84] ss:$8 sps:$4 sm:$0xff]  }
 0x362   : > { %9556 = vmatprep.subr.bf16.mxu0 %v11661_v43  ;;  %v11750_v43 = vld [vmem:[%s13730_s9 + $0x80] ss:$8 sps:$4 sm:$0xff]  }
 0x364   : > { %9188 = vmatpush1.bf16.msra.mxu1 %v11656_v44  ;;  %v11755_v44 = vld [vmem:[%s13730_s9 + $0x94] ss:$8 sps:$4 sm:$0xff]  }
 0x365   : > { %9557 = vmatpush1.bf16.msra.mxu0 %v11659_v45  ;;  %9189 = vmatprep.subr.bf16.mxu1 %v11664_v32  ;;  %v11753_v45 = vld [vmem:[%s13730_s9 + $0x90] ss:$8 sps:$4 sm:$0xff]   ;;  %v11758_v32 = vld [vmem:[%s13730_s9 + $0xa4] ss:$8 sps:$4 sm:$0xff]  }
 0x366   : > { %9558 = vmatprep.subr.bf16.mxu0 %v11667_v46  ;;  %v11756_v46 = vld [vmem:[%s13730_s9 + $0xa0] ss:$8 sps:$4 sm:$0xff]  }
 0x368   : > { %9190 = vmatpush1.bf16.msra.mxu1 %v11662_v33  ;;  %v11761_v33 = vld [vmem:[%s13730_s9 + $0xb4] ss:$8 sps:$4 sm:$0xff]  }
 0x369   : > { %9559 = vmatpush1.bf16.msra.mxu0 %v11665_v47  ;;  %9191 = vmatprep.subr.bf16.mxu1 %v11670_v48  ;;  %v11759_v47 = vld [vmem:[%s13730_s9 + $0xb0] ss:$8 sps:$4 sm:$0xff]   ;;  %v11764_v48 = vld [vmem:[%s13730_s9 + $0xc4] ss:$8 sps:$4 sm:$0xff]  }
 0x36a   : > { %9560 = vmatprep.subr.bf16.mxu0 %v11673_v50  ;;  %v11762_v50 = vld [vmem:[%s13730_s9 + $0xc0] ss:$8 sps:$4 sm:$0xff]  }
 0x36c   : > { %9192 = vmatpush1.bf16.msra.mxu1 %v11668_v53  ;;  %v11767_v53 = vld [vmem:[%s13730_s9 + $0xd4] ss:$8 sps:$4 sm:$0xff]  }
 0x36d   : > { %9561 = vmatpush1.bf16.msra.mxu0 %v11671_v54  ;;  %9193 = vmatprep.subr.bf16.mxu1 %v11676_v56  ;;  %v11765_v54 = vld [vmem:[%s13730_s9 + $0xd0] ss:$8 sps:$4 sm:$0xff]   ;;  %v11770_v56 = vld [vmem:[%s13730_s9 + $0xe4] ss:$8 sps:$4 sm:$0xff]  }
 0x36e   : > { %9562 = vmatprep.subr.bf16.mxu0 %v11679_v57  ;;  %v11768_v57 = vld [vmem:[%s13730_s9 + $0xe0] ss:$8 sps:$4 sm:$0xff]  }
 0x370   : > { %9194 = vmatpush1.bf16.msra.mxu1 %v11674_v58  ;;  %v11773_v58 = vld [vmem:[%s13730_s9 + $0xf4] ss:$8 sps:$4 sm:$0xff]  }
 0x371   : > { %9563 = vmatpush1.bf16.msra.mxu0 %v11677_v49  ;;  %9195 = vmatprep.subr.bf16.mxu1 %v11682_v52  ;;  %v11771_v49 = vld [vmem:[%s13730_s9 + $0xf0] ss:$8 sps:$4 sm:$0xff]   ;;  %v10672_v52 = vcombine.low %v13880_v23, %v13880_v23 }
 0x372   : > { %9564 = vmatprep.subr.bf16.mxu0 %v11685_v59 }
 0x374   : > { %9196 = vmatpush1.bf16.msra.mxu1 %v11680_v60 }
 0x375   : > { %9565 = vmatpush1.bf16.msra.mxu0 %v11683_v61  ;;  %9197 = vmatprep.subr.bf16.mxu1 %v11688_v51 }
 0x376   : > { %9566 = vmatprep.subr.bf16.mxu0 %v11691_v0  ;;  %v9629_v0 = vlaneseq }
 0x378   : > { %9198 = vmatpush1.bf16.msra.mxu1 %v11686_v2  ;;  %v9630_v2 = vshrl.u32 %v9629_v0, 7 }
 0x379   : > { %9567 = vmatpush1.bf16.msra.mxu0 %v11689_v3  ;;  %9199 = vmatprep.subr.bf16.mxu1 %v11694_v4  ;;  %v9627_v4 = vld [vmem:[%s5229_s17] sm:$0x3] }
 0x37a   : > { %9568 = vmatprep.subr.bf16.mxu0 %v11697_v5  ;;  %v9631_v3 = vsub.s32 0, %v9630_v2  ;;  %v9635_v5 = vsub.s32 1, %v9630_v2 }
 0x37c   : > { %9200 = vmatpush1.bf16.msra.mxu1 %v11692_v6  ;;  %v9632_v6 = vrot.slane %v9627_v4, %v9631_v3 }
 0x37d   : > { %9569 = vmatpush1.bf16.msra.mxu0 %v11695_v7  ;;  %9201 = vmatprep.subr.bf16.mxu1 %v11700_v8  ;;  %v9636_v7 = vrot.slane %v9627_v4, %v9635_v5  ;;  %v9849_v8 = vld [vmem:[%s5218_s20] sm:$0x3] }
 0x37e   : > { %9570 = vmatprep.subr.bf16.mxu0 %v11703_v62 }
 0x380   : > { %9202 = vmatpush1.bf16.msra.mxu1 %v11698_v10  ;;  %v9854_v10 = vrot.slane %v9849_v8, %v9631_v3 }
 0x381   : > { %9571 = vmatpush1.bf16.msra.mxu0 %v11701_v55  ;;  %9203 = vmatprep.subr.bf16.mxu1 %v11706_v1 }
 0x382   : > { %9572 = vmatprep.subr.bf16.mxu0 %v11709_v11  ;;  %v9858_v11 = vrot.slane %v9849_v8, %v9635_v5 }
 0x384   : > { %9204 = vmatpush1.bf16.msra.mxu1 %v11704_v12 }
 0x385   : > { %9573 = vmatpush1.bf16.msra.mxu0 %v11707_v13  ;;  %9205 = vmatprep.subr.bf16.mxu1 %v11712_v14 }
 0x386   : > { %9574 = vmatprep.subr.bf16.mxu0 %v11715_v63 }
 0x388   : > { %9206 = vmatpush1.bf16.msra.mxu1 %v11710_v17 }
 0x389   : > { %9575 = vmatpush1.bf16.msra.mxu0 %v11713_v9  ;;  %9207 = vmatprep.subr.bf16.mxu1 %v11718_v18 }
 0x38a   : > { %9576 = vmatprep.subr.bf16.mxu0 %v11721_v19 }
 0x38c   : > { %9208 = vmatpush1.bf16.msra.mxu1 %v11716_v22 }
 0x38d   : > { %9577 = vmatpush1.bf16.msra.mxu0 %v11719_v15 }
 0x38e   : > { %9806 = vmatprep.subr.bf16.mxu0 %v11728_v16 }
 0x38f   : > { %9210 = vmatmul.mubr.bf16.vlgmr.msra.gmra.mrb[0].mxu1 %v10076_v24 }
 0x390   : > { %9579 = vmatmul.mubr.bf16.vlgmr.msra.gmra.mrb[0].mxu0 %v10094_v25 }
 0x391   : > { %9807 = vmatpush1.bf16.msra.mxu0 %v11726_v26  ;;  %9838 = vmatprep.mubr.bf16.mxu0 %v10673_v27 }
 0x392   : > { %9808 = vmatprep.subr.bf16.mxu0 %v11731_v28 }
 0x395   : > { %9809 = vmatpush1.bf16.msra.mxu0 %v11729_v20 }
 0x396   : > { %9810 = vmatprep.subr.bf16.mxu0 %v11734_v21 }
 0x399   : > { %9811 = vmatpush1.bf16.msra.mxu0 %v11732_v29 }
 0x39a   : > { %9812 = vmatprep.subr.bf16.mxu0 %v11737_v30 }
 0x39d   : > { %9813 = vmatpush1.bf16.msra.mxu0 %v11735_v31 }
 0x39e   : > { %9814 = vmatprep.subr.bf16.mxu0 %v11740_v34 }
 0x3a1   : > { %9815 = vmatpush1.bf16.msra.mxu0 %v11738_v35 }
 0x3a2   : > { %9816 = vmatprep.subr.bf16.mxu0 %v11743_v36 }
 0x3a5   : > { %9817 = vmatpush1.bf16.msra.mxu0 %v11741_v37 }
 0x3a6   : > { %9818 = vmatprep.subr.bf16.mxu0 %v11746_v38 }
 0x3a9   : > { %9819 = vmatpush1.bf16.msra.mxu0 %v11744_v39 }
 0x3aa   : > { %9820 = vmatprep.subr.bf16.mxu0 %v11749_v40 }
 0x3ad   : > { %9821 = vmatpush1.bf16.msra.mxu0 %v11747_v41 }
 0x3ae   : > { %9822 = vmatprep.subr.bf16.mxu0 %v11752_v42 }
 0x3b1   : > { %9823 = vmatpush1.bf16.msra.mxu0 %v11750_v43 }
 0x3b2   : > { %9824 = vmatprep.subr.bf16.mxu0 %v11755_v44 }
 0x3b5   : > { %9825 = vmatpush1.bf16.msra.mxu0 %v11753_v45 }
 0x3b6   : > { %9826 = vmatprep.subr.bf16.mxu0 %v11758_v32 }
 0x3b9   : > { %9827 = vmatpush1.bf16.msra.mxu0 %v11756_v46 }
 0x3ba   : > { %9828 = vmatprep.subr.bf16.mxu0 %v11761_v33 }
 0x3bd   : > { %9829 = vmatpush1.bf16.msra.mxu0 %v11759_v47 }
 0x3be   : > { %9830 = vmatprep.subr.bf16.mxu0 %v11764_v48 }
 0x3c1   : > { %9831 = vmatpush1.bf16.msra.mxu0 %v11762_v50 }
 0x3c2   : > { %9832 = vmatprep.subr.bf16.mxu0 %v11767_v53 }
 0x3c5   : > { %9833 = vmatpush1.bf16.msra.mxu0 %v11765_v54 }
 0x3c6   : > { %9834 = vmatprep.subr.bf16.mxu0 %v11770_v56 }
 0x3c9   : > { %9835 = vmatpush1.bf16.msra.mxu0 %v11768_v57 }
 0x3ca   : > { %9836 = vmatprep.subr.bf16.mxu0 %v11773_v58 }
 0x3cd   : > { %9837 = vmatpush1.bf16.msra.mxu0 %v11771_v49 }
 0x3d0   : > { %9839 = vmatmul.mubr.bf16.vlgmr.msra.gmra.mrb[0].mxu0 %v10672_v52 }
 0x462   : > { %v9211_v59 = vpop.f32.mrb[0].mxu1 }
 0x463   : > { %v9213_v60 = vpop.f32.mrb[1].mxu1  ;;  %v10710_v62 = vadd.f32 %v9632_v6, %v9211_v59 }
 0x464   : > { %v9215_v61 = vpop.f32.mrb[2].mxu1  ;;  %v10713_v55 = vadd.f32 %v9636_v7, %v9213_v60 }
 0x465   : > { %v9216_v51 = vpop.f32.mrb[3].mxu1 }
 0x4a3   : > { %v9840_v1 = vpop.f32.mrb[0].mxu0 }
 0x4a4   : > { %v10711_v12 = vadd.f32 %v10710_v62, %v9840_v1  ;;  %v9842_v13 = vpop.f32.mrb[1].mxu0 }
 0x4a5   : > { %v10714_v14 = vadd.f32 %v10713_v55, %v9842_v13  ;;  %v9844_v63 = vpop.f32.mrb[2].mxu0 }
 0x4a6   : > { %v10712_v17 = vadd.f32 %v10711_v12, %v9854_v10  ;;  %v9845_v9 = vpop.f32.mrb[3].mxu0 }
 0x4a7   : > { %v10715_v18 = vadd.f32 %v10714_v14, %v9858_v11 }
 0x4a8   : > { %v9865_v19 = vmax.f32 %v10712_v17, 0.0 }
 0x4a9   : > { %v9866_v22 = vmax.f32 %v10715_v18, 0.0 }
 0x4aa   : > { %9867 = vst [vmem:[%s5239_s7] sm:$0xff] %v9865_v19 }
 0x4ab   : > { %9868 = vst [vmem:[%s5239_s7 + $0x8] sm:$0xff] %v9866_v22 }
 0x4ac PF: > { %s16_s25 = sadd.s32 1, %s11814_s25   ;;  %s13954_s21 = smov %s11802_s22 }
 0x4ad   : > { %p13_p10 = scmp.ge.s32.totalorder %s16_s25, 4   ;;  %s13955_s22 = smov %s11890_s30 }
 0x4ae   : > { %s13956_s23 = smov %s11810_s24  ;;  %s13957_s24 = smov %s13959_s26 }
 0x4af   :  { %15 = sbr.rel (!%p13_p10) target bundleno = 3 (0x3), region = 203 }

</bundles_post_ra>
